<compile_context>
chip_gen: v6e
topology: v6e:2x2x1
jax: 0.10.0
libtpu: 0.0.40
codegen_flags: <defaults>
</compile_context>

<pallas_src>
import functools
import math

import jax
import jax.numpy as jnp
from jax.experimental import pallas as pl
from jax.experimental.pallas import tpu as pltpu


# ---------------------------------------------------------------------------
# Buffer construction (mirrors SinusoidalPositionalEncoding.__init__)
# ---------------------------------------------------------------------------
def make_pe(max_len: int, d_model: int, dtype=jnp.float32) -> jax.Array:
    assert d_model % 2 == 0, "d_model must be even (sin/cos interleaving)"
    position = jnp.arange(max_len, dtype=jnp.float32)[:, None]            # (L, 1)
    div_term = jnp.exp(
        jnp.arange(0, d_model, 2, dtype=jnp.float32)
        * (-math.log(10000.0) / d_model)
    )                                                                      # (D/2,)
    angles = position * div_term                                           # (L, D/2)
    pe = jnp.zeros((max_len, 1, d_model), dtype=jnp.float32)
    pe = pe.at[:, 0, 0::2].set(jnp.sin(angles))
    pe = pe.at[:, 0, 1::2].set(jnp.cos(angles))
    return pe.astype(dtype)


# ---------------------------------------------------------------------------
# Kernel: one sequence tile.  x/o tiles are (tile_s, B*D) lane-dense slabs,
# pe tile is the compact (tile_s, D) slice.  Broadcast over batch is done with
# static, 128-lane-aligned slices (VMEM-only work, hidden under the HBM DMAs).
# ---------------------------------------------------------------------------
def _add_pe_kernel(x_ref, pe_ref, o_ref, *, batch: int, d_model: int):
    pe = pe_ref[...]                                    # (tile_s, D), loaded once
    for b in range(batch):                              # static unroll over batch
        sl = slice(b * d_model, (b + 1) * d_model)      # lane-aligned (D % 128 == 0)
        o_ref[:, sl] = (x_ref[:, sl] + pe).astype(o_ref.dtype)


_TILE_BYTES = 4 * 1024 * 1024        # target x-tile size (review: 4-8 MiB sweet spot)
_VMEM_LIMIT = 32 * 1024 * 1024       # 2*(x+out)+pe tiles ~= 17 MiB; headroom on v7x
_MIN_PALLAS_BYTES = 1 * 1024 * 1024  # below this a fused XLA add beats a kernel launch
_MAX_UNROLL_BATCH = 512              # keep the static batch unroll bounded


def _choose_tile_s(seq_len: int, row_bytes: int, sublane: int):
    """Largest divisor of seq_len whose tile fits the VMEM budget and keeps the
    sublane dim aligned (multiple of `sublane`, or the full extent)."""
    max_rows = _TILE_BYTES // row_bytes
    if max_rows < 1:
        return None
    best = None
    i = 1
    while i * i <= seq_len:
        if seq_len % i == 0:
            for t in (i, seq_len // i):
                if t <= max_rows and (t % sublane == 0 or t == seq_len):
                    if best is None or t > best:
                        best = t
        i += 1
    return best


def sinusoidal_pos_encoding(x: jax.Array, pe: jax.Array, *, donate_x: bool = False):
    """Forward: x + pe[:x.shape[0]] with pe broadcast over the batch axis.

    x  : (seq_len, batch, d_model)   (seq-first, like the PyTorch module)
    pe : (max_len, 1, d_model)       buffer from make_pe()
    Output has x.dtype (pe is cast to x.dtype before the add).
    donate_x=True aliases the output onto x's buffer (only useful when the
    caller donates / no longer needs x; otherwise XLA inserts a copy).
    """
    S, B, D = x.shape
    assert pe.shape[0] >= S and pe.shape[2] == D, "pe buffer too small / wrong d_model"
    pe_s = pe[:S, 0, :].astype(x.dtype)          # (S, D) compact; broadcast in-kernel

    itemsize = x.dtype.itemsize
    sublane = 8 * max(1, 4 // itemsize)          # 8 (f32) / 16 (bf16) / 32 (int8)
    total_bytes = S * B * D * itemsize
    lane_dense = (D % 128 == 0)

    tile_s = None
    if lane_dense and total_bytes >= _MIN_PALLAS_BYTES and B <= _MAX_UNROLL_BATCH:
        tile_s = _choose_tile_s(S, B * D * itemsize, sublane)

    if tile_s is None:
        # Tiny or awkwardly-shaped inputs: a standalone Pallas kernel only adds
        # launch overhead / lane-sparse stores -- let XLA fuse the broadcast add.
        return x + pe_s[:, None, :]

    x2d = x.reshape(S, B * D)                    # free: collapses trailing dims
    grid = (S // tile_s,)

    out2d = pl.pallas_call(
        functools.partial(_add_pe_kernel, batch=B, d_model=D),
        out_shape=jax.ShapeDtypeStruct((S, B * D), x.dtype),
        grid=grid,
        in_specs=[
            pl.BlockSpec((tile_s, B * D), lambda i: (i, 0)),   # x tile (lane-dense)
            pl.BlockSpec((tile_s, D), lambda i: (i, 0)),       # pe tile (compact)
        ],
        out_specs=pl.BlockSpec((tile_s, B * D), lambda i: (i, 0)),
        input_output_aliases=({0: 0} if donate_x else {}),
        compiler_params=pltpu.CompilerParams(
            dimension_semantics=("parallel",),    # v7x megacore sharding over S tiles
            vmem_limit_bytes=_VMEM_LIMIT,
        ),
    )(x2d, pe_s)

    return out2d.reshape(S, B, D)


if __name__ == "__main__":
    key = jax.random.PRNGKey(0)
    k1, k2 = jax.random.split(key)

    # --- 1) Module-scale toy shape (takes the fused-XLA fast path) -----------
    d_model, max_len, seq_len, batch = 32, 64, 8, 2
    x_small = jax.random.normal(k1, (seq_len, batch, d_model), dtype=jnp.float32)
    pe_small = make_pe(max_len, d_model)
    out_small = jax.block_until_ready(sinusoidal_pos_encoding(x_small, pe_small))
    ref_small = x_small + pe_small[:seq_len]
    assert out_small.shape == x_small.shape and out_small.dtype == x_small.dtype
    assert jnp.allclose(out_small, ref_small, atol=1e-6, rtol=1e-6)

    # --- 2) Shape large enough to exercise the tiled Pallas path (f32) -------
    d_model, max_len, seq_len, batch = 512, 4096, 2048, 8
    x_big = jax.random.normal(k2, (seq_len, batch, d_model), dtype=jnp.float32)
    pe_big = make_pe(max_len, d_model)
    out_big = jax.block_until_ready(sinusoidal_pos_encoding(x_big, pe_big))
    ref_big = x_big + pe_big[:seq_len]
    assert out_big.shape == x_big.shape and out_big.dtype == x_big.dtype
    assert jnp.allclose(out_big, ref_big, atol=1e-6, rtol=1e-6)

    # --- 3) bf16 input through the Pallas path (pe cast to x.dtype) ----------
    x_bf16 = x_big.astype(jnp.bfloat16)
    out_bf16 = jax.block_until_ready(sinusoidal_pos_encoding(x_bf16, pe_big))
    ref_bf16 = x_bf16 + pe_big[:seq_len, 0, :].astype(jnp.bfloat16)[:, None, :]
    assert out_bf16.shape == x_bf16.shape and out_bf16.dtype == jnp.bfloat16
    assert jnp.allclose(out_bf16.astype(jnp.float32), ref_bf16.astype(jnp.float32),
                        atol=1e-2, rtol=1e-2)

    print("KERNEL_OK")
</pallas_src>

<mosaic_0001>
module attributes {stable_mosaic.version = 11 : i64} {
  func.func @_add_pe_kernel(%arg0: i32, %arg1: memref<256x4096xf32, #tpu.memory_space<vmem>>, %arg2: memref<256x512xf32, #tpu.memory_space<vmem>>, %arg3: memref<256x4096xf32, #tpu.memory_space<vmem>>) attributes {dimension_semantics = [#tpu.dimension_semantics<parallel>], iteration_bounds = array<i64: 8>, scalar_prefetch = 0 : i64, scratch_operands = 0 : i64, tpu.core_type = #tpu.core_type<tc>, window_params = [{transform_indices = @transform_0, window_bounds = array<i64: 256, 4096>}, {transform_indices = @transform_1, window_bounds = array<i64: 256, 512>}, {transform_indices = @transform_2, window_bounds = array<i64: 256, 4096>}]} {
    %c0 = arith.constant 0 : index
    %c0_0 = arith.constant 0 : index
    %0 = vector.load %arg2[%c0, %c0_0] : memref<256x512xf32, #tpu.memory_space<vmem>>, vector<256x512xf32>
    %c0_1 = arith.constant 0 : index
    %c0_2 = arith.constant 0 : index
    %1 = vector.load %arg1[%c0_1, %c0_2] : memref<256x4096xf32, #tpu.memory_space<vmem>>, vector<256x512xf32>
    %2 = arith.addf %1, %0 : vector<256x512xf32>
    %c0_3 = arith.constant 0 : index
    %c0_4 = arith.constant 0 : index
    %3 = vector.load %arg3[%c0_3, %c0_4] : memref<256x4096xf32, #tpu.memory_space<vmem>>, vector<256x512xf32>
    tpu.vector_store %arg3[%c0_3, %c0_4], %2 {strides = array<i32>} : memref<256x4096xf32, #tpu.memory_space<vmem>>, vector<256x512xf32>,
    %c0_5 = arith.constant 0 : index
    %c512 = arith.constant 512 : index
    %4 = vector.load %arg1[%c0_5, %c512] : memref<256x4096xf32, #tpu.memory_space<vmem>>, vector<256x512xf32>
    %5 = arith.addf %4, %0 : vector<256x512xf32>
    %c0_6 = arith.constant 0 : index
    %c512_7 = arith.constant 512 : index
    %6 = vector.load %arg3[%c0_6, %c512_7] : memref<256x4096xf32, #tpu.memory_space<vmem>>, vector<256x512xf32>
    tpu.vector_store %arg3[%c0_6, %c512_7], %5 {strides = array<i32>} : memref<256x4096xf32, #tpu.memory_space<vmem>>, vector<256x512xf32>,
    %c0_8 = arith.constant 0 : index
    %c1024 = arith.constant 1024 : index
    %7 = vector.load %arg1[%c0_8, %c1024] : memref<256x4096xf32, #tpu.memory_space<vmem>>, vector<256x512xf32>
    %8 = arith.addf %7, %0 : vector<256x512xf32>
    %c0_9 = arith.constant 0 : index
    %c1024_10 = arith.constant 1024 : index
    %9 = vector.load %arg3[%c0_9, %c1024_10] : memref<256x4096xf32, #tpu.memory_space<vmem>>, vector<256x512xf32>
    tpu.vector_store %arg3[%c0_9, %c1024_10], %8 {strides = array<i32>} : memref<256x4096xf32, #tpu.memory_space<vmem>>, vector<256x512xf32>,
    %c0_11 = arith.constant 0 : index
    %c1536 = arith.constant 1536 : index
    %10 = vector.load %arg1[%c0_11, %c1536] : memref<256x4096xf32, #tpu.memory_space<vmem>>, vector<256x512xf32>
    %11 = arith.addf %10, %0 : vector<256x512xf32>
    %c0_12 = arith.constant 0 : index
    %c1536_13 = arith.constant 1536 : index
    %12 = vector.load %arg3[%c0_12, %c1536_13] : memref<256x4096xf32, #tpu.memory_space<vmem>>, vector<256x512xf32>
    tpu.vector_store %arg3[%c0_12, %c1536_13], %11 {strides = array<i32>} : memref<256x4096xf32, #tpu.memory_space<vmem>>, vector<256x512xf32>,
    %c0_14 = arith.constant 0 : index
    %c2048 = arith.constant 2048 : index
    %13 = vector.load %arg1[%c0_14, %c2048] : memref<256x4096xf32, #tpu.memory_space<vmem>>, vector<256x512xf32>
    %14 = arith.addf %13, %0 : vector<256x512xf32>
    %c0_15 = arith.constant 0 : index
    %c2048_16 = arith.constant 2048 : index
    %15 = vector.load %arg3[%c0_15, %c2048_16] : memref<256x4096xf32, #tpu.memory_space<vmem>>, vector<256x512xf32>
    tpu.vector_store %arg3[%c0_15, %c2048_16], %14 {strides = array<i32>} : memref<256x4096xf32, #tpu.memory_space<vmem>>, vector<256x512xf32>,
    %c0_17 = arith.constant 0 : index
    %c2560 = arith.constant 2560 : index
    %16 = vector.load %arg1[%c0_17, %c2560] : memref<256x4096xf32, #tpu.memory_space<vmem>>, vector<256x512xf32>
    %17 = arith.addf %16, %0 : vector<256x512xf32>
    %c0_18 = arith.constant 0 : index
    %c2560_19 = arith.constant 2560 : index
    %18 = vector.load %arg3[%c0_18, %c2560_19] : memref<256x4096xf32, #tpu.memory_space<vmem>>, vector<256x512xf32>
    tpu.vector_store %arg3[%c0_18, %c2560_19], %17 {strides = array<i32>} : memref<256x4096xf32, #tpu.memory_space<vmem>>, vector<256x512xf32>,
    %c0_20 = arith.constant 0 : index
    %c3072 = arith.constant 3072 : index
    %19 = vector.load %arg1[%c0_20, %c3072] : memref<256x4096xf32, #tpu.memory_space<vmem>>, vector<256x512xf32>
    %20 = arith.addf %19, %0 : vector<256x512xf32>
    %c0_21 = arith.constant 0 : index
    %c3072_22 = arith.constant 3072 : index
    %21 = vector.load %arg3[%c0_21, %c3072_22] : memref<256x4096xf32, #tpu.memory_space<vmem>>, vector<256x512xf32>
    tpu.vector_store %arg3[%c0_21, %c3072_22], %20 {strides = array<i32>} : memref<256x4096xf32, #tpu.memory_space<vmem>>, vector<256x512xf32>,
    %c0_23 = arith.constant 0 : index
    %c3584 = arith.constant 3584 : index
    %22 = vector.load %arg1[%c0_23, %c3584] : memref<256x4096xf32, #tpu.memory_space<vmem>>, vector<256x512xf32>
    %23 = arith.addf %22, %0 : vector<256x512xf32>
    %c0_24 = arith.constant 0 : index
    %c3584_25 = arith.constant 3584 : index
    %24 = vector.load %arg3[%c0_24, %c3584_25] : memref<256x4096xf32, #tpu.memory_space<vmem>>, vector<256x512xf32>
    tpu.vector_store %arg3[%c0_24, %c3584_25], %23 {strides = array<i32>} : memref<256x4096xf32, #tpu.memory_space<vmem>>, vector<256x512xf32>,
    return
  }
  func.func @transform_0(%arg0: i32) -> (i32, i32) {
    %c0_i32 = arith.constant 0 : i32
    %c0_i32_0 = arith.constant 0 : i32
    return %arg0, %c0_i32 : i32, i32
  }
  func.func @transform_1(%arg0: i32) -> (i32, i32) {
    %c0_i32 = arith.constant 0 : i32
    %c0_i32_0 = arith.constant 0 : i32
    return %arg0, %c0_i32 : i32, i32
  }
  func.func @transform_2(%arg0: i32) -> (i32, i32) {
    %c0_i32 = arith.constant 0 : i32
    %c0_i32_0 = arith.constant 0 : i32
    return %arg0, %c0_i32 : i32, i32
  }
}

</mosaic_0001>

<bundles_post_ra>
// kernel: tpu_custom_call.1
= control target key start
LH: loop header
LB: loop body
LE: loop exit
PB: predicated region body
PF: predicated region fallthrough
CT: control target
= control target key end

     0   :  { %7 = vsyncpa [#allocation3], 0  ;;  %s8954_s0 = inlined_call_operand.hbm [shape: f32[2048,4096], index: 0, kind: input, shape index: {}]   ;;  %s8955_s1 = inlined_call_operand.hbm [shape: f32[2048,512], index: 1, kind: input, shape index: {}]   ;;  %s8956_s2 = inlined_call_operand.hbm [shape: f32[2048,4096], index: 2, kind: output, shape index: {}]  }
   0x1   :  { %9 = vsyncpa [#allocation3 + $0x1], 0 }
   0x2   :  { %10 = vsyncpa [#allocation6], 0 }
   0x3   :  { %12 = vsyncpa [#allocation6 + $0x1], 0 }
   0x4   :  { %13 = vsyncpa [#allocation4], 0 }
   0x5   :  { %15 = vsyncpa [#allocation4 + $0x1], 0  ;;  %s4140_s9 = smov 0   ;;  %s4142_s10 = smov 0  }
   0x6   :  { %s4144_s11 = smov 0   ;;  %s4146_s12 = smov 0  }
   0x7 LB: > { %s4161_s13 = sadd.s32 4294967295, %s4114_s12   ;;  %s3518_s14 = sadd.s32 4294967294, %s4114_s12   ;;  %s4114_s12 = sphi %s4146_s12, %s9901_s12   ;;  %s4110_s11 = sphi %s4144_s11, %s9900_s11   ;;  %s4106_s10 = sphi %s4142_s10, %s9899_s10   ;;  %s4102_s9 = sphi %s4140_s9, %s9898_s9  }
   0x8   : > { %s4165_s15 = sadd.s32 1, %s4114_s12   ;;  %s28_s16 = sadd.s32 1, %s4110_s11 }
   0x9   : > { %s25_s17 = ssub.s32 %s4114_s12, %s4165_s15  ;;  %p35_p0 = scmp.ne.s32.totalorder %s4110_s11, %s4106_s10 }
   0xa   : > { %p26_p1 = scmp.eq.s32.totalorder %s25_s17, 0  ;;  %p36_p2 = scmp.eq.s32.totalorder %s4114_s12, 0 }
   0xb   : > { %p41_p3 = scmp.ne.s32.totalorder %s4106_s10, %s4102_s9  ;;  %p42_p4 = scmp.eq.s32.totalorder %s4161_s13, 0 }
   0xc   : > { %s4177_s18 = scalar_select %p26_p1, %s4110_s11, %s28_s16  }
   0xd   : > { %p4179_p5 = por %p36_p2, %p35_p0  ;;  %p4183_p6 = por %p42_p4, %p41_p3 }
   0xe   : > { %p91_p7 = scmp.eq.s32.totalorder %s4161_s13, 7  ;;  %p97_p8 = scmp.eq.s32.totalorder %s3518_s14, 7 }
   0xf   : > { %s9270_s20 = scalar_select %p4183_p6, 1, 0 }
  0x10   : > { %p3562_p9 = scmp.lt.s32.totalorder %s4114_s12, 8  ;;  %p4189_p10 = por %p91_p7, %p35_p0 }
  0x11   : > { %p4193_p11 = por %p97_p8, %p41_p3  ;;  %s4198_s23 = sand.u32 1, %s4110_s11  }
  0x12   : > { %s9271_s21 = scalar_select %p4189_p10, 1, 0 }
  0x13   : > { %s9272_s22 = scalar_select %p4193_p11, 1, 0 }
  0x14   : > { %s3540_s24 = sshll.u32 %s4114_s12, 17  ;;  %s3521_s25 = sshll.u32 %s4198_s23, 13 }
  0x15   : > { %s4205_s28 = scalar_lea.hbm %s8954_s0, %s3540_s24  ;;  %s121_s29 = scalar_lea.vmem [#allocation2], %s3521_s25 }
  0x16   : > { %s129_s30 = sshll.u32 %s121_s29, 4  ;;  %p4209_p12 = pnand %p3562_p9, %p4179_p5  ;;  %s4213_s30 = int_to_ptr.vmem [resolvable:$true] %s129_s30 }
  0x17   : > { %s118_s4 = scalar_lea.sflag [#allocation3], %s4198_s23  ;;  %s3990_s5 = scalar_lea.hbm %s4205_s28, 131072 }
  0x18   : > { %p3991_p13 = scmp.ne.s32.totalorder %s4205_s28, %s3990_s5  ;;  %p3992_p0 = pneg %p4209_p12 }
  0x19   : > { %s3995_s8 = scalar_lea.hbm %s8954_s0, 1048576  ;;  %p3996_p3 = scmp.lt.s32.totalorder %s4205_s28, %s8954_s0 }
  0x1a   : > { %p3993_p1 = pnand %p3992_p0, %p3991_p13  ;;  %p3997_p4 = scmp.lt.s32.totalorder %s3995_s8, %s3990_s5 }
  0x1c   : > { %p3994_p2 = pneg %p3993_p1  ;;  %p3998_p5 = por %p3997_p4, %p3996_p3 }
  0x1e   : > { %p3999_p7 = pnand %p3998_p5, %p3994_p2 }
  0x20   : > { %4002 = shalt.err (!%p3999_p7)
}
  0x21   : > { %s4003_s17 = scalar_lea.vmem %s4213_s30, 131072  ;;  %s4116_s19 = smov [#allocation2]  }
  0x22   : > { %p4004_p8 = scmp.ne.s32.totalorder %s4213_s30, %s4003_s17  ;;  %s4008_s24 = sshll.u32 %s4116_s19, 4  ;;  %s4009_s24 = int_to_ptr.vmem [resolvable:$false] %s4008_s24 }
  0x23   : > { %s4010_s25 = scalar_lea.vmem %s4009_s24, 262144  ;;  %p4011_p1 = scmp.lt.s32.totalorder %s4213_s30, %s4009_s24 }
  0x24   : > { %p4006_p9 = pnand %p4004_p8, %p3992_p0  ;;  %p4012_p11 = scmp.lt.s32.totalorder %s4010_s25, %s4003_s17 }
  0x26   : > { %p4007_p13 = pneg %p4006_p9  ;;  %p4013_p10 = por %p4012_p11, %p4011_p1 }
  0x28   : > { %p4014_p3 = pnand %p4013_p10, %p4007_p13 }
  0x2a   : > { %4017 = shalt.err (!%p4014_p3)
}
  0x2b   : > { %s4117_s26 = smov 4096   ;;  %s4118_s27 = smov 256  }
  0x2c   : > { %3554 = dma.hbm_to_vmem [thread:$0]  (!%p4209_p12), %s4205_s28, 131072, %s4213_s30, %s118_s4, %s4117_s26, %s4117_s26, %s4118_s27  }
  0x2d   : > { %p3529_p2 = scmp.ge.s32.totalorder %s4114_s12, 1  ;;  %p159_p4 = scmp.lt.s32.totalorder %s4114_s12, 9 }
  0x2e   : > { %s3525_s29 = sshll.u32 %s4198_s23, 10  ;;  %s3542_s6 = sshll.u32 %s4114_s12, 14 }
  0x2f   : > { %p4245_p10 = pnand %p3529_p2, %p159_p4  ;;  %s143_s7 = scalar_lea.vmem [#allocation5], %s3525_s29 }
  0x30   : > { %s151_s8 = sshll.u32 %s143_s7, 4  ;;  %s4253_s17 = scalar_lea.hbm %s8955_s1, %s3542_s6  ;;  %s4255_s8 = int_to_ptr.vmem [resolvable:$true] %s151_s8 }
  0x31   : > { %s140_s28 = scalar_lea.sflag [#allocation6], %s4198_s23  ;;  %s4018_s30 = scalar_lea.hbm %s4253_s17, 16384 }
  0x32   : > { %p4019_p11 = scmp.ne.s32.totalorder %s4253_s17, %s4018_s30  ;;  %s4023_s24 = scalar_lea.hbm %s8955_s1, 131072 }
  0x33   : > { %p4024_p8 = scmp.lt.s32.totalorder %s4253_s17, %s8955_s1  ;;  %p4025_p9 = scmp.lt.s32.totalorder %s4023_s24, %s4018_s30 }
  0x34   : > { %p4021_p5 = pnand %p4019_p11, %p3992_p0 }
  0x35   : > { %p4026_p13 = por %p4025_p9, %p4024_p8 }
  0x36   : > { %p4022_p7 = pneg %p4021_p5 }
  0x38   : > { %p4027_p1 = pnand %p4026_p13, %p4022_p7 }
  0x3a   : > { %4030 = shalt.err (!%p4027_p1)
}
  0x3b   : > { %s4031_s27 = scalar_lea.vmem %s4255_s8, 16384  ;;  %s4119_s29 = smov [#allocation5]  }
  0x3c   : > { %p4032_p3 = scmp.ne.s32.totalorder %s4255_s8, %s4031_s27  ;;  %s4036_s6 = sshll.u32 %s4119_s29, 4  ;;  %s4037_s6 = int_to_ptr.vmem [resolvable:$false] %s4036_s6 }
  0x3d   : > { %s4038_s7 = scalar_lea.vmem %s4037_s6, 32768  ;;  %p4039_p11 = scmp.lt.s32.totalorder %s4255_s8, %s4037_s6 }
  0x3e   : > { %p4034_p2 = pnand %p4032_p3, %p3992_p0  ;;  %p4040_p5 = scmp.lt.s32.totalorder %s4038_s7, %s4031_s27 }
  0x40   : > { %p4035_p4 = pneg %p4034_p2  ;;  %p4041_p6 = por %p4040_p5, %p4039_p11 }
  0x42   : > { %p4042_p8 = pnand %p4041_p6, %p4035_p4 }
  0x44   : > { %4045 = shalt.err (!%p4042_p8)
}
  0x45   : > { %s4120_s14 = smov 512   ;;  %s4121_s16 = smov 32  }
  0x46   : > { %3557 = dma.hbm_to_vmem [thread:$0]  (!%p4209_p12), %s4253_s17, 16384, %s4255_s8, %s140_s28, %s4120_s14, %s4120_s14, %s4121_s16  }
  0x47   : > { %163 = sbr.rel (%p4245_p10) target bundleno = 896 (0x380), region = 28 }
  0x4c   : > { %s4285_s30 = sand.u32 1, %s4106_s10   ;;  %p9275_p6 = scmp.ne.s32.totalorder %s9270_s20, 0 }
  0x4d   : > { %s3530_s4 = sshll.u32 %s4285_s30, 13  ;;  %s166_s19 = scalar_lea.sflag [#allocation3], %s4285_s30 }
  0x4e   : > { %s4289_s24 = scalar_lea.vmem [#allocation2], %s3530_s4 }
  0x4f   : > { %4089 = dma.done.wait (%p9275_p6), %s166_s19, 131072  }
  0x50   : > { %4091 = vsyncadd (%p9275_p6), %s166_s19, 4294836224  ;;  %s3531_s23 = sshll.u32 %s4285_s30, 10  ;;  %s175_s3 = scalar_lea.sflag [#allocation6], %s4285_s30 }
  0x51   : > { %s4297_s5 = scalar_lea.vmem [#allocation5], %s3531_s23 }
  0x52   : > { %4093 = dma.done.wait (%p9275_p6), %s175_s3, 16384  }
  0x53   : > { %4095 = vsyncadd (%p9275_p6), %s175_s3, 4294950912  ;;  %v207_v0 = vld [vmem:[%s4297_s5] sm:$0xff]  ;;  %v208_v2 = vld [vmem:[%s4297_s5 + $0x8] sm:$0xff]  ;;  %s4316_s20 = scalar_lea.vmem [#allocation7], %s3530_s4  ;;  %s3544_s8 = sshll.u32 %s4161_s13, 17 }
  0x54   : > { %v335_v1 = vld [vmem:[%s4289_s24] sm:$0xff]  ;;  %v336_v4 = vld [vmem:[%s4289_s24 + $0x8] sm:$0xff]  ;;  %v209_v5 = vld [vmem:[%s4297_s5 + $0x10] sm:$0xff]  ;;  %s3422_s17 = sshll.u32 %s4316_s20, 4  ;;  %s8896_s26 = scalar_lea.hbm %s8956_s2, %s3544_s8  ;;  %s8900_s17 = int_to_ptr.vmem [resolvable:$true] %s3422_s17 }
  0x55   : > { %v463_v3 = vadd.f32 %v335_v1, %v207_v0  ;;  %v337_v6 = vld [vmem:[%s4289_s24 + $0x10] sm:$0xff]  ;;  %v464_v7 = vadd.f32 %v336_v4, %v208_v2  ;;  %v4310_v9 = vld [vmem:[%s4297_s5 + $0x18] sm:$0xff]  ;;  %v4314_v11 = vld [vmem:[%s4297_s5 + $0x20] sm:$0xff]  ;;  %s3408_s13 = scalar_lea.sflag [#allocation4], %s4285_s30  ;;  %s4046_s27 = scalar_lea.vmem %s8900_s17, 131072 }
  0x56   : > { %v465_v8 = vadd.f32 %v337_v6, %v209_v5  ;;  %v338_v10 = vld [vmem:[%s4289_s24 + $0x18] sm:$0xff]  ;;  %v339_v13 = vld [vmem:[%s4289_s24 + $0x100] sm:$0xff]  ;;  %v212_v14 = vld [vmem:[%s4297_s5 + $0x28] sm:$0xff]  ;;  %p4047_p12 = scmp.ne.s32.totalorder %s8900_s17, %s4046_s27  ;;  %p9896_p0 = scmp.ne.s32.totalorder %s9271_s21, 0 }
  0x57   : > { %591 = vst [vmem:[%s4316_s20] sm:$0xff] %v463_v3  ;;  %v466_v12 = vadd.f32 %v338_v10, %v4310_v9  ;;  %v340_v15 = vld [vmem:[%s4289_s24 + $0x108] sm:$0xff]  ;;  %592 = vst [vmem:[%s4316_s20 + $0x8] sm:$0xff] %v464_v7  ;;  %v467_v16 = vadd.f32 %v339_v13, %v4314_v11  ;;  %v4327_v18 = vld [vmem:[%s4297_s5 + $0x30] sm:$0xff]  ;;  %s4122_s29 = smov [#allocation7]  }
  0x58   : > { %593 = vst [vmem:[%s4316_s20 + $0x10] sm:$0xff] %v465_v8  ;;  %v468_v17 = vadd.f32 %v340_v15, %v212_v14  ;;  %v341_v19 = vld [vmem:[%s4289_s24 + $0x110] sm:$0xff]  ;;  %v4331_v20 = vld [vmem:[%s4297_s5 + $0x38] sm:$0xff]  ;;  %v4337_v23 = vld [vmem:[%s4297_s5 + $0x40] sm:$0xff]  ;;  %p4048_p10 = pnand %p4047_p12, %p9896_p0  ;;  %s4050_s6 = sshll.u32 %s4122_s29, 4  ;;  %s4051_s6 = int_to_ptr.vmem [resolvable:$false] %s4050_s6 }
  0x59   : > { %594 = vst [vmem:[%s4316_s20 + $0x18] sm:$0xff] %v466_v12  ;;  %v469_v21 = vadd.f32 %v341_v19, %v4327_v18  ;;  %v342_v22 = vld [vmem:[%s4289_s24 + $0x118] sm:$0xff]  ;;  %v343_v24 = vld [vmem:[%s4289_s24 + $0x200] sm:$0xff]  ;;  %595 = vst [vmem:[%s4316_s20 + $0x100] sm:$0xff] %v467_v16  ;;  %s4052_s7 = scalar_lea.vmem %s4051_s6, 262144  ;;  %p4053_p9 = scmp.lt.s32.totalorder %s8900_s17, %s4051_s6 }
  0x5a   : > { %596 = vst [vmem:[%s4316_s20 + $0x108] sm:$0xff] %v468_v17  ;;  %v470_v25 = vadd.f32 %v342_v22, %v4331_v20  ;;  %v471_v26 = vadd.f32 %v343_v24, %v4337_v23  ;;  %v4345_v27 = vld [vmem:[%s4297_s5 + $0x48] sm:$0xff]  ;;  %v4349_v29 = vld [vmem:[%s4297_s5 + $0x50] sm:$0xff]  ;;  %v4355_v32 = vld [vmem:[%s4297_s5 + $0x58] sm:$0xff]  ;;  %p4049_p7 = pneg %p4048_p10  ;;  %p4054_p13 = scmp.lt.s32.totalorder %s4052_s7, %s4046_s27 }
  0x5b   : > { %v344_v28 = vld [vmem:[%s4289_s24 + $0x208] sm:$0xff]  ;;  %597 = vst [vmem:[%s4316_s20 + $0x110] sm:$0xff] %v469_v21  ;;  %v345_v31 = vld [vmem:[%s4289_s24 + $0x210] sm:$0xff]  ;;  %v346_v33 = vld [vmem:[%s4289_s24 + $0x218] sm:$0xff] }
  0x5c   : > { %v472_v30 = vadd.f32 %v344_v28, %v4345_v27  ;;  %598 = vst [vmem:[%s4316_s20 + $0x118] sm:$0xff] %v470_v25  ;;  %599 = vst [vmem:[%s4316_s20 + $0x200] sm:$0xff] %v471_v26  ;;  %v473_v34 = vadd.f32 %v345_v31, %v4349_v29  ;;  %v474_v35 = vadd.f32 %v346_v33, %v4355_v32  ;;  %v4363_v36 = vld [vmem:[%s4297_s5 + $0x60] sm:$0xff]  ;;  %v4367_v38 = vld [vmem:[%s4297_s5 + $0x68] sm:$0xff]  ;;  %p4055_p1 = por %p4054_p13, %p4053_p9 }
  0x5d   : > { %v347_v37 = vld [vmem:[%s4289_s24 + $0x300] sm:$0xff]  ;;  %v348_v40 = vld [vmem:[%s4289_s24 + $0x308] sm:$0xff]  ;;  %v4373_v41 = vld [vmem:[%s4297_s5 + $0x70] sm:$0xff] }
  0x5e   : > { %600 = vst [vmem:[%s4316_s20 + $0x208] sm:$0xff] %v472_v30  ;;  %v475_v39 = vadd.f32 %v347_v37, %v4363_v36  ;;  %v349_v42 = vld [vmem:[%s4289_s24 + $0x310] sm:$0xff]  ;;  %601 = vst [vmem:[%s4316_s20 + $0x210] sm:$0xff] %v473_v34  ;;  %v476_v43 = vadd.f32 %v348_v40, %v4367_v38  ;;  %v4381_v45 = vld [vmem:[%s4297_s5 + $0x78] sm:$0xff]  ;;  %p4056_p3 = pnand %p4055_p1, %p4049_p7 }
  0x5f   : > { %602 = vst [vmem:[%s4316_s20 + $0x218] sm:$0xff] %v474_v35  ;;  %v477_v44 = vadd.f32 %v349_v42, %v4373_v41  ;;  %v350_v46 = vld [vmem:[%s4289_s24 + $0x318] sm:$0xff]  ;;  %v4385_v47 = vld [vmem:[%s4297_s5 + $0x80] sm:$0xff]  ;;  %v4391_v50 = vld [vmem:[%s4297_s5 + $0x88] sm:$0xff] }
  0x60   : > { %603 = vst [vmem:[%s4316_s20 + $0x300] sm:$0xff] %v475_v39  ;;  %v478_v48 = vadd.f32 %v350_v46, %v4381_v45  ;;  %v351_v49 = vld [vmem:[%s4289_s24 + $0x400] sm:$0xff]  ;;  %v352_v51 = vld [vmem:[%s4289_s24 + $0x408] sm:$0xff]  ;;  %604 = vst [vmem:[%s4316_s20 + $0x308] sm:$0xff] %v476_v43 }
  0x61   : > { %605 = vst [vmem:[%s4316_s20 + $0x310] sm:$0xff] %v477_v44  ;;  %v479_v52 = vadd.f32 %v351_v49, %v4385_v47  ;;  %v480_v53 = vadd.f32 %v352_v51, %v4391_v50  ;;  %v4399_v54 = vld [vmem:[%s4297_s5 + $0x90] sm:$0xff]  ;;  %v4403_v56 = vld [vmem:[%s4297_s5 + $0x98] sm:$0xff]  ;;  %v4409_v59 = vld [vmem:[%s4297_s5 + $0xa0] sm:$0xff] }
  0x62   : > { %v353_v55 = vld [vmem:[%s4289_s24 + $0x410] sm:$0xff]  ;;  %606 = vst [vmem:[%s4316_s20 + $0x318] sm:$0xff] %v478_v48  ;;  %v354_v58 = vld [vmem:[%s4289_s24 + $0x418] sm:$0xff]  ;;  %v355_v60 = vld [vmem:[%s4289_s24 + $0x500] sm:$0xff] }
  0x63   : > { %v481_v57 = vadd.f32 %v353_v55, %v4399_v54  ;;  %607 = vst [vmem:[%s4316_s20 + $0x400] sm:$0xff] %v479_v52  ;;  %608 = vst [vmem:[%s4316_s20 + $0x408] sm:$0xff] %v480_v53  ;;  %v482_v61 = vadd.f32 %v354_v58, %v4403_v56  ;;  %v483_v62 = vadd.f32 %v355_v60, %v4409_v59  ;;  %v4417_v63 = vld [vmem:[%s4297_s5 + $0xa8] sm:$0xff]  ;;  %v4421_v1 = vld [vmem:[%s4297_s5 + $0xb0] sm:$0xff] }
  0x64   : > { %v356_v0 = vld [vmem:[%s4289_s24 + $0x508] sm:$0xff]  ;;  %v357_v3 = vld [vmem:[%s4289_s24 + $0x510] sm:$0xff]  ;;  %v4427_v4 = vld [vmem:[%s4297_s5 + $0xb8] sm:$0xff] }
  0x65   : > { %609 = vst [vmem:[%s4316_s20 + $0x410] sm:$0xff] %v481_v57  ;;  %v484_v2 = vadd.f32 %v356_v0, %v4417_v63  ;;  %v358_v5 = vld [vmem:[%s4289_s24 + $0x518] sm:$0xff]  ;;  %610 = vst [vmem:[%s4316_s20 + $0x418] sm:$0xff] %v482_v61  ;;  %v485_v6 = vadd.f32 %v357_v3, %v4421_v1  ;;  %v4435_v8 = vld [vmem:[%s4297_s5 + $0xc0] sm:$0xff] }
  0x66   : > { %611 = vst [vmem:[%s4316_s20 + $0x500] sm:$0xff] %v483_v62  ;;  %v486_v7 = vadd.f32 %v358_v5, %v4427_v4  ;;  %v359_v10 = vld [vmem:[%s4289_s24 + $0x600] sm:$0xff]  ;;  %v4439_v12 = vld [vmem:[%s4297_s5 + $0xc8] sm:$0xff]  ;;  %v4445_v15 = vld [vmem:[%s4297_s5 + $0xd0] sm:$0xff] }
  0x67   : > { %612 = vst [vmem:[%s4316_s20 + $0x508] sm:$0xff] %v484_v2  ;;  %v487_v13 = vadd.f32 %v359_v10, %v4435_v8  ;;  %v360_v14 = vld [vmem:[%s4289_s24 + $0x608] sm:$0xff]  ;;  %v361_v16 = vld [vmem:[%s4289_s24 + $0x610] sm:$0xff]  ;;  %613 = vst [vmem:[%s4316_s20 + $0x510] sm:$0xff] %v485_v6 }
  0x68   : > { %614 = vst [vmem:[%s4316_s20 + $0x518] sm:$0xff] %v486_v7  ;;  %v488_v17 = vadd.f32 %v360_v14, %v4439_v12  ;;  %v489_v19 = vadd.f32 %v361_v16, %v4445_v15  ;;  %v4453_v21 = vld [vmem:[%s4297_s5 + $0xd8] sm:$0xff]  ;;  %v4457_v24 = vld [vmem:[%s4297_s5 + $0xe0] sm:$0xff]  ;;  %v4463_v28 = vld [vmem:[%s4297_s5 + $0xe8] sm:$0xff] }
  0x69   : > { %v362_v22 = vld [vmem:[%s4289_s24 + $0x618] sm:$0xff]  ;;  %615 = vst [vmem:[%s4316_s20 + $0x600] sm:$0xff] %v487_v13  ;;  %v363_v26 = vld [vmem:[%s4289_s24 + $0x700] sm:$0xff]  ;;  %v364_v30 = vld [vmem:[%s4289_s24 + $0x708] sm:$0xff] }
  0x6a   : > { %v490_v25 = vadd.f32 %v362_v22, %v4453_v21  ;;  %616 = vst [vmem:[%s4316_s20 + $0x608] sm:$0xff] %v488_v17  ;;  %617 = vst [vmem:[%s4316_s20 + $0x610] sm:$0xff] %v489_v19  ;;  %v491_v31 = vadd.f32 %v363_v26, %v4457_v24  ;;  %v492_v33 = vadd.f32 %v364_v30, %v4463_v28  ;;  %v4471_v34 = vld [vmem:[%s4297_s5 + $0xf0] sm:$0xff]  ;;  %v4475_v37 = vld [vmem:[%s4297_s5 + $0xf8] sm:$0xff] }
  0x6b   : > { %v365_v35 = vld [vmem:[%s4289_s24 + $0x710] sm:$0xff]  ;;  %v366_v40 = vld [vmem:[%s4289_s24 + $0x718] sm:$0xff]  ;;  %v4481_v42 = vld [vmem:[%s4297_s5 + $0x100] sm:$0xff] }
  0x6c   : > { %618 = vst [vmem:[%s4316_s20 + $0x618] sm:$0xff] %v490_v25  ;;  %v493_v39 = vadd.f32 %v365_v35, %v4471_v34  ;;  %v367_v43 = vld [vmem:[%s4289_s24 + $0x800] sm:$0xff]  ;;  %619 = vst [vmem:[%s4316_s20 + $0x700] sm:$0xff] %v491_v31  ;;  %v494_v44 = vadd.f32 %v366_v40, %v4475_v37  ;;  %v4489_v48 = vld [vmem:[%s4297_s5 + $0x108] sm:$0xff] }
  0x6d   : > { %620 = vst [vmem:[%s4316_s20 + $0x708] sm:$0xff] %v492_v33  ;;  %v495_v46 = vadd.f32 %v367_v43, %v4481_v42  ;;  %v368_v49 = vld [vmem:[%s4289_s24 + $0x808] sm:$0xff]  ;;  %v4493_v51 = vld [vmem:[%s4297_s5 + $0x110] sm:$0xff]  ;;  %v4499_v55 = vld [vmem:[%s4297_s5 + $0x118] sm:$0xff] }
  0x6e   : > { %621 = vst [vmem:[%s4316_s20 + $0x710] sm:$0xff] %v493_v39  ;;  %v496_v52 = vadd.f32 %v368_v49, %v4489_v48  ;;  %v369_v53 = vld [vmem:[%s4289_s24 + $0x810] sm:$0xff]  ;;  %v370_v57 = vld [vmem:[%s4289_s24 + $0x818] sm:$0xff]  ;;  %622 = vst [vmem:[%s4316_s20 + $0x718] sm:$0xff] %v494_v44 }
  0x6f   : > { %623 = vst [vmem:[%s4316_s20 + $0x800] sm:$0xff] %v495_v46  ;;  %v497_v58 = vadd.f32 %v369_v53, %v4493_v51  ;;  %v498_v60 = vadd.f32 %v370_v57, %v4499_v55  ;;  %v4507_v61 = vld [vmem:[%s4297_s5 + $0x120] sm:$0xff]  ;;  %v4511_v0 = vld [vmem:[%s4297_s5 + $0x128] sm:$0xff]  ;;  %v4517_v5 = vld [vmem:[%s4297_s5 + $0x130] sm:$0xff] }
  0x70   : > { %v371_v62 = vld [vmem:[%s4289_s24 + $0x900] sm:$0xff]  ;;  %624 = vst [vmem:[%s4316_s20 + $0x808] sm:$0xff] %v496_v52  ;;  %v372_v3 = vld [vmem:[%s4289_s24 + $0x908] sm:$0xff]  ;;  %v373_v6 = vld [vmem:[%s4289_s24 + $0x910] sm:$0xff] }
  0x71   : > { %v499_v2 = vadd.f32 %v371_v62, %v4507_v61  ;;  %625 = vst [vmem:[%s4316_s20 + $0x810] sm:$0xff] %v497_v58  ;;  %626 = vst [vmem:[%s4316_s20 + $0x818] sm:$0xff] %v498_v60  ;;  %v500_v7 = vadd.f32 %v372_v3, %v4511_v0  ;;  %v501_v10 = vadd.f32 %v373_v6, %v4517_v5  ;;  %v4525_v13 = vld [vmem:[%s4297_s5 + $0x138] sm:$0xff]  ;;  %v4529_v16 = vld [vmem:[%s4297_s5 + $0x140] sm:$0xff] }
  0x72   : > { %v374_v14 = vld [vmem:[%s4289_s24 + $0x918] sm:$0xff]  ;;  %v375_v19 = vld [vmem:[%s4289_s24 + $0xa00] sm:$0xff]  ;;  %v4535_v22 = vld [vmem:[%s4297_s5 + $0x148] sm:$0xff] }
  0x73   : > { %627 = vst [vmem:[%s4316_s20 + $0x900] sm:$0xff] %v499_v2  ;;  %v502_v17 = vadd.f32 %v374_v14, %v4525_v13  ;;  %v376_v25 = vld [vmem:[%s4289_s24 + $0xa08] sm:$0xff]  ;;  %628 = vst [vmem:[%s4316_s20 + $0x908] sm:$0xff] %v500_v7  ;;  %v503_v26 = vadd.f32 %v375_v19, %v4529_v16  ;;  %v4543_v31 = vld [vmem:[%s4297_s5 + $0x150] sm:$0xff] }
  0x74   : > { %629 = vst [vmem:[%s4316_s20 + $0x910] sm:$0xff] %v501_v10  ;;  %v504_v30 = vadd.f32 %v376_v25, %v4535_v22  ;;  %v377_v33 = vld [vmem:[%s4289_s24 + $0xa10] sm:$0xff]  ;;  %v4547_v35 = vld [vmem:[%s4297_s5 + $0x158] sm:$0xff]  ;;  %v4553_v43 = vld [vmem:[%s4297_s5 + $0x160] sm:$0xff] }
  0x75   : > { %630 = vst [vmem:[%s4316_s20 + $0x918] sm:$0xff] %v502_v17  ;;  %v505_v39 = vadd.f32 %v377_v33, %v4543_v31  ;;  %v378_v40 = vld [vmem:[%s4289_s24 + $0xa18] sm:$0xff]  ;;  %v379_v44 = vld [vmem:[%s4289_s24 + $0xb00] sm:$0xff]  ;;  %631 = vst [vmem:[%s4316_s20 + $0xa00] sm:$0xff] %v503_v26 }
  0x76   : > { %632 = vst [vmem:[%s4316_s20 + $0xa08] sm:$0xff] %v504_v30  ;;  %v506_v46 = vadd.f32 %v378_v40, %v4547_v35  ;;  %v507_v49 = vadd.f32 %v379_v44, %v4553_v43  ;;  %v4561_v52 = vld [vmem:[%s4297_s5 + $0x168] sm:$0xff]  ;;  %v4565_v57 = vld [vmem:[%s4297_s5 + $0x170] sm:$0xff]  ;;  %v4571_v62 = vld [vmem:[%s4297_s5 + $0x178] sm:$0xff] }
  0x77   : > { %v380_v53 = vld [vmem:[%s4289_s24 + $0xb08] sm:$0xff]  ;;  %633 = vst [vmem:[%s4316_s20 + $0xa10] sm:$0xff] %v505_v39  ;;  %v381_v60 = vld [vmem:[%s4289_s24 + $0xb10] sm:$0xff]  ;;  %v382_v2 = vld [vmem:[%s4289_s24 + $0xb18] sm:$0xff] }
  0x78   : > { %v508_v58 = vadd.f32 %v380_v53, %v4561_v52  ;;  %634 = vst [vmem:[%s4316_s20 + $0xa18] sm:$0xff] %v506_v46  ;;  %635 = vst [vmem:[%s4316_s20 + $0xb00] sm:$0xff] %v507_v49  ;;  %v509_v3 = vadd.f32 %v381_v60, %v4565_v57  ;;  %v510_v6 = vadd.f32 %v382_v2, %v4571_v62  ;;  %v4579_v7 = vld [vmem:[%s4297_s5 + $0x180] sm:$0xff]  ;;  %v4583_v14 = vld [vmem:[%s4297_s5 + $0x188] sm:$0xff] }
  0x79   : > { %v383_v10 = vld [vmem:[%s4289_s24 + $0xc00] sm:$0xff]  ;;  %v384_v19 = vld [vmem:[%s4289_s24 + $0xc08] sm:$0xff]  ;;  %v4589_v25 = vld [vmem:[%s4297_s5 + $0x190] sm:$0xff] }
  0x7a   : > { %636 = vst [vmem:[%s4316_s20 + $0xb08] sm:$0xff] %v508_v58  ;;  %v511_v17 = vadd.f32 %v383_v10, %v4579_v7  ;;  %v385_v26 = vld [vmem:[%s4289_s24 + $0xc10] sm:$0xff]  ;;  %637 = vst [vmem:[%s4316_s20 + $0xb10] sm:$0xff] %v509_v3  ;;  %v512_v30 = vadd.f32 %v384_v19, %v4583_v14  ;;  %v4597_v39 = vld [vmem:[%s4297_s5 + $0x198] sm:$0xff] }
  0x7b   : > { %638 = vst [vmem:[%s4316_s20 + $0xb18] sm:$0xff] %v510_v6  ;;  %v513_v33 = vadd.f32 %v385_v26, %v4589_v25  ;;  %v386_v40 = vld [vmem:[%s4289_s24 + $0xc18] sm:$0xff]  ;;  %v4601_v44 = vld [vmem:[%s4297_s5 + $0x1a0] sm:$0xff]  ;;  %v4607_v53 = vld [vmem:[%s4297_s5 + $0x1a8] sm:$0xff] }
  0x7c   : > { %639 = vst [vmem:[%s4316_s20 + $0xc00] sm:$0xff] %v511_v17  ;;  %v514_v46 = vadd.f32 %v386_v40, %v4597_v39  ;;  %v387_v49 = vld [vmem:[%s4289_s24 + $0xd00] sm:$0xff]  ;;  %v388_v58 = vld [vmem:[%s4289_s24 + $0xd08] sm:$0xff]  ;;  %640 = vst [vmem:[%s4316_s20 + $0xc08] sm:$0xff] %v512_v30 }
  0x7d   : > { %641 = vst [vmem:[%s4316_s20 + $0xc10] sm:$0xff] %v513_v33  ;;  %v515_v60 = vadd.f32 %v387_v49, %v4601_v44  ;;  %v516_v2 = vadd.f32 %v388_v58, %v4607_v53  ;;  %v4615_v3 = vld [vmem:[%s4297_s5 + $0x1b0] sm:$0xff]  ;;  %v4619_v10 = vld [vmem:[%s4297_s5 + $0x1b8] sm:$0xff]  ;;  %v4625_v26 = vld [vmem:[%s4297_s5 + $0x1c0] sm:$0xff] }
  0x7e   : > { %9276 = vst [vmem:[#allocation11_spill] sm:$0xff] %v4615_v3  ;;  %v389_v6 = vld [vmem:[%s4289_s24 + $0xd10] sm:$0xff]  ;;  %9277 = vst [vmem:[#allocation12_spill] sm:$0xff] %v4619_v10  ;;  %v390_v19 = vld [vmem:[%s4289_s24 + $0xd18] sm:$0xff] }
  0x7f   : > { %642 = vst [vmem:[%s4316_s20 + $0xc18] sm:$0xff] %v514_v46  ;;  %v517_v17 = vadd.f32 %v389_v6, %v4615_v3  ;;  %9278 = vst [vmem:[#allocation13_spill] sm:$0xff] %v4625_v26  ;;  %v391_v30 = vld [vmem:[%s4289_s24 + $0xe00] sm:$0xff]  ;;  %v518_v33 = vadd.f32 %v390_v19, %v4619_v10  ;;  %v4633_v46 = vld [vmem:[%s4297_s5 + $0x1c8] sm:$0xff] }
  0x80   : > { %643 = vst [vmem:[%s4316_s20 + $0xd00] sm:$0xff] %v515_v60  ;;  %644 = vst [vmem:[%s4316_s20 + $0xd08] sm:$0xff] %v516_v2  ;;  %v519_v40 = vadd.f32 %v391_v30, %v4625_v26  ;;  %v392_v49 = vld [vmem:[%s4289_s24 + $0xe08] sm:$0xff]  ;;  %v4637_v58 = vld [vmem:[%s4297_s5 + $0x1d0] sm:$0xff] }
  0x81   : > { %9279 = vst [vmem:[#allocation14_spill] sm:$0xff] %v4633_v46  ;;  %9280 = vst [vmem:[#allocation15_spill] sm:$0xff] %v4637_v58  ;;  %v520_v60 = vadd.f32 %v392_v49, %v4633_v46  ;;  %v393_v2 = vld [vmem:[%s4289_s24 + $0xe10] sm:$0xff]  ;;  %v4643_v6 = vld [vmem:[%s4297_s5 + $0x1d8] sm:$0xff] }
  0x82   : > { %645 = vst [vmem:[%s4316_s20 + $0xd10] sm:$0xff] %v517_v17  ;;  %9281 = vst [vmem:[#allocation16_spill] sm:$0xff] %v4643_v6  ;;  %v394_v19 = vld [vmem:[%s4289_s24 + $0xe18] sm:$0xff]  ;;  %v521_v30 = vadd.f32 %v393_v2, %v4637_v58  ;;  %v4651_v17 = vld [vmem:[%s4297_s5 + $0x1e0] sm:$0xff] }
  0x83   : > { %646 = vst [vmem:[%s4316_s20 + $0xd18] sm:$0xff] %v518_v33  ;;  %647 = vst [vmem:[%s4316_s20 + $0xe00] sm:$0xff] %v519_v40  ;;  %v522_v26 = vadd.f32 %v394_v19, %v4643_v6  ;;  %v395_v10 = vld [vmem:[%s4289_s24 + $0xf00] sm:$0xff]  ;;  %v4655_v49 = vld [vmem:[%s4297_s5 + $0x1e8] sm:$0xff] }
  0x84   : > { %9282 = vst [vmem:[#allocation17_spill] sm:$0xff] %v4651_v17  ;;  %9283 = vst [vmem:[#allocation18_spill] sm:$0xff] %v4655_v49  ;;  %v523_v33 = vadd.f32 %v395_v10, %v4651_v17  ;;  %v396_v40 = vld [vmem:[%s4289_s24 + $0xf08] sm:$0xff]  ;;  %v4661_v46 = vld [vmem:[%s4297_s5 + $0x1f0] sm:$0xff] }
  0x85   : > { %648 = vst [vmem:[%s4316_s20 + $0xe08] sm:$0xff] %v520_v60  ;;  %9284 = vst [vmem:[#allocation19_spill] sm:$0xff] %v4661_v46  ;;  %v397_v2 = vld [vmem:[%s4289_s24 + $0xf10] sm:$0xff]  ;;  %v524_v19 = vadd.f32 %v396_v40, %v4655_v49  ;;  %v4669_v60 = vld [vmem:[%s4297_s5 + $0x1f8] sm:$0xff] }
  0x86   : > { %649 = vst [vmem:[%s4316_s20 + $0xe10] sm:$0xff] %v521_v30  ;;  %650 = vst [vmem:[%s4316_s20 + $0xe18] sm:$0xff] %v522_v26  ;;  %v525_v6 = vadd.f32 %v397_v2, %v4661_v46  ;;  %v398_v58 = vld [vmem:[%s4289_s24 + $0xf18] sm:$0xff]  ;;  %v4673_v10 = vld [vmem:[%s4297_s5 + $0x200] sm:$0xff] }
  0x87   : > { %9285 = vst [vmem:[#allocation20_spill] sm:$0xff] %v4669_v60  ;;  %9286 = vst [vmem:[#allocation21_spill] sm:$0xff] %v4673_v10  ;;  %v526_v30 = vadd.f32 %v398_v58, %v4669_v60  ;;  %v399_v26 = vld [vmem:[%s4289_s24 + $0x1000] sm:$0xff]  ;;  %v4679_v17 = vld [vmem:[%s4297_s5 + $0x208] sm:$0xff] }
  0x88   : > { %651 = vst [vmem:[%s4316_s20 + $0xf00] sm:$0xff] %v523_v33  ;;  %9287 = vst [vmem:[#allocation22_spill] sm:$0xff] %v4679_v17  ;;  %v400_v40 = vld [vmem:[%s4289_s24 + $0x1008] sm:$0xff]  ;;  %v527_v2 = vadd.f32 %v399_v26, %v4673_v10  ;;  %v4687_v33 = vld [vmem:[%s4297_s5 + $0x210] sm:$0xff] }
  0x89   : > { %652 = vst [vmem:[%s4316_s20 + $0xf08] sm:$0xff] %v524_v19  ;;  %653 = vst [vmem:[%s4316_s20 + $0xf10] sm:$0xff] %v525_v6  ;;  %v528_v46 = vadd.f32 %v400_v40, %v4679_v17  ;;  %v401_v49 = vld [vmem:[%s4289_s24 + $0x1010] sm:$0xff]  ;;  %v4691_v58 = vld [vmem:[%s4297_s5 + $0x218] sm:$0xff] }
  0x8a   : > { %9288 = vst [vmem:[#allocation23_spill] sm:$0xff] %v4687_v33  ;;  %9289 = vst [vmem:[#allocation24_spill] sm:$0xff] %v4691_v58  ;;  %v529_v19 = vadd.f32 %v401_v49, %v4687_v33  ;;  %v402_v6 = vld [vmem:[%s4289_s24 + $0x1018] sm:$0xff]  ;;  %v4697_v60 = vld [vmem:[%s4297_s5 + $0x220] sm:$0xff] }
  0x8b   : > { %654 = vst [vmem:[%s4316_s20 + $0xf18] sm:$0xff] %v526_v30  ;;  %9290 = vst [vmem:[#allocation25_spill] sm:$0xff] %v4697_v60  ;;  %v403_v26 = vld [vmem:[%s4289_s24 + $0x1100] sm:$0xff]  ;;  %v530_v40 = vadd.f32 %v402_v6, %v4691_v58  ;;  %v4705_v30 = vld [vmem:[%s4297_s5 + $0x228] sm:$0xff] }
  0x8c   : > { %655 = vst [vmem:[%s4316_s20 + $0x1000] sm:$0xff] %v527_v2  ;;  %656 = vst [vmem:[%s4316_s20 + $0x1008] sm:$0xff] %v528_v46  ;;  %v531_v17 = vadd.f32 %v403_v26, %v4697_v60  ;;  %v404_v10 = vld [vmem:[%s4289_s24 + $0x1108] sm:$0xff]  ;;  %v4709_v49 = vld [vmem:[%s4297_s5 + $0x230] sm:$0xff] }
  0x8d   : > { %9291 = vst [vmem:[#allocation26_spill] sm:$0xff] %v4705_v30  ;;  %9292 = vst [vmem:[#allocation27_spill] sm:$0xff] %v4709_v49  ;;  %v532_v2 = vadd.f32 %v404_v10, %v4705_v30  ;;  %v405_v46 = vld [vmem:[%s4289_s24 + $0x1110] sm:$0xff]  ;;  %v4715_v33 = vld [vmem:[%s4297_s5 + $0x238] sm:$0xff] }
  0x8e   : > { %657 = vst [vmem:[%s4316_s20 + $0x1010] sm:$0xff] %v529_v19  ;;  %9293 = vst [vmem:[#allocation28_spill] sm:$0xff] %v4715_v33  ;;  %v406_v6 = vld [vmem:[%s4289_s24 + $0x1118] sm:$0xff]  ;;  %v533_v26 = vadd.f32 %v405_v46, %v4709_v49  ;;  %v4723_v19 = vld [vmem:[%s4297_s5 + $0x240] sm:$0xff] }
  0x8f   : > { %658 = vst [vmem:[%s4316_s20 + $0x1018] sm:$0xff] %v530_v40  ;;  %659 = vst [vmem:[%s4316_s20 + $0x1100] sm:$0xff] %v531_v17  ;;  %v534_v60 = vadd.f32 %v406_v6, %v4715_v33  ;;  %v407_v58 = vld [vmem:[%s4289_s24 + $0x1200] sm:$0xff]  ;;  %v4727_v10 = vld [vmem:[%s4297_s5 + $0x248] sm:$0xff] }
  0x90   : > { %9294 = vst [vmem:[#allocation29_spill] sm:$0xff] %v4723_v19  ;;  %9295 = vst [vmem:[#allocation30_spill] sm:$0xff] %v4727_v10  ;;  %v535_v40 = vadd.f32 %v407_v58, %v4723_v19  ;;  %v408_v17 = vld [vmem:[%s4289_s24 + $0x1208] sm:$0xff]  ;;  %v4733_v30 = vld [vmem:[%s4297_s5 + $0x250] sm:$0xff] }
  0x91   : > { %660 = vst [vmem:[%s4316_s20 + $0x1108] sm:$0xff] %v532_v2  ;;  %9296 = vst [vmem:[#allocation31_spill] sm:$0xff] %v4733_v30  ;;  %v409_v46 = vld [vmem:[%s4289_s24 + $0x1210] sm:$0xff]  ;;  %v536_v6 = vadd.f32 %v408_v17, %v4727_v10  ;;  %v4741_v2 = vld [vmem:[%s4297_s5 + $0x258] sm:$0xff] }
  0x92   : > { %661 = vst [vmem:[%s4316_s20 + $0x1110] sm:$0xff] %v533_v26  ;;  %662 = vst [vmem:[%s4316_s20 + $0x1118] sm:$0xff] %v534_v60  ;;  %v537_v33 = vadd.f32 %v409_v46, %v4733_v30  ;;  %v410_v49 = vld [vmem:[%s4289_s24 + $0x1218] sm:$0xff]  ;;  %v4745_v58 = vld [vmem:[%s4297_s5 + $0x260] sm:$0xff] }
  0x93   : > { %9297 = vst [vmem:[#allocation32_spill] sm:$0xff] %v4741_v2  ;;  %9298 = vst [vmem:[#allocation33_spill] sm:$0xff] %v4745_v58  ;;  %v538_v26 = vadd.f32 %v410_v49, %v4741_v2  ;;  %v411_v60 = vld [vmem:[%s4289_s24 + $0x1300] sm:$0xff]  ;;  %v4751_v19 = vld [vmem:[%s4297_s5 + $0x268] sm:$0xff] }
  0x94   : > { %663 = vst [vmem:[%s4316_s20 + $0x1200] sm:$0xff] %v535_v40  ;;  %9299 = vst [vmem:[#allocation34_spill] sm:$0xff] %v4751_v19  ;;  %v412_v17 = vld [vmem:[%s4289_s24 + $0x1308] sm:$0xff]  ;;  %v539_v46 = vadd.f32 %v411_v60, %v4745_v58  ;;  %v4759_v40 = vld [vmem:[%s4297_s5 + $0x270] sm:$0xff] }
  0x95   : > { %664 = vst [vmem:[%s4316_s20 + $0x1208] sm:$0xff] %v536_v6  ;;  %665 = vst [vmem:[%s4316_s20 + $0x1210] sm:$0xff] %v537_v33  ;;  %v540_v30 = vadd.f32 %v412_v17, %v4751_v19  ;;  %v413_v10 = vld [vmem:[%s4289_s24 + $0x1310] sm:$0xff]  ;;  %v4763_v49 = vld [vmem:[%s4297_s5 + $0x278] sm:$0xff] }
  0x96   : > { %9300 = vst [vmem:[#allocation35_spill] sm:$0xff] %v4759_v40  ;;  %9301 = vst [vmem:[#allocation36_spill] sm:$0xff] %v4763_v49  ;;  %v541_v6 = vadd.f32 %v413_v10, %v4759_v40  ;;  %v414_v33 = vld [vmem:[%s4289_s24 + $0x1318] sm:$0xff]  ;;  %v4769_v2 = vld [vmem:[%s4297_s5 + $0x280] sm:$0xff] }
  0x97   : > { %666 = vst [vmem:[%s4316_s20 + $0x1218] sm:$0xff] %v538_v26  ;;  %9302 = vst [vmem:[#allocation37_spill] sm:$0xff] %v4769_v2  ;;  %v415_v60 = vld [vmem:[%s4289_s24 + $0x1400] sm:$0xff]  ;;  %v542_v17 = vadd.f32 %v414_v33, %v4763_v49  ;;  %v4777_v26 = vld [vmem:[%s4297_s5 + $0x288] sm:$0xff] }
  0x98   : > { %667 = vst [vmem:[%s4316_s20 + $0x1300] sm:$0xff] %v539_v46  ;;  %668 = vst [vmem:[%s4316_s20 + $0x1308] sm:$0xff] %v540_v30  ;;  %v543_v19 = vadd.f32 %v415_v60, %v4769_v2  ;;  %v416_v58 = vld [vmem:[%s4289_s24 + $0x1408] sm:$0xff]  ;;  %v4781_v10 = vld [vmem:[%s4297_s5 + $0x290] sm:$0xff] }
  0x99   : > { %9303 = vst [vmem:[#allocation38_spill] sm:$0xff] %v4777_v26  ;;  %9304 = vst [vmem:[#allocation39_spill] sm:$0xff] %v4781_v10  ;;  %v544_v46 = vadd.f32 %v416_v58, %v4777_v26  ;;  %v417_v30 = vld [vmem:[%s4289_s24 + $0x1410] sm:$0xff]  ;;  %v4787_v40 = vld [vmem:[%s4297_s5 + $0x298] sm:$0xff] }
  0x9a   : > { %669 = vst [vmem:[%s4316_s20 + $0x1310] sm:$0xff] %v541_v6  ;;  %9305 = vst [vmem:[#allocation40_spill] sm:$0xff] %v4787_v40  ;;  %v418_v33 = vld [vmem:[%s4289_s24 + $0x1418] sm:$0xff]  ;;  %v545_v60 = vadd.f32 %v417_v30, %v4781_v10  ;;  %v4795_v6 = vld [vmem:[%s4297_s5 + $0x2a0] sm:$0xff] }
  0x9b   : > { %670 = vst [vmem:[%s4316_s20 + $0x1318] sm:$0xff] %v542_v17  ;;  %671 = vst [vmem:[%s4316_s20 + $0x1400] sm:$0xff] %v543_v19  ;;  %v546_v2 = vadd.f32 %v418_v33, %v4787_v40  ;;  %v419_v49 = vld [vmem:[%s4289_s24 + $0x1500] sm:$0xff]  ;;  %v4799_v58 = vld [vmem:[%s4297_s5 + $0x2a8] sm:$0xff] }
  0x9c   : > { %9306 = vst [vmem:[#allocation41_spill] sm:$0xff] %v4795_v6  ;;  %9307 = vst [vmem:[#allocation42_spill] sm:$0xff] %v4799_v58  ;;  %v547_v17 = vadd.f32 %v419_v49, %v4795_v6  ;;  %v420_v19 = vld [vmem:[%s4289_s24 + $0x1508] sm:$0xff]  ;;  %v4805_v26 = vld [vmem:[%s4297_s5 + $0x2b0] sm:$0xff] }
  0x9d   : > { %672 = vst [vmem:[%s4316_s20 + $0x1408] sm:$0xff] %v544_v46  ;;  %9308 = vst [vmem:[#allocation43_spill] sm:$0xff] %v4805_v26  ;;  %v421_v30 = vld [vmem:[%s4289_s24 + $0x1510] sm:$0xff]  ;;  %v548_v33 = vadd.f32 %v420_v19, %v4799_v58  ;;  %v4813_v46 = vld [vmem:[%s4297_s5 + $0x2b8] sm:$0xff] }
  0x9e   : > { %673 = vst [vmem:[%s4316_s20 + $0x1410] sm:$0xff] %v545_v60  ;;  %674 = vst [vmem:[%s4316_s20 + $0x1418] sm:$0xff] %v546_v2  ;;  %v549_v40 = vadd.f32 %v421_v30, %v4805_v26  ;;  %v422_v10 = vld [vmem:[%s4289_s24 + $0x1518] sm:$0xff]  ;;  %v4817_v49 = vld [vmem:[%s4297_s5 + $0x2c0] sm:$0xff] }
  0x9f   : > { %9309 = vst [vmem:[#allocation44_spill] sm:$0xff] %v4813_v46  ;;  %9310 = vst [vmem:[#allocation45_spill] sm:$0xff] %v4817_v49  ;;  %v550_v60 = vadd.f32 %v422_v10, %v4813_v46  ;;  %v423_v2 = vld [vmem:[%s4289_s24 + $0x1600] sm:$0xff]  ;;  %v4823_v6 = vld [vmem:[%s4297_s5 + $0x2c8] sm:$0xff] }
  0xa0   : > { %675 = vst [vmem:[%s4316_s20 + $0x1500] sm:$0xff] %v547_v17  ;;  %9311 = vst [vmem:[#allocation46_spill] sm:$0xff] %v4823_v6  ;;  %v424_v19 = vld [vmem:[%s4289_s24 + $0x1608] sm:$0xff]  ;;  %v551_v30 = vadd.f32 %v423_v2, %v4817_v49  ;;  %v4831_v17 = vld [vmem:[%s4297_s5 + $0x2d0] sm:$0xff] }
  0xa1   : > { %676 = vst [vmem:[%s4316_s20 + $0x1508] sm:$0xff] %v548_v33  ;;  %677 = vst [vmem:[%s4316_s20 + $0x1510] sm:$0xff] %v549_v40  ;;  %v552_v26 = vadd.f32 %v424_v19, %v4823_v6  ;;  %v425_v58 = vld [vmem:[%s4289_s24 + $0x1610] sm:$0xff]  ;;  %v4835_v10 = vld [vmem:[%s4297_s5 + $0x2d8] sm:$0xff] }
  0xa2   : > { %9312 = vst [vmem:[#allocation47_spill] sm:$0xff] %v4831_v17  ;;  %9313 = vst [vmem:[#allocation48_spill] sm:$0xff] %v4835_v10  ;;  %v553_v33 = vadd.f32 %v425_v58, %v4831_v17  ;;  %v426_v40 = vld [vmem:[%s4289_s24 + $0x1618] sm:$0xff]  ;;  %v4841_v46 = vld [vmem:[%s4297_s5 + $0x2e0] sm:$0xff] }
  0xa3   : > { %678 = vst [vmem:[%s4316_s20 + $0x1518] sm:$0xff] %v550_v60  ;;  %9314 = vst [vmem:[#allocation49_spill] sm:$0xff] %v4841_v46  ;;  %v427_v2 = vld [vmem:[%s4289_s24 + $0x1700] sm:$0xff]  ;;  %v554_v19 = vadd.f32 %v426_v40, %v4835_v10  ;;  %v4849_v60 = vld [vmem:[%s4297_s5 + $0x2e8] sm:$0xff] }
  0xa4   : > { %679 = vst [vmem:[%s4316_s20 + $0x1600] sm:$0xff] %v551_v30  ;;  %680 = vst [vmem:[%s4316_s20 + $0x1608] sm:$0xff] %v552_v26  ;;  %v555_v6 = vadd.f32 %v427_v2, %v4841_v46  ;;  %v428_v49 = vld [vmem:[%s4289_s24 + $0x1708] sm:$0xff]  ;;  %v4853_v58 = vld [vmem:[%s4297_s5 + $0x2f0] sm:$0xff] }
  0xa5   : > { %9315 = vst [vmem:[#allocation50_spill] sm:$0xff] %v4849_v60  ;;  %9316 = vst [vmem:[#allocation51_spill] sm:$0xff] %v4853_v58  ;;  %v556_v30 = vadd.f32 %v428_v49, %v4849_v60  ;;  %v429_v26 = vld [vmem:[%s4289_s24 + $0x1710] sm:$0xff]  ;;  %v4859_v17 = vld [vmem:[%s4297_s5 + $0x2f8] sm:$0xff] }
  0xa6   : > { %681 = vst [vmem:[%s4316_s20 + $0x1610] sm:$0xff] %v553_v33  ;;  %9317 = vst [vmem:[#allocation52_spill] sm:$0xff] %v4859_v17  ;;  %v430_v40 = vld [vmem:[%s4289_s24 + $0x1718] sm:$0xff]  ;;  %v557_v2 = vadd.f32 %v429_v26, %v4853_v58  ;;  %v4867_v33 = vld [vmem:[%s4297_s5 + $0x300] sm:$0xff] }
  0xa7   : > { %682 = vst [vmem:[%s4316_s20 + $0x1618] sm:$0xff] %v554_v19  ;;  %683 = vst [vmem:[%s4316_s20 + $0x1700] sm:$0xff] %v555_v6  ;;  %v558_v46 = vadd.f32 %v430_v40, %v4859_v17  ;;  %v431_v10 = vld [vmem:[%s4289_s24 + $0x1800] sm:$0xff]  ;;  %v4871_v49 = vld [vmem:[%s4297_s5 + $0x308] sm:$0xff] }
  0xa8   : > { %9318 = vst [vmem:[#allocation53_spill] sm:$0xff] %v4867_v33  ;;  %9319 = vst [vmem:[#allocation54_spill] sm:$0xff] %v4871_v49  ;;  %v559_v19 = vadd.f32 %v431_v10, %v4867_v33  ;;  %v432_v6 = vld [vmem:[%s4289_s24 + $0x1808] sm:$0xff]  ;;  %v4877_v60 = vld [vmem:[%s4297_s5 + $0x310] sm:$0xff] }
  0xa9   : > { %684 = vst [vmem:[%s4316_s20 + $0x1708] sm:$0xff] %v556_v30  ;;  %9320 = vst [vmem:[#allocation55_spill] sm:$0xff] %v4877_v60  ;;  %v433_v26 = vld [vmem:[%s4289_s24 + $0x1810] sm:$0xff]  ;;  %v560_v40 = vadd.f32 %v432_v6, %v4871_v49  ;;  %v4885_v30 = vld [vmem:[%s4297_s5 + $0x318] sm:$0xff] }
  0xaa   : > { %685 = vst [vmem:[%s4316_s20 + $0x1710] sm:$0xff] %v557_v2  ;;  %686 = vst [vmem:[%s4316_s20 + $0x1718] sm:$0xff] %v558_v46  ;;  %v561_v17 = vadd.f32 %v433_v26, %v4877_v60  ;;  %v434_v58 = vld [vmem:[%s4289_s24 + $0x1818] sm:$0xff]  ;;  %v4889_v10 = vld [vmem:[%s4297_s5 + $0x320] sm:$0xff] }
  0xab   : > { %9321 = vst [vmem:[#allocation56_spill] sm:$0xff] %v4885_v30  ;;  %9322 = vst [vmem:[#allocation57_spill] sm:$0xff] %v4889_v10  ;;  %v562_v2 = vadd.f32 %v434_v58, %v4885_v30  ;;  %v435_v46 = vld [vmem:[%s4289_s24 + $0x1900] sm:$0xff]  ;;  %v4895_v33 = vld [vmem:[%s4297_s5 + $0x328] sm:$0xff] }
  0xac   : > { %687 = vst [vmem:[%s4316_s20 + $0x1800] sm:$0xff] %v559_v19  ;;  %9323 = vst [vmem:[#allocation58_spill] sm:$0xff] %v4895_v33  ;;  %v436_v6 = vld [vmem:[%s4289_s24 + $0x1908] sm:$0xff]  ;;  %v563_v26 = vadd.f32 %v435_v46, %v4889_v10  ;;  %v4903_v19 = vld [vmem:[%s4297_s5 + $0x330] sm:$0xff] }
  0xad   : > { %688 = vst [vmem:[%s4316_s20 + $0x1808] sm:$0xff] %v560_v40  ;;  %689 = vst [vmem:[%s4316_s20 + $0x1810] sm:$0xff] %v561_v17  ;;  %v564_v60 = vadd.f32 %v436_v6, %v4895_v33  ;;  %v437_v49 = vld [vmem:[%s4289_s24 + $0x1910] sm:$0xff]  ;;  %v4907_v58 = vld [vmem:[%s4297_s5 + $0x338] sm:$0xff] }
  0xae   : > { %9324 = vst [vmem:[#allocation59_spill] sm:$0xff] %v4903_v19  ;;  %9325 = vst [vmem:[#allocation60_spill] sm:$0xff] %v4907_v58  ;;  %v565_v40 = vadd.f32 %v437_v49, %v4903_v19  ;;  %v438_v17 = vld [vmem:[%s4289_s24 + $0x1918] sm:$0xff]  ;;  %v4913_v30 = vld [vmem:[%s4297_s5 + $0x340] sm:$0xff] }
  0xaf   : > { %690 = vst [vmem:[%s4316_s20 + $0x1818] sm:$0xff] %v562_v2  ;;  %9326 = vst [vmem:[#allocation61_spill] sm:$0xff] %v4913_v30  ;;  %v439_v46 = vld [vmem:[%s4289_s24 + $0x1a00] sm:$0xff]  ;;  %v566_v6 = vadd.f32 %v438_v17, %v4907_v58  ;;  %v4921_v2 = vld [vmem:[%s4297_s5 + $0x348] sm:$0xff] }
  0xb0   : > { %691 = vst [vmem:[%s4316_s20 + $0x1900] sm:$0xff] %v563_v26  ;;  %692 = vst [vmem:[%s4316_s20 + $0x1908] sm:$0xff] %v564_v60  ;;  %v567_v33 = vadd.f32 %v439_v46, %v4913_v30  ;;  %v440_v10 = vld [vmem:[%s4289_s24 + $0x1a08] sm:$0xff]  ;;  %v4925_v49 = vld [vmem:[%s4297_s5 + $0x350] sm:$0xff] }
  0xb1   : > { %9327 = vst [vmem:[#allocation62_spill] sm:$0xff] %v4921_v2  ;;  %9328 = vst [vmem:[#allocation63_spill] sm:$0xff] %v4925_v49  ;;  %v568_v26 = vadd.f32 %v440_v10, %v4921_v2  ;;  %v441_v60 = vld [vmem:[%s4289_s24 + $0x1a10] sm:$0xff]  ;;  %v4931_v19 = vld [vmem:[%s4297_s5 + $0x358] sm:$0xff] }
  0xb2   : > { %693 = vst [vmem:[%s4316_s20 + $0x1910] sm:$0xff] %v565_v40  ;;  %9329 = vst [vmem:[#allocation64_spill] sm:$0xff] %v4931_v19  ;;  %v442_v17 = vld [vmem:[%s4289_s24 + $0x1a18] sm:$0xff]  ;;  %v569_v46 = vadd.f32 %v441_v60, %v4925_v49  ;;  %v4939_v40 = vld [vmem:[%s4297_s5 + $0x360] sm:$0xff] }
  0xb3   : > { %694 = vst [vmem:[%s4316_s20 + $0x1918] sm:$0xff] %v566_v6  ;;  %695 = vst [vmem:[%s4316_s20 + $0x1a00] sm:$0xff] %v567_v33  ;;  %v570_v30 = vadd.f32 %v442_v17, %v4931_v19  ;;  %v443_v58 = vld [vmem:[%s4289_s24 + $0x1b00] sm:$0xff]  ;;  %v4943_v10 = vld [vmem:[%s4297_s5 + $0x368] sm:$0xff] }
  0xb4   : > { %9330 = vst [vmem:[#allocation65_spill] sm:$0xff] %v4939_v40  ;;  %9331 = vst [vmem:[#allocation66_spill] sm:$0xff] %v4943_v10  ;;  %v571_v6 = vadd.f32 %v443_v58, %v4939_v40  ;;  %v444_v33 = vld [vmem:[%s4289_s24 + $0x1b08] sm:$0xff]  ;;  %v4949_v2 = vld [vmem:[%s4297_s5 + $0x370] sm:$0xff] }
  0xb5   : > { %696 = vst [vmem:[%s4316_s20 + $0x1a08] sm:$0xff] %v568_v26  ;;  %9332 = vst [vmem:[#allocation67_spill] sm:$0xff] %v4949_v2  ;;  %v445_v60 = vld [vmem:[%s4289_s24 + $0x1b10] sm:$0xff]  ;;  %v572_v17 = vadd.f32 %v444_v33, %v4943_v10  ;;  %v4957_v26 = vld [vmem:[%s4297_s5 + $0x378] sm:$0xff] }
  0xb6   : > { %697 = vst [vmem:[%s4316_s20 + $0x1a10] sm:$0xff] %v569_v46  ;;  %698 = vst [vmem:[%s4316_s20 + $0x1a18] sm:$0xff] %v570_v30  ;;  %v573_v19 = vadd.f32 %v445_v60, %v4949_v2  ;;  %v446_v49 = vld [vmem:[%s4289_s24 + $0x1b18] sm:$0xff]  ;;  %v4961_v58 = vld [vmem:[%s4297_s5 + $0x380] sm:$0xff] }
  0xb7   : > { %9333 = vst [vmem:[#allocation68_spill] sm:$0xff] %v4957_v26  ;;  %9334 = vst [vmem:[#allocation69_spill] sm:$0xff] %v4961_v58  ;;  %v574_v46 = vadd.f32 %v446_v49, %v4957_v26  ;;  %v447_v30 = vld [vmem:[%s4289_s24 + $0x1c00] sm:$0xff]  ;;  %v4967_v40 = vld [vmem:[%s4297_s5 + $0x388] sm:$0xff] }
  0xb8   : > { %699 = vst [vmem:[%s4316_s20 + $0x1b00] sm:$0xff] %v571_v6  ;;  %9335 = vst [vmem:[#allocation70_spill] sm:$0xff] %v4967_v40  ;;  %v448_v33 = vld [vmem:[%s4289_s24 + $0x1c08] sm:$0xff]  ;;  %v575_v60 = vadd.f32 %v447_v30, %v4961_v58  ;;  %v4975_v6 = vld [vmem:[%s4297_s5 + $0x390] sm:$0xff] }
  0xb9   : > { %700 = vst [vmem:[%s4316_s20 + $0x1b08] sm:$0xff] %v572_v17  ;;  %701 = vst [vmem:[%s4316_s20 + $0x1b10] sm:$0xff] %v573_v19  ;;  %v576_v2 = vadd.f32 %v448_v33, %v4967_v40  ;;  %v449_v10 = vld [vmem:[%s4289_s24 + $0x1c10] sm:$0xff]  ;;  %v4979_v49 = vld [vmem:[%s4297_s5 + $0x398] sm:$0xff] }
  0xba   : > { %9336 = vst [vmem:[#allocation71_spill] sm:$0xff] %v4975_v6  ;;  %9337 = vst [vmem:[#allocation72_spill] sm:$0xff] %v4979_v49  ;;  %v577_v17 = vadd.f32 %v449_v10, %v4975_v6  ;;  %v450_v19 = vld [vmem:[%s4289_s24 + $0x1c18] sm:$0xff]  ;;  %v4985_v26 = vld [vmem:[%s4297_s5 + $0x3a0] sm:$0xff] }
  0xbb   : > { %702 = vst [vmem:[%s4316_s20 + $0x1b18] sm:$0xff] %v574_v46  ;;  %9338 = vst [vmem:[#allocation73_spill] sm:$0xff] %v4985_v26  ;;  %v451_v30 = vld [vmem:[%s4289_s24 + $0x1d00] sm:$0xff]  ;;  %v578_v33 = vadd.f32 %v450_v19, %v4979_v49  ;;  %v4993_v46 = vld [vmem:[%s4297_s5 + $0x3a8] sm:$0xff] }
  0xbc   : > { %703 = vst [vmem:[%s4316_s20 + $0x1c00] sm:$0xff] %v575_v60  ;;  %704 = vst [vmem:[%s4316_s20 + $0x1c08] sm:$0xff] %v576_v2  ;;  %v579_v40 = vadd.f32 %v451_v30, %v4985_v26  ;;  %v452_v58 = vld [vmem:[%s4289_s24 + $0x1d08] sm:$0xff]  ;;  %v4997_v10 = vld [vmem:[%s4297_s5 + $0x3b0] sm:$0xff] }
  0xbd   : > { %9339 = vst [vmem:[#allocation74_spill] sm:$0xff] %v4993_v46  ;;  %9340 = vst [vmem:[#allocation75_spill] sm:$0xff] %v4997_v10  ;;  %v580_v60 = vadd.f32 %v452_v58, %v4993_v46  ;;  %v453_v2 = vld [vmem:[%s4289_s24 + $0x1d10] sm:$0xff]  ;;  %v5003_v6 = vld [vmem:[%s4297_s5 + $0x3b8] sm:$0xff] }
  0xbe   : > { %705 = vst [vmem:[%s4316_s20 + $0x1c10] sm:$0xff] %v577_v17  ;;  %9341 = vst [vmem:[#allocation76_spill] sm:$0xff] %v5003_v6  ;;  %v454_v19 = vld [vmem:[%s4289_s24 + $0x1d18] sm:$0xff]  ;;  %v581_v30 = vadd.f32 %v453_v2, %v4997_v10  ;;  %v5011_v17 = vld [vmem:[%s4297_s5 + $0x3c0] sm:$0xff] }
  0xbf   : > { %706 = vst [vmem:[%s4316_s20 + $0x1c18] sm:$0xff] %v578_v33  ;;  %707 = vst [vmem:[%s4316_s20 + $0x1d00] sm:$0xff] %v579_v40  ;;  %v582_v26 = vadd.f32 %v454_v19, %v5003_v6  ;;  %v455_v49 = vld [vmem:[%s4289_s24 + $0x1e00] sm:$0xff]  ;;  %v5015_v58 = vld [vmem:[%s4297_s5 + $0x3c8] sm:$0xff] }
  0xc0   : > { %9342 = vst [vmem:[#allocation77_spill] sm:$0xff] %v5011_v17  ;;  %9343 = vst [vmem:[#allocation78_spill] sm:$0xff] %v5015_v58  ;;  %v583_v33 = vadd.f32 %v455_v49, %v5011_v17  ;;  %v456_v40 = vld [vmem:[%s4289_s24 + $0x1e08] sm:$0xff]  ;;  %v5021_v46 = vld [vmem:[%s4297_s5 + $0x3d0] sm:$0xff] }
  0xc1   : > { %708 = vst [vmem:[%s4316_s20 + $0x1d08] sm:$0xff] %v580_v60  ;;  %9344 = vst [vmem:[#allocation79_spill] sm:$0xff] %v5021_v46  ;;  %v457_v2 = vld [vmem:[%s4289_s24 + $0x1e10] sm:$0xff]  ;;  %v584_v19 = vadd.f32 %v456_v40, %v5015_v58  ;;  %v5029_v60 = vld [vmem:[%s4297_s5 + $0x3d8] sm:$0xff] }
  0xc2   : > { %709 = vst [vmem:[%s4316_s20 + $0x1d10] sm:$0xff] %v581_v30  ;;  %710 = vst [vmem:[%s4316_s20 + $0x1d18] sm:$0xff] %v582_v26  ;;  %v585_v6 = vadd.f32 %v457_v2, %v5021_v46  ;;  %v458_v10 = vld [vmem:[%s4289_s24 + $0x1e18] sm:$0xff]  ;;  %v5033_v49 = vld [vmem:[%s4297_s5 + $0x3e0] sm:$0xff] }
  0xc3   : > { %9345 = vst [vmem:[#allocation80_spill] sm:$0xff] %v5029_v60  ;;  %9346 = vst [vmem:[#allocation81_spill] sm:$0xff] %v5033_v49  ;;  %v586_v30 = vadd.f32 %v458_v10, %v5029_v60  ;;  %v459_v26 = vld [vmem:[%s4289_s24 + $0x1f00] sm:$0xff]  ;;  %v5039_v17 = vld [vmem:[%s4297_s5 + $0x3e8] sm:$0xff] }
  0xc4   : > { %711 = vst [vmem:[%s4316_s20 + $0x1e00] sm:$0xff] %v583_v33  ;;  %9347 = vst [vmem:[#allocation82_spill] sm:$0xff] %v5039_v17  ;;  %v460_v40 = vld [vmem:[%s4289_s24 + $0x1f08] sm:$0xff]  ;;  %v587_v2 = vadd.f32 %v459_v26, %v5033_v49  ;;  %v5047_v58 = vld [vmem:[%s4297_s5 + $0x3f0] sm:$0xff] }
  0xc5   : > { %712 = vst [vmem:[%s4316_s20 + $0x1e08] sm:$0xff] %v584_v19  ;;  %713 = vst [vmem:[%s4316_s20 + $0x1e10] sm:$0xff] %v585_v6  ;;  %v588_v46 = vadd.f32 %v460_v40, %v5039_v17  ;;  %v461_v33 = vld [vmem:[%s4289_s24 + $0x1f10] sm:$0xff]  ;;  %v5051_v10 = vld [vmem:[%s4297_s5 + $0x3f8] sm:$0xff] }
  0xc6   : > { %9348 = vst [vmem:[#allocation83_spill] sm:$0xff] %v5047_v58  ;;  %9349 = vst [vmem:[#allocation84_spill] sm:$0xff] %v5051_v10  ;;  %v589_v60 = vadd.f32 %v461_v33, %v5047_v58  ;;  %v462_v19 = vld [vmem:[%s4289_s24 + $0x1f18] sm:$0xff]  ;;  %v719_v6 = vld [vmem:[%s4289_s24 + $0x20] sm:$0xff] }
  0xc7   : > { %714 = vst [vmem:[%s4316_s20 + $0x1e18] sm:$0xff] %v586_v30  ;;  %v720_v3 = vld [vmem:[%s4289_s24 + $0x28] sm:$0xff]  ;;  %715 = vst [vmem:[%s4316_s20 + $0x1f00] sm:$0xff] %v587_v2  ;;  %v590_v26 = vadd.f32 %v462_v19, %v5051_v10  ;;  %v5062_v40 = vld [vmem:[%s4297_s5] sm:$0xff] }
  0xc8   : > { %716 = vst [vmem:[%s4316_s20 + $0x1f08] sm:$0xff] %v588_v46  ;;  %9350 = vst [vmem:[#allocation85_spill] sm:$0xff] %v5062_v40  ;;  %v847_v17 = vadd.f32 %v5062_v40, %v719_v6  ;;  %v5066_v30 = vld [vmem:[%s4297_s5 + $0x8] sm:$0xff]  ;;  %v721_v58 = vld [vmem:[%s4289_s24 + $0x30] sm:$0xff] }
  0xc9   : > { %9351 = vst [vmem:[#allocation86_spill] sm:$0xff] %v5066_v30  ;;  %v848_v33 = vadd.f32 %v5066_v30, %v720_v3  ;;  %v722_v49 = vld [vmem:[%s4289_s24 + $0x38] sm:$0xff]  ;;  %v723_v2 = vld [vmem:[%s4289_s24 + $0x120] sm:$0xff]  ;;  %717 = vst [vmem:[%s4316_s20 + $0x1f10] sm:$0xff] %v589_v60 }
  0xca   : > { %v5074_v46 = vld [vmem:[%s4297_s5 + $0x10] sm:$0xff]  ;;  %v850_v6 = vadd.f32 %v722_v49, %v4310_v9  ;;  %v851_v40 = vadd.f32 %v723_v2, %v4314_v11  ;;  %v724_v10 = vld [vmem:[%s4289_s24 + $0x128] sm:$0xff]  ;;  %v726_v30 = vld [vmem:[%s4289_s24 + $0x138] sm:$0xff]  ;;  %718 = vst [vmem:[%s4316_s20 + $0x1f18] sm:$0xff] %v590_v26 }
  0xcb   : > { %9352 = vst [vmem:[#allocation87_spill] sm:$0xff] %v5074_v46  ;;  %v849_v19 = vadd.f32 %v5074_v46, %v721_v58  ;;  %v725_v3 = vld [vmem:[%s4289_s24 + $0x130] sm:$0xff]  ;;  %975 = vst [vmem:[%s4316_s20 + $0x20] sm:$0xff] %v847_v17  ;;  %v5086_v60 = vld [vmem:[%s4297_s5 + $0x28] sm:$0xff]  ;;  %v854_v11 = vadd.f32 %v726_v30, %v4331_v20 }
  0xcc   : > { %976 = vst [vmem:[%s4316_s20 + $0x28] sm:$0xff] %v848_v33  ;;  %v852_v58 = vadd.f32 %v5086_v60, %v724_v10  ;;  %v853_v9 = vadd.f32 %v725_v3, %v4327_v18  ;;  %v727_v49 = vld [vmem:[%s4289_s24 + $0x220] sm:$0xff]  ;;  %v728_v2 = vld [vmem:[%s4289_s24 + $0x228] sm:$0xff]  ;;  %v729_v46 = vld [vmem:[%s4289_s24 + $0x230] sm:$0xff] }
  0xcd   : > { %977 = vst [vmem:[%s4316_s20 + $0x30] sm:$0xff] %v849_v19  ;;  %978 = vst [vmem:[%s4316_s20 + $0x38] sm:$0xff] %v850_v6  ;;  %v855_v17 = vadd.f32 %v727_v49, %v4337_v23  ;;  %v856_v10 = vadd.f32 %v728_v2, %v4345_v27  ;;  %v857_v18 = vadd.f32 %v729_v46, %v4349_v29  ;;  %v730_v26 = vld [vmem:[%s4289_s24 + $0x238] sm:$0xff]  ;;  %v731_v20 = vld [vmem:[%s4289_s24 + $0x320] sm:$0xff] }
  0xce   : > { %979 = vst [vmem:[%s4316_s20 + $0x120] sm:$0xff] %v851_v40  ;;  %v732_v30 = vld [vmem:[%s4289_s24 + $0x328] sm:$0xff]  ;;  %980 = vst [vmem:[%s4316_s20 + $0x128] sm:$0xff] %v852_v58  ;;  %v858_v40 = vadd.f32 %v730_v26, %v4355_v32  ;;  %v859_v23 = vadd.f32 %v731_v20, %v4363_v36  ;;  %v733_v33 = vld [vmem:[%s4289_s24 + $0x330] sm:$0xff] }
  0xcf   : > { %981 = vst [vmem:[%s4316_s20 + $0x130] sm:$0xff] %v853_v9  ;;  %982 = vst [vmem:[%s4316_s20 + $0x138] sm:$0xff] %v854_v11  ;;  %v860_v27 = vadd.f32 %v732_v30, %v4367_v38  ;;  %v734_v29 = vld [vmem:[%s4289_s24 + $0x338] sm:$0xff]  ;;  %v735_v46 = vld [vmem:[%s4289_s24 + $0x420] sm:$0xff]  ;;  %v861_v19 = vadd.f32 %v733_v33, %v4373_v41 }
  0xd0   : > { %983 = vst [vmem:[%s4316_s20 + $0x220] sm:$0xff] %v855_v17  ;;  %984 = vst [vmem:[%s4316_s20 + $0x228] sm:$0xff] %v856_v10  ;;  %v862_v32 = vadd.f32 %v734_v29, %v4381_v45  ;;  %v863_v36 = vadd.f32 %v735_v46, %v4385_v47  ;;  %v736_v6 = vld [vmem:[%s4289_s24 + $0x428] sm:$0xff]  ;;  %v737_v38 = vld [vmem:[%s4289_s24 + $0x430] sm:$0xff] }
  0xd1   : > { %985 = vst [vmem:[%s4316_s20 + $0x230] sm:$0xff] %v857_v18  ;;  %v738_v3 = vld [vmem:[%s4289_s24 + $0x438] sm:$0xff]  ;;  %986 = vst [vmem:[%s4316_s20 + $0x238] sm:$0xff] %v858_v40  ;;  %v864_v58 = vadd.f32 %v736_v6, %v4391_v50  ;;  %v865_v41 = vadd.f32 %v737_v38, %v4399_v54  ;;  %v739_v9 = vld [vmem:[%s4289_s24 + $0x520] sm:$0xff] }
  0xd2   : > { %987 = vst [vmem:[%s4316_s20 + $0x320] sm:$0xff] %v859_v23  ;;  %988 = vst [vmem:[%s4316_s20 + $0x328] sm:$0xff] %v860_v27  ;;  %v866_v45 = vadd.f32 %v738_v3, %v4403_v56  ;;  %v740_v47 = vld [vmem:[%s4289_s24 + $0x528] sm:$0xff]  ;;  %v741_v11 = vld [vmem:[%s4289_s24 + $0x530] sm:$0xff]  ;;  %v867_v49 = vadd.f32 %v739_v9, %v4409_v59 }
  0xd3   : > { %989 = vst [vmem:[%s4316_s20 + $0x330] sm:$0xff] %v861_v19  ;;  %990 = vst [vmem:[%s4316_s20 + $0x338] sm:$0xff] %v862_v32  ;;  %v868_v50 = vadd.f32 %v740_v47, %v4417_v63  ;;  %v869_v54 = vadd.f32 %v741_v11, %v4421_v1  ;;  %v742_v2 = vld [vmem:[%s4289_s24 + $0x538] sm:$0xff]  ;;  %v743_v56 = vld [vmem:[%s4289_s24 + $0x620] sm:$0xff] }
  0xd4   : > { %991 = vst [vmem:[%s4316_s20 + $0x420] sm:$0xff] %v863_v36  ;;  %v744_v17 = vld [vmem:[%s4289_s24 + $0x628] sm:$0xff]  ;;  %992 = vst [vmem:[%s4316_s20 + $0x428] sm:$0xff] %v864_v58  ;;  %v870_v10 = vadd.f32 %v742_v2, %v4427_v4  ;;  %v871_v59 = vadd.f32 %v743_v56, %v4435_v8  ;;  %v745_v18 = vld [vmem:[%s4289_s24 + $0x630] sm:$0xff] }
  0xd5   : > { %993 = vst [vmem:[%s4316_s20 + $0x430] sm:$0xff] %v865_v41  ;;  %994 = vst [vmem:[%s4316_s20 + $0x438] sm:$0xff] %v866_v45  ;;  %v872_v63 = vadd.f32 %v744_v17, %v4439_v12  ;;  %v746_v1 = vld [vmem:[%s4289_s24 + $0x638] sm:$0xff]  ;;  %v747_v26 = vld [vmem:[%s4289_s24 + $0x720] sm:$0xff]  ;;  %v873_v20 = vadd.f32 %v745_v18, %v4445_v15 }
  0xd6   : > { %995 = vst [vmem:[%s4316_s20 + $0x520] sm:$0xff] %v867_v49  ;;  %996 = vst [vmem:[%s4316_s20 + $0x528] sm:$0xff] %v868_v50  ;;  %v874_v4 = vadd.f32 %v746_v1, %v4453_v21  ;;  %v875_v8 = vadd.f32 %v747_v26, %v4457_v24  ;;  %v748_v30 = vld [vmem:[%s4289_s24 + $0x728] sm:$0xff]  ;;  %v749_v12 = vld [vmem:[%s4289_s24 + $0x730] sm:$0xff] }
  0xd7   : > { %997 = vst [vmem:[%s4316_s20 + $0x530] sm:$0xff] %v869_v54  ;;  %v750_v40 = vld [vmem:[%s4289_s24 + $0x738] sm:$0xff]  ;;  %998 = vst [vmem:[%s4316_s20 + $0x538] sm:$0xff] %v870_v10  ;;  %v876_v23 = vadd.f32 %v748_v30, %v4463_v28  ;;  %v877_v15 = vadd.f32 %v749_v12, %v4471_v34  ;;  %v751_v27 = vld [vmem:[%s4289_s24 + $0x820] sm:$0xff] }
  0xd8   : > { %999 = vst [vmem:[%s4316_s20 + $0x620] sm:$0xff] %v871_v59  ;;  %1000 = vst [vmem:[%s4316_s20 + $0x628] sm:$0xff] %v872_v63  ;;  %v878_v21 = vadd.f32 %v750_v40, %v4475_v37  ;;  %v752_v24 = vld [vmem:[%s4289_s24 + $0x828] sm:$0xff]  ;;  %v753_v33 = vld [vmem:[%s4289_s24 + $0x830] sm:$0xff]  ;;  %v879_v29 = vadd.f32 %v751_v27, %v4481_v42 }
  0xd9   : > { %1001 = vst [vmem:[%s4316_s20 + $0x630] sm:$0xff] %v873_v20  ;;  %1002 = vst [vmem:[%s4316_s20 + $0x638] sm:$0xff] %v874_v4  ;;  %v880_v28 = vadd.f32 %v752_v24, %v4489_v48  ;;  %v881_v34 = vadd.f32 %v753_v33, %v4493_v51  ;;  %v754_v46 = vld [vmem:[%s4289_s24 + $0x838] sm:$0xff]  ;;  %v755_v37 = vld [vmem:[%s4289_s24 + $0x920] sm:$0xff] }
  0xda   : > { %1003 = vst [vmem:[%s4316_s20 + $0x720] sm:$0xff] %v875_v8  ;;  %v756_v19 = vld [vmem:[%s4289_s24 + $0x928] sm:$0xff]  ;;  %1004 = vst [vmem:[%s4316_s20 + $0x728] sm:$0xff] %v876_v23  ;;  %v882_v32 = vadd.f32 %v754_v46, %v4499_v55  ;;  %v883_v42 = vadd.f32 %v755_v37, %v4507_v61  ;;  %v757_v36 = vld [vmem:[%s4289_s24 + $0x930] sm:$0xff] }
  0xdb   : > { %1005 = vst [vmem:[%s4316_s20 + $0x730] sm:$0xff] %v877_v15  ;;  %1006 = vst [vmem:[%s4316_s20 + $0x738] sm:$0xff] %v878_v21  ;;  %v884_v48 = vadd.f32 %v756_v19, %v4511_v0  ;;  %v758_v51 = vld [vmem:[%s4289_s24 + $0x938] sm:$0xff]  ;;  %v759_v6 = vld [vmem:[%s4289_s24 + $0xa20] sm:$0xff]  ;;  %v885_v38 = vadd.f32 %v757_v36, %v4517_v5 }
  0xdc   : > { %1007 = vst [vmem:[%s4316_s20 + $0x820] sm:$0xff] %v879_v29  ;;  %1008 = vst [vmem:[%s4316_s20 + $0x828] sm:$0xff] %v880_v28  ;;  %v886_v55 = vadd.f32 %v758_v51, %v4525_v13  ;;  %v887_v61 = vadd.f32 %v759_v6, %v4529_v16  ;;  %v760_v3 = vld [vmem:[%s4289_s24 + $0xa28] sm:$0xff]  ;;  %v761_v0 = vld [vmem:[%s4289_s24 + $0xa30] sm:$0xff] }
  0xdd   : > { %1009 = vst [vmem:[%s4316_s20 + $0x830] sm:$0xff] %v881_v34  ;;  %v762_v58 = vld [vmem:[%s4289_s24 + $0xa38] sm:$0xff]  ;;  %1010 = vst [vmem:[%s4316_s20 + $0x838] sm:$0xff] %v882_v32  ;;  %v888_v41 = vadd.f32 %v760_v3, %v4535_v22  ;;  %v889_v5 = vadd.f32 %v761_v0, %v4543_v31  ;;  %v763_v45 = vld [vmem:[%s4289_s24 + $0xb20] sm:$0xff] }
  0xde   : > { %1011 = vst [vmem:[%s4316_s20 + $0x920] sm:$0xff] %v883_v42  ;;  %1012 = vst [vmem:[%s4316_s20 + $0x928] sm:$0xff] %v884_v48  ;;  %v890_v13 = vadd.f32 %v762_v58, %v4547_v35  ;;  %v764_v16 = vld [vmem:[%s4289_s24 + $0xb28] sm:$0xff]  ;;  %v765_v9 = vld [vmem:[%s4289_s24 + $0xb30] sm:$0xff]  ;;  %v891_v47 = vadd.f32 %v763_v45, %v4553_v43 }
  0xdf   : > { %1013 = vst [vmem:[%s4316_s20 + $0x930] sm:$0xff] %v885_v38  ;;  %1014 = vst [vmem:[%s4316_s20 + $0x938] sm:$0xff] %v886_v55  ;;  %v892_v22 = vadd.f32 %v764_v16, %v4561_v52  ;;  %v893_v31 = vadd.f32 %v765_v9, %v4565_v57  ;;  %v766_v11 = vld [vmem:[%s4289_s24 + $0xb38] sm:$0xff]  ;;  %v767_v35 = vld [vmem:[%s4289_s24 + $0xc20] sm:$0xff] }
  0xe0   : > { %1015 = vst [vmem:[%s4316_s20 + $0xa20] sm:$0xff] %v887_v61  ;;  %v768_v49 = vld [vmem:[%s4289_s24 + $0xc28] sm:$0xff]  ;;  %1016 = vst [vmem:[%s4316_s20 + $0xa28] sm:$0xff] %v888_v41  ;;  %v894_v50 = vadd.f32 %v766_v11, %v4571_v62  ;;  %v895_v43 = vadd.f32 %v767_v35, %v4579_v7  ;;  %v769_v54 = vld [vmem:[%s4289_s24 + $0xc30] sm:$0xff] }
  0xe1   : > { %1017 = vst [vmem:[%s4316_s20 + $0xa30] sm:$0xff] %v889_v5  ;;  %1018 = vst [vmem:[%s4316_s20 + $0xa38] sm:$0xff] %v890_v13  ;;  %v896_v52 = vadd.f32 %v768_v49, %v4583_v14  ;;  %v770_v57 = vld [vmem:[%s4289_s24 + $0xc38] sm:$0xff]  ;;  %v771_v2 = vld [vmem:[%s4289_s24 + $0xd20] sm:$0xff]  ;;  %v897_v56 = vadd.f32 %v769_v54, %v4589_v25 }
  0xe2   : > { %1019 = vst [vmem:[%s4316_s20 + $0xb20] sm:$0xff] %v891_v47  ;;  %1020 = vst [vmem:[%s4316_s20 + $0xb28] sm:$0xff] %v892_v22  ;;  %v898_v62 = vadd.f32 %v770_v57, %v4597_v39  ;;  %v899_v7 = vadd.f32 %v771_v2, %v4601_v44  ;;  %v772_v17 = vld [vmem:[%s4289_s24 + $0xd28] sm:$0xff]  ;;  %v773_v14 = vld [vmem:[%s4289_s24 + $0xd30] sm:$0xff] }
  0xe3   : > { %1021 = vst [vmem:[%s4316_s20 + $0xb30] sm:$0xff] %v893_v31  ;;  %v774_v10 = vld [vmem:[%s4289_s24 + $0xd38] sm:$0xff]  ;;  %1022 = vst [vmem:[%s4316_s20 + $0xb38] sm:$0xff] %v894_v50  ;;  %v900_v59 = vadd.f32 %v772_v17, %v4607_v53  ;;  %v9353_v63 = vld [vmem:[#allocation11_spill] sm:$0xff] }
  0xe4   : > { %1023 = vst [vmem:[%s4316_s20 + $0xc20] sm:$0xff] %v895_v43  ;;  %1024 = vst [vmem:[%s4316_s20 + $0xc28] sm:$0xff] %v896_v52  ;;  %v901_v25 = vadd.f32 %v773_v14, %v9353_v63  ;;  %v9354_v18 = vld [vmem:[#allocation12_spill] sm:$0xff]  ;;  %v775_v1 = vld [vmem:[%s4289_s24 + $0xe20] sm:$0xff] }
  0xe5   : > { %v902_v39 = vadd.f32 %v774_v10, %v9354_v18  ;;  %v776_v44 = vld [vmem:[%s4289_s24 + $0xe28] sm:$0xff]  ;;  %v777_v26 = vld [vmem:[%s4289_s24 + $0xe30] sm:$0xff]  ;;  %1025 = vst [vmem:[%s4316_s20 + $0xc30] sm:$0xff] %v897_v56  ;;  %1026 = vst [vmem:[%s4316_s20 + $0xc38] sm:$0xff] %v898_v62 }
  0xe6   : > { %1027 = vst [vmem:[%s4316_s20 + $0xd20] sm:$0xff] %v899_v7  ;;  %v9355_v20 = vld [vmem:[#allocation13_spill] sm:$0xff]  ;;  %v9356_v8 = vld [vmem:[#allocation14_spill] sm:$0xff]  ;;  %v9357_v30 = vld [vmem:[#allocation15_spill] sm:$0xff] }
  0xe7   : > { %v903_v4 = vadd.f32 %v775_v1, %v9355_v20  ;;  %v904_v53 = vadd.f32 %v776_v44, %v9356_v8  ;;  %v905_v12 = vadd.f32 %v777_v26, %v9357_v30  ;;  %v778_v40 = vld [vmem:[%s4289_s24 + $0xe38] sm:$0xff]  ;;  %v779_v23 = vld [vmem:[%s4289_s24 + $0xf20] sm:$0xff]  ;;  %v780_v15 = vld [vmem:[%s4289_s24 + $0xf28] sm:$0xff]  ;;  %1028 = vst [vmem:[%s4316_s20 + $0xd28] sm:$0xff] %v900_v59 }
  0xe8   : > { %1029 = vst [vmem:[%s4316_s20 + $0xd30] sm:$0xff] %v901_v25  ;;  %1030 = vst [vmem:[%s4316_s20 + $0xd38] sm:$0xff] %v902_v39  ;;  %v9358_v21 = vld [vmem:[#allocation16_spill] sm:$0xff]  ;;  %v9359_v24 = vld [vmem:[#allocation17_spill] sm:$0xff] }
  0xe9   : > { %v906_v27 = vadd.f32 %v778_v40, %v9358_v21  ;;  %v907_v33 = vadd.f32 %v779_v23, %v9359_v24  ;;  %v9360_v29 = vld [vmem:[#allocation18_spill] sm:$0xff]  ;;  %v781_v34 = vld [vmem:[%s4289_s24 + $0xf30] sm:$0xff]  ;;  %v783_v37 = vld [vmem:[%s4289_s24 + $0x1020] sm:$0xff]  ;;  %1031 = vst [vmem:[%s4316_s20 + $0xe20] sm:$0xff] %v903_v4 }
  0xea   : > { %v908_v28 = vadd.f32 %v780_v15, %v9360_v29  ;;  %v782_v46 = vld [vmem:[%s4289_s24 + $0xf38] sm:$0xff]  ;;  %1032 = vst [vmem:[%s4316_s20 + $0xe28] sm:$0xff] %v904_v53  ;;  %1033 = vst [vmem:[%s4316_s20 + $0xe30] sm:$0xff] %v905_v12  ;;  %v9361_v19 = vld [vmem:[#allocation19_spill] sm:$0xff] }
  0xeb   : > { %v909_v32 = vadd.f32 %v781_v34, %v9361_v19  ;;  %v9362_v42 = vld [vmem:[#allocation20_spill] sm:$0xff]  ;;  %v9363_v36 = vld [vmem:[#allocation21_spill] sm:$0xff]  ;;  %v786_v55 = vld [vmem:[%s4289_s24 + $0x1038] sm:$0xff]  ;;  %1034 = vst [vmem:[%s4316_s20 + $0xe38] sm:$0xff] %v906_v27 }
  0xec   : > { %v910_v48 = vadd.f32 %v782_v46, %v9362_v42  ;;  %v911_v51 = vadd.f32 %v783_v37, %v9363_v36  ;;  %v784_v6 = vld [vmem:[%s4289_s24 + $0x1028] sm:$0xff]  ;;  %v785_v38 = vld [vmem:[%s4289_s24 + $0x1030] sm:$0xff]  ;;  %1035 = vst [vmem:[%s4316_s20 + $0xf20] sm:$0xff] %v907_v33  ;;  %1036 = vst [vmem:[%s4316_s20 + $0xf28] sm:$0xff] %v908_v28 }
  0xed   : > { %v9364_v61 = vld [vmem:[#allocation22_spill] sm:$0xff]  ;;  %v9365_v0 = vld [vmem:[#allocation23_spill] sm:$0xff]  ;;  %v9366_v41 = vld [vmem:[#allocation24_spill] sm:$0xff]  ;;  %1037 = vst [vmem:[%s4316_s20 + $0xf30] sm:$0xff] %v909_v32 }
  0xee   : > { %v912_v3 = vadd.f32 %v784_v6, %v9364_v61  ;;  %v913_v58 = vadd.f32 %v785_v38, %v9365_v0  ;;  %v914_v5 = vadd.f32 %v786_v55, %v9366_v41  ;;  %v787_v13 = vld [vmem:[%s4289_s24 + $0x1120] sm:$0xff]  ;;  %v788_v45 = vld [vmem:[%s4289_s24 + $0x1128] sm:$0xff]  ;;  %v789_v16 = vld [vmem:[%s4289_s24 + $0x1130] sm:$0xff]  ;;  %1038 = vst [vmem:[%s4316_s20 + $0xf38] sm:$0xff] %v910_v48 }
  0xef   : > { %1039 = vst [vmem:[%s4316_s20 + $0x1020] sm:$0xff] %v911_v51  ;;  %v9367_v9 = vld [vmem:[#allocation25_spill] sm:$0xff]  ;;  %v9368_v22 = vld [vmem:[#allocation26_spill] sm:$0xff]  ;;  %v9369_v11 = vld [vmem:[#allocation27_spill] sm:$0xff] }
  0xf0   : > { %v915_v47 = vadd.f32 %v787_v13, %v9367_v9  ;;  %v916_v31 = vadd.f32 %v788_v45, %v9368_v22  ;;  %v917_v35 = vadd.f32 %v789_v16, %v9369_v11  ;;  %v790_v49 = vld [vmem:[%s4289_s24 + $0x1138] sm:$0xff]  ;;  %v791_v50 = vld [vmem:[%s4289_s24 + $0x1220] sm:$0xff]  ;;  %v792_v43 = vld [vmem:[%s4289_s24 + $0x1228] sm:$0xff]  ;;  %1040 = vst [vmem:[%s4316_s20 + $0x1028] sm:$0xff] %v912_v3 }
  0xf1   : > { %1041 = vst [vmem:[%s4316_s20 + $0x1030] sm:$0xff] %v913_v58  ;;  %1042 = vst [vmem:[%s4316_s20 + $0x1038] sm:$0xff] %v914_v5  ;;  %v9370_v52 = vld [vmem:[#allocation28_spill] sm:$0xff]  ;;  %v9371_v57 = vld [vmem:[#allocation29_spill] sm:$0xff] }
  0xf2   : > { %v918_v54 = vadd.f32 %v790_v49, %v9370_v52  ;;  %v919_v2 = vadd.f32 %v791_v50, %v9371_v57  ;;  %v9372_v56 = vld [vmem:[#allocation30_spill] sm:$0xff]  ;;  %v793_v7 = vld [vmem:[%s4289_s24 + $0x1230] sm:$0xff]  ;;  %v795_v14 = vld [vmem:[%s4289_s24 + $0x1320] sm:$0xff]  ;;  %1043 = vst [vmem:[%s4316_s20 + $0x1120] sm:$0xff] %v915_v47 }
  0xf3   : > { %v920_v62 = vadd.f32 %v792_v43, %v9372_v56  ;;  %v794_v17 = vld [vmem:[%s4289_s24 + $0x1238] sm:$0xff]  ;;  %1044 = vst [vmem:[%s4316_s20 + $0x1128] sm:$0xff] %v916_v31  ;;  %1045 = vst [vmem:[%s4316_s20 + $0x1130] sm:$0xff] %v917_v35  ;;  %v9373_v10 = vld [vmem:[#allocation31_spill] sm:$0xff] }
  0xf4   : > { %v921_v59 = vadd.f32 %v793_v7, %v9373_v10  ;;  %v9374_v63 = vld [vmem:[#allocation32_spill] sm:$0xff]  ;;  %v9375_v18 = vld [vmem:[#allocation33_spill] sm:$0xff]  ;;  %v798_v26 = vld [vmem:[%s4289_s24 + $0x1338] sm:$0xff]  ;;  %1046 = vst [vmem:[%s4316_s20 + $0x1138] sm:$0xff] %v918_v54 }
  0xf5   : > { %v922_v25 = vadd.f32 %v794_v17, %v9374_v63  ;;  %v923_v39 = vadd.f32 %v795_v14, %v9375_v18  ;;  %v796_v1 = vld [vmem:[%s4289_s24 + $0x1328] sm:$0xff]  ;;  %v797_v44 = vld [vmem:[%s4289_s24 + $0x1330] sm:$0xff]  ;;  %1047 = vst [vmem:[%s4316_s20 + $0x1220] sm:$0xff] %v919_v2  ;;  %1048 = vst [vmem:[%s4316_s20 + $0x1228] sm:$0xff] %v920_v62 }
  0xf6   : > { %v9376_v20 = vld [vmem:[#allocation34_spill] sm:$0xff]  ;;  %v9377_v8 = vld [vmem:[#allocation35_spill] sm:$0xff]  ;;  %v9378_v30 = vld [vmem:[#allocation36_spill] sm:$0xff]  ;;  %1049 = vst [vmem:[%s4316_s20 + $0x1230] sm:$0xff] %v921_v59 }
  0xf7   : > { %v924_v4 = vadd.f32 %v796_v1, %v9376_v20  ;;  %v925_v53 = vadd.f32 %v797_v44, %v9377_v8  ;;  %v926_v12 = vadd.f32 %v798_v26, %v9378_v30  ;;  %v799_v40 = vld [vmem:[%s4289_s24 + $0x1420] sm:$0xff]  ;;  %v800_v23 = vld [vmem:[%s4289_s24 + $0x1428] sm:$0xff]  ;;  %v801_v15 = vld [vmem:[%s4289_s24 + $0x1430] sm:$0xff]  ;;  %1050 = vst [vmem:[%s4316_s20 + $0x1238] sm:$0xff] %v922_v25 }
  0xf8   : > { %1051 = vst [vmem:[%s4316_s20 + $0x1320] sm:$0xff] %v923_v39  ;;  %v9379_v21 = vld [vmem:[#allocation37_spill] sm:$0xff]  ;;  %v9380_v24 = vld [vmem:[#allocation38_spill] sm:$0xff]  ;;  %v9381_v29 = vld [vmem:[#allocation39_spill] sm:$0xff] }
  0xf9   : > { %v927_v27 = vadd.f32 %v799_v40, %v9379_v21  ;;  %v928_v33 = vadd.f32 %v800_v23, %v9380_v24  ;;  %v929_v28 = vadd.f32 %v801_v15, %v9381_v29  ;;  %v802_v34 = vld [vmem:[%s4289_s24 + $0x1438] sm:$0xff]  ;;  %v803_v46 = vld [vmem:[%s4289_s24 + $0x1520] sm:$0xff]  ;;  %v804_v37 = vld [vmem:[%s4289_s24 + $0x1528] sm:$0xff]  ;;  %1052 = vst [vmem:[%s4316_s20 + $0x1328] sm:$0xff] %v924_v4 }
  0xfa   : > { %1053 = vst [vmem:[%s4316_s20 + $0x1330] sm:$0xff] %v925_v53  ;;  %1054 = vst [vmem:[%s4316_s20 + $0x1338] sm:$0xff] %v926_v12  ;;  %v9382_v19 = vld [vmem:[#allocation40_spill] sm:$0xff]  ;;  %v9383_v42 = vld [vmem:[#allocation41_spill] sm:$0xff] }
  0xfb   : > { %v930_v32 = vadd.f32 %v802_v34, %v9382_v19  ;;  %v931_v48 = vadd.f32 %v803_v46, %v9383_v42  ;;  %v9384_v36 = vld [vmem:[#allocation42_spill] sm:$0xff]  ;;  %v805_v6 = vld [vmem:[%s4289_s24 + $0x1530] sm:$0xff]  ;;  %v807_v55 = vld [vmem:[%s4289_s24 + $0x1620] sm:$0xff]  ;;  %1055 = vst [vmem:[%s4316_s20 + $0x1420] sm:$0xff] %v927_v27 }
  0xfc   : > { %v932_v51 = vadd.f32 %v804_v37, %v9384_v36  ;;  %v806_v38 = vld [vmem:[%s4289_s24 + $0x1538] sm:$0xff]  ;;  %1056 = vst [vmem:[%s4316_s20 + $0x1428] sm:$0xff] %v928_v33  ;;  %1057 = vst [vmem:[%s4316_s20 + $0x1430] sm:$0xff] %v929_v28  ;;  %v9385_v61 = vld [vmem:[#allocation43_spill] sm:$0xff] }
  0xfd   : > { %v933_v3 = vadd.f32 %v805_v6, %v9385_v61  ;;  %v9386_v0 = vld [vmem:[#allocation44_spill] sm:$0xff]  ;;  %v9387_v41 = vld [vmem:[#allocation45_spill] sm:$0xff]  ;;  %v810_v16 = vld [vmem:[%s4289_s24 + $0x1638] sm:$0xff]  ;;  %1058 = vst [vmem:[%s4316_s20 + $0x1438] sm:$0xff] %v930_v32 }
  0xfe   : > { %v934_v58 = vadd.f32 %v806_v38, %v9386_v0  ;;  %v935_v5 = vadd.f32 %v807_v55, %v9387_v41  ;;  %v808_v13 = vld [vmem:[%s4289_s24 + $0x1628] sm:$0xff]  ;;  %v809_v45 = vld [vmem:[%s4289_s24 + $0x1630] sm:$0xff]  ;;  %1059 = vst [vmem:[%s4316_s20 + $0x1520] sm:$0xff] %v931_v48  ;;  %1060 = vst [vmem:[%s4316_s20 + $0x1528] sm:$0xff] %v932_v51 }
  0xff   : > { %v9388_v9 = vld [vmem:[#allocation46_spill] sm:$0xff]  ;;  %v9389_v22 = vld [vmem:[#allocation47_spill] sm:$0xff]  ;;  %v9390_v11 = vld [vmem:[#allocation48_spill] sm:$0xff]  ;;  %1061 = vst [vmem:[%s4316_s20 + $0x1530] sm:$0xff] %v933_v3 }
 0x100   : > { %v936_v47 = vadd.f32 %v808_v13, %v9388_v9  ;;  %v937_v31 = vadd.f32 %v809_v45, %v9389_v22  ;;  %v938_v35 = vadd.f32 %v810_v16, %v9390_v11  ;;  %v811_v49 = vld [vmem:[%s4289_s24 + $0x1720] sm:$0xff]  ;;  %v812_v50 = vld [vmem:[%s4289_s24 + $0x1728] sm:$0xff]  ;;  %v813_v43 = vld [vmem:[%s4289_s24 + $0x1730] sm:$0xff]  ;;  %1062 = vst [vmem:[%s4316_s20 + $0x1538] sm:$0xff] %v934_v58 }
 0x101   : > { %1063 = vst [vmem:[%s4316_s20 + $0x1620] sm:$0xff] %v935_v5  ;;  %v9391_v52 = vld [vmem:[#allocation49_spill] sm:$0xff]  ;;  %v9392_v57 = vld [vmem:[#allocation50_spill] sm:$0xff]  ;;  %v9393_v56 = vld [vmem:[#allocation51_spill] sm:$0xff] }
 0x102   : > { %v939_v54 = vadd.f32 %v811_v49, %v9391_v52  ;;  %v940_v2 = vadd.f32 %v812_v50, %v9392_v57  ;;  %v941_v62 = vadd.f32 %v813_v43, %v9393_v56  ;;  %v814_v7 = vld [vmem:[%s4289_s24 + $0x1738] sm:$0xff]  ;;  %v815_v17 = vld [vmem:[%s4289_s24 + $0x1820] sm:$0xff]  ;;  %v816_v14 = vld [vmem:[%s4289_s24 + $0x1828] sm:$0xff]  ;;  %1064 = vst [vmem:[%s4316_s20 + $0x1628] sm:$0xff] %v936_v47 }
 0x103   : > { %1065 = vst [vmem:[%s4316_s20 + $0x1630] sm:$0xff] %v937_v31  ;;  %1066 = vst [vmem:[%s4316_s20 + $0x1638] sm:$0xff] %v938_v35  ;;  %v9394_v10 = vld [vmem:[#allocation52_spill] sm:$0xff]  ;;  %v9395_v63 = vld [vmem:[#allocation53_spill] sm:$0xff] }
 0x104   : > { %v942_v59 = vadd.f32 %v814_v7, %v9394_v10  ;;  %v943_v25 = vadd.f32 %v815_v17, %v9395_v63  ;;  %v9396_v18 = vld [vmem:[#allocation54_spill] sm:$0xff]  ;;  %v817_v1 = vld [vmem:[%s4289_s24 + $0x1830] sm:$0xff]  ;;  %v819_v26 = vld [vmem:[%s4289_s24 + $0x1920] sm:$0xff]  ;;  %1067 = vst [vmem:[%s4316_s20 + $0x1720] sm:$0xff] %v939_v54 }
 0x105   : > { %v944_v39 = vadd.f32 %v816_v14, %v9396_v18  ;;  %v818_v44 = vld [vmem:[%s4289_s24 + $0x1838] sm:$0xff]  ;;  %1068 = vst [vmem:[%s4316_s20 + $0x1728] sm:$0xff] %v940_v2  ;;  %1069 = vst [vmem:[%s4316_s20 + $0x1730] sm:$0xff] %v941_v62  ;;  %v9397_v20 = vld [vmem:[#allocation55_spill] sm:$0xff] }
 0x106   : > { %v945_v4 = vadd.f32 %v817_v1, %v9397_v20  ;;  %v9398_v8 = vld [vmem:[#allocation56_spill] sm:$0xff]  ;;  %v9399_v30 = vld [vmem:[#allocation57_spill] sm:$0xff]  ;;  %v822_v15 = vld [vmem:[%s4289_s24 + $0x1938] sm:$0xff]  ;;  %1070 = vst [vmem:[%s4316_s20 + $0x1738] sm:$0xff] %v942_v59 }
 0x107   : > { %v946_v53 = vadd.f32 %v818_v44, %v9398_v8  ;;  %v947_v12 = vadd.f32 %v819_v26, %v9399_v30  ;;  %v820_v40 = vld [vmem:[%s4289_s24 + $0x1928] sm:$0xff]  ;;  %v821_v23 = vld [vmem:[%s4289_s24 + $0x1930] sm:$0xff]  ;;  %1071 = vst [vmem:[%s4316_s20 + $0x1820] sm:$0xff] %v943_v25  ;;  %1072 = vst [vmem:[%s4316_s20 + $0x1828] sm:$0xff] %v944_v39 }
 0x108   : > { %v9400_v21 = vld [vmem:[#allocation58_spill] sm:$0xff]  ;;  %v9401_v24 = vld [vmem:[#allocation59_spill] sm:$0xff]  ;;  %v9402_v29 = vld [vmem:[#allocation60_spill] sm:$0xff]  ;;  %1073 = vst [vmem:[%s4316_s20 + $0x1830] sm:$0xff] %v945_v4 }
 0x109   : > { %v948_v27 = vadd.f32 %v820_v40, %v9400_v21  ;;  %v949_v33 = vadd.f32 %v821_v23, %v9401_v24  ;;  %v950_v28 = vadd.f32 %v822_v15, %v9402_v29  ;;  %v823_v34 = vld [vmem:[%s4289_s24 + $0x1a20] sm:$0xff]  ;;  %v824_v46 = vld [vmem:[%s4289_s24 + $0x1a28] sm:$0xff]  ;;  %v825_v37 = vld [vmem:[%s4289_s24 + $0x1a30] sm:$0xff]  ;;  %1074 = vst [vmem:[%s4316_s20 + $0x1838] sm:$0xff] %v946_v53 }
 0x10a   : > { %1075 = vst [vmem:[%s4316_s20 + $0x1920] sm:$0xff] %v947_v12  ;;  %v9403_v19 = vld [vmem:[#allocation61_spill] sm:$0xff]  ;;  %v9404_v42 = vld [vmem:[#allocation62_spill] sm:$0xff]  ;;  %v9405_v36 = vld [vmem:[#allocation63_spill] sm:$0xff] }
 0x10b   : > { %v951_v32 = vadd.f32 %v823_v34, %v9403_v19  ;;  %v952_v48 = vadd.f32 %v824_v46, %v9404_v42  ;;  %v953_v51 = vadd.f32 %v825_v37, %v9405_v36  ;;  %v826_v6 = vld [vmem:[%s4289_s24 + $0x1a38] sm:$0xff]  ;;  %v827_v38 = vld [vmem:[%s4289_s24 + $0x1b20] sm:$0xff]  ;;  %v828_v55 = vld [vmem:[%s4289_s24 + $0x1b28] sm:$0xff]  ;;  %1076 = vst [vmem:[%s4316_s20 + $0x1928] sm:$0xff] %v948_v27 }
 0x10c   : > { %1077 = vst [vmem:[%s4316_s20 + $0x1930] sm:$0xff] %v949_v33  ;;  %1078 = vst [vmem:[%s4316_s20 + $0x1938] sm:$0xff] %v950_v28  ;;  %v9406_v61 = vld [vmem:[#allocation64_spill] sm:$0xff]  ;;  %v9407_v0 = vld [vmem:[#allocation65_spill] sm:$0xff] }
 0x10d   : > { %v954_v3 = vadd.f32 %v826_v6, %v9406_v61  ;;  %v955_v58 = vadd.f32 %v827_v38, %v9407_v0  ;;  %v9408_v41 = vld [vmem:[#allocation66_spill] sm:$0xff]  ;;  %v829_v13 = vld [vmem:[%s4289_s24 + $0x1b30] sm:$0xff]  ;;  %v831_v16 = vld [vmem:[%s4289_s24 + $0x1c20] sm:$0xff]  ;;  %1079 = vst [vmem:[%s4316_s20 + $0x1a20] sm:$0xff] %v951_v32 }
 0x10e   : > { %v956_v5 = vadd.f32 %v828_v55, %v9408_v41  ;;  %v830_v45 = vld [vmem:[%s4289_s24 + $0x1b38] sm:$0xff]  ;;  %1080 = vst [vmem:[%s4316_s20 + $0x1a28] sm:$0xff] %v952_v48  ;;  %1081 = vst [vmem:[%s4316_s20 + $0x1a30] sm:$0xff] %v953_v51  ;;  %v9409_v9 = vld [vmem:[#allocation67_spill] sm:$0xff] }
 0x10f   : > { %v957_v47 = vadd.f32 %v829_v13, %v9409_v9  ;;  %v9410_v22 = vld [vmem:[#allocation68_spill] sm:$0xff]  ;;  %v9411_v11 = vld [vmem:[#allocation69_spill] sm:$0xff]  ;;  %v834_v43 = vld [vmem:[%s4289_s24 + $0x1c38] sm:$0xff]  ;;  %1082 = vst [vmem:[%s4316_s20 + $0x1a38] sm:$0xff] %v954_v3 }
 0x110   : > { %v958_v31 = vadd.f32 %v830_v45, %v9410_v22  ;;  %v959_v35 = vadd.f32 %v831_v16, %v9411_v11  ;;  %v832_v49 = vld [vmem:[%s4289_s24 + $0x1c28] sm:$0xff]  ;;  %v833_v50 = vld [vmem:[%s4289_s24 + $0x1c30] sm:$0xff]  ;;  %1083 = vst [vmem:[%s4316_s20 + $0x1b20] sm:$0xff] %v955_v58  ;;  %1084 = vst [vmem:[%s4316_s20 + $0x1b28] sm:$0xff] %v956_v5 }
 0x111   : > { %v9412_v52 = vld [vmem:[#allocation70_spill] sm:$0xff]  ;;  %v9413_v57 = vld [vmem:[#allocation71_spill] sm:$0xff]  ;;  %v9414_v56 = vld [vmem:[#allocation72_spill] sm:$0xff]  ;;  %1085 = vst [vmem:[%s4316_s20 + $0x1b30] sm:$0xff] %v957_v47 }
 0x112   : > { %v960_v54 = vadd.f32 %v832_v49, %v9412_v52  ;;  %v961_v2 = vadd.f32 %v833_v50, %v9413_v57  ;;  %v962_v62 = vadd.f32 %v834_v43, %v9414_v56  ;;  %v835_v7 = vld [vmem:[%s4289_s24 + $0x1d20] sm:$0xff]  ;;  %v836_v17 = vld [vmem:[%s4289_s24 + $0x1d28] sm:$0xff]  ;;  %v837_v14 = vld [vmem:[%s4289_s24 + $0x1d30] sm:$0xff]  ;;  %1086 = vst [vmem:[%s4316_s20 + $0x1b38] sm:$0xff] %v958_v31 }
 0x113   : > { %1087 = vst [vmem:[%s4316_s20 + $0x1c20] sm:$0xff] %v959_v35  ;;  %v9415_v10 = vld [vmem:[#allocation73_spill] sm:$0xff]  ;;  %v9416_v63 = vld [vmem:[#allocation74_spill] sm:$0xff]  ;;  %v9417_v18 = vld [vmem:[#allocation75_spill] sm:$0xff] }
 0x114   : > { %v963_v59 = vadd.f32 %v835_v7, %v9415_v10  ;;  %v964_v25 = vadd.f32 %v836_v17, %v9416_v63  ;;  %v965_v39 = vadd.f32 %v837_v14, %v9417_v18  ;;  %v838_v1 = vld [vmem:[%s4289_s24 + $0x1d38] sm:$0xff]  ;;  %v839_v44 = vld [vmem:[%s4289_s24 + $0x1e20] sm:$0xff]  ;;  %v840_v26 = vld [vmem:[%s4289_s24 + $0x1e28] sm:$0xff]  ;;  %1088 = vst [vmem:[%s4316_s20 + $0x1c28] sm:$0xff] %v960_v54 }
 0x115   : > { %1089 = vst [vmem:[%s4316_s20 + $0x1c30] sm:$0xff] %v961_v2  ;;  %1090 = vst [vmem:[%s4316_s20 + $0x1c38] sm:$0xff] %v962_v62  ;;  %v9418_v20 = vld [vmem:[#allocation76_spill] sm:$0xff]  ;;  %v9419_v8 = vld [vmem:[#allocation77_spill] sm:$0xff] }
 0x116   : > { %v966_v4 = vadd.f32 %v838_v1, %v9418_v20  ;;  %v967_v53 = vadd.f32 %v839_v44, %v9419_v8  ;;  %v9420_v30 = vld [vmem:[#allocation78_spill] sm:$0xff]  ;;  %v841_v40 = vld [vmem:[%s4289_s24 + $0x1e30] sm:$0xff]  ;;  %v843_v15 = vld [vmem:[%s4289_s24 + $0x1f20] sm:$0xff]  ;;  %1091 = vst [vmem:[%s4316_s20 + $0x1d20] sm:$0xff] %v963_v59 }
 0x117   : > { %v968_v12 = vadd.f32 %v840_v26, %v9420_v30  ;;  %v842_v23 = vld [vmem:[%s4289_s24 + $0x1e38] sm:$0xff]  ;;  %1092 = vst [vmem:[%s4316_s20 + $0x1d28] sm:$0xff] %v964_v25  ;;  %1093 = vst [vmem:[%s4316_s20 + $0x1d30] sm:$0xff] %v965_v39  ;;  %v9421_v21 = vld [vmem:[#allocation79_spill] sm:$0xff] }
 0x118   : > { %v969_v27 = vadd.f32 %v841_v40, %v9421_v21  ;;  %v9422_v24 = vld [vmem:[#allocation80_spill] sm:$0xff]  ;;  %v9423_v29 = vld [vmem:[#allocation81_spill] sm:$0xff]  ;;  %v846_v37 = vld [vmem:[%s4289_s24 + $0x1f38] sm:$0xff]  ;;  %1094 = vst [vmem:[%s4316_s20 + $0x1d38] sm:$0xff] %v966_v4 }
 0x119   : > { %v970_v33 = vadd.f32 %v842_v23, %v9422_v24  ;;  %v971_v28 = vadd.f32 %v843_v15, %v9423_v29  ;;  %v844_v34 = vld [vmem:[%s4289_s24 + $0x1f28] sm:$0xff]  ;;  %v845_v46 = vld [vmem:[%s4289_s24 + $0x1f30] sm:$0xff]  ;;  %1095 = vst [vmem:[%s4316_s20 + $0x1e20] sm:$0xff] %v967_v53  ;;  %1096 = vst [vmem:[%s4316_s20 + $0x1e28] sm:$0xff] %v968_v12 }
 0x11a   : > { %v9424_v19 = vld [vmem:[#allocation82_spill] sm:$0xff]  ;;  %v9425_v42 = vld [vmem:[#allocation83_spill] sm:$0xff]  ;;  %v9426_v36 = vld [vmem:[#allocation84_spill] sm:$0xff]  ;;  %1097 = vst [vmem:[%s4316_s20 + $0x1e30] sm:$0xff] %v969_v27 }
 0x11b   : > { %v972_v32 = vadd.f32 %v844_v34, %v9424_v19  ;;  %v973_v48 = vadd.f32 %v845_v46, %v9425_v42  ;;  %v974_v51 = vadd.f32 %v846_v37, %v9426_v36  ;;  %v1103_v6 = vld [vmem:[%s4289_s24 + $0x40] sm:$0xff]  ;;  %v1104_v38 = vld [vmem:[%s4289_s24 + $0x48] sm:$0xff]  ;;  %v1105_v55 = vld [vmem:[%s4289_s24 + $0x50] sm:$0xff]  ;;  %1098 = vst [vmem:[%s4316_s20 + $0x1e38] sm:$0xff] %v970_v33 }
 0x11c   : > { %1099 = vst [vmem:[%s4316_s20 + $0x1f20] sm:$0xff] %v971_v28  ;;  %v9427_v61 = vld [vmem:[#allocation85_spill] sm:$0xff]  ;;  %v9428_v0 = vld [vmem:[#allocation86_spill] sm:$0xff]  ;;  %v9429_v41 = vld [vmem:[#allocation87_spill] sm:$0xff] }
 0x11d   : > { %v1231_v3 = vadd.f32 %v9427_v61, %v1103_v6  ;;  %v1232_v58 = vadd.f32 %v9428_v0, %v1104_v38  ;;  %v1233_v5 = vadd.f32 %v9429_v41, %v1105_v55  ;;  %v1106_v13 = vld [vmem:[%s4289_s24 + $0x58] sm:$0xff]  ;;  %v1107_v45 = vld [vmem:[%s4289_s24 + $0x140] sm:$0xff]  ;;  %v1108_v16 = vld [vmem:[%s4289_s24 + $0x148] sm:$0xff]  ;;  %1100 = vst [vmem:[%s4316_s20 + $0x1f28] sm:$0xff] %v972_v32 }
 0x11e   : > { %1101 = vst [vmem:[%s4316_s20 + $0x1f30] sm:$0xff] %v973_v48  ;;  %1102 = vst [vmem:[%s4316_s20 + $0x1f38] sm:$0xff] %v974_v51  ;;  %v5467_v9 = vld [vmem:[%s4297_s5 + $0x18] sm:$0xff]  ;;  %v5471_v22 = vld [vmem:[%s4297_s5 + $0x20] sm:$0xff]  ;;  %v1236_v11 = vadd.f32 %v5086_v60, %v1108_v16 }
 0x11f   : > { %v1234_v47 = vadd.f32 %v5467_v9, %v1106_v13  ;;  %v1235_v31 = vadd.f32 %v5471_v22, %v1107_v45  ;;  %v1109_v35 = vld [vmem:[%s4289_s24 + $0x150] sm:$0xff]  ;;  %v1110_v49 = vld [vmem:[%s4289_s24 + $0x158] sm:$0xff]  ;;  %v1111_v50 = vld [vmem:[%s4289_s24 + $0x240] sm:$0xff]  ;;  %1359 = vst [vmem:[%s4316_s20 + $0x40] sm:$0xff] %v1231_v3 }
 0x120   : > { %1360 = vst [vmem:[%s4316_s20 + $0x48] sm:$0xff] %v1232_v58  ;;  %1361 = vst [vmem:[%s4316_s20 + $0x50] sm:$0xff] %v1233_v5  ;;  %v5482_v43 = vld [vmem:[%s4297_s5 + $0x30] sm:$0xff]  ;;  %v5486_v54 = vld [vmem:[%s4297_s5 + $0x38] sm:$0xff] }
 0x121   : > { %v1237_v52 = vadd.f32 %v5482_v43, %v1109_v35  ;;  %v1238_v60 = vadd.f32 %v5486_v54, %v1110_v49  ;;  %v5490_v57 = vld [vmem:[%s4297_s5 + $0x40] sm:$0xff]  ;;  %v1112_v56 = vld [vmem:[%s4289_s24 + $0x248] sm:$0xff]  ;;  %v1113_v62 = vld [vmem:[%s4289_s24 + $0x250] sm:$0xff]  ;;  %1362 = vst [vmem:[%s4316_s20 + $0x58] sm:$0xff] %v1234_v47 }
 0x122   : > { %v1239_v2 = vadd.f32 %v5490_v57, %v1111_v50  ;;  %v1114_v7 = vld [vmem:[%s4289_s24 + $0x258] sm:$0xff]  ;;  %1363 = vst [vmem:[%s4316_s20 + $0x140] sm:$0xff] %v1235_v31  ;;  %1364 = vst [vmem:[%s4316_s20 + $0x148] sm:$0xff] %v1236_v11  ;;  %v5500_v17 = vld [vmem:[%s4297_s5 + $0x48] sm:$0xff] }
 0x123   : > { %v1240_v14 = vadd.f32 %v5500_v17, %v1112_v56  ;;  %v5504_v10 = vld [vmem:[%s4297_s5 + $0x50] sm:$0xff]  ;;  %v5508_v63 = vld [vmem:[%s4297_s5 + $0x58] sm:$0xff]  ;;  %v1115_v18 = vld [vmem:[%s4289_s24 + $0x340] sm:$0xff]  ;;  %1365 = vst [vmem:[%s4316_s20 + $0x150] sm:$0xff] %v1237_v52 }
 0x124   : > { %v1241_v59 = vadd.f32 %v5504_v10, %v1113_v62  ;;  %v1242_v25 = vadd.f32 %v5508_v63, %v1114_v7  ;;  %v1116_v39 = vld [vmem:[%s4289_s24 + $0x348] sm:$0xff]  ;;  %v1117_v1 = vld [vmem:[%s4289_s24 + $0x350] sm:$0xff]  ;;  %1366 = vst [vmem:[%s4316_s20 + $0x158] sm:$0xff] %v1238_v60  ;;  %1367 = vst [vmem:[%s4316_s20 + $0x240] sm:$0xff] %v1239_v2 }
 0x125   : > { %v5518_v44 = vld [vmem:[%s4297_s5 + $0x60] sm:$0xff]  ;;  %v5522_v20 = vld [vmem:[%s4297_s5 + $0x68] sm:$0xff]  ;;  %v5526_v8 = vld [vmem:[%s4297_s5 + $0x70] sm:$0xff]  ;;  %1368 = vst [vmem:[%s4316_s20 + $0x248] sm:$0xff] %v1240_v14 }
 0x126   : > { %v1243_v26 = vadd.f32 %v5518_v44, %v1115_v18  ;;  %v1244_v4 = vadd.f32 %v5522_v20, %v1116_v39  ;;  %v1245_v53 = vadd.f32 %v5526_v8, %v1117_v1  ;;  %v1118_v30 = vld [vmem:[%s4289_s24 + $0x358] sm:$0xff]  ;;  %v1119_v12 = vld [vmem:[%s4289_s24 + $0x440] sm:$0xff]  ;;  %v1120_v40 = vld [vmem:[%s4289_s24 + $0x448] sm:$0xff]  ;;  %1369 = vst [vmem:[%s4316_s20 + $0x250] sm:$0xff] %v1241_v59 }
 0x127   : > { %1370 = vst [vmem:[%s4316_s20 + $0x258] sm:$0xff] %v1242_v25  ;;  %v5536_v23 = vld [vmem:[%s4297_s5 + $0x78] sm:$0xff]  ;;  %v5540_v21 = vld [vmem:[%s4297_s5 + $0x80] sm:$0xff]  ;;  %v5544_v24 = vld [vmem:[%s4297_s5 + $0x88] sm:$0xff] }
 0x128   : > { %v1246_v15 = vadd.f32 %v5536_v23, %v1118_v30  ;;  %v1247_v27 = vadd.f32 %v5540_v21, %v1119_v12  ;;  %v1248_v33 = vadd.f32 %v5544_v24, %v1120_v40  ;;  %v1121_v29 = vld [vmem:[%s4289_s24 + $0x450] sm:$0xff]  ;;  %v1122_v28 = vld [vmem:[%s4289_s24 + $0x458] sm:$0xff]  ;;  %v1123_v34 = vld [vmem:[%s4289_s24 + $0x540] sm:$0xff]  ;;  %1371 = vst [vmem:[%s4316_s20 + $0x340] sm:$0xff] %v1243_v26 }
 0x129   : > { %1372 = vst [vmem:[%s4316_s20 + $0x348] sm:$0xff] %v1244_v4  ;;  %1373 = vst [vmem:[%s4316_s20 + $0x350] sm:$0xff] %v1245_v53  ;;  %v5554_v46 = vld [vmem:[%s4297_s5 + $0x90] sm:$0xff]  ;;  %v5558_v19 = vld [vmem:[%s4297_s5 + $0x98] sm:$0xff] }
 0x12a   : > { %v1249_v37 = vadd.f32 %v5554_v46, %v1121_v29  ;;  %v1250_v32 = vadd.f32 %v5558_v19, %v1122_v28  ;;  %v5562_v42 = vld [vmem:[%s4297_s5 + $0xa0] sm:$0xff]  ;;  %v1124_v36 = vld [vmem:[%s4289_s24 + $0x548] sm:$0xff]  ;;  %v1125_v51 = vld [vmem:[%s4289_s24 + $0x550] sm:$0xff]  ;;  %1374 = vst [vmem:[%s4316_s20 + $0x358] sm:$0xff] %v1246_v15 }
 0x12b   : > { %v1251_v48 = vadd.f32 %v5562_v42, %v1123_v34  ;;  %v1126_v6 = vld [vmem:[%s4289_s24 + $0x558] sm:$0xff]  ;;  %1375 = vst [vmem:[%s4316_s20 + $0x440] sm:$0xff] %v1247_v27  ;;  %1376 = vst [vmem:[%s4316_s20 + $0x448] sm:$0xff] %v1248_v33  ;;  %v5572_v38 = vld [vmem:[%s4297_s5 + $0xa8] sm:$0xff] }
 0x12c   : > { %v1252_v55 = vadd.f32 %v5572_v38, %v1124_v36  ;;  %v5576_v61 = vld [vmem:[%s4297_s5 + $0xb0] sm:$0xff]  ;;  %v5580_v0 = vld [vmem:[%s4297_s5 + $0xb8] sm:$0xff]  ;;  %v1127_v41 = vld [vmem:[%s4289_s24 + $0x640] sm:$0xff]  ;;  %1377 = vst [vmem:[%s4316_s20 + $0x450] sm:$0xff] %v1249_v37 }
 0x12d   : > { %v1253_v3 = vadd.f32 %v5576_v61, %v1125_v51  ;;  %v1254_v58 = vadd.f32 %v5580_v0, %v1126_v6  ;;  %v1128_v5 = vld [vmem:[%s4289_s24 + $0x648] sm:$0xff]  ;;  %v1129_v13 = vld [vmem:[%s4289_s24 + $0x650] sm:$0xff]  ;;  %1378 = vst [vmem:[%s4316_s20 + $0x458] sm:$0xff] %v1250_v32  ;;  %1379 = vst [vmem:[%s4316_s20 + $0x540] sm:$0xff] %v1251_v48 }
 0x12e   : > { %v5590_v45 = vld [vmem:[%s4297_s5 + $0xc0] sm:$0xff]  ;;  %v5594_v47 = vld [vmem:[%s4297_s5 + $0xc8] sm:$0xff]  ;;  %v5598_v11 = vld [vmem:[%s4297_s5 + $0xd0] sm:$0xff]  ;;  %1380 = vst [vmem:[%s4316_s20 + $0x548] sm:$0xff] %v1252_v55 }
 0x12f   : > { %v1255_v16 = vadd.f32 %v5590_v45, %v1127_v41  ;;  %v1256_v31 = vadd.f32 %v5594_v47, %v1128_v5  ;;  %v1257_v35 = vadd.f32 %v5598_v11, %v1129_v13  ;;  %v1130_v49 = vld [vmem:[%s4289_s24 + $0x658] sm:$0xff]  ;;  %v1131_v50 = vld [vmem:[%s4289_s24 + $0x740] sm:$0xff]  ;;  %v1132_v52 = vld [vmem:[%s4289_s24 + $0x748] sm:$0xff]  ;;  %1381 = vst [vmem:[%s4316_s20 + $0x550] sm:$0xff] %v1253_v3 }
 0x130   : > { %1382 = vst [vmem:[%s4316_s20 + $0x558] sm:$0xff] %v1254_v58  ;;  %v5608_v60 = vld [vmem:[%s4297_s5 + $0xd8] sm:$0xff]  ;;  %v5612_v56 = vld [vmem:[%s4297_s5 + $0xe0] sm:$0xff]  ;;  %v5616_v7 = vld [vmem:[%s4297_s5 + $0xe8] sm:$0xff] }
 0x131   : > { %v1258_v2 = vadd.f32 %v5608_v60, %v1130_v49  ;;  %v1259_v62 = vadd.f32 %v5612_v56, %v1131_v50  ;;  %v1260_v14 = vadd.f32 %v5616_v7, %v1132_v52  ;;  %v1133_v59 = vld [vmem:[%s4289_s24 + $0x750] sm:$0xff]  ;;  %v1134_v25 = vld [vmem:[%s4289_s24 + $0x758] sm:$0xff]  ;;  %v1135_v18 = vld [vmem:[%s4289_s24 + $0x840] sm:$0xff]  ;;  %1383 = vst [vmem:[%s4316_s20 + $0x640] sm:$0xff] %v1255_v16 }
 0x132   : > { %1384 = vst [vmem:[%s4316_s20 + $0x648] sm:$0xff] %v1256_v31  ;;  %1385 = vst [vmem:[%s4316_s20 + $0x650] sm:$0xff] %v1257_v35  ;;  %v5626_v39 = vld [vmem:[%s4297_s5 + $0xf0] sm:$0xff]  ;;  %v5630_v26 = vld [vmem:[%s4297_s5 + $0xf8] sm:$0xff] }
 0x133   : > { %v1261_v1 = vadd.f32 %v5626_v39, %v1133_v59  ;;  %v1262_v4 = vadd.f32 %v5630_v26, %v1134_v25  ;;  %v5634_v53 = vld [vmem:[%s4297_s5 + $0x100] sm:$0xff]  ;;  %v1136_v12 = vld [vmem:[%s4289_s24 + $0x848] sm:$0xff]  ;;  %v1137_v40 = vld [vmem:[%s4289_s24 + $0x850] sm:$0xff]  ;;  %1386 = vst [vmem:[%s4316_s20 + $0x658] sm:$0xff] %v1258_v2 }
 0x134   : > { %v1263_v30 = vadd.f32 %v5634_v53, %v1135_v18  ;;  %v1138_v15 = vld [vmem:[%s4289_s24 + $0x858] sm:$0xff]  ;;  %1387 = vst [vmem:[%s4316_s20 + $0x740] sm:$0xff] %v1259_v62  ;;  %1388 = vst [vmem:[%s4316_s20 + $0x748] sm:$0xff] %v1260_v14  ;;  %v5644_v27 = vld [vmem:[%s4297_s5 + $0x108] sm:$0xff] }
 0x135   : > { %v1264_v33 = vadd.f32 %v5644_v27, %v1136_v12  ;;  %v5648_v29 = vld [vmem:[%s4297_s5 + $0x110] sm:$0xff]  ;;  %v5652_v34 = vld [vmem:[%s4297_s5 + $0x118] sm:$0xff]  ;;  %v1139_v32 = vld [vmem:[%s4289_s24 + $0x940] sm:$0xff]  ;;  %1389 = vst [vmem:[%s4316_s20 + $0x750] sm:$0xff] %v1261_v1 }
 0x136   : > { %v1265_v28 = vadd.f32 %v5648_v29, %v1137_v40  ;;  %v1266_v37 = vadd.f32 %v5652_v34, %v1138_v15  ;;  %v1140_v48 = vld [vmem:[%s4289_s24 + $0x948] sm:$0xff]  ;;  %v1141_v36 = vld [vmem:[%s4289_s24 + $0x950] sm:$0xff]  ;;  %1390 = vst [vmem:[%s4316_s20 + $0x758] sm:$0xff] %v1262_v4  ;;  %1391 = vst [vmem:[%s4316_s20 + $0x840] sm:$0xff] %v1263_v30 }
 0x137   : > { %v5662_v51 = vld [vmem:[%s4297_s5 + $0x120] sm:$0xff]  ;;  %v5666_v55 = vld [vmem:[%s4297_s5 + $0x128] sm:$0xff]  ;;  %v5670_v58 = vld [vmem:[%s4297_s5 + $0x130] sm:$0xff]  ;;  %1392 = vst [vmem:[%s4316_s20 + $0x848] sm:$0xff] %v1264_v33 }
 0x138   : > { %v1267_v6 = vadd.f32 %v5662_v51, %v1139_v32  ;;  %v1268_v3 = vadd.f32 %v5666_v55, %v1140_v48  ;;  %v1269_v41 = vadd.f32 %v5670_v58, %v1141_v36  ;;  %v1142_v5 = vld [vmem:[%s4289_s24 + $0x958] sm:$0xff]  ;;  %v1143_v13 = vld [vmem:[%s4289_s24 + $0xa40] sm:$0xff]  ;;  %v1144_v16 = vld [vmem:[%s4289_s24 + $0xa48] sm:$0xff]  ;;  %1393 = vst [vmem:[%s4316_s20 + $0x850] sm:$0xff] %v1265_v28 }
 0x139   : > { %1394 = vst [vmem:[%s4316_s20 + $0x858] sm:$0xff] %v1266_v37  ;;  %v5680_v31 = vld [vmem:[%s4297_s5 + $0x138] sm:$0xff]  ;;  %v5684_v49 = vld [vmem:[%s4297_s5 + $0x140] sm:$0xff]  ;;  %v5688_v52 = vld [vmem:[%s4297_s5 + $0x148] sm:$0xff] }
 0x13a   : > { %v1270_v35 = vadd.f32 %v5680_v31, %v1142_v5  ;;  %v1271_v50 = vadd.f32 %v5684_v49, %v1143_v13  ;;  %v1272_v2 = vadd.f32 %v5688_v52, %v1144_v16  ;;  %v1145_v62 = vld [vmem:[%s4289_s24 + $0xa50] sm:$0xff]  ;;  %v1146_v14 = vld [vmem:[%s4289_s24 + $0xa58] sm:$0xff]  ;;  %v1147_v59 = vld [vmem:[%s4289_s24 + $0xb40] sm:$0xff]  ;;  %1395 = vst [vmem:[%s4316_s20 + $0x940] sm:$0xff] %v1267_v6 }
 0x13b   : > { %1396 = vst [vmem:[%s4316_s20 + $0x948] sm:$0xff] %v1268_v3  ;;  %1397 = vst [vmem:[%s4316_s20 + $0x950] sm:$0xff] %v1269_v41  ;;  %v5698_v25 = vld [vmem:[%s4297_s5 + $0x150] sm:$0xff]  ;;  %v5702_v1 = vld [vmem:[%s4297_s5 + $0x158] sm:$0xff] }
 0x13c   : > { %v1273_v18 = vadd.f32 %v5698_v25, %v1145_v62  ;;  %v1274_v4 = vadd.f32 %v5702_v1, %v1146_v14  ;;  %v5706_v30 = vld [vmem:[%s4297_s5 + $0x160] sm:$0xff]  ;;  %v1148_v40 = vld [vmem:[%s4289_s24 + $0xb48] sm:$0xff]  ;;  %v1149_v15 = vld [vmem:[%s4289_s24 + $0xb50] sm:$0xff]  ;;  %1398 = vst [vmem:[%s4316_s20 + $0x958] sm:$0xff] %v1270_v35 }
 0x13d   : > { %v1275_v12 = vadd.f32 %v5706_v30, %v1147_v59  ;;  %v1150_v33 = vld [vmem:[%s4289_s24 + $0xb58] sm:$0xff]  ;;  %1399 = vst [vmem:[%s4316_s20 + $0xa40] sm:$0xff] %v1271_v50  ;;  %1400 = vst [vmem:[%s4316_s20 + $0xa48] sm:$0xff] %v1272_v2  ;;  %v5716_v28 = vld [vmem:[%s4297_s5 + $0x168] sm:$0xff] }
 0x13e   : > { %v1276_v37 = vadd.f32 %v5716_v28, %v1148_v40  ;;  %v5720_v32 = vld [vmem:[%s4297_s5 + $0x170] sm:$0xff]  ;;  %v5724_v36 = vld [vmem:[%s4297_s5 + $0x178] sm:$0xff]  ;;  %v1151_v3 = vld [vmem:[%s4289_s24 + $0xc40] sm:$0xff]  ;;  %1401 = vst [vmem:[%s4316_s20 + $0xa50] sm:$0xff] %v1273_v18 }
 0x13f   : > { %v1277_v48 = vadd.f32 %v5720_v32, %v1149_v15  ;;  %v1278_v6 = vadd.f32 %v5724_v36, %v1150_v33  ;;  %v1152_v41 = vld [vmem:[%s4289_s24 + $0xc48] sm:$0xff]  ;;  %v1153_v5 = vld [vmem:[%s4289_s24 + $0xc50] sm:$0xff]  ;;  %1402 = vst [vmem:[%s4316_s20 + $0xa58] sm:$0xff] %v1274_v4  ;;  %1403 = vst [vmem:[%s4316_s20 + $0xb40] sm:$0xff] %v1275_v12 }
 0x140   : > { %v5734_v13 = vld [vmem:[%s4297_s5 + $0x180] sm:$0xff]  ;;  %v5738_v35 = vld [vmem:[%s4297_s5 + $0x188] sm:$0xff]  ;;  %v5742_v2 = vld [vmem:[%s4297_s5 + $0x190] sm:$0xff]  ;;  %1404 = vst [vmem:[%s4316_s20 + $0xb48] sm:$0xff] %v1276_v37 }
 0x141   : > { %v1279_v16 = vadd.f32 %v5734_v13, %v1151_v3  ;;  %v1280_v50 = vadd.f32 %v5738_v35, %v1152_v41  ;;  %v1281_v62 = vadd.f32 %v5742_v2, %v1153_v5  ;;  %v1154_v14 = vld [vmem:[%s4289_s24 + $0xc58] sm:$0xff]  ;;  %v1155_v59 = vld [vmem:[%s4289_s24 + $0xd40] sm:$0xff]  ;;  %v1156_v18 = vld [vmem:[%s4289_s24 + $0xd48] sm:$0xff]  ;;  %1405 = vst [vmem:[%s4316_s20 + $0xb50] sm:$0xff] %v1277_v48 }
 0x142   : > { %1406 = vst [vmem:[%s4316_s20 + $0xb58] sm:$0xff] %v1278_v6  ;;  %v5752_v4 = vld [vmem:[%s4297_s5 + $0x198] sm:$0xff]  ;;  %v5756_v40 = vld [vmem:[%s4297_s5 + $0x1a0] sm:$0xff]  ;;  %v5760_v33 = vld [vmem:[%s4297_s5 + $0x1a8] sm:$0xff] }
 0x143   : > { %v1282_v12 = vadd.f32 %v5752_v4, %v1154_v14  ;;  %v1283_v15 = vadd.f32 %v5756_v40, %v1155_v59  ;;  %9430 = vst [vmem:[#allocation11_spill] sm:$0xff] %v5760_v33  ;;  %v1284_v3 = vadd.f32 %v5760_v33, %v1156_v18  ;;  %v1157_v37 = vld [vmem:[%s4289_s24 + $0xd50] sm:$0xff]  ;;  %v1158_v48 = vld [vmem:[%s4289_s24 + $0xd58] sm:$0xff]  ;;  %v1159_v6 = vld [vmem:[%s4289_s24 + $0xe40] sm:$0xff] }
 0x144   : > { %1407 = vst [vmem:[%s4316_s20 + $0xc40] sm:$0xff] %v1279_v16  ;;  %1408 = vst [vmem:[%s4316_s20 + $0xc48] sm:$0xff] %v1280_v50  ;;  %v5770_v41 = vld [vmem:[%s4297_s5 + $0x1b0] sm:$0xff]  ;;  %v5774_v14 = vld [vmem:[%s4297_s5 + $0x1b8] sm:$0xff] }
 0x145   : > { %1409 = vst [vmem:[%s4316_s20 + $0xc50] sm:$0xff] %v1281_v62  ;;  %9431 = vst [vmem:[#allocation12_spill] sm:$0xff] %v5770_v41  ;;  %v1285_v5 = vadd.f32 %v5770_v41, %v1157_v37  ;;  %v1286_v59 = vadd.f32 %v5774_v14, %v1158_v48  ;;  %v5778_v18 = vld [vmem:[%s4297_s5 + $0x1c0] sm:$0xff]  ;;  %v1160_v16 = vld [vmem:[%s4289_s24 + $0xe48] sm:$0xff] }
 0x146   : > { %9432 = vst [vmem:[#allocation13_spill] sm:$0xff] %v5774_v14  ;;  %9433 = vst [vmem:[#allocation14_spill] sm:$0xff] %v5778_v18  ;;  %v1287_v33 = vadd.f32 %v5778_v18, %v1159_v6  ;;  %v1161_v50 = vld [vmem:[%s4289_s24 + $0xe50] sm:$0xff]  ;;  %v1162_v62 = vld [vmem:[%s4289_s24 + $0xe58] sm:$0xff] }
 0x147   : > { %1410 = vst [vmem:[%s4316_s20 + $0xc58] sm:$0xff] %v1282_v12  ;;  %1411 = vst [vmem:[%s4316_s20 + $0xd40] sm:$0xff] %v1283_v15  ;;  %v5788_v37 = vld [vmem:[%s4297_s5 + $0x1c8] sm:$0xff]  ;;  %v5792_v14 = vld [vmem:[%s4297_s5 + $0x1d0] sm:$0xff] }
 0x148   : > { %1412 = vst [vmem:[%s4316_s20 + $0xd48] sm:$0xff] %v1284_v3  ;;  %9434 = vst [vmem:[#allocation15_spill] sm:$0xff] %v5788_v37  ;;  %v1288_v48 = vadd.f32 %v5788_v37, %v1160_v16  ;;  %v1289_v6 = vadd.f32 %v5792_v14, %v1161_v50  ;;  %v5796_v18 = vld [vmem:[%s4297_s5 + $0x1d8] sm:$0xff]  ;;  %v1163_v12 = vld [vmem:[%s4289_s24 + $0xf40] sm:$0xff] }
 0x149   : > { %9435 = vst [vmem:[#allocation16_spill] sm:$0xff] %v5792_v14  ;;  %9436 = vst [vmem:[#allocation17_spill] sm:$0xff] %v5796_v18  ;;  %v1290_v41 = vadd.f32 %v5796_v18, %v1162_v62  ;;  %v1164_v15 = vld [vmem:[%s4289_s24 + $0xf48] sm:$0xff]  ;;  %v1165_v3 = vld [vmem:[%s4289_s24 + $0xf50] sm:$0xff] }
 0x14a   : > { %1413 = vst [vmem:[%s4316_s20 + $0xd50] sm:$0xff] %v1285_v5  ;;  %1414 = vst [vmem:[%s4316_s20 + $0xd58] sm:$0xff] %v1286_v59  ;;  %v5806_v16 = vld [vmem:[%s4297_s5 + $0x1e0] sm:$0xff]  ;;  %v5810_v14 = vld [vmem:[%s4297_s5 + $0x1e8] sm:$0xff] }
 0x14b   : > { %1415 = vst [vmem:[%s4316_s20 + $0xe40] sm:$0xff] %v1287_v33  ;;  %9437 = vst [vmem:[#allocation18_spill] sm:$0xff] %v5806_v16  ;;  %v1291_v50 = vadd.f32 %v5806_v16, %v1163_v12  ;;  %v1292_v62 = vadd.f32 %v5810_v14, %v1164_v15  ;;  %v5814_v18 = vld [vmem:[%s4297_s5 + $0x1f0] sm:$0xff]  ;;  %v1166_v5 = vld [vmem:[%s4289_s24 + $0xf58] sm:$0xff] }
 0x14c   : > { %9438 = vst [vmem:[#allocation19_spill] sm:$0xff] %v5810_v14  ;;  %9439 = vst [vmem:[#allocation20_spill] sm:$0xff] %v5814_v18  ;;  %v1293_v37 = vadd.f32 %v5814_v18, %v1165_v3  ;;  %v1167_v33 = vld [vmem:[%s4289_s24 + $0x1040] sm:$0xff]  ;;  %v1168_v59 = vld [vmem:[%s4289_s24 + $0x1048] sm:$0xff] }
 0x14d   : > { %1416 = vst [vmem:[%s4316_s20 + $0xe48] sm:$0xff] %v1288_v48  ;;  %1417 = vst [vmem:[%s4316_s20 + $0xe50] sm:$0xff] %v1289_v6  ;;  %v5824_v12 = vld [vmem:[%s4297_s5 + $0x1f8] sm:$0xff]  ;;  %v5828_v14 = vld [vmem:[%s4297_s5 + $0x200] sm:$0xff] }
 0x14e   : > { %1418 = vst [vmem:[%s4316_s20 + $0xe58] sm:$0xff] %v1290_v41  ;;  %9440 = vst [vmem:[#allocation21_spill] sm:$0xff] %v5824_v12  ;;  %v1294_v15 = vadd.f32 %v5824_v12, %v1166_v5  ;;  %v1295_v3 = vadd.f32 %v5828_v14, %v1167_v33  ;;  %v5832_v18 = vld [vmem:[%s4297_s5 + $0x208] sm:$0xff]  ;;  %v1169_v48 = vld [vmem:[%s4289_s24 + $0x1050] sm:$0xff] }
 0x14f   : > { %9441 = vst [vmem:[#allocation22_spill] sm:$0xff] %v5828_v14  ;;  %9442 = vst [vmem:[#allocation23_spill] sm:$0xff] %v5832_v18  ;;  %v1296_v16 = vadd.f32 %v5832_v18, %v1168_v59  ;;  %v1170_v41 = vld [vmem:[%s4289_s24 + $0x1058] sm:$0xff]  ;;  %v1171_v6 = vld [vmem:[%s4289_s24 + $0x1140] sm:$0xff] }
 0x150   : > { %1419 = vst [vmem:[%s4316_s20 + $0xf40] sm:$0xff] %v1291_v50  ;;  %1420 = vst [vmem:[%s4316_s20 + $0xf48] sm:$0xff] %v1292_v62  ;;  %v5842_v5 = vld [vmem:[%s4297_s5 + $0x210] sm:$0xff]  ;;  %v5846_v14 = vld [vmem:[%s4297_s5 + $0x218] sm:$0xff] }
 0x151   : > { %1421 = vst [vmem:[%s4316_s20 + $0xf50] sm:$0xff] %v1293_v37  ;;  %9443 = vst [vmem:[#allocation24_spill] sm:$0xff] %v5842_v5  ;;  %v1297_v33 = vadd.f32 %v5842_v5, %v1169_v48  ;;  %v1298_v59 = vadd.f32 %v5846_v14, %v1170_v41  ;;  %v5850_v18 = vld [vmem:[%s4297_s5 + $0x220] sm:$0xff]  ;;  %v1172_v50 = vld [vmem:[%s4289_s24 + $0x1148] sm:$0xff] }
 0x152   : > { %9444 = vst [vmem:[#allocation25_spill] sm:$0xff] %v5846_v14  ;;  %9445 = vst [vmem:[#allocation26_spill] sm:$0xff] %v5850_v18  ;;  %v1299_v12 = vadd.f32 %v5850_v18, %v1171_v6  ;;  %v1173_v37 = vld [vmem:[%s4289_s24 + $0x1150] sm:$0xff]  ;;  %v1174_v62 = vld [vmem:[%s4289_s24 + $0x1158] sm:$0xff] }
 0x153   : > { %1422 = vst [vmem:[%s4316_s20 + $0xf58] sm:$0xff] %v1294_v15  ;;  %1423 = vst [vmem:[%s4316_s20 + $0x1040] sm:$0xff] %v1295_v3  ;;  %v5860_v48 = vld [vmem:[%s4297_s5 + $0x228] sm:$0xff]  ;;  %v5864_v14 = vld [vmem:[%s4297_s5 + $0x230] sm:$0xff] }
 0x154   : > { %1424 = vst [vmem:[%s4316_s20 + $0x1048] sm:$0xff] %v1296_v16  ;;  %9446 = vst [vmem:[#allocation27_spill] sm:$0xff] %v5860_v48  ;;  %v1300_v41 = vadd.f32 %v5860_v48, %v1172_v50  ;;  %v1301_v6 = vadd.f32 %v5864_v14, %v1173_v37  ;;  %v5868_v18 = vld [vmem:[%s4297_s5 + $0x238] sm:$0xff]  ;;  %v1175_v15 = vld [vmem:[%s4289_s24 + $0x1240] sm:$0xff] }
 0x155   : > { %9447 = vst [vmem:[#allocation28_spill] sm:$0xff] %v5864_v14  ;;  %9448 = vst [vmem:[#allocation29_spill] sm:$0xff] %v5868_v18  ;;  %v1302_v5 = vadd.f32 %v5868_v18, %v1174_v62  ;;  %v1176_v16 = vld [vmem:[%s4289_s24 + $0x1248] sm:$0xff]  ;;  %v1177_v3 = vld [vmem:[%s4289_s24 + $0x1250] sm:$0xff] }
 0x156   : > { %1425 = vst [vmem:[%s4316_s20 + $0x1050] sm:$0xff] %v1297_v33  ;;  %1426 = vst [vmem:[%s4316_s20 + $0x1058] sm:$0xff] %v1298_v59  ;;  %v5878_v50 = vld [vmem:[%s4297_s5 + $0x240] sm:$0xff]  ;;  %v5882_v14 = vld [vmem:[%s4297_s5 + $0x248] sm:$0xff] }
 0x157   : > { %1427 = vst [vmem:[%s4316_s20 + $0x1140] sm:$0xff] %v1299_v12  ;;  %9449 = vst [vmem:[#allocation30_spill] sm:$0xff] %v5878_v50  ;;  %v1303_v37 = vadd.f32 %v5878_v50, %v1175_v15  ;;  %v1304_v62 = vadd.f32 %v5882_v14, %v1176_v16  ;;  %v5886_v18 = vld [vmem:[%s4297_s5 + $0x250] sm:$0xff]  ;;  %v1178_v33 = vld [vmem:[%s4289_s24 + $0x1258] sm:$0xff] }
 0x158   : > { %9450 = vst [vmem:[#allocation31_spill] sm:$0xff] %v5882_v14  ;;  %9451 = vst [vmem:[#allocation32_spill] sm:$0xff] %v5886_v18  ;;  %v1305_v48 = vadd.f32 %v5886_v18, %v1177_v3  ;;  %v1179_v12 = vld [vmem:[%s4289_s24 + $0x1340] sm:$0xff]  ;;  %v1180_v59 = vld [vmem:[%s4289_s24 + $0x1348] sm:$0xff] }
 0x159   : > { %1428 = vst [vmem:[%s4316_s20 + $0x1148] sm:$0xff] %v1300_v41  ;;  %1429 = vst [vmem:[%s4316_s20 + $0x1150] sm:$0xff] %v1301_v6  ;;  %v5896_v15 = vld [vmem:[%s4297_s5 + $0x258] sm:$0xff]  ;;  %v5900_v14 = vld [vmem:[%s4297_s5 + $0x260] sm:$0xff] }
 0x15a   : > { %1430 = vst [vmem:[%s4316_s20 + $0x1158] sm:$0xff] %v1302_v5  ;;  %9452 = vst [vmem:[#allocation33_spill] sm:$0xff] %v5896_v15  ;;  %v1306_v16 = vadd.f32 %v5896_v15, %v1178_v33  ;;  %v1307_v3 = vadd.f32 %v5900_v14, %v1179_v12  ;;  %v5904_v18 = vld [vmem:[%s4297_s5 + $0x268] sm:$0xff]  ;;  %v1181_v41 = vld [vmem:[%s4289_s24 + $0x1350] sm:$0xff] }
 0x15b   : > { %9453 = vst [vmem:[#allocation34_spill] sm:$0xff] %v5900_v14  ;;  %9454 = vst [vmem:[#allocation35_spill] sm:$0xff] %v5904_v18  ;;  %v1308_v50 = vadd.f32 %v5904_v18, %v1180_v59  ;;  %v1182_v5 = vld [vmem:[%s4289_s24 + $0x1358] sm:$0xff]  ;;  %v1183_v6 = vld [vmem:[%s4289_s24 + $0x1440] sm:$0xff] }
 0x15c   : > { %1431 = vst [vmem:[%s4316_s20 + $0x1240] sm:$0xff] %v1303_v37  ;;  %1432 = vst [vmem:[%s4316_s20 + $0x1248] sm:$0xff] %v1304_v62  ;;  %v5914_v33 = vld [vmem:[%s4297_s5 + $0x270] sm:$0xff]  ;;  %v5918_v14 = vld [vmem:[%s4297_s5 + $0x278] sm:$0xff] }
 0x15d   : > { %1433 = vst [vmem:[%s4316_s20 + $0x1250] sm:$0xff] %v1305_v48  ;;  %9455 = vst [vmem:[#allocation36_spill] sm:$0xff] %v5914_v33  ;;  %v1309_v12 = vadd.f32 %v5914_v33, %v1181_v41  ;;  %v1310_v59 = vadd.f32 %v5918_v14, %v1182_v5  ;;  %v5922_v18 = vld [vmem:[%s4297_s5 + $0x280] sm:$0xff]  ;;  %v1184_v37 = vld [vmem:[%s4289_s24 + $0x1448] sm:$0xff] }
 0x15e   : > { %9456 = vst [vmem:[#allocation37_spill] sm:$0xff] %v5918_v14  ;;  %9457 = vst [vmem:[#allocation38_spill] sm:$0xff] %v5922_v18  ;;  %v1311_v15 = vadd.f32 %v5922_v18, %v1183_v6  ;;  %v1185_v48 = vld [vmem:[%s4289_s24 + $0x1450] sm:$0xff]  ;;  %v1186_v62 = vld [vmem:[%s4289_s24 + $0x1458] sm:$0xff] }
 0x15f   : > { %1434 = vst [vmem:[%s4316_s20 + $0x1258] sm:$0xff] %v1306_v16  ;;  %1435 = vst [vmem:[%s4316_s20 + $0x1340] sm:$0xff] %v1307_v3  ;;  %v5932_v41 = vld [vmem:[%s4297_s5 + $0x288] sm:$0xff]  ;;  %v5936_v14 = vld [vmem:[%s4297_s5 + $0x290] sm:$0xff] }
 0x160   : > { %1436 = vst [vmem:[%s4316_s20 + $0x1348] sm:$0xff] %v1308_v50  ;;  %9458 = vst [vmem:[#allocation39_spill] sm:$0xff] %v5932_v41  ;;  %v1312_v5 = vadd.f32 %v5932_v41, %v1184_v37  ;;  %v1313_v6 = vadd.f32 %v5936_v14, %v1185_v48  ;;  %v5940_v18 = vld [vmem:[%s4297_s5 + $0x298] sm:$0xff]  ;;  %v1187_v16 = vld [vmem:[%s4289_s24 + $0x1540] sm:$0xff] }
 0x161   : > { %9459 = vst [vmem:[#allocation40_spill] sm:$0xff] %v5936_v14  ;;  %9460 = vst [vmem:[#allocation41_spill] sm:$0xff] %v5940_v18  ;;  %v1314_v33 = vadd.f32 %v5940_v18, %v1186_v62  ;;  %v1188_v50 = vld [vmem:[%s4289_s24 + $0x1548] sm:$0xff]  ;;  %v1189_v3 = vld [vmem:[%s4289_s24 + $0x1550] sm:$0xff] }
 0x162   : > { %1437 = vst [vmem:[%s4316_s20 + $0x1350] sm:$0xff] %v1309_v12  ;;  %1438 = vst [vmem:[%s4316_s20 + $0x1358] sm:$0xff] %v1310_v59  ;;  %v5950_v37 = vld [vmem:[%s4297_s5 + $0x2a0] sm:$0xff]  ;;  %v5954_v14 = vld [vmem:[%s4297_s5 + $0x2a8] sm:$0xff] }
 0x163   : > { %1439 = vst [vmem:[%s4316_s20 + $0x1440] sm:$0xff] %v1311_v15  ;;  %9461 = vst [vmem:[#allocation42_spill] sm:$0xff] %v5950_v37  ;;  %v1315_v48 = vadd.f32 %v5950_v37, %v1187_v16  ;;  %v1316_v62 = vadd.f32 %v5954_v14, %v1188_v50  ;;  %v5958_v18 = vld [vmem:[%s4297_s5 + $0x2b0] sm:$0xff]  ;;  %v1190_v12 = vld [vmem:[%s4289_s24 + $0x1558] sm:$0xff] }
 0x164   : > { %9462 = vst [vmem:[#allocation43_spill] sm:$0xff] %v5954_v14  ;;  %9463 = vst [vmem:[#allocation44_spill] sm:$0xff] %v5958_v18  ;;  %v1317_v41 = vadd.f32 %v5958_v18, %v1189_v3  ;;  %v1191_v15 = vld [vmem:[%s4289_s24 + $0x1640] sm:$0xff]  ;;  %v1192_v59 = vld [vmem:[%s4289_s24 + $0x1648] sm:$0xff] }
 0x165   : > { %1440 = vst [vmem:[%s4316_s20 + $0x1448] sm:$0xff] %v1312_v5  ;;  %1441 = vst [vmem:[%s4316_s20 + $0x1450] sm:$0xff] %v1313_v6  ;;  %v5968_v16 = vld [vmem:[%s4297_s5 + $0x2b8] sm:$0xff]  ;;  %v5972_v14 = vld [vmem:[%s4297_s5 + $0x2c0] sm:$0xff] }
 0x166   : > { %1442 = vst [vmem:[%s4316_s20 + $0x1458] sm:$0xff] %v1314_v33  ;;  %9464 = vst [vmem:[#allocation45_spill] sm:$0xff] %v5968_v16  ;;  %v1318_v50 = vadd.f32 %v5968_v16, %v1190_v12  ;;  %v1319_v3 = vadd.f32 %v5972_v14, %v1191_v15  ;;  %v5976_v18 = vld [vmem:[%s4297_s5 + $0x2c8] sm:$0xff]  ;;  %v1193_v5 = vld [vmem:[%s4289_s24 + $0x1650] sm:$0xff] }
 0x167   : > { %9465 = vst [vmem:[#allocation46_spill] sm:$0xff] %v5972_v14  ;;  %9466 = vst [vmem:[#allocation47_spill] sm:$0xff] %v5976_v18  ;;  %v1320_v37 = vadd.f32 %v5976_v18, %v1192_v59  ;;  %v1194_v33 = vld [vmem:[%s4289_s24 + $0x1658] sm:$0xff]  ;;  %v1195_v6 = vld [vmem:[%s4289_s24 + $0x1740] sm:$0xff] }
 0x168   : > { %1443 = vst [vmem:[%s4316_s20 + $0x1540] sm:$0xff] %v1315_v48  ;;  %1444 = vst [vmem:[%s4316_s20 + $0x1548] sm:$0xff] %v1316_v62  ;;  %v5986_v12 = vld [vmem:[%s4297_s5 + $0x2d0] sm:$0xff]  ;;  %v5990_v14 = vld [vmem:[%s4297_s5 + $0x2d8] sm:$0xff] }
 0x169   : > { %1445 = vst [vmem:[%s4316_s20 + $0x1550] sm:$0xff] %v1317_v41  ;;  %9467 = vst [vmem:[#allocation48_spill] sm:$0xff] %v5986_v12  ;;  %v1321_v15 = vadd.f32 %v5986_v12, %v1193_v5  ;;  %v1322_v59 = vadd.f32 %v5990_v14, %v1194_v33  ;;  %v5994_v18 = vld [vmem:[%s4297_s5 + $0x2e0] sm:$0xff]  ;;  %v1196_v48 = vld [vmem:[%s4289_s24 + $0x1748] sm:$0xff] }
 0x16a   : > { %9468 = vst [vmem:[#allocation49_spill] sm:$0xff] %v5990_v14  ;;  %9469 = vst [vmem:[#allocation50_spill] sm:$0xff] %v5994_v18  ;;  %v1323_v16 = vadd.f32 %v5994_v18, %v1195_v6  ;;  %v1197_v41 = vld [vmem:[%s4289_s24 + $0x1750] sm:$0xff]  ;;  %v1198_v62 = vld [vmem:[%s4289_s24 + $0x1758] sm:$0xff] }
 0x16b   : > { %1446 = vst [vmem:[%s4316_s20 + $0x1558] sm:$0xff] %v1318_v50  ;;  %1447 = vst [vmem:[%s4316_s20 + $0x1640] sm:$0xff] %v1319_v3  ;;  %v6004_v5 = vld [vmem:[%s4297_s5 + $0x2e8] sm:$0xff]  ;;  %v6008_v14 = vld [vmem:[%s4297_s5 + $0x2f0] sm:$0xff] }
 0x16c   : > { %1448 = vst [vmem:[%s4316_s20 + $0x1648] sm:$0xff] %v1320_v37  ;;  %9470 = vst [vmem:[#allocation51_spill] sm:$0xff] %v6004_v5  ;;  %v1324_v33 = vadd.f32 %v6004_v5, %v1196_v48  ;;  %v1325_v6 = vadd.f32 %v6008_v14, %v1197_v41  ;;  %v6012_v18 = vld [vmem:[%s4297_s5 + $0x2f8] sm:$0xff]  ;;  %v1199_v50 = vld [vmem:[%s4289_s24 + $0x1840] sm:$0xff] }
 0x16d   : > { %9471 = vst [vmem:[#allocation52_spill] sm:$0xff] %v6008_v14  ;;  %9472 = vst [vmem:[#allocation53_spill] sm:$0xff] %v6012_v18  ;;  %v1326_v12 = vadd.f32 %v6012_v18, %v1198_v62  ;;  %v1200_v37 = vld [vmem:[%s4289_s24 + $0x1848] sm:$0xff]  ;;  %v1201_v3 = vld [vmem:[%s4289_s24 + $0x1850] sm:$0xff] }
 0x16e   : > { %1449 = vst [vmem:[%s4316_s20 + $0x1650] sm:$0xff] %v1321_v15  ;;  %1450 = vst [vmem:[%s4316_s20 + $0x1658] sm:$0xff] %v1322_v59  ;;  %v6022_v48 = vld [vmem:[%s4297_s5 + $0x300] sm:$0xff]  ;;  %v6026_v14 = vld [vmem:[%s4297_s5 + $0x308] sm:$0xff] }
 0x16f   : > { %1451 = vst [vmem:[%s4316_s20 + $0x1740] sm:$0xff] %v1323_v16  ;;  %9473 = vst [vmem:[#allocation54_spill] sm:$0xff] %v6022_v48  ;;  %v1327_v41 = vadd.f32 %v6022_v48, %v1199_v50  ;;  %v1328_v62 = vadd.f32 %v6026_v14, %v1200_v37  ;;  %v6030_v18 = vld [vmem:[%s4297_s5 + $0x310] sm:$0xff]  ;;  %v1202_v15 = vld [vmem:[%s4289_s24 + $0x1858] sm:$0xff] }
 0x170   : > { %9474 = vst [vmem:[#allocation55_spill] sm:$0xff] %v6026_v14  ;;  %9475 = vst [vmem:[#allocation56_spill] sm:$0xff] %v6030_v18  ;;  %v1329_v5 = vadd.f32 %v6030_v18, %v1201_v3  ;;  %v1203_v16 = vld [vmem:[%s4289_s24 + $0x1940] sm:$0xff]  ;;  %v1204_v59 = vld [vmem:[%s4289_s24 + $0x1948] sm:$0xff] }
 0x171   : > { %1452 = vst [vmem:[%s4316_s20 + $0x1748] sm:$0xff] %v1324_v33  ;;  %1453 = vst [vmem:[%s4316_s20 + $0x1750] sm:$0xff] %v1325_v6  ;;  %v6040_v50 = vld [vmem:[%s4297_s5 + $0x318] sm:$0xff]  ;;  %v6044_v14 = vld [vmem:[%s4297_s5 + $0x320] sm:$0xff] }
 0x172   : > { %1454 = vst [vmem:[%s4316_s20 + $0x1758] sm:$0xff] %v1326_v12  ;;  %9476 = vst [vmem:[#allocation57_spill] sm:$0xff] %v6040_v50  ;;  %v1330_v37 = vadd.f32 %v6040_v50, %v1202_v15  ;;  %v1331_v3 = vadd.f32 %v6044_v14, %v1203_v16  ;;  %v6048_v18 = vld [vmem:[%s4297_s5 + $0x328] sm:$0xff]  ;;  %v1205_v33 = vld [vmem:[%s4289_s24 + $0x1950] sm:$0xff] }
 0x173   : > { %9477 = vst [vmem:[#allocation58_spill] sm:$0xff] %v6044_v14  ;;  %9478 = vst [vmem:[#allocation59_spill] sm:$0xff] %v6048_v18  ;;  %v1332_v48 = vadd.f32 %v6048_v18, %v1204_v59  ;;  %v1206_v12 = vld [vmem:[%s4289_s24 + $0x1958] sm:$0xff]  ;;  %v1207_v6 = vld [vmem:[%s4289_s24 + $0x1a40] sm:$0xff] }
 0x174   : > { %1455 = vst [vmem:[%s4316_s20 + $0x1840] sm:$0xff] %v1327_v41  ;;  %1456 = vst [vmem:[%s4316_s20 + $0x1848] sm:$0xff] %v1328_v62  ;;  %v6058_v15 = vld [vmem:[%s4297_s5 + $0x330] sm:$0xff]  ;;  %v6062_v14 = vld [vmem:[%s4297_s5 + $0x338] sm:$0xff] }
 0x175   : > { %1457 = vst [vmem:[%s4316_s20 + $0x1850] sm:$0xff] %v1329_v5  ;;  %9479 = vst [vmem:[#allocation60_spill] sm:$0xff] %v6058_v15  ;;  %v1333_v16 = vadd.f32 %v6058_v15, %v1205_v33  ;;  %v1334_v59 = vadd.f32 %v6062_v14, %v1206_v12  ;;  %v6066_v18 = vld [vmem:[%s4297_s5 + $0x340] sm:$0xff]  ;;  %v1208_v41 = vld [vmem:[%s4289_s24 + $0x1a48] sm:$0xff] }
 0x176   : > { %9480 = vst [vmem:[#allocation61_spill] sm:$0xff] %v6062_v14  ;;  %9481 = vst [vmem:[#allocation62_spill] sm:$0xff] %v6066_v18  ;;  %v1335_v50 = vadd.f32 %v6066_v18, %v1207_v6  ;;  %v1209_v5 = vld [vmem:[%s4289_s24 + $0x1a50] sm:$0xff]  ;;  %v1210_v62 = vld [vmem:[%s4289_s24 + $0x1a58] sm:$0xff] }
 0x177   : > { %1458 = vst [vmem:[%s4316_s20 + $0x1858] sm:$0xff] %v1330_v37  ;;  %1459 = vst [vmem:[%s4316_s20 + $0x1940] sm:$0xff] %v1331_v3  ;;  %v6076_v33 = vld [vmem:[%s4297_s5 + $0x348] sm:$0xff]  ;;  %v6080_v14 = vld [vmem:[%s4297_s5 + $0x350] sm:$0xff] }
 0x178   : > { %1460 = vst [vmem:[%s4316_s20 + $0x1948] sm:$0xff] %v1332_v48  ;;  %9482 = vst [vmem:[#allocation63_spill] sm:$0xff] %v6076_v33  ;;  %v1336_v12 = vadd.f32 %v6076_v33, %v1208_v41  ;;  %v1337_v6 = vadd.f32 %v6080_v14, %v1209_v5  ;;  %v6084_v18 = vld [vmem:[%s4297_s5 + $0x358] sm:$0xff]  ;;  %v1211_v37 = vld [vmem:[%s4289_s24 + $0x1b40] sm:$0xff] }
 0x179   : > { %9483 = vst [vmem:[#allocation64_spill] sm:$0xff] %v6080_v14  ;;  %9484 = vst [vmem:[#allocation65_spill] sm:$0xff] %v6084_v18  ;;  %v1338_v15 = vadd.f32 %v6084_v18, %v1210_v62  ;;  %v1212_v48 = vld [vmem:[%s4289_s24 + $0x1b48] sm:$0xff]  ;;  %v1213_v3 = vld [vmem:[%s4289_s24 + $0x1b50] sm:$0xff] }
 0x17a   : > { %1461 = vst [vmem:[%s4316_s20 + $0x1950] sm:$0xff] %v1333_v16  ;;  %1462 = vst [vmem:[%s4316_s20 + $0x1958] sm:$0xff] %v1334_v59  ;;  %v6094_v41 = vld [vmem:[%s4297_s5 + $0x360] sm:$0xff]  ;;  %v6098_v14 = vld [vmem:[%s4297_s5 + $0x368] sm:$0xff] }
 0x17b   : > { %1463 = vst [vmem:[%s4316_s20 + $0x1a40] sm:$0xff] %v1335_v50  ;;  %9485 = vst [vmem:[#allocation66_spill] sm:$0xff] %v6094_v41  ;;  %v1339_v5 = vadd.f32 %v6094_v41, %v1211_v37  ;;  %v1340_v62 = vadd.f32 %v6098_v14, %v1212_v48  ;;  %v6102_v18 = vld [vmem:[%s4297_s5 + $0x370] sm:$0xff]  ;;  %v1214_v16 = vld [vmem:[%s4289_s24 + $0x1b58] sm:$0xff] }
 0x17c   : > { %9486 = vst [vmem:[#allocation67_spill] sm:$0xff] %v6098_v14  ;;  %9487 = vst [vmem:[#allocation68_spill] sm:$0xff] %v6102_v18  ;;  %v1341_v33 = vadd.f32 %v6102_v18, %v1213_v3  ;;  %v1215_v50 = vld [vmem:[%s4289_s24 + $0x1c40] sm:$0xff]  ;;  %v1216_v59 = vld [vmem:[%s4289_s24 + $0x1c48] sm:$0xff] }
 0x17d   : > { %1464 = vst [vmem:[%s4316_s20 + $0x1a48] sm:$0xff] %v1336_v12  ;;  %1465 = vst [vmem:[%s4316_s20 + $0x1a50] sm:$0xff] %v1337_v6  ;;  %v6112_v37 = vld [vmem:[%s4297_s5 + $0x378] sm:$0xff]  ;;  %v6116_v14 = vld [vmem:[%s4297_s5 + $0x380] sm:$0xff] }
 0x17e   : > { %1466 = vst [vmem:[%s4316_s20 + $0x1a58] sm:$0xff] %v1338_v15  ;;  %9488 = vst [vmem:[#allocation69_spill] sm:$0xff] %v6112_v37  ;;  %v1342_v48 = vadd.f32 %v6112_v37, %v1214_v16  ;;  %v1343_v3 = vadd.f32 %v6116_v14, %v1215_v50  ;;  %v6120_v18 = vld [vmem:[%s4297_s5 + $0x388] sm:$0xff]  ;;  %v1217_v12 = vld [vmem:[%s4289_s24 + $0x1c50] sm:$0xff] }
 0x17f   : > { %9489 = vst [vmem:[#allocation70_spill] sm:$0xff] %v6116_v14  ;;  %9490 = vst [vmem:[#allocation71_spill] sm:$0xff] %v6120_v18  ;;  %v1344_v41 = vadd.f32 %v6120_v18, %v1216_v59  ;;  %v1218_v15 = vld [vmem:[%s4289_s24 + $0x1c58] sm:$0xff]  ;;  %v1219_v6 = vld [vmem:[%s4289_s24 + $0x1d40] sm:$0xff] }
 0x180   : > { %1467 = vst [vmem:[%s4316_s20 + $0x1b40] sm:$0xff] %v1339_v5  ;;  %1468 = vst [vmem:[%s4316_s20 + $0x1b48] sm:$0xff] %v1340_v62  ;;  %v6130_v16 = vld [vmem:[%s4297_s5 + $0x390] sm:$0xff]  ;;  %v6134_v14 = vld [vmem:[%s4297_s5 + $0x398] sm:$0xff] }
 0x181   : > { %1469 = vst [vmem:[%s4316_s20 + $0x1b50] sm:$0xff] %v1341_v33  ;;  %9491 = vst [vmem:[#allocation72_spill] sm:$0xff] %v6130_v16  ;;  %v1345_v50 = vadd.f32 %v6130_v16, %v1217_v12  ;;  %v1346_v59 = vadd.f32 %v6134_v14, %v1218_v15  ;;  %v6138_v18 = vld [vmem:[%s4297_s5 + $0x3a0] sm:$0xff]  ;;  %v1220_v5 = vld [vmem:[%s4289_s24 + $0x1d48] sm:$0xff] }
 0x182   : > { %9492 = vst [vmem:[#allocation73_spill] sm:$0xff] %v6134_v14  ;;  %9493 = vst [vmem:[#allocation74_spill] sm:$0xff] %v6138_v18  ;;  %v1347_v37 = vadd.f32 %v6138_v18, %v1219_v6  ;;  %v1221_v33 = vld [vmem:[%s4289_s24 + $0x1d50] sm:$0xff]  ;;  %v1222_v62 = vld [vmem:[%s4289_s24 + $0x1d58] sm:$0xff] }
 0x183   : > { %1470 = vst [vmem:[%s4316_s20 + $0x1b58] sm:$0xff] %v1342_v48  ;;  %1471 = vst [vmem:[%s4316_s20 + $0x1c40] sm:$0xff] %v1343_v3  ;;  %v6148_v12 = vld [vmem:[%s4297_s5 + $0x3a8] sm:$0xff]  ;;  %v6152_v14 = vld [vmem:[%s4297_s5 + $0x3b0] sm:$0xff] }
 0x184   : > { %1472 = vst [vmem:[%s4316_s20 + $0x1c48] sm:$0xff] %v1344_v41  ;;  %9494 = vst [vmem:[#allocation75_spill] sm:$0xff] %v6148_v12  ;;  %v1348_v15 = vadd.f32 %v6148_v12, %v1220_v5  ;;  %v1349_v6 = vadd.f32 %v6152_v14, %v1221_v33  ;;  %v6156_v18 = vld [vmem:[%s4297_s5 + $0x3b8] sm:$0xff]  ;;  %v1223_v48 = vld [vmem:[%s4289_s24 + $0x1e40] sm:$0xff] }
 0x185   : > { %9495 = vst [vmem:[#allocation76_spill] sm:$0xff] %v6152_v14  ;;  %9496 = vst [vmem:[#allocation77_spill] sm:$0xff] %v6156_v18  ;;  %v1350_v16 = vadd.f32 %v6156_v18, %v1222_v62  ;;  %v1224_v41 = vld [vmem:[%s4289_s24 + $0x1e48] sm:$0xff]  ;;  %v1225_v3 = vld [vmem:[%s4289_s24 + $0x1e50] sm:$0xff] }
 0x186   : > { %1473 = vst [vmem:[%s4316_s20 + $0x1c50] sm:$0xff] %v1345_v50  ;;  %1474 = vst [vmem:[%s4316_s20 + $0x1c58] sm:$0xff] %v1346_v59  ;;  %v6166_v5 = vld [vmem:[%s4297_s5 + $0x3c0] sm:$0xff]  ;;  %v6170_v14 = vld [vmem:[%s4297_s5 + $0x3c8] sm:$0xff] }
 0x187   : > { %1475 = vst [vmem:[%s4316_s20 + $0x1d40] sm:$0xff] %v1347_v37  ;;  %9497 = vst [vmem:[#allocation78_spill] sm:$0xff] %v6166_v5  ;;  %v1351_v33 = vadd.f32 %v6166_v5, %v1223_v48  ;;  %v1352_v62 = vadd.f32 %v6170_v14, %v1224_v41  ;;  %v6174_v18 = vld [vmem:[%s4297_s5 + $0x3d0] sm:$0xff]  ;;  %v1226_v50 = vld [vmem:[%s4289_s24 + $0x1e58] sm:$0xff] }
 0x188   : > { %9498 = vst [vmem:[#allocation79_spill] sm:$0xff] %v6170_v14  ;;  %9499 = vst [vmem:[#allocation80_spill] sm:$0xff] %v6174_v18  ;;  %v1353_v12 = vadd.f32 %v6174_v18, %v1225_v3  ;;  %v1227_v37 = vld [vmem:[%s4289_s24 + $0x1f40] sm:$0xff]  ;;  %v1228_v59 = vld [vmem:[%s4289_s24 + $0x1f48] sm:$0xff] }
 0x189   : > { %1476 = vst [vmem:[%s4316_s20 + $0x1d48] sm:$0xff] %v1348_v15  ;;  %1477 = vst [vmem:[%s4316_s20 + $0x1d50] sm:$0xff] %v1349_v6  ;;  %v6184_v48 = vld [vmem:[%s4297_s5 + $0x3d8] sm:$0xff]  ;;  %v6188_v14 = vld [vmem:[%s4297_s5 + $0x3e0] sm:$0xff] }
 0x18a   : > { %1478 = vst [vmem:[%s4316_s20 + $0x1d58] sm:$0xff] %v1350_v16  ;;  %9500 = vst [vmem:[#allocation81_spill] sm:$0xff] %v6184_v48  ;;  %v1354_v41 = vadd.f32 %v6184_v48, %v1226_v50  ;;  %v1355_v3 = vadd.f32 %v6188_v14, %v1227_v37  ;;  %v6192_v18 = vld [vmem:[%s4297_s5 + $0x3e8] sm:$0xff]  ;;  %v1229_v15 = vld [vmem:[%s4289_s24 + $0x1f50] sm:$0xff] }
 0x18b   : > { %9501 = vst [vmem:[#allocation82_spill] sm:$0xff] %v6188_v14  ;;  %9502 = vst [vmem:[#allocation83_spill] sm:$0xff] %v6192_v18  ;;  %v1356_v5 = vadd.f32 %v6192_v18, %v1228_v59  ;;  %v1230_v16 = vld [vmem:[%s4289_s24 + $0x1f58] sm:$0xff]  ;;  %v1487_v6 = vld [vmem:[%s4289_s24 + $0x60] sm:$0xff] }
 0x18c   : > { %1479 = vst [vmem:[%s4316_s20 + $0x1e40] sm:$0xff] %v1351_v33  ;;  %1480 = vst [vmem:[%s4316_s20 + $0x1e48] sm:$0xff] %v1352_v62  ;;  %v6202_v50 = vld [vmem:[%s4297_s5 + $0x3f0] sm:$0xff]  ;;  %v6206_v14 = vld [vmem:[%s4297_s5 + $0x3f8] sm:$0xff] }
 0x18d   : > { %1481 = vst [vmem:[%s4316_s20 + $0x1e50] sm:$0xff] %v1353_v12  ;;  %9503 = vst [vmem:[#allocation84_spill] sm:$0xff] %v6202_v50  ;;  %v1357_v37 = vadd.f32 %v6202_v50, %v1229_v15  ;;  %v1358_v59 = vadd.f32 %v6206_v14, %v1230_v16  ;;  %v6210_v18 = vld [vmem:[%s4297_s5] sm:$0xff]  ;;  %v1488_v33 = vld [vmem:[%s4289_s24 + $0x68] sm:$0xff] }
 0x18e   : > { %9504 = vst [vmem:[#allocation85_spill] sm:$0xff] %v6206_v14  ;;  %9505 = vst [vmem:[#allocation86_spill] sm:$0xff] %v6210_v18  ;;  %v1615_v48 = vadd.f32 %v6210_v18, %v1487_v6  ;;  %v1489_v12 = vld [vmem:[%s4289_s24 + $0x70] sm:$0xff]  ;;  %v1490_v62 = vld [vmem:[%s4289_s24 + $0x78] sm:$0xff] }
 0x18f   : > { %1482 = vst [vmem:[%s4316_s20 + $0x1e58] sm:$0xff] %v1354_v41  ;;  %1483 = vst [vmem:[%s4316_s20 + $0x1f40] sm:$0xff] %v1355_v3  ;;  %v6220_v15 = vld [vmem:[%s4297_s5 + $0x8] sm:$0xff]  ;;  %v6224_v14 = vld [vmem:[%s4297_s5 + $0x10] sm:$0xff]  ;;  %v1618_v18 = vadd.f32 %v5467_v9, %v1490_v62 }
 0x190   : > { %1484 = vst [vmem:[%s4316_s20 + $0x1f48] sm:$0xff] %v1356_v5  ;;  %9506 = vst [vmem:[#allocation87_spill] sm:$0xff] %v6220_v15  ;;  %v1616_v16 = vadd.f32 %v6220_v15, %v1488_v33  ;;  %v1617_v6 = vadd.f32 %v6224_v14, %v1489_v12  ;;  %v1491_v50 = vld [vmem:[%s4289_s24 + $0x160] sm:$0xff]  ;;  %v1492_v41 = vld [vmem:[%s4289_s24 + $0x168] sm:$0xff] }
 0x191   : > { %9507 = vst [vmem:[#allocation88_spill] sm:$0xff] %v6224_v14  ;;  %v1493_v3 = vld [vmem:[%s4289_s24 + $0x170] sm:$0xff]  ;;  %1485 = vst [vmem:[%s4316_s20 + $0x1f50] sm:$0xff] %v1357_v37  ;;  %v1619_v5 = vadd.f32 %v5471_v22, %v1491_v50  ;;  %v6236_v33 = vld [vmem:[%s4297_s5 + $0x28] sm:$0xff] }
 0x192   : > { %1486 = vst [vmem:[%s4316_s20 + $0x1f58] sm:$0xff] %v1358_v59  ;;  %1743 = vst [vmem:[%s4316_s20 + $0x60] sm:$0xff] %v1615_v48  ;;  %v1620_v12 = vadd.f32 %v6236_v33, %v1492_v41  ;;  %v1621_v9 = vadd.f32 %v5482_v43, %v1493_v3  ;;  %v1494_v62 = vld [vmem:[%s4289_s24 + $0x178] sm:$0xff]  ;;  %v1495_v14 = vld [vmem:[%s4289_s24 + $0x260] sm:$0xff] }
 0x193   : > { %v1496_v15 = vld [vmem:[%s4289_s24 + $0x268] sm:$0xff]  ;;  %1744 = vst [vmem:[%s4316_s20 + $0x68] sm:$0xff] %v1616_v16  ;;  %1745 = vst [vmem:[%s4316_s20 + $0x70] sm:$0xff] %v1617_v6  ;;  %v1622_v22 = vadd.f32 %v5486_v54, %v1494_v62  ;;  %v1623_v48 = vadd.f32 %v5490_v57, %v1495_v14  ;;  %v1497_v37 = vld [vmem:[%s4289_s24 + $0x270] sm:$0xff] }
 0x194   : > { %1746 = vst [vmem:[%s4316_s20 + $0x78] sm:$0xff] %v1618_v18  ;;  %v1624_v50 = vadd.f32 %v5500_v17, %v1496_v15  ;;  %v1498_v43 = vld [vmem:[%s4289_s24 + $0x278] sm:$0xff]  ;;  %v1499_v59 = vld [vmem:[%s4289_s24 + $0x360] sm:$0xff]  ;;  %1747 = vst [vmem:[%s4316_s20 + $0x160] sm:$0xff] %v1619_v5  ;;  %v1625_v18 = vadd.f32 %v5504_v10, %v1497_v37 }
 0x195   : > { %1748 = vst [vmem:[%s4316_s20 + $0x168] sm:$0xff] %v1620_v12  ;;  %1749 = vst [vmem:[%s4316_s20 + $0x170] sm:$0xff] %v1621_v9  ;;  %v1626_v54 = vadd.f32 %v5508_v63, %v1498_v43  ;;  %v1627_v57 = vadd.f32 %v5518_v44, %v1499_v59  ;;  %v1500_v14 = vld [vmem:[%s4289_s24 + $0x368] sm:$0xff]  ;;  %v1501_v17 = vld [vmem:[%s4289_s24 + $0x370] sm:$0xff] }
 0x196   : > { %v1502_v15 = vld [vmem:[%s4289_s24 + $0x378] sm:$0xff]  ;;  %1750 = vst [vmem:[%s4316_s20 + $0x178] sm:$0xff] %v1622_v22  ;;  %1751 = vst [vmem:[%s4316_s20 + $0x260] sm:$0xff] %v1623_v48  ;;  %v1628_v16 = vadd.f32 %v5522_v20, %v1500_v14  ;;  %v1629_v10 = vadd.f32 %v5526_v8, %v1501_v17  ;;  %v1503_v6 = vld [vmem:[%s4289_s24 + $0x460] sm:$0xff] }
 0x197   : > { %1752 = vst [vmem:[%s4316_s20 + $0x268] sm:$0xff] %v1624_v50  ;;  %v1630_v63 = vadd.f32 %v5536_v23, %v1502_v15  ;;  %v1504_v44 = vld [vmem:[%s4289_s24 + $0x468] sm:$0xff]  ;;  %v1505_v41 = vld [vmem:[%s4289_s24 + $0x470] sm:$0xff]  ;;  %1753 = vst [vmem:[%s4316_s20 + $0x270] sm:$0xff] %v1625_v18  ;;  %v1631_v3 = vadd.f32 %v5540_v21, %v1503_v6 }
 0x198   : > { %1754 = vst [vmem:[%s4316_s20 + $0x278] sm:$0xff] %v1626_v54  ;;  %1755 = vst [vmem:[%s4316_s20 + $0x360] sm:$0xff] %v1627_v57  ;;  %v1632_v20 = vadd.f32 %v5544_v24, %v1504_v44  ;;  %v1633_v8 = vadd.f32 %v5554_v46, %v1505_v41  ;;  %v1506_v5 = vld [vmem:[%s4289_s24 + $0x478] sm:$0xff]  ;;  %v1507_v23 = vld [vmem:[%s4289_s24 + $0x560] sm:$0xff] }
 0x199   : > { %v1508_v12 = vld [vmem:[%s4289_s24 + $0x568] sm:$0xff]  ;;  %1756 = vst [vmem:[%s4316_s20 + $0x368] sm:$0xff] %v1628_v16  ;;  %1757 = vst [vmem:[%s4316_s20 + $0x370] sm:$0xff] %v1629_v10  ;;  %v1634_v9 = vadd.f32 %v5558_v19, %v1506_v5  ;;  %v1635_v21 = vadd.f32 %v5562_v42, %v1507_v23  ;;  %v1509_v62 = vld [vmem:[%s4289_s24 + $0x570] sm:$0xff] }
 0x19a   : > { %1758 = vst [vmem:[%s4316_s20 + $0x378] sm:$0xff] %v1630_v63  ;;  %v1636_v24 = vadd.f32 %v5572_v38, %v1508_v12  ;;  %v1510_v46 = vld [vmem:[%s4289_s24 + $0x578] sm:$0xff]  ;;  %v1511_v22 = vld [vmem:[%s4289_s24 + $0x660] sm:$0xff]  ;;  %1759 = vst [vmem:[%s4316_s20 + $0x460] sm:$0xff] %v1631_v3  ;;  %v1637_v48 = vadd.f32 %v5576_v61, %v1509_v62 }
 0x19b   : > { %1760 = vst [vmem:[%s4316_s20 + $0x468] sm:$0xff] %v1632_v20  ;;  %1761 = vst [vmem:[%s4316_s20 + $0x470] sm:$0xff] %v1633_v8  ;;  %v1638_v19 = vadd.f32 %v5580_v0, %v1510_v46  ;;  %v1639_v42 = vadd.f32 %v5590_v45, %v1511_v22  ;;  %v1512_v50 = vld [vmem:[%s4289_s24 + $0x668] sm:$0xff]  ;;  %v1513_v38 = vld [vmem:[%s4289_s24 + $0x670] sm:$0xff] }
 0x19c   : > { %v1514_v37 = vld [vmem:[%s4289_s24 + $0x678] sm:$0xff]  ;;  %1762 = vst [vmem:[%s4316_s20 + $0x478] sm:$0xff] %v1634_v9  ;;  %1763 = vst [vmem:[%s4316_s20 + $0x560] sm:$0xff] %v1635_v21  ;;  %v1640_v43 = vadd.f32 %v5594_v47, %v1512_v50  ;;  %v1641_v61 = vadd.f32 %v5598_v11, %v1513_v38  ;;  %v1515_v59 = vld [vmem:[%s4289_s24 + $0x760] sm:$0xff] }
 0x19d   : > { %1764 = vst [vmem:[%s4316_s20 + $0x568] sm:$0xff] %v1636_v24  ;;  %v1642_v0 = vadd.f32 %v5608_v60, %v1514_v37  ;;  %v1516_v45 = vld [vmem:[%s4289_s24 + $0x768] sm:$0xff]  ;;  %v1517_v18 = vld [vmem:[%s4289_s24 + $0x770] sm:$0xff]  ;;  %1765 = vst [vmem:[%s4316_s20 + $0x570] sm:$0xff] %v1637_v48  ;;  %v1643_v54 = vadd.f32 %v5612_v56, %v1515_v59 }
 0x19e   : > { %1766 = vst [vmem:[%s4316_s20 + $0x578] sm:$0xff] %v1638_v19  ;;  %1767 = vst [vmem:[%s4316_s20 + $0x660] sm:$0xff] %v1639_v42  ;;  %v1644_v47 = vadd.f32 %v5616_v7, %v1516_v45  ;;  %v1645_v11 = vadd.f32 %v5626_v39, %v1517_v18  ;;  %v1518_v57 = vld [vmem:[%s4289_s24 + $0x778] sm:$0xff]  ;;  %v1519_v60 = vld [vmem:[%s4289_s24 + $0x860] sm:$0xff] }
 0x19f   : > { %v1520_v14 = vld [vmem:[%s4289_s24 + $0x868] sm:$0xff]  ;;  %1768 = vst [vmem:[%s4316_s20 + $0x668] sm:$0xff] %v1640_v43  ;;  %1769 = vst [vmem:[%s4316_s20 + $0x670] sm:$0xff] %v1641_v61  ;;  %v1646_v17 = vadd.f32 %v5630_v26, %v1518_v57  ;;  %v1647_v56 = vadd.f32 %v5634_v53, %v1519_v60  ;;  %v1521_v15 = vld [vmem:[%s4289_s24 + $0x870] sm:$0xff] }
 0x1a0   : > { %1770 = vst [vmem:[%s4316_s20 + $0x678] sm:$0xff] %v1642_v0  ;;  %v1648_v7 = vadd.f32 %v5644_v27, %v1520_v14  ;;  %v1522_v39 = vld [vmem:[%s4289_s24 + $0x878] sm:$0xff]  ;;  %v1523_v16 = vld [vmem:[%s4289_s24 + $0x960] sm:$0xff]  ;;  %1771 = vst [vmem:[%s4316_s20 + $0x760] sm:$0xff] %v1643_v54  ;;  %v1649_v10 = vadd.f32 %v5648_v29, %v1521_v15 }
 0x1a1   : > { %1772 = vst [vmem:[%s4316_s20 + $0x768] sm:$0xff] %v1644_v47  ;;  %1773 = vst [vmem:[%s4316_s20 + $0x770] sm:$0xff] %v1645_v11  ;;  %v1650_v26 = vadd.f32 %v5652_v34, %v1522_v39  ;;  %v1651_v53 = vadd.f32 %v5662_v51, %v1523_v16  ;;  %v1524_v63 = vld [vmem:[%s4289_s24 + $0x968] sm:$0xff]  ;;  %v1525_v27 = vld [vmem:[%s4289_s24 + $0x970] sm:$0xff] }
 0x1a2   : > { %v1526_v6 = vld [vmem:[%s4289_s24 + $0x978] sm:$0xff]  ;;  %1774 = vst [vmem:[%s4316_s20 + $0x778] sm:$0xff] %v1646_v17  ;;  %1775 = vst [vmem:[%s4316_s20 + $0x860] sm:$0xff] %v1647_v56  ;;  %v1652_v44 = vadd.f32 %v5666_v55, %v1524_v63  ;;  %v1653_v29 = vadd.f32 %v5670_v58, %v1525_v27  ;;  %v1527_v41 = vld [vmem:[%s4289_s24 + $0xa60] sm:$0xff] }
 0x1a3   : > { %1776 = vst [vmem:[%s4316_s20 + $0x868] sm:$0xff] %v1648_v7  ;;  %v1654_v34 = vadd.f32 %v5680_v31, %v1526_v6  ;;  %v1528_v51 = vld [vmem:[%s4289_s24 + $0xa68] sm:$0xff]  ;;  %v1529_v3 = vld [vmem:[%s4289_s24 + $0xa70] sm:$0xff]  ;;  %1777 = vst [vmem:[%s4316_s20 + $0x870] sm:$0xff] %v1649_v10  ;;  %v1655_v20 = vadd.f32 %v5684_v49, %v1527_v41 }
 0x1a4   : > { %1778 = vst [vmem:[%s4316_s20 + $0x878] sm:$0xff] %v1650_v26  ;;  %1779 = vst [vmem:[%s4316_s20 + $0x960] sm:$0xff] %v1651_v53  ;;  %v1656_v55 = vadd.f32 %v5688_v52, %v1528_v51  ;;  %v1657_v58 = vadd.f32 %v5698_v25, %v1529_v3  ;;  %v1530_v8 = vld [vmem:[%s4289_s24 + $0xa78] sm:$0xff]  ;;  %v1531_v31 = vld [vmem:[%s4289_s24 + $0xb60] sm:$0xff] }
 0x1a5   : > { %v1532_v5 = vld [vmem:[%s4289_s24 + $0xb68] sm:$0xff]  ;;  %1780 = vst [vmem:[%s4316_s20 + $0x968] sm:$0xff] %v1652_v44  ;;  %1781 = vst [vmem:[%s4316_s20 + $0x970] sm:$0xff] %v1653_v29  ;;  %v1658_v23 = vadd.f32 %v5702_v1, %v1530_v8  ;;  %v1659_v49 = vadd.f32 %v5706_v30, %v1531_v31  ;;  %v1533_v12 = vld [vmem:[%s4289_s24 + $0xb70] sm:$0xff] }
 0x1a6   : > { %1782 = vst [vmem:[%s4316_s20 + $0x978] sm:$0xff] %v1654_v34  ;;  %v1660_v52 = vadd.f32 %v5716_v28, %v1532_v5  ;;  %v1534_v25 = vld [vmem:[%s4289_s24 + $0xb78] sm:$0xff]  ;;  %v1535_v9 = vld [vmem:[%s4289_s24 + $0xc60] sm:$0xff]  ;;  %1783 = vst [vmem:[%s4316_s20 + $0xa60] sm:$0xff] %v1655_v20  ;;  %v1661_v21 = vadd.f32 %v5720_v32, %v1533_v12 }
 0x1a7   : > { %1784 = vst [vmem:[%s4316_s20 + $0xa68] sm:$0xff] %v1656_v55  ;;  %1785 = vst [vmem:[%s4316_s20 + $0xa70] sm:$0xff] %v1657_v58  ;;  %v1662_v1 = vadd.f32 %v5724_v36, %v1534_v25  ;;  %v1663_v30 = vadd.f32 %v5734_v13, %v1535_v9  ;;  %v1536_v24 = vld [vmem:[%s4289_s24 + $0xc68] sm:$0xff]  ;;  %v1537_v28 = vld [vmem:[%s4289_s24 + $0xc70] sm:$0xff] }
 0x1a8   : > { %v1538_v62 = vld [vmem:[%s4289_s24 + $0xc78] sm:$0xff]  ;;  %1786 = vst [vmem:[%s4316_s20 + $0xa78] sm:$0xff] %v1658_v23  ;;  %1787 = vst [vmem:[%s4316_s20 + $0xb60] sm:$0xff] %v1659_v49  ;;  %v1664_v46 = vadd.f32 %v5738_v35, %v1536_v24  ;;  %v1665_v32 = vadd.f32 %v5742_v2, %v1537_v28  ;;  %v1539_v22 = vld [vmem:[%s4289_s24 + $0xd60] sm:$0xff] }
 0x1a9   : > { %1788 = vst [vmem:[%s4316_s20 + $0xb68] sm:$0xff] %v1660_v52  ;;  %v1666_v36 = vadd.f32 %v5752_v4, %v1538_v62  ;;  %v1540_v13 = vld [vmem:[%s4289_s24 + $0xd68] sm:$0xff]  ;;  %v1541_v48 = vld [vmem:[%s4289_s24 + $0xd70] sm:$0xff]  ;;  %1789 = vst [vmem:[%s4316_s20 + $0xb70] sm:$0xff] %v1661_v21  ;;  %v1667_v19 = vadd.f32 %v5756_v40, %v1539_v22 }
 0x1aa   : > { %1790 = vst [vmem:[%s4316_s20 + $0xb78] sm:$0xff] %v1662_v1  ;;  %1791 = vst [vmem:[%s4316_s20 + $0xc60] sm:$0xff] %v1663_v30  ;;  %v9508_v42 = vld [vmem:[#allocation11_spill] sm:$0xff]  ;;  %v9509_v50 = vld [vmem:[#allocation12_spill] sm:$0xff] }
 0x1ab   : > { %v1668_v35 = vadd.f32 %v9508_v42, %v1540_v13  ;;  %v1669_v2 = vadd.f32 %v9509_v50, %v1541_v48  ;;  %v1542_v38 = vld [vmem:[%s4289_s24 + $0xd78] sm:$0xff]  ;;  %v1543_v4 = vld [vmem:[%s4289_s24 + $0xe60] sm:$0xff]  ;;  %v1544_v37 = vld [vmem:[%s4289_s24 + $0xe68] sm:$0xff]  ;;  %1792 = vst [vmem:[%s4316_s20 + $0xc68] sm:$0xff] %v1664_v46 }
 0x1ac   : > { %1793 = vst [vmem:[%s4316_s20 + $0xc70] sm:$0xff] %v1665_v32  ;;  %1794 = vst [vmem:[%s4316_s20 + $0xc78] sm:$0xff] %v1666_v36  ;;  %v9510_v43 = vld [vmem:[#allocation13_spill] sm:$0xff]  ;;  %v9511_v0 = vld [vmem:[#allocation14_spill] sm:$0xff] }
 0x1ad   : > { %v1670_v61 = vadd.f32 %v9510_v43, %v1542_v38  ;;  %v1671_v40 = vadd.f32 %v9511_v0, %v1543_v4  ;;  %v9512_v59 = vld [vmem:[#allocation15_spill] sm:$0xff]  ;;  %v1545_v18 = vld [vmem:[%s4289_s24 + $0xe70] sm:$0xff]  ;;  %v1546_v54 = vld [vmem:[%s4289_s24 + $0xe78] sm:$0xff]  ;;  %1795 = vst [vmem:[%s4316_s20 + $0xd60] sm:$0xff] %v1667_v19 }
 0x1ae   : > { %v1672_v45 = vadd.f32 %v9512_v59, %v1544_v37  ;;  %v1547_v47 = vld [vmem:[%s4289_s24 + $0xf60] sm:$0xff]  ;;  %1796 = vst [vmem:[%s4316_s20 + $0xd68] sm:$0xff] %v1668_v35  ;;  %1797 = vst [vmem:[%s4316_s20 + $0xd70] sm:$0xff] %v1669_v2  ;;  %v9513_v11 = vld [vmem:[#allocation16_spill] sm:$0xff] }
 0x1af   : > { %v1673_v57 = vadd.f32 %v9513_v11, %v1545_v18  ;;  %v9514_v60 = vld [vmem:[#allocation17_spill] sm:$0xff]  ;;  %v9515_v17 = vld [vmem:[#allocation18_spill] sm:$0xff]  ;;  %v1548_v7 = vld [vmem:[%s4289_s24 + $0xf68] sm:$0xff]  ;;  %1798 = vst [vmem:[%s4316_s20 + $0xd78] sm:$0xff] %v1670_v61 }
 0x1b0   : > { %v1674_v14 = vadd.f32 %v9514_v60, %v1546_v54  ;;  %v1675_v56 = vadd.f32 %v9515_v17, %v1547_v47  ;;  %v1549_v15 = vld [vmem:[%s4289_s24 + $0xf70] sm:$0xff]  ;;  %v1550_v39 = vld [vmem:[%s4289_s24 + $0xf78] sm:$0xff]  ;;  %1799 = vst [vmem:[%s4316_s20 + $0xe60] sm:$0xff] %v1671_v40  ;;  %1800 = vst [vmem:[%s4316_s20 + $0xe68] sm:$0xff] %v1672_v45 }
 0x1b1   : > { %v9516_v16 = vld [vmem:[#allocation19_spill] sm:$0xff]  ;;  %v9517_v26 = vld [vmem:[#allocation20_spill] sm:$0xff]  ;;  %v9518_v63 = vld [vmem:[#allocation21_spill] sm:$0xff]  ;;  %1801 = vst [vmem:[%s4316_s20 + $0xe70] sm:$0xff] %v1673_v57 }
 0x1b2   : > { %v1676_v10 = vadd.f32 %v9516_v16, %v1548_v7  ;;  %v1677_v53 = vadd.f32 %v9517_v26, %v1549_v15  ;;  %v1678_v27 = vadd.f32 %v9518_v63, %v1550_v39  ;;  %v1551_v6 = vld [vmem:[%s4289_s24 + $0x1060] sm:$0xff]  ;;  %v1552_v44 = vld [vmem:[%s4289_s24 + $0x1068] sm:$0xff]  ;;  %v1553_v29 = vld [vmem:[%s4289_s24 + $0x1070] sm:$0xff]  ;;  %1802 = vst [vmem:[%s4316_s20 + $0xe78] sm:$0xff] %v1674_v14 }
 0x1b3   : > { %1803 = vst [vmem:[%s4316_s20 + $0xf60] sm:$0xff] %v1675_v56  ;;  %v9519_v34 = vld [vmem:[#allocation22_spill] sm:$0xff]  ;;  %v9520_v51 = vld [vmem:[#allocation23_spill] sm:$0xff]  ;;  %v9521_v20 = vld [vmem:[#allocation24_spill] sm:$0xff] }
 0x1b4   : > { %v1679_v41 = vadd.f32 %v9519_v34, %v1551_v6  ;;  %v1680_v3 = vadd.f32 %v9520_v51, %v1552_v44  ;;  %v1681_v55 = vadd.f32 %v9521_v20, %v1553_v29  ;;  %v1554_v58 = vld [vmem:[%s4289_s24 + $0x1078] sm:$0xff]  ;;  %v1555_v8 = vld [vmem:[%s4289_s24 + $0x1160] sm:$0xff]  ;;  %v1556_v31 = vld [vmem:[%s4289_s24 + $0x1168] sm:$0xff]  ;;  %1804 = vst [vmem:[%s4316_s20 + $0xf68] sm:$0xff] %v1676_v10 }
 0x1b5   : > { %1805 = vst [vmem:[%s4316_s20 + $0xf70] sm:$0xff] %v1677_v53  ;;  %1806 = vst [vmem:[%s4316_s20 + $0xf78] sm:$0xff] %v1678_v27  ;;  %v9522_v5 = vld [vmem:[#allocation25_spill] sm:$0xff]  ;;  %v9523_v49 = vld [vmem:[#allocation26_spill] sm:$0xff] }
 0x1b6   : > { %v1682_v23 = vadd.f32 %v9522_v5, %v1554_v58  ;;  %v1683_v52 = vadd.f32 %v9523_v49, %v1555_v8  ;;  %v9524_v12 = vld [vmem:[#allocation27_spill] sm:$0xff]  ;;  %v1557_v9 = vld [vmem:[%s4289_s24 + $0x1170] sm:$0xff]  ;;  %v1558_v21 = vld [vmem:[%s4289_s24 + $0x1178] sm:$0xff]  ;;  %1807 = vst [vmem:[%s4316_s20 + $0x1060] sm:$0xff] %v1679_v41 }
 0x1b7   : > { %v1684_v25 = vadd.f32 %v9524_v12, %v1556_v31  ;;  %v1559_v1 = vld [vmem:[%s4289_s24 + $0x1260] sm:$0xff]  ;;  %1808 = vst [vmem:[%s4316_s20 + $0x1068] sm:$0xff] %v1680_v3  ;;  %1809 = vst [vmem:[%s4316_s20 + $0x1070] sm:$0xff] %v1681_v55  ;;  %v9525_v30 = vld [vmem:[#allocation28_spill] sm:$0xff] }
 0x1b8   : > { %v1685_v24 = vadd.f32 %v9525_v30, %v1557_v9  ;;  %v9526_v28 = vld [vmem:[#allocation29_spill] sm:$0xff]  ;;  %v9527_v46 = vld [vmem:[#allocation30_spill] sm:$0xff]  ;;  %v1560_v36 = vld [vmem:[%s4289_s24 + $0x1268] sm:$0xff]  ;;  %1810 = vst [vmem:[%s4316_s20 + $0x1078] sm:$0xff] %v1682_v23 }
 0x1b9   : > { %v1686_v62 = vadd.f32 %v9526_v28, %v1558_v21  ;;  %v1687_v32 = vadd.f32 %v9527_v46, %v1559_v1  ;;  %v1561_v22 = vld [vmem:[%s4289_s24 + $0x1270] sm:$0xff]  ;;  %v1562_v13 = vld [vmem:[%s4289_s24 + $0x1278] sm:$0xff]  ;;  %1811 = vst [vmem:[%s4316_s20 + $0x1160] sm:$0xff] %v1683_v52  ;;  %1812 = vst [vmem:[%s4316_s20 + $0x1168] sm:$0xff] %v1684_v25 }
 0x1ba   : > { %v9528_v48 = vld [vmem:[#allocation31_spill] sm:$0xff]  ;;  %v9529_v42 = vld [vmem:[#allocation32_spill] sm:$0xff]  ;;  %v9530_v50 = vld [vmem:[#allocation33_spill] sm:$0xff]  ;;  %1813 = vst [vmem:[%s4316_s20 + $0x1170] sm:$0xff] %v1685_v24 }
 0x1bb   : > { %v1688_v19 = vadd.f32 %v9528_v48, %v1560_v36  ;;  %v1689_v35 = vadd.f32 %v9529_v42, %v1561_v22  ;;  %v1690_v2 = vadd.f32 %v9530_v50, %v1562_v13  ;;  %v1563_v38 = vld [vmem:[%s4289_s24 + $0x1360] sm:$0xff]  ;;  %v1564_v4 = vld [vmem:[%s4289_s24 + $0x1368] sm:$0xff]  ;;  %v1565_v37 = vld [vmem:[%s4289_s24 + $0x1370] sm:$0xff]  ;;  %1814 = vst [vmem:[%s4316_s20 + $0x1178] sm:$0xff] %v1686_v62 }
 0x1bc   : > { %1815 = vst [vmem:[%s4316_s20 + $0x1260] sm:$0xff] %v1687_v32  ;;  %v9531_v43 = vld [vmem:[#allocation34_spill] sm:$0xff]  ;;  %v9532_v0 = vld [vmem:[#allocation35_spill] sm:$0xff]  ;;  %v9533_v59 = vld [vmem:[#allocation36_spill] sm:$0xff] }
 0x1bd   : > { %v1691_v61 = vadd.f32 %v9531_v43, %v1563_v38  ;;  %v1692_v40 = vadd.f32 %v9532_v0, %v1564_v4  ;;  %v1693_v45 = vadd.f32 %v9533_v59, %v1565_v37  ;;  %v1566_v18 = vld [vmem:[%s4289_s24 + $0x1378] sm:$0xff]  ;;  %v1567_v54 = vld [vmem:[%s4289_s24 + $0x1460] sm:$0xff]  ;;  %v1568_v47 = vld [vmem:[%s4289_s24 + $0x1468] sm:$0xff]  ;;  %1816 = vst [vmem:[%s4316_s20 + $0x1268] sm:$0xff] %v1688_v19 }
 0x1be   : > { %1817 = vst [vmem:[%s4316_s20 + $0x1270] sm:$0xff] %v1689_v35  ;;  %1818 = vst [vmem:[%s4316_s20 + $0x1278] sm:$0xff] %v1690_v2  ;;  %v9534_v11 = vld [vmem:[#allocation37_spill] sm:$0xff]  ;;  %v9535_v60 = vld [vmem:[#allocation38_spill] sm:$0xff] }
 0x1bf   : > { %v1694_v57 = vadd.f32 %v9534_v11, %v1566_v18  ;;  %v1695_v14 = vadd.f32 %v9535_v60, %v1567_v54  ;;  %v9536_v17 = vld [vmem:[#allocation39_spill] sm:$0xff]  ;;  %v1569_v7 = vld [vmem:[%s4289_s24 + $0x1470] sm:$0xff]  ;;  %v1570_v15 = vld [vmem:[%s4289_s24 + $0x1478] sm:$0xff]  ;;  %1819 = vst [vmem:[%s4316_s20 + $0x1360] sm:$0xff] %v1691_v61 }
 0x1c0   : > { %v1696_v56 = vadd.f32 %v9536_v17, %v1568_v47  ;;  %v1571_v39 = vld [vmem:[%s4289_s24 + $0x1560] sm:$0xff]  ;;  %1820 = vst [vmem:[%s4316_s20 + $0x1368] sm:$0xff] %v1692_v40  ;;  %1821 = vst [vmem:[%s4316_s20 + $0x1370] sm:$0xff] %v1693_v45  ;;  %v9537_v16 = vld [vmem:[#allocation40_spill] sm:$0xff] }
 0x1c1   : > { %v1697_v10 = vadd.f32 %v9537_v16, %v1569_v7  ;;  %v9538_v26 = vld [vmem:[#allocation41_spill] sm:$0xff]  ;;  %v9539_v63 = vld [vmem:[#allocation42_spill] sm:$0xff]  ;;  %v1572_v6 = vld [vmem:[%s4289_s24 + $0x1568] sm:$0xff]  ;;  %1822 = vst [vmem:[%s4316_s20 + $0x1378] sm:$0xff] %v1694_v57 }
 0x1c2   : > { %v1698_v53 = vadd.f32 %v9538_v26, %v1570_v15  ;;  %v1699_v27 = vadd.f32 %v9539_v63, %v1571_v39  ;;  %v1573_v44 = vld [vmem:[%s4289_s24 + $0x1570] sm:$0xff]  ;;  %v1574_v29 = vld [vmem:[%s4289_s24 + $0x1578] sm:$0xff]  ;;  %1823 = vst [vmem:[%s4316_s20 + $0x1460] sm:$0xff] %v1695_v14  ;;  %1824 = vst [vmem:[%s4316_s20 + $0x1468] sm:$0xff] %v1696_v56 }
 0x1c3   : > { %v9540_v34 = vld [vmem:[#allocation43_spill] sm:$0xff]  ;;  %v9541_v51 = vld [vmem:[#allocation44_spill] sm:$0xff]  ;;  %v9542_v20 = vld [vmem:[#allocation45_spill] sm:$0xff]  ;;  %1825 = vst [vmem:[%s4316_s20 + $0x1470] sm:$0xff] %v1697_v10 }
 0x1c4   : > { %v1700_v41 = vadd.f32 %v9540_v34, %v1572_v6  ;;  %v1701_v3 = vadd.f32 %v9541_v51, %v1573_v44  ;;  %v1702_v55 = vadd.f32 %v9542_v20, %v1574_v29  ;;  %v1575_v58 = vld [vmem:[%s4289_s24 + $0x1660] sm:$0xff]  ;;  %v1576_v8 = vld [vmem:[%s4289_s24 + $0x1668] sm:$0xff]  ;;  %v1577_v31 = vld [vmem:[%s4289_s24 + $0x1670] sm:$0xff]  ;;  %1826 = vst [vmem:[%s4316_s20 + $0x1478] sm:$0xff] %v1698_v53 }
 0x1c5   : > { %1827 = vst [vmem:[%s4316_s20 + $0x1560] sm:$0xff] %v1699_v27  ;;  %v9543_v5 = vld [vmem:[#allocation46_spill] sm:$0xff]  ;;  %v9544_v49 = vld [vmem:[#allocation47_spill] sm:$0xff]  ;;  %v9545_v12 = vld [vmem:[#allocation48_spill] sm:$0xff] }
 0x1c6   : > { %v1703_v23 = vadd.f32 %v9543_v5, %v1575_v58  ;;  %v1704_v52 = vadd.f32 %v9544_v49, %v1576_v8  ;;  %v1705_v25 = vadd.f32 %v9545_v12, %v1577_v31  ;;  %v1578_v9 = vld [vmem:[%s4289_s24 + $0x1678] sm:$0xff]  ;;  %v1579_v21 = vld [vmem:[%s4289_s24 + $0x1760] sm:$0xff]  ;;  %v1580_v1 = vld [vmem:[%s4289_s24 + $0x1768] sm:$0xff]  ;;  %1828 = vst [vmem:[%s4316_s20 + $0x1568] sm:$0xff] %v1700_v41 }
 0x1c7   : > { %1829 = vst [vmem:[%s4316_s20 + $0x1570] sm:$0xff] %v1701_v3  ;;  %1830 = vst [vmem:[%s4316_s20 + $0x1578] sm:$0xff] %v1702_v55  ;;  %v9546_v30 = vld [vmem:[#allocation49_spill] sm:$0xff]  ;;  %v9547_v28 = vld [vmem:[#allocation50_spill] sm:$0xff] }
 0x1c8   : > { %v1706_v24 = vadd.f32 %v9546_v30, %v1578_v9  ;;  %v1707_v62 = vadd.f32 %v9547_v28, %v1579_v21  ;;  %v9548_v46 = vld [vmem:[#allocation51_spill] sm:$0xff]  ;;  %v1581_v36 = vld [vmem:[%s4289_s24 + $0x1770] sm:$0xff]  ;;  %v1582_v22 = vld [vmem:[%s4289_s24 + $0x1778] sm:$0xff]  ;;  %1831 = vst [vmem:[%s4316_s20 + $0x1660] sm:$0xff] %v1703_v23 }
 0x1c9   : > { %v1708_v32 = vadd.f32 %v9548_v46, %v1580_v1  ;;  %v1583_v13 = vld [vmem:[%s4289_s24 + $0x1860] sm:$0xff]  ;;  %1832 = vst [vmem:[%s4316_s20 + $0x1668] sm:$0xff] %v1704_v52  ;;  %1833 = vst [vmem:[%s4316_s20 + $0x1670] sm:$0xff] %v1705_v25  ;;  %v9549_v48 = vld [vmem:[#allocation52_spill] sm:$0xff] }
 0x1ca   : > { %v1709_v19 = vadd.f32 %v9549_v48, %v1581_v36  ;;  %v9550_v42 = vld [vmem:[#allocation53_spill] sm:$0xff]  ;;  %v9551_v50 = vld [vmem:[#allocation54_spill] sm:$0xff]  ;;  %v1584_v38 = vld [vmem:[%s4289_s24 + $0x1868] sm:$0xff]  ;;  %1834 = vst [vmem:[%s4316_s20 + $0x1678] sm:$0xff] %v1706_v24 }
 0x1cb   : > { %v1710_v35 = vadd.f32 %v9550_v42, %v1582_v22  ;;  %v1711_v2 = vadd.f32 %v9551_v50, %v1583_v13  ;;  %v1585_v4 = vld [vmem:[%s4289_s24 + $0x1870] sm:$0xff]  ;;  %v1586_v37 = vld [vmem:[%s4289_s24 + $0x1878] sm:$0xff]  ;;  %1835 = vst [vmem:[%s4316_s20 + $0x1760] sm:$0xff] %v1707_v62  ;;  %1836 = vst [vmem:[%s4316_s20 + $0x1768] sm:$0xff] %v1708_v32 }
 0x1cc   : > { %v9552_v43 = vld [vmem:[#allocation55_spill] sm:$0xff]  ;;  %v9553_v0 = vld [vmem:[#allocation56_spill] sm:$0xff]  ;;  %v9554_v59 = vld [vmem:[#allocation57_spill] sm:$0xff]  ;;  %1837 = vst [vmem:[%s4316_s20 + $0x1770] sm:$0xff] %v1709_v19 }
 0x1cd   : > { %v1712_v61 = vadd.f32 %v9552_v43, %v1584_v38  ;;  %v1713_v40 = vadd.f32 %v9553_v0, %v1585_v4  ;;  %v1714_v45 = vadd.f32 %v9554_v59, %v1586_v37  ;;  %v1587_v18 = vld [vmem:[%s4289_s24 + $0x1960] sm:$0xff]  ;;  %v1588_v54 = vld [vmem:[%s4289_s24 + $0x1968] sm:$0xff]  ;;  %v1589_v47 = vld [vmem:[%s4289_s24 + $0x1970] sm:$0xff]  ;;  %1838 = vst [vmem:[%s4316_s20 + $0x1778] sm:$0xff] %v1710_v35 }
 0x1ce   : > { %1839 = vst [vmem:[%s4316_s20 + $0x1860] sm:$0xff] %v1711_v2  ;;  %v9555_v11 = vld [vmem:[#allocation58_spill] sm:$0xff]  ;;  %v9556_v60 = vld [vmem:[#allocation59_spill] sm:$0xff]  ;;  %v9557_v17 = vld [vmem:[#allocation60_spill] sm:$0xff] }
 0x1cf   : > { %v1715_v57 = vadd.f32 %v9555_v11, %v1587_v18  ;;  %v1716_v14 = vadd.f32 %v9556_v60, %v1588_v54  ;;  %v1717_v56 = vadd.f32 %v9557_v17, %v1589_v47  ;;  %v1590_v7 = vld [vmem:[%s4289_s24 + $0x1978] sm:$0xff]  ;;  %v1591_v15 = vld [vmem:[%s4289_s24 + $0x1a60] sm:$0xff]  ;;  %v1592_v39 = vld [vmem:[%s4289_s24 + $0x1a68] sm:$0xff]  ;;  %1840 = vst [vmem:[%s4316_s20 + $0x1868] sm:$0xff] %v1712_v61 }
 0x1d0   : > { %1841 = vst [vmem:[%s4316_s20 + $0x1870] sm:$0xff] %v1713_v40  ;;  %1842 = vst [vmem:[%s4316_s20 + $0x1878] sm:$0xff] %v1714_v45  ;;  %v9558_v16 = vld [vmem:[#allocation61_spill] sm:$0xff]  ;;  %v9559_v26 = vld [vmem:[#allocation62_spill] sm:$0xff] }
 0x1d1   : > { %v1718_v10 = vadd.f32 %v9558_v16, %v1590_v7  ;;  %v1719_v53 = vadd.f32 %v9559_v26, %v1591_v15  ;;  %v9560_v63 = vld [vmem:[#allocation63_spill] sm:$0xff]  ;;  %v1593_v6 = vld [vmem:[%s4289_s24 + $0x1a70] sm:$0xff]  ;;  %v1594_v44 = vld [vmem:[%s4289_s24 + $0x1a78] sm:$0xff]  ;;  %1843 = vst [vmem:[%s4316_s20 + $0x1960] sm:$0xff] %v1715_v57 }
 0x1d2   : > { %v1720_v27 = vadd.f32 %v9560_v63, %v1592_v39  ;;  %v1595_v29 = vld [vmem:[%s4289_s24 + $0x1b60] sm:$0xff]  ;;  %1844 = vst [vmem:[%s4316_s20 + $0x1968] sm:$0xff] %v1716_v14  ;;  %1845 = vst [vmem:[%s4316_s20 + $0x1970] sm:$0xff] %v1717_v56  ;;  %v9561_v34 = vld [vmem:[#allocation64_spill] sm:$0xff] }
 0x1d3   : > { %v1721_v41 = vadd.f32 %v9561_v34, %v1593_v6  ;;  %v9562_v51 = vld [vmem:[#allocation65_spill] sm:$0xff]  ;;  %v9563_v20 = vld [vmem:[#allocation66_spill] sm:$0xff]  ;;  %v1596_v58 = vld [vmem:[%s4289_s24 + $0x1b68] sm:$0xff]  ;;  %1846 = vst [vmem:[%s4316_s20 + $0x1978] sm:$0xff] %v1718_v10 }
 0x1d4   : > { %v1722_v3 = vadd.f32 %v9562_v51, %v1594_v44  ;;  %v1723_v55 = vadd.f32 %v9563_v20, %v1595_v29  ;;  %v1597_v8 = vld [vmem:[%s4289_s24 + $0x1b70] sm:$0xff]  ;;  %v1598_v31 = vld [vmem:[%s4289_s24 + $0x1b78] sm:$0xff]  ;;  %1847 = vst [vmem:[%s4316_s20 + $0x1a60] sm:$0xff] %v1719_v53  ;;  %1848 = vst [vmem:[%s4316_s20 + $0x1a68] sm:$0xff] %v1720_v27 }
 0x1d5   : > { %v9564_v5 = vld [vmem:[#allocation67_spill] sm:$0xff]  ;;  %v9565_v49 = vld [vmem:[#allocation68_spill] sm:$0xff]  ;;  %v9566_v12 = vld [vmem:[#allocation69_spill] sm:$0xff]  ;;  %1849 = vst [vmem:[%s4316_s20 + $0x1a70] sm:$0xff] %v1721_v41 }
 0x1d6   : > { %v1724_v23 = vadd.f32 %v9564_v5, %v1596_v58  ;;  %v1725_v52 = vadd.f32 %v9565_v49, %v1597_v8  ;;  %v1726_v25 = vadd.f32 %v9566_v12, %v1598_v31  ;;  %v1599_v9 = vld [vmem:[%s4289_s24 + $0x1c60] sm:$0xff]  ;;  %v1600_v21 = vld [vmem:[%s4289_s24 + $0x1c68] sm:$0xff]  ;;  %v1601_v1 = vld [vmem:[%s4289_s24 + $0x1c70] sm:$0xff]  ;;  %1850 = vst [vmem:[%s4316_s20 + $0x1a78] sm:$0xff] %v1722_v3 }
 0x1d7   : > { %1851 = vst [vmem:[%s4316_s20 + $0x1b60] sm:$0xff] %v1723_v55  ;;  %v9567_v30 = vld [vmem:[#allocation70_spill] sm:$0xff]  ;;  %v9568_v28 = vld [vmem:[#allocation71_spill] sm:$0xff]  ;;  %v9569_v46 = vld [vmem:[#allocation72_spill] sm:$0xff] }
 0x1d8   : > { %v1727_v24 = vadd.f32 %v9567_v30, %v1599_v9  ;;  %v1728_v62 = vadd.f32 %v9568_v28, %v1600_v21  ;;  %v1729_v32 = vadd.f32 %v9569_v46, %v1601_v1  ;;  %v1602_v36 = vld [vmem:[%s4289_s24 + $0x1c78] sm:$0xff]  ;;  %v1603_v22 = vld [vmem:[%s4289_s24 + $0x1d60] sm:$0xff]  ;;  %v1604_v13 = vld [vmem:[%s4289_s24 + $0x1d68] sm:$0xff]  ;;  %1852 = vst [vmem:[%s4316_s20 + $0x1b68] sm:$0xff] %v1724_v23 }
 0x1d9   : > { %1853 = vst [vmem:[%s4316_s20 + $0x1b70] sm:$0xff] %v1725_v52  ;;  %1854 = vst [vmem:[%s4316_s20 + $0x1b78] sm:$0xff] %v1726_v25  ;;  %v9570_v48 = vld [vmem:[#allocation73_spill] sm:$0xff]  ;;  %v9571_v42 = vld [vmem:[#allocation74_spill] sm:$0xff] }
 0x1da   : > { %v1730_v19 = vadd.f32 %v9570_v48, %v1602_v36  ;;  %v1731_v35 = vadd.f32 %v9571_v42, %v1603_v22  ;;  %v9572_v50 = vld [vmem:[#allocation75_spill] sm:$0xff]  ;;  %v1605_v38 = vld [vmem:[%s4289_s24 + $0x1d70] sm:$0xff]  ;;  %v1606_v4 = vld [vmem:[%s4289_s24 + $0x1d78] sm:$0xff]  ;;  %1855 = vst [vmem:[%s4316_s20 + $0x1c60] sm:$0xff] %v1727_v24 }
 0x1db   : > { %v1732_v2 = vadd.f32 %v9572_v50, %v1604_v13  ;;  %v1607_v37 = vld [vmem:[%s4289_s24 + $0x1e60] sm:$0xff]  ;;  %1856 = vst [vmem:[%s4316_s20 + $0x1c68] sm:$0xff] %v1728_v62  ;;  %1857 = vst [vmem:[%s4316_s20 + $0x1c70] sm:$0xff] %v1729_v32  ;;  %v9573_v43 = vld [vmem:[#allocation76_spill] sm:$0xff] }
 0x1dc   : > { %v1733_v61 = vadd.f32 %v9573_v43, %v1605_v38  ;;  %v9574_v0 = vld [vmem:[#allocation77_spill] sm:$0xff]  ;;  %v9575_v59 = vld [vmem:[#allocation78_spill] sm:$0xff]  ;;  %v1608_v18 = vld [vmem:[%s4289_s24 + $0x1e68] sm:$0xff]  ;;  %1858 = vst [vmem:[%s4316_s20 + $0x1c78] sm:$0xff] %v1730_v19 }
 0x1dd   : > { %v1734_v40 = vadd.f32 %v9574_v0, %v1606_v4  ;;  %v1735_v45 = vadd.f32 %v9575_v59, %v1607_v37  ;;  %v1609_v54 = vld [vmem:[%s4289_s24 + $0x1e70] sm:$0xff]  ;;  %v1610_v47 = vld [vmem:[%s4289_s24 + $0x1e78] sm:$0xff]  ;;  %1859 = vst [vmem:[%s4316_s20 + $0x1d60] sm:$0xff] %v1731_v35  ;;  %1860 = vst [vmem:[%s4316_s20 + $0x1d68] sm:$0xff] %v1732_v2 }
 0x1de   : > { %v9576_v11 = vld [vmem:[#allocation79_spill] sm:$0xff]  ;;  %v9577_v60 = vld [vmem:[#allocation80_spill] sm:$0xff]  ;;  %v9578_v17 = vld [vmem:[#allocation81_spill] sm:$0xff]  ;;  %1861 = vst [vmem:[%s4316_s20 + $0x1d70] sm:$0xff] %v1733_v61 }
 0x1df   : > { %v1736_v57 = vadd.f32 %v9576_v11, %v1608_v18  ;;  %v1737_v14 = vadd.f32 %v9577_v60, %v1609_v54  ;;  %v1738_v56 = vadd.f32 %v9578_v17, %v1610_v47  ;;  %v1611_v7 = vld [vmem:[%s4289_s24 + $0x1f60] sm:$0xff]  ;;  %v1612_v15 = vld [vmem:[%s4289_s24 + $0x1f68] sm:$0xff]  ;;  %v1613_v39 = vld [vmem:[%s4289_s24 + $0x1f70] sm:$0xff]  ;;  %1862 = vst [vmem:[%s4316_s20 + $0x1d78] sm:$0xff] %v1734_v40 }
 0x1e0   : > { %1863 = vst [vmem:[%s4316_s20 + $0x1e60] sm:$0xff] %v1735_v45  ;;  %v9579_v16 = vld [vmem:[#allocation82_spill] sm:$0xff]  ;;  %v9580_v26 = vld [vmem:[#allocation83_spill] sm:$0xff]  ;;  %v9581_v63 = vld [vmem:[#allocation84_spill] sm:$0xff] }
 0x1e1   : > { %v1739_v10 = vadd.f32 %v9579_v16, %v1611_v7  ;;  %v1740_v53 = vadd.f32 %v9580_v26, %v1612_v15  ;;  %v1741_v27 = vadd.f32 %v9581_v63, %v1613_v39  ;;  %v1614_v6 = vld [vmem:[%s4289_s24 + $0x1f78] sm:$0xff]  ;;  %v1871_v44 = vld [vmem:[%s4289_s24 + $0x80] sm:$0xff]  ;;  %v1872_v29 = vld [vmem:[%s4289_s24 + $0x88] sm:$0xff]  ;;  %1864 = vst [vmem:[%s4316_s20 + $0x1e68] sm:$0xff] %v1736_v57 }
 0x1e2   : > { %1865 = vst [vmem:[%s4316_s20 + $0x1e70] sm:$0xff] %v1737_v14  ;;  %1866 = vst [vmem:[%s4316_s20 + $0x1e78] sm:$0xff] %v1738_v56  ;;  %v9582_v34 = vld [vmem:[#allocation85_spill] sm:$0xff]  ;;  %v9583_v51 = vld [vmem:[#allocation86_spill] sm:$0xff] }
 0x1e3   : > { %v1742_v41 = vadd.f32 %v9582_v34, %v1614_v6  ;;  %v1999_v3 = vadd.f32 %v9583_v51, %v1871_v44  ;;  %v9584_v20 = vld [vmem:[#allocation87_spill] sm:$0xff]  ;;  %v1873_v58 = vld [vmem:[%s4289_s24 + $0x90] sm:$0xff]  ;;  %v1874_v8 = vld [vmem:[%s4289_s24 + $0x98] sm:$0xff]  ;;  %1867 = vst [vmem:[%s4316_s20 + $0x1f60] sm:$0xff] %v1739_v10 }
 0x1e4   : > { %v2000_v55 = vadd.f32 %v9584_v20, %v1872_v29  ;;  %v1875_v31 = vld [vmem:[%s4289_s24 + $0x180] sm:$0xff]  ;;  %1868 = vst [vmem:[%s4316_s20 + $0x1f68] sm:$0xff] %v1740_v53  ;;  %1869 = vst [vmem:[%s4316_s20 + $0x1f70] sm:$0xff] %v1741_v27  ;;  %v9585_v5 = vld [vmem:[#allocation88_spill] sm:$0xff] }
 0x1e5   : > { %v2001_v23 = vadd.f32 %v9585_v5, %v1873_v58  ;;  %v6617_v49 = vld [vmem:[%s4297_s5 + $0x18] sm:$0xff]  ;;  %v6621_v12 = vld [vmem:[%s4297_s5 + $0x20] sm:$0xff]  ;;  %v1876_v9 = vld [vmem:[%s4289_s24 + $0x188] sm:$0xff]  ;;  %1870 = vst [vmem:[%s4316_s20 + $0x1f78] sm:$0xff] %v1742_v41 }
 0x1e6   : > { %v2002_v52 = vadd.f32 %v6617_v49, %v1874_v8  ;;  %v2003_v25 = vadd.f32 %v6621_v12, %v1875_v31  ;;  %v1877_v21 = vld [vmem:[%s4289_s24 + $0x190] sm:$0xff]  ;;  %v1878_v1 = vld [vmem:[%s4289_s24 + $0x198] sm:$0xff]  ;;  %2127 = vst [vmem:[%s4316_s20 + $0x80] sm:$0xff] %v1999_v3  ;;  %2128 = vst [vmem:[%s4316_s20 + $0x88] sm:$0xff] %v2000_v55  ;;  %v2004_v30 = vadd.f32 %v6236_v33, %v1876_v9 }
 0x1e7   : > { %v6632_v24 = vld [vmem:[%s4297_s5 + $0x30] sm:$0xff]  ;;  %v6636_v62 = vld [vmem:[%s4297_s5 + $0x38] sm:$0xff]  ;;  %v1879_v32 = vld [vmem:[%s4289_s24 + $0x280] sm:$0xff]  ;;  %2129 = vst [vmem:[%s4316_s20 + $0x90] sm:$0xff] %v2001_v23 }
 0x1e8   : > { %v2005_v28 = vadd.f32 %v6632_v24, %v1877_v21  ;;  %v2006_v46 = vadd.f32 %v6636_v62, %v1878_v1  ;;  %v1880_v36 = vld [vmem:[%s4289_s24 + $0x288] sm:$0xff]  ;;  %v1881_v22 = vld [vmem:[%s4289_s24 + $0x290] sm:$0xff]  ;;  %2130 = vst [vmem:[%s4316_s20 + $0x98] sm:$0xff] %v2002_v52  ;;  %2131 = vst [vmem:[%s4316_s20 + $0x180] sm:$0xff] %v2003_v25 }
 0x1e9   : > { %v6646_v33 = vld [vmem:[%s4297_s5 + $0x40] sm:$0xff]  ;;  %v6650_v48 = vld [vmem:[%s4297_s5 + $0x48] sm:$0xff]  ;;  %v6654_v42 = vld [vmem:[%s4297_s5 + $0x50] sm:$0xff]  ;;  %2132 = vst [vmem:[%s4316_s20 + $0x188] sm:$0xff] %v2004_v30 }
 0x1ea   : > { %v2007_v13 = vadd.f32 %v6646_v33, %v1879_v32  ;;  %v2008_v19 = vadd.f32 %v6650_v48, %v1880_v36  ;;  %v2009_v35 = vadd.f32 %v6654_v42, %v1881_v22  ;;  %v1882_v50 = vld [vmem:[%s4289_s24 + $0x298] sm:$0xff]  ;;  %v1883_v2 = vld [vmem:[%s4289_s24 + $0x380] sm:$0xff]  ;;  %v1884_v38 = vld [vmem:[%s4289_s24 + $0x388] sm:$0xff]  ;;  %2133 = vst [vmem:[%s4316_s20 + $0x190] sm:$0xff] %v2005_v28 }
 0x1eb   : > { %2134 = vst [vmem:[%s4316_s20 + $0x198] sm:$0xff] %v2006_v46  ;;  %v6664_v4 = vld [vmem:[%s4297_s5 + $0x58] sm:$0xff]  ;;  %v6668_v43 = vld [vmem:[%s4297_s5 + $0x60] sm:$0xff]  ;;  %v6672_v0 = vld [vmem:[%s4297_s5 + $0x68] sm:$0xff] }
 0x1ec   : > { %v2010_v37 = vadd.f32 %v6664_v4, %v1882_v50  ;;  %v2011_v61 = vadd.f32 %v6668_v43, %v1883_v2  ;;  %v2012_v40 = vadd.f32 %v6672_v0, %v1884_v38  ;;  %v1885_v59 = vld [vmem:[%s4289_s24 + $0x390] sm:$0xff]  ;;  %v1886_v45 = vld [vmem:[%s4289_s24 + $0x398] sm:$0xff]  ;;  %v1887_v18 = vld [vmem:[%s4289_s24 + $0x480] sm:$0xff]  ;;  %2135 = vst [vmem:[%s4316_s20 + $0x280] sm:$0xff] %v2007_v13 }
 0x1ed   : > { %2136 = vst [vmem:[%s4316_s20 + $0x288] sm:$0xff] %v2008_v19  ;;  %2137 = vst [vmem:[%s4316_s20 + $0x290] sm:$0xff] %v2009_v35  ;;  %v6682_v54 = vld [vmem:[%s4297_s5 + $0x70] sm:$0xff]  ;;  %v6686_v11 = vld [vmem:[%s4297_s5 + $0x78] sm:$0xff] }
 0x1ee   : > { %v2013_v47 = vadd.f32 %v6682_v54, %v1885_v59  ;;  %v2014_v57 = vadd.f32 %v6686_v11, %v1886_v45  ;;  %v6690_v60 = vld [vmem:[%s4297_s5 + $0x80] sm:$0xff]  ;;  %v1888_v17 = vld [vmem:[%s4289_s24 + $0x488] sm:$0xff]  ;;  %v1889_v56 = vld [vmem:[%s4289_s24 + $0x490] sm:$0xff]  ;;  %2138 = vst [vmem:[%s4316_s20 + $0x298] sm:$0xff] %v2010_v37 }
 0x1ef   : > { %v2015_v14 = vadd.f32 %v6690_v60, %v1887_v18  ;;  %v1890_v7 = vld [vmem:[%s4289_s24 + $0x498] sm:$0xff]  ;;  %2139 = vst [vmem:[%s4316_s20 + $0x380] sm:$0xff] %v2011_v61  ;;  %2140 = vst [vmem:[%s4316_s20 + $0x388] sm:$0xff] %v2012_v40  ;;  %v6700_v15 = vld [vmem:[%s4297_s5 + $0x88] sm:$0xff] }
 0x1f0   : > { %v2016_v39 = vadd.f32 %v6700_v15, %v1888_v17  ;;  %v6704_v16 = vld [vmem:[%s4297_s5 + $0x90] sm:$0xff]  ;;  %v6708_v26 = vld [vmem:[%s4297_s5 + $0x98] sm:$0xff]  ;;  %v1891_v63 = vld [vmem:[%s4289_s24 + $0x580] sm:$0xff]  ;;  %2141 = vst [vmem:[%s4316_s20 + $0x390] sm:$0xff] %v2013_v47 }
 0x1f1   : > { %v2017_v10 = vadd.f32 %v6704_v16, %v1889_v56  ;;  %v2018_v53 = vadd.f32 %v6708_v26, %v1890_v7  ;;  %v1892_v27 = vld [vmem:[%s4289_s24 + $0x588] sm:$0xff]  ;;  %v1893_v6 = vld [vmem:[%s4289_s24 + $0x590] sm:$0xff]  ;;  %2142 = vst [vmem:[%s4316_s20 + $0x398] sm:$0xff] %v2014_v57  ;;  %2143 = vst [vmem:[%s4316_s20 + $0x480] sm:$0xff] %v2015_v14 }
 0x1f2   : > { %v6718_v44 = vld [vmem:[%s4297_s5 + $0xa0] sm:$0xff]  ;;  %v6722_v34 = vld [vmem:[%s4297_s5 + $0xa8] sm:$0xff]  ;;  %v6726_v51 = vld [vmem:[%s4297_s5 + $0xb0] sm:$0xff]  ;;  %2144 = vst [vmem:[%s4316_s20 + $0x488] sm:$0xff] %v2016_v39 }
 0x1f3   : > { %v2019_v29 = vadd.f32 %v6718_v44, %v1891_v63  ;;  %v2020_v41 = vadd.f32 %v6722_v34, %v1892_v27  ;;  %v2021_v3 = vadd.f32 %v6726_v51, %v1893_v6  ;;  %v1894_v20 = vld [vmem:[%s4289_s24 + $0x598] sm:$0xff]  ;;  %v1895_v55 = vld [vmem:[%s4289_s24 + $0x680] sm:$0xff]  ;;  %v1896_v58 = vld [vmem:[%s4289_s24 + $0x688] sm:$0xff]  ;;  %2145 = vst [vmem:[%s4316_s20 + $0x490] sm:$0xff] %v2017_v10 }
 0x1f4   : > { %2146 = vst [vmem:[%s4316_s20 + $0x498] sm:$0xff] %v2018_v53  ;;  %v6736_v8 = vld [vmem:[%s4297_s5 + $0xb8] sm:$0xff]  ;;  %v6740_v5 = vld [vmem:[%s4297_s5 + $0xc0] sm:$0xff]  ;;  %v6744_v52 = vld [vmem:[%s4297_s5 + $0xc8] sm:$0xff] }
 0x1f5   : > { %v2022_v31 = vadd.f32 %v6736_v8, %v1894_v20  ;;  %v2023_v23 = vadd.f32 %v6740_v5, %v1895_v55  ;;  %v2024_v25 = vadd.f32 %v6744_v52, %v1896_v58  ;;  %v1897_v9 = vld [vmem:[%s4289_s24 + $0x690] sm:$0xff]  ;;  %v1898_v21 = vld [vmem:[%s4289_s24 + $0x698] sm:$0xff]  ;;  %v1899_v1 = vld [vmem:[%s4289_s24 + $0x780] sm:$0xff]  ;;  %2147 = vst [vmem:[%s4316_s20 + $0x580] sm:$0xff] %v2019_v29 }
 0x1f6   : > { %2148 = vst [vmem:[%s4316_s20 + $0x588] sm:$0xff] %v2020_v41  ;;  %2149 = vst [vmem:[%s4316_s20 + $0x590] sm:$0xff] %v2021_v3  ;;  %v6754_v30 = vld [vmem:[%s4297_s5 + $0xd0] sm:$0xff]  ;;  %v6758_v46 = vld [vmem:[%s4297_s5 + $0xd8] sm:$0xff] }
 0x1f7   : > { %v2025_v28 = vadd.f32 %v6754_v30, %v1897_v9  ;;  %v2026_v32 = vadd.f32 %v6758_v46, %v1898_v21  ;;  %v6762_v36 = vld [vmem:[%s4297_s5 + $0xe0] sm:$0xff]  ;;  %v1900_v13 = vld [vmem:[%s4289_s24 + $0x788] sm:$0xff]  ;;  %v1901_v19 = vld [vmem:[%s4289_s24 + $0x790] sm:$0xff]  ;;  %2150 = vst [vmem:[%s4316_s20 + $0x598] sm:$0xff] %v2022_v31 }
 0x1f8   : > { %v2027_v22 = vadd.f32 %v6762_v36, %v1899_v1  ;;  %v1902_v35 = vld [vmem:[%s4289_s24 + $0x798] sm:$0xff]  ;;  %2151 = vst [vmem:[%s4316_s20 + $0x680] sm:$0xff] %v2023_v23  ;;  %2152 = vst [vmem:[%s4316_s20 + $0x688] sm:$0xff] %v2024_v25  ;;  %v6772_v50 = vld [vmem:[%s4297_s5 + $0xe8] sm:$0xff] }
 0x1f9   : > { %v2028_v2 = vadd.f32 %v6772_v50, %v1900_v13  ;;  %v6776_v38 = vld [vmem:[%s4297_s5 + $0xf0] sm:$0xff]  ;;  %v6780_v61 = vld [vmem:[%s4297_s5 + $0xf8] sm:$0xff]  ;;  %v1903_v59 = vld [vmem:[%s4289_s24 + $0x880] sm:$0xff]  ;;  %2153 = vst [vmem:[%s4316_s20 + $0x690] sm:$0xff] %v2025_v28 }
 0x1fa   : > { %v2029_v37 = vadd.f32 %v6776_v38, %v1901_v19  ;;  %v2030_v40 = vadd.f32 %v6780_v61, %v1902_v35  ;;  %v1904_v45 = vld [vmem:[%s4289_s24 + $0x888] sm:$0xff]  ;;  %v1905_v18 = vld [vmem:[%s4289_s24 + $0x890] sm:$0xff]  ;;  %2154 = vst [vmem:[%s4316_s20 + $0x698] sm:$0xff] %v2026_v32  ;;  %2155 = vst [vmem:[%s4316_s20 + $0x780] sm:$0xff] %v2027_v22 }
 0x1fb   : > { %v6790_v47 = vld [vmem:[%s4297_s5 + $0x100] sm:$0xff]  ;;  %v6794_v14 = vld [vmem:[%s4297_s5 + $0x108] sm:$0xff]  ;;  %v6798_v56 = vld [vmem:[%s4297_s5 + $0x110] sm:$0xff]  ;;  %2156 = vst [vmem:[%s4316_s20 + $0x788] sm:$0xff] %v2028_v2 }
 0x1fc   : > { %v2031_v57 = vadd.f32 %v6790_v47, %v1903_v59  ;;  %v2032_v17 = vadd.f32 %v6794_v14, %v1904_v45  ;;  %v2033_v7 = vadd.f32 %v6798_v56, %v1905_v18  ;;  %v1906_v39 = vld [vmem:[%s4289_s24 + $0x898] sm:$0xff]  ;;  %v1907_v10 = vld [vmem:[%s4289_s24 + $0x980] sm:$0xff]  ;;  %v1908_v53 = vld [vmem:[%s4289_s24 + $0x988] sm:$0xff]  ;;  %2157 = vst [vmem:[%s4316_s20 + $0x790] sm:$0xff] %v2029_v37 }
 0x1fd   : > { %2158 = vst [vmem:[%s4316_s20 + $0x798] sm:$0xff] %v2030_v40  ;;  %v6808_v63 = vld [vmem:[%s4297_s5 + $0x118] sm:$0xff]  ;;  %v6812_v6 = vld [vmem:[%s4297_s5 + $0x120] sm:$0xff]  ;;  %v6816_v41 = vld [vmem:[%s4297_s5 + $0x128] sm:$0xff] }
 0x1fe   : > { %v2034_v27 = vadd.f32 %v6808_v63, %v1906_v39  ;;  %v2035_v29 = vadd.f32 %v6812_v6, %v1907_v10  ;;  %v2036_v3 = vadd.f32 %v6816_v41, %v1908_v53  ;;  %v1909_v20 = vld [vmem:[%s4289_s24 + $0x990] sm:$0xff]  ;;  %v1910_v55 = vld [vmem:[%s4289_s24 + $0x998] sm:$0xff]  ;;  %v1911_v58 = vld [vmem:[%s4289_s24 + $0xa80] sm:$0xff]  ;;  %2159 = vst [vmem:[%s4316_s20 + $0x880] sm:$0xff] %v2031_v57 }
 0x1ff   : > { %2160 = vst [vmem:[%s4316_s20 + $0x888] sm:$0xff] %v2032_v17  ;;  %2161 = vst [vmem:[%s4316_s20 + $0x890] sm:$0xff] %v2033_v7  ;;  %v6826_v31 = vld [vmem:[%s4297_s5 + $0x130] sm:$0xff]  ;;  %v6830_v25 = vld [vmem:[%s4297_s5 + $0x138] sm:$0xff] }
 0x200   : > { %v2037_v23 = vadd.f32 %v6826_v31, %v1909_v20  ;;  %v2038_v9 = vadd.f32 %v6830_v25, %v1910_v55  ;;  %v6834_v21 = vld [vmem:[%s4297_s5 + $0x140] sm:$0xff]  ;;  %v1912_v28 = vld [vmem:[%s4289_s24 + $0xa88] sm:$0xff]  ;;  %v1913_v32 = vld [vmem:[%s4289_s24 + $0xa90] sm:$0xff]  ;;  %2162 = vst [vmem:[%s4316_s20 + $0x898] sm:$0xff] %v2034_v27 }
 0x201   : > { %v2039_v1 = vadd.f32 %v6834_v21, %v1911_v58  ;;  %v1914_v22 = vld [vmem:[%s4289_s24 + $0xa98] sm:$0xff]  ;;  %2163 = vst [vmem:[%s4316_s20 + $0x980] sm:$0xff] %v2035_v29  ;;  %2164 = vst [vmem:[%s4316_s20 + $0x988] sm:$0xff] %v2036_v3  ;;  %v6844_v13 = vld [vmem:[%s4297_s5 + $0x148] sm:$0xff] }
 0x202   : > { %v2040_v19 = vadd.f32 %v6844_v13, %v1912_v28  ;;  %v6848_v35 = vld [vmem:[%s4297_s5 + $0x150] sm:$0xff]  ;;  %v6852_v37 = vld [vmem:[%s4297_s5 + $0x158] sm:$0xff]  ;;  %v1915_v59 = vld [vmem:[%s4289_s24 + $0xb80] sm:$0xff]  ;;  %2165 = vst [vmem:[%s4316_s20 + $0x990] sm:$0xff] %v2037_v23 }
 0x203   : > { %v2041_v2 = vadd.f32 %v6848_v35, %v1913_v32  ;;  %v2042_v40 = vadd.f32 %v6852_v37, %v1914_v22  ;;  %v1916_v45 = vld [vmem:[%s4289_s24 + $0xb88] sm:$0xff]  ;;  %v1917_v18 = vld [vmem:[%s4289_s24 + $0xb90] sm:$0xff]  ;;  %2166 = vst [vmem:[%s4316_s20 + $0x998] sm:$0xff] %v2038_v9  ;;  %2167 = vst [vmem:[%s4316_s20 + $0xa80] sm:$0xff] %v2039_v1 }
 0x204   : > { %v6862_v57 = vld [vmem:[%s4297_s5 + $0x160] sm:$0xff]  ;;  %v6866_v7 = vld [vmem:[%s4297_s5 + $0x168] sm:$0xff]  ;;  %v6870_v10 = vld [vmem:[%s4297_s5 + $0x170] sm:$0xff]  ;;  %2168 = vst [vmem:[%s4316_s20 + $0xa88] sm:$0xff] %v2040_v19 }
 0x205   : > { %v2043_v17 = vadd.f32 %v6862_v57, %v1915_v59  ;;  %v2044_v39 = vadd.f32 %v6866_v7, %v1916_v45  ;;  %v2045_v53 = vadd.f32 %v6870_v10, %v1917_v18  ;;  %v1918_v27 = vld [vmem:[%s4289_s24 + $0xb98] sm:$0xff]  ;;  %v1919_v29 = vld [vmem:[%s4289_s24 + $0xc80] sm:$0xff]  ;;  %v1920_v3 = vld [vmem:[%s4289_s24 + $0xc88] sm:$0xff]  ;;  %2169 = vst [vmem:[%s4316_s20 + $0xa90] sm:$0xff] %v2041_v2 }
 0x206   : > { %2170 = vst [vmem:[%s4316_s20 + $0xa98] sm:$0xff] %v2042_v40  ;;  %v6880_v20 = vld [vmem:[%s4297_s5 + $0x178] sm:$0xff]  ;;  %v6884_v58 = vld [vmem:[%s4297_s5 + $0x180] sm:$0xff]  ;;  %v6888_v9 = vld [vmem:[%s4297_s5 + $0x188] sm:$0xff] }
 0x207   : > { %v2046_v55 = vadd.f32 %v6880_v20, %v1918_v27  ;;  %v2047_v23 = vadd.f32 %v6884_v58, %v1919_v29  ;;  %v2048_v1 = vadd.f32 %v6888_v9, %v1920_v3  ;;  %v1921_v28 = vld [vmem:[%s4289_s24 + $0xc90] sm:$0xff]  ;;  %v1922_v32 = vld [vmem:[%s4289_s24 + $0xc98] sm:$0xff]  ;;  %v1923_v22 = vld [vmem:[%s4289_s24 + $0xd80] sm:$0xff]  ;;  %2171 = vst [vmem:[%s4316_s20 + $0xb80] sm:$0xff] %v2043_v17 }
 0x208   : > { %2172 = vst [vmem:[%s4316_s20 + $0xb88] sm:$0xff] %v2044_v39  ;;  %2173 = vst [vmem:[%s4316_s20 + $0xb90] sm:$0xff] %v2045_v53  ;;  %v6898_v19 = vld [vmem:[%s4297_s5 + $0x190] sm:$0xff]  ;;  %v6902_v40 = vld [vmem:[%s4297_s5 + $0x198] sm:$0xff] }
 0x209   : > { %v2049_v2 = vadd.f32 %v6898_v19, %v1921_v28  ;;  %v2050_v59 = vadd.f32 %v6902_v40, %v1922_v32  ;;  %v6906_v45 = vld [vmem:[%s4297_s5 + $0x1a0] sm:$0xff]  ;;  %v1924_v17 = vld [vmem:[%s4289_s24 + $0xd88] sm:$0xff]  ;;  %v1925_v39 = vld [vmem:[%s4289_s24 + $0xd90] sm:$0xff]  ;;  %2174 = vst [vmem:[%s4316_s20 + $0xb98] sm:$0xff] %v2046_v55 }
 0x20a   : > { %9586 = vst [vmem:[#allocation11_spill] sm:$0xff] %v6906_v45  ;;  %v2051_v18 = vadd.f32 %v6906_v45, %v1923_v22  ;;  %v1926_v53 = vld [vmem:[%s4289_s24 + $0xd98] sm:$0xff]  ;;  %2175 = vst [vmem:[%s4316_s20 + $0xc80] sm:$0xff] %v2047_v23  ;;  %v6916_v27 = vld [vmem:[%s4297_s5 + $0x1a8] sm:$0xff] }
 0x20b   : > { %2176 = vst [vmem:[%s4316_s20 + $0xc88] sm:$0xff] %v2048_v1  ;;  %9587 = vst [vmem:[#allocation12_spill] sm:$0xff] %v6916_v27  ;;  %v2052_v29 = vadd.f32 %v6916_v27, %v1924_v17  ;;  %v6920_v3 = vld [vmem:[%s4297_s5 + $0x1b0] sm:$0xff]  ;;  %v6924_v32 = vld [vmem:[%s4297_s5 + $0x1b8] sm:$0xff] }
 0x20c   : > { %9588 = vst [vmem:[#allocation13_spill] sm:$0xff] %v6920_v3  ;;  %v2053_v28 = vadd.f32 %v6920_v3, %v1925_v39  ;;  %9589 = vst [vmem:[#allocation14_spill] sm:$0xff] %v6924_v32  ;;  %v2054_v22 = vadd.f32 %v6924_v32, %v1926_v53  ;;  %v1927_v55 = vld [vmem:[%s4289_s24 + $0xe80] sm:$0xff]  ;;  %v1928_v23 = vld [vmem:[%s4289_s24 + $0xe88] sm:$0xff] }
 0x20d   : > { %v1929_v1 = vld [vmem:[%s4289_s24 + $0xe90] sm:$0xff]  ;;  %2177 = vst [vmem:[%s4316_s20 + $0xc90] sm:$0xff] %v2049_v2  ;;  %2178 = vst [vmem:[%s4316_s20 + $0xc98] sm:$0xff] %v2050_v59  ;;  %v6934_v17 = vld [vmem:[%s4297_s5 + $0x1c0] sm:$0xff] }
 0x20e   : > { %2179 = vst [vmem:[%s4316_s20 + $0xd80] sm:$0xff] %v2051_v18  ;;  %9590 = vst [vmem:[#allocation15_spill] sm:$0xff] %v6934_v17  ;;  %v2055_v39 = vadd.f32 %v6934_v17, %v1927_v55  ;;  %v6938_v3 = vld [vmem:[%s4297_s5 + $0x1c8] sm:$0xff]  ;;  %v6942_v32 = vld [vmem:[%s4297_s5 + $0x1d0] sm:$0xff] }
 0x20f   : > { %9591 = vst [vmem:[#allocation16_spill] sm:$0xff] %v6938_v3  ;;  %v2056_v53 = vadd.f32 %v6938_v3, %v1928_v23  ;;  %9592 = vst [vmem:[#allocation17_spill] sm:$0xff] %v6942_v32  ;;  %v2057_v27 = vadd.f32 %v6942_v32, %v1929_v1  ;;  %v1930_v2 = vld [vmem:[%s4289_s24 + $0xe98] sm:$0xff]  ;;  %v1931_v59 = vld [vmem:[%s4289_s24 + $0xf80] sm:$0xff] }
 0x210   : > { %v1932_v18 = vld [vmem:[%s4289_s24 + $0xf88] sm:$0xff]  ;;  %2180 = vst [vmem:[%s4316_s20 + $0xd88] sm:$0xff] %v2052_v29  ;;  %2181 = vst [vmem:[%s4316_s20 + $0xd90] sm:$0xff] %v2053_v28  ;;  %v6952_v55 = vld [vmem:[%s4297_s5 + $0x1d8] sm:$0xff] }
 0x211   : > { %2182 = vst [vmem:[%s4316_s20 + $0xd98] sm:$0xff] %v2054_v22  ;;  %9593 = vst [vmem:[#allocation18_spill] sm:$0xff] %v6952_v55  ;;  %v2058_v23 = vadd.f32 %v6952_v55, %v1930_v2  ;;  %v6956_v3 = vld [vmem:[%s4297_s5 + $0x1e0] sm:$0xff]  ;;  %v6960_v32 = vld [vmem:[%s4297_s5 + $0x1e8] sm:$0xff] }
 0x212   : > { %9594 = vst [vmem:[#allocation19_spill] sm:$0xff] %v6956_v3  ;;  %v2059_v1 = vadd.f32 %v6956_v3, %v1931_v59  ;;  %9595 = vst [vmem:[#allocation20_spill] sm:$0xff] %v6960_v32  ;;  %v2060_v17 = vadd.f32 %v6960_v32, %v1932_v18  ;;  %v1933_v29 = vld [vmem:[%s4289_s24 + $0xf90] sm:$0xff]  ;;  %v1934_v28 = vld [vmem:[%s4289_s24 + $0xf98] sm:$0xff] }
 0x213   : > { %v1935_v22 = vld [vmem:[%s4289_s24 + $0x1080] sm:$0xff]  ;;  %2183 = vst [vmem:[%s4316_s20 + $0xe80] sm:$0xff] %v2055_v39  ;;  %2184 = vst [vmem:[%s4316_s20 + $0xe88] sm:$0xff] %v2056_v53  ;;  %v6970_v2 = vld [vmem:[%s4297_s5 + $0x1f0] sm:$0xff] }
 0x214   : > { %2185 = vst [vmem:[%s4316_s20 + $0xe90] sm:$0xff] %v2057_v27  ;;  %9596 = vst [vmem:[#allocation21_spill] sm:$0xff] %v6970_v2  ;;  %v2061_v59 = vadd.f32 %v6970_v2, %v1933_v29  ;;  %v6974_v3 = vld [vmem:[%s4297_s5 + $0x1f8] sm:$0xff]  ;;  %v6978_v32 = vld [vmem:[%s4297_s5 + $0x200] sm:$0xff] }
 0x215   : > { %9597 = vst [vmem:[#allocation22_spill] sm:$0xff] %v6974_v3  ;;  %v2062_v18 = vadd.f32 %v6974_v3, %v1934_v28  ;;  %9598 = vst [vmem:[#allocation23_spill] sm:$0xff] %v6978_v32  ;;  %v2063_v55 = vadd.f32 %v6978_v32, %v1935_v22  ;;  %v1936_v39 = vld [vmem:[%s4289_s24 + $0x1088] sm:$0xff]  ;;  %v1937_v27 = vld [vmem:[%s4289_s24 + $0x1090] sm:$0xff] }
 0x216   : > { %v1938_v53 = vld [vmem:[%s4289_s24 + $0x1098] sm:$0xff]  ;;  %2186 = vst [vmem:[%s4316_s20 + $0xe98] sm:$0xff] %v2058_v23  ;;  %2187 = vst [vmem:[%s4316_s20 + $0xf80] sm:$0xff] %v2059_v1  ;;  %v6988_v29 = vld [vmem:[%s4297_s5 + $0x208] sm:$0xff] }
 0x217   : > { %2188 = vst [vmem:[%s4316_s20 + $0xf88] sm:$0xff] %v2060_v17  ;;  %9599 = vst [vmem:[#allocation24_spill] sm:$0xff] %v6988_v29  ;;  %v2064_v28 = vadd.f32 %v6988_v29, %v1936_v39  ;;  %v6992_v3 = vld [vmem:[%s4297_s5 + $0x210] sm:$0xff]  ;;  %v6996_v32 = vld [vmem:[%s4297_s5 + $0x218] sm:$0xff] }
 0x218   : > { %9600 = vst [vmem:[#allocation25_spill] sm:$0xff] %v6992_v3  ;;  %v2065_v22 = vadd.f32 %v6992_v3, %v1937_v27  ;;  %9601 = vst [vmem:[#allocation26_spill] sm:$0xff] %v6996_v32  ;;  %v2066_v2 = vadd.f32 %v6996_v32, %v1938_v53  ;;  %v1939_v23 = vld [vmem:[%s4289_s24 + $0x1180] sm:$0xff]  ;;  %v1940_v17 = vld [vmem:[%s4289_s24 + $0x1188] sm:$0xff] }
 0x219   : > { %v1941_v1 = vld [vmem:[%s4289_s24 + $0x1190] sm:$0xff]  ;;  %2189 = vst [vmem:[%s4316_s20 + $0xf90] sm:$0xff] %v2061_v59  ;;  %2190 = vst [vmem:[%s4316_s20 + $0xf98] sm:$0xff] %v2062_v18  ;;  %v7006_v39 = vld [vmem:[%s4297_s5 + $0x220] sm:$0xff] }
 0x21a   : > { %2191 = vst [vmem:[%s4316_s20 + $0x1080] sm:$0xff] %v2063_v55  ;;  %9602 = vst [vmem:[#allocation27_spill] sm:$0xff] %v7006_v39  ;;  %v2067_v27 = vadd.f32 %v7006_v39, %v1939_v23  ;;  %v7010_v3 = vld [vmem:[%s4297_s5 + $0x228] sm:$0xff]  ;;  %v7014_v32 = vld [vmem:[%s4297_s5 + $0x230] sm:$0xff] }
 0x21b   : > { %9603 = vst [vmem:[#allocation28_spill] sm:$0xff] %v7010_v3  ;;  %v2068_v53 = vadd.f32 %v7010_v3, %v1940_v17  ;;  %9604 = vst [vmem:[#allocation29_spill] sm:$0xff] %v7014_v32  ;;  %v2069_v29 = vadd.f32 %v7014_v32, %v1941_v1  ;;  %v1942_v59 = vld [vmem:[%s4289_s24 + $0x1198] sm:$0xff]  ;;  %v1943_v55 = vld [vmem:[%s4289_s24 + $0x1280] sm:$0xff] }
 0x21c   : > { %v1944_v18 = vld [vmem:[%s4289_s24 + $0x1288] sm:$0xff]  ;;  %2192 = vst [vmem:[%s4316_s20 + $0x1088] sm:$0xff] %v2064_v28  ;;  %2193 = vst [vmem:[%s4316_s20 + $0x1090] sm:$0xff] %v2065_v22  ;;  %v7024_v23 = vld [vmem:[%s4297_s5 + $0x238] sm:$0xff] }
 0x21d   : > { %2194 = vst [vmem:[%s4316_s20 + $0x1098] sm:$0xff] %v2066_v2  ;;  %9605 = vst [vmem:[#allocation30_spill] sm:$0xff] %v7024_v23  ;;  %v2070_v17 = vadd.f32 %v7024_v23, %v1942_v59  ;;  %v7028_v3 = vld [vmem:[%s4297_s5 + $0x240] sm:$0xff]  ;;  %v7032_v32 = vld [vmem:[%s4297_s5 + $0x248] sm:$0xff] }
 0x21e   : > { %9606 = vst [vmem:[#allocation31_spill] sm:$0xff] %v7028_v3  ;;  %v2071_v1 = vadd.f32 %v7028_v3, %v1943_v55  ;;  %9607 = vst [vmem:[#allocation32_spill] sm:$0xff] %v7032_v32  ;;  %v2072_v39 = vadd.f32 %v7032_v32, %v1944_v18  ;;  %v1945_v28 = vld [vmem:[%s4289_s24 + $0x1290] sm:$0xff]  ;;  %v1946_v2 = vld [vmem:[%s4289_s24 + $0x1298] sm:$0xff] }
 0x21f   : > { %v1947_v22 = vld [vmem:[%s4289_s24 + $0x1380] sm:$0xff]  ;;  %2195 = vst [vmem:[%s4316_s20 + $0x1180] sm:$0xff] %v2067_v27  ;;  %2196 = vst [vmem:[%s4316_s20 + $0x1188] sm:$0xff] %v2068_v53  ;;  %v7042_v59 = vld [vmem:[%s4297_s5 + $0x250] sm:$0xff] }
 0x220   : > { %2197 = vst [vmem:[%s4316_s20 + $0x1190] sm:$0xff] %v2069_v29  ;;  %9608 = vst [vmem:[#allocation33_spill] sm:$0xff] %v7042_v59  ;;  %v2073_v55 = vadd.f32 %v7042_v59, %v1945_v28  ;;  %v7046_v3 = vld [vmem:[%s4297_s5 + $0x258] sm:$0xff]  ;;  %v7050_v32 = vld [vmem:[%s4297_s5 + $0x260] sm:$0xff] }
 0x221   : > { %9609 = vst [vmem:[#allocation34_spill] sm:$0xff] %v7046_v3  ;;  %v2074_v18 = vadd.f32 %v7046_v3, %v1946_v2  ;;  %9610 = vst [vmem:[#allocation35_spill] sm:$0xff] %v7050_v32  ;;  %v2075_v23 = vadd.f32 %v7050_v32, %v1947_v22  ;;  %v1948_v27 = vld [vmem:[%s4289_s24 + $0x1388] sm:$0xff]  ;;  %v1949_v29 = vld [vmem:[%s4289_s24 + $0x1390] sm:$0xff] }
 0x222   : > { %v1950_v53 = vld [vmem:[%s4289_s24 + $0x1398] sm:$0xff]  ;;  %2198 = vst [vmem:[%s4316_s20 + $0x1198] sm:$0xff] %v2070_v17  ;;  %2199 = vst [vmem:[%s4316_s20 + $0x1280] sm:$0xff] %v2071_v1  ;;  %v7060_v28 = vld [vmem:[%s4297_s5 + $0x268] sm:$0xff] }
 0x223   : > { %2200 = vst [vmem:[%s4316_s20 + $0x1288] sm:$0xff] %v2072_v39  ;;  %9611 = vst [vmem:[#allocation36_spill] sm:$0xff] %v7060_v28  ;;  %v2076_v2 = vadd.f32 %v7060_v28, %v1948_v27  ;;  %v7064_v3 = vld [vmem:[%s4297_s5 + $0x270] sm:$0xff]  ;;  %v7068_v32 = vld [vmem:[%s4297_s5 + $0x278] sm:$0xff] }
 0x224   : > { %9612 = vst [vmem:[#allocation37_spill] sm:$0xff] %v7064_v3  ;;  %v2077_v22 = vadd.f32 %v7064_v3, %v1949_v29  ;;  %9613 = vst [vmem:[#allocation38_spill] sm:$0xff] %v7068_v32  ;;  %v2078_v59 = vadd.f32 %v7068_v32, %v1950_v53  ;;  %v1951_v17 = vld [vmem:[%s4289_s24 + $0x1480] sm:$0xff]  ;;  %v1952_v39 = vld [vmem:[%s4289_s24 + $0x1488] sm:$0xff] }
 0x225   : > { %v1953_v1 = vld [vmem:[%s4289_s24 + $0x1490] sm:$0xff]  ;;  %2201 = vst [vmem:[%s4316_s20 + $0x1290] sm:$0xff] %v2073_v55  ;;  %2202 = vst [vmem:[%s4316_s20 + $0x1298] sm:$0xff] %v2074_v18  ;;  %v7078_v27 = vld [vmem:[%s4297_s5 + $0x280] sm:$0xff] }
 0x226   : > { %2203 = vst [vmem:[%s4316_s20 + $0x1380] sm:$0xff] %v2075_v23  ;;  %9614 = vst [vmem:[#allocation39_spill] sm:$0xff] %v7078_v27  ;;  %v2079_v29 = vadd.f32 %v7078_v27, %v1951_v17  ;;  %v7082_v3 = vld [vmem:[%s4297_s5 + $0x288] sm:$0xff]  ;;  %v7086_v32 = vld [vmem:[%s4297_s5 + $0x290] sm:$0xff] }
 0x227   : > { %9615 = vst [vmem:[#allocation40_spill] sm:$0xff] %v7082_v3  ;;  %v2080_v53 = vadd.f32 %v7082_v3, %v1952_v39  ;;  %9616 = vst [vmem:[#allocation41_spill] sm:$0xff] %v7086_v32  ;;  %v2081_v28 = vadd.f32 %v7086_v32, %v1953_v1  ;;  %v1954_v55 = vld [vmem:[%s4289_s24 + $0x1498] sm:$0xff]  ;;  %v1955_v23 = vld [vmem:[%s4289_s24 + $0x1580] sm:$0xff] }
 0x228   : > { %v1956_v18 = vld [vmem:[%s4289_s24 + $0x1588] sm:$0xff]  ;;  %2204 = vst [vmem:[%s4316_s20 + $0x1388] sm:$0xff] %v2076_v2  ;;  %2205 = vst [vmem:[%s4316_s20 + $0x1390] sm:$0xff] %v2077_v22  ;;  %v7096_v17 = vld [vmem:[%s4297_s5 + $0x298] sm:$0xff] }
 0x229   : > { %2206 = vst [vmem:[%s4316_s20 + $0x1398] sm:$0xff] %v2078_v59  ;;  %9617 = vst [vmem:[#allocation42_spill] sm:$0xff] %v7096_v17  ;;  %v2082_v39 = vadd.f32 %v7096_v17, %v1954_v55  ;;  %v7100_v3 = vld [vmem:[%s4297_s5 + $0x2a0] sm:$0xff]  ;;  %v7104_v32 = vld [vmem:[%s4297_s5 + $0x2a8] sm:$0xff] }
 0x22a   : > { %9618 = vst [vmem:[#allocation43_spill] sm:$0xff] %v7100_v3  ;;  %v2083_v1 = vadd.f32 %v7100_v3, %v1955_v23  ;;  %9619 = vst [vmem:[#allocation44_spill] sm:$0xff] %v7104_v32  ;;  %v2084_v27 = vadd.f32 %v7104_v32, %v1956_v18  ;;  %v1957_v2 = vld [vmem:[%s4289_s24 + $0x1590] sm:$0xff]  ;;  %v1958_v59 = vld [vmem:[%s4289_s24 + $0x1598] sm:$0xff] }
 0x22b   : > { %v1959_v22 = vld [vmem:[%s4289_s24 + $0x1680] sm:$0xff]  ;;  %2207 = vst [vmem:[%s4316_s20 + $0x1480] sm:$0xff] %v2079_v29  ;;  %2208 = vst [vmem:[%s4316_s20 + $0x1488] sm:$0xff] %v2080_v53  ;;  %v7114_v55 = vld [vmem:[%s4297_s5 + $0x2b0] sm:$0xff] }
 0x22c   : > { %2209 = vst [vmem:[%s4316_s20 + $0x1490] sm:$0xff] %v2081_v28  ;;  %9620 = vst [vmem:[#allocation45_spill] sm:$0xff] %v7114_v55  ;;  %v2085_v23 = vadd.f32 %v7114_v55, %v1957_v2  ;;  %v7118_v3 = vld [vmem:[%s4297_s5 + $0x2b8] sm:$0xff]  ;;  %v7122_v32 = vld [vmem:[%s4297_s5 + $0x2c0] sm:$0xff] }
 0x22d   : > { %9621 = vst [vmem:[#allocation46_spill] sm:$0xff] %v7118_v3  ;;  %v2086_v18 = vadd.f32 %v7118_v3, %v1958_v59  ;;  %9622 = vst [vmem:[#allocation47_spill] sm:$0xff] %v7122_v32  ;;  %v2087_v17 = vadd.f32 %v7122_v32, %v1959_v22  ;;  %v1960_v29 = vld [vmem:[%s4289_s24 + $0x1688] sm:$0xff]  ;;  %v1961_v28 = vld [vmem:[%s4289_s24 + $0x1690] sm:$0xff] }
 0x22e   : > { %v1962_v53 = vld [vmem:[%s4289_s24 + $0x1698] sm:$0xff]  ;;  %2210 = vst [vmem:[%s4316_s20 + $0x1498] sm:$0xff] %v2082_v39  ;;  %2211 = vst [vmem:[%s4316_s20 + $0x1580] sm:$0xff] %v2083_v1  ;;  %v7132_v2 = vld [vmem:[%s4297_s5 + $0x2c8] sm:$0xff] }
 0x22f   : > { %2212 = vst [vmem:[%s4316_s20 + $0x1588] sm:$0xff] %v2084_v27  ;;  %9623 = vst [vmem:[#allocation48_spill] sm:$0xff] %v7132_v2  ;;  %v2088_v59 = vadd.f32 %v7132_v2, %v1960_v29  ;;  %v7136_v3 = vld [vmem:[%s4297_s5 + $0x2d0] sm:$0xff]  ;;  %v7140_v32 = vld [vmem:[%s4297_s5 + $0x2d8] sm:$0xff] }
 0x230   : > { %9624 = vst [vmem:[#allocation49_spill] sm:$0xff] %v7136_v3  ;;  %v2089_v22 = vadd.f32 %v7136_v3, %v1961_v28  ;;  %9625 = vst [vmem:[#allocation50_spill] sm:$0xff] %v7140_v32  ;;  %v2090_v55 = vadd.f32 %v7140_v32, %v1962_v53  ;;  %v1963_v39 = vld [vmem:[%s4289_s24 + $0x1780] sm:$0xff]  ;;  %v1964_v27 = vld [vmem:[%s4289_s24 + $0x1788] sm:$0xff] }
 0x231   : > { %v1965_v1 = vld [vmem:[%s4289_s24 + $0x1790] sm:$0xff]  ;;  %2213 = vst [vmem:[%s4316_s20 + $0x1590] sm:$0xff] %v2085_v23  ;;  %2214 = vst [vmem:[%s4316_s20 + $0x1598] sm:$0xff] %v2086_v18  ;;  %v7150_v29 = vld [vmem:[%s4297_s5 + $0x2e0] sm:$0xff] }
 0x232   : > { %2215 = vst [vmem:[%s4316_s20 + $0x1680] sm:$0xff] %v2087_v17  ;;  %9626 = vst [vmem:[#allocation51_spill] sm:$0xff] %v7150_v29  ;;  %v2091_v28 = vadd.f32 %v7150_v29, %v1963_v39  ;;  %v7154_v3 = vld [vmem:[%s4297_s5 + $0x2e8] sm:$0xff]  ;;  %v7158_v32 = vld [vmem:[%s4297_s5 + $0x2f0] sm:$0xff] }
 0x233   : > { %9627 = vst [vmem:[#allocation52_spill] sm:$0xff] %v7154_v3  ;;  %v2092_v53 = vadd.f32 %v7154_v3, %v1964_v27  ;;  %9628 = vst [vmem:[#allocation53_spill] sm:$0xff] %v7158_v32  ;;  %v2093_v2 = vadd.f32 %v7158_v32, %v1965_v1  ;;  %v1966_v23 = vld [vmem:[%s4289_s24 + $0x1798] sm:$0xff]  ;;  %v1967_v17 = vld [vmem:[%s4289_s24 + $0x1880] sm:$0xff] }
 0x234   : > { %v1968_v18 = vld [vmem:[%s4289_s24 + $0x1888] sm:$0xff]  ;;  %2216 = vst [vmem:[%s4316_s20 + $0x1688] sm:$0xff] %v2088_v59  ;;  %2217 = vst [vmem:[%s4316_s20 + $0x1690] sm:$0xff] %v2089_v22  ;;  %v7168_v39 = vld [vmem:[%s4297_s5 + $0x2f8] sm:$0xff] }
 0x235   : > { %2218 = vst [vmem:[%s4316_s20 + $0x1698] sm:$0xff] %v2090_v55  ;;  %9629 = vst [vmem:[#allocation54_spill] sm:$0xff] %v7168_v39  ;;  %v2094_v27 = vadd.f32 %v7168_v39, %v1966_v23  ;;  %v7172_v3 = vld [vmem:[%s4297_s5 + $0x300] sm:$0xff]  ;;  %v7176_v32 = vld [vmem:[%s4297_s5 + $0x308] sm:$0xff] }
 0x236   : > { %9630 = vst [vmem:[#allocation55_spill] sm:$0xff] %v7172_v3  ;;  %v2095_v1 = vadd.f32 %v7172_v3, %v1967_v17  ;;  %9631 = vst [vmem:[#allocation56_spill] sm:$0xff] %v7176_v32  ;;  %v2096_v29 = vadd.f32 %v7176_v32, %v1968_v18  ;;  %v1969_v59 = vld [vmem:[%s4289_s24 + $0x1890] sm:$0xff]  ;;  %v1970_v55 = vld [vmem:[%s4289_s24 + $0x1898] sm:$0xff] }
 0x237   : > { %v1971_v22 = vld [vmem:[%s4289_s24 + $0x1980] sm:$0xff]  ;;  %2219 = vst [vmem:[%s4316_s20 + $0x1780] sm:$0xff] %v2091_v28  ;;  %2220 = vst [vmem:[%s4316_s20 + $0x1788] sm:$0xff] %v2092_v53  ;;  %v7186_v23 = vld [vmem:[%s4297_s5 + $0x310] sm:$0xff] }
 0x238   : > { %2221 = vst [vmem:[%s4316_s20 + $0x1790] sm:$0xff] %v2093_v2  ;;  %9632 = vst [vmem:[#allocation57_spill] sm:$0xff] %v7186_v23  ;;  %v2097_v17 = vadd.f32 %v7186_v23, %v1969_v59  ;;  %v7190_v3 = vld [vmem:[%s4297_s5 + $0x318] sm:$0xff]  ;;  %v7194_v32 = vld [vmem:[%s4297_s5 + $0x320] sm:$0xff] }
 0x239   : > { %9633 = vst [vmem:[#allocation58_spill] sm:$0xff] %v7190_v3  ;;  %v2098_v18 = vadd.f32 %v7190_v3, %v1970_v55  ;;  %9634 = vst [vmem:[#allocation59_spill] sm:$0xff] %v7194_v32  ;;  %v2099_v39 = vadd.f32 %v7194_v32, %v1971_v22  ;;  %v1972_v28 = vld [vmem:[%s4289_s24 + $0x1988] sm:$0xff]  ;;  %v1973_v2 = vld [vmem:[%s4289_s24 + $0x1990] sm:$0xff] }
 0x23a   : > { %v1974_v53 = vld [vmem:[%s4289_s24 + $0x1998] sm:$0xff]  ;;  %2222 = vst [vmem:[%s4316_s20 + $0x1798] sm:$0xff] %v2094_v27  ;;  %2223 = vst [vmem:[%s4316_s20 + $0x1880] sm:$0xff] %v2095_v1  ;;  %v7204_v59 = vld [vmem:[%s4297_s5 + $0x328] sm:$0xff] }
 0x23b   : > { %2224 = vst [vmem:[%s4316_s20 + $0x1888] sm:$0xff] %v2096_v29  ;;  %9635 = vst [vmem:[#allocation60_spill] sm:$0xff] %v7204_v59  ;;  %v2100_v55 = vadd.f32 %v7204_v59, %v1972_v28  ;;  %v7208_v3 = vld [vmem:[%s4297_s5 + $0x330] sm:$0xff]  ;;  %v7212_v32 = vld [vmem:[%s4297_s5 + $0x338] sm:$0xff] }
 0x23c   : > { %9636 = vst [vmem:[#allocation61_spill] sm:$0xff] %v7208_v3  ;;  %v2101_v22 = vadd.f32 %v7208_v3, %v1973_v2  ;;  %9637 = vst [vmem:[#allocation62_spill] sm:$0xff] %v7212_v32  ;;  %v2102_v23 = vadd.f32 %v7212_v32, %v1974_v53  ;;  %v1975_v27 = vld [vmem:[%s4289_s24 + $0x1a80] sm:$0xff]  ;;  %v1976_v29 = vld [vmem:[%s4289_s24 + $0x1a88] sm:$0xff] }
 0x23d   : > { %v1977_v1 = vld [vmem:[%s4289_s24 + $0x1a90] sm:$0xff]  ;;  %2225 = vst [vmem:[%s4316_s20 + $0x1890] sm:$0xff] %v2097_v17  ;;  %2226 = vst [vmem:[%s4316_s20 + $0x1898] sm:$0xff] %v2098_v18  ;;  %v7222_v28 = vld [vmem:[%s4297_s5 + $0x340] sm:$0xff] }
 0x23e   : > { %2227 = vst [vmem:[%s4316_s20 + $0x1980] sm:$0xff] %v2099_v39  ;;  %9638 = vst [vmem:[#allocation63_spill] sm:$0xff] %v7222_v28  ;;  %v2103_v2 = vadd.f32 %v7222_v28, %v1975_v27  ;;  %v7226_v3 = vld [vmem:[%s4297_s5 + $0x348] sm:$0xff]  ;;  %v7230_v32 = vld [vmem:[%s4297_s5 + $0x350] sm:$0xff] }
 0x23f   : > { %9639 = vst [vmem:[#allocation64_spill] sm:$0xff] %v7226_v3  ;;  %v2104_v53 = vadd.f32 %v7226_v3, %v1976_v29  ;;  %9640 = vst [vmem:[#allocation65_spill] sm:$0xff] %v7230_v32  ;;  %v2105_v59 = vadd.f32 %v7230_v32, %v1977_v1  ;;  %v1978_v17 = vld [vmem:[%s4289_s24 + $0x1a98] sm:$0xff]  ;;  %v1979_v39 = vld [vmem:[%s4289_s24 + $0x1b80] sm:$0xff] }
 0x240   : > { %v1980_v18 = vld [vmem:[%s4289_s24 + $0x1b88] sm:$0xff]  ;;  %2228 = vst [vmem:[%s4316_s20 + $0x1988] sm:$0xff] %v2100_v55  ;;  %2229 = vst [vmem:[%s4316_s20 + $0x1990] sm:$0xff] %v2101_v22  ;;  %v7240_v27 = vld [vmem:[%s4297_s5 + $0x358] sm:$0xff] }
 0x241   : > { %2230 = vst [vmem:[%s4316_s20 + $0x1998] sm:$0xff] %v2102_v23  ;;  %9641 = vst [vmem:[#allocation66_spill] sm:$0xff] %v7240_v27  ;;  %v2106_v29 = vadd.f32 %v7240_v27, %v1978_v17  ;;  %v7244_v3 = vld [vmem:[%s4297_s5 + $0x360] sm:$0xff]  ;;  %v7248_v32 = vld [vmem:[%s4297_s5 + $0x368] sm:$0xff] }
 0x242   : > { %9642 = vst [vmem:[#allocation67_spill] sm:$0xff] %v7244_v3  ;;  %v2107_v1 = vadd.f32 %v7244_v3, %v1979_v39  ;;  %9643 = vst [vmem:[#allocation68_spill] sm:$0xff] %v7248_v32  ;;  %v2108_v28 = vadd.f32 %v7248_v32, %v1980_v18  ;;  %v1981_v55 = vld [vmem:[%s4289_s24 + $0x1b90] sm:$0xff]  ;;  %v1982_v23 = vld [vmem:[%s4289_s24 + $0x1b98] sm:$0xff] }
 0x243   : > { %v1983_v22 = vld [vmem:[%s4289_s24 + $0x1c80] sm:$0xff]  ;;  %2231 = vst [vmem:[%s4316_s20 + $0x1a80] sm:$0xff] %v2103_v2  ;;  %2232 = vst [vmem:[%s4316_s20 + $0x1a88] sm:$0xff] %v2104_v53  ;;  %v7258_v17 = vld [vmem:[%s4297_s5 + $0x370] sm:$0xff] }
 0x244   : > { %2233 = vst [vmem:[%s4316_s20 + $0x1a90] sm:$0xff] %v2105_v59  ;;  %9644 = vst [vmem:[#allocation69_spill] sm:$0xff] %v7258_v17  ;;  %v2109_v39 = vadd.f32 %v7258_v17, %v1981_v55  ;;  %v7262_v3 = vld [vmem:[%s4297_s5 + $0x378] sm:$0xff]  ;;  %v7266_v32 = vld [vmem:[%s4297_s5 + $0x380] sm:$0xff] }
 0x245   : > { %9645 = vst [vmem:[#allocation70_spill] sm:$0xff] %v7262_v3  ;;  %v2110_v18 = vadd.f32 %v7262_v3, %v1982_v23  ;;  %9646 = vst [vmem:[#allocation71_spill] sm:$0xff] %v7266_v32  ;;  %v2111_v27 = vadd.f32 %v7266_v32, %v1983_v22  ;;  %v1984_v2 = vld [vmem:[%s4289_s24 + $0x1c88] sm:$0xff]  ;;  %v1985_v59 = vld [vmem:[%s4289_s24 + $0x1c90] sm:$0xff] }
 0x246   : > { %v1986_v53 = vld [vmem:[%s4289_s24 + $0x1c98] sm:$0xff]  ;;  %2234 = vst [vmem:[%s4316_s20 + $0x1a98] sm:$0xff] %v2106_v29  ;;  %2235 = vst [vmem:[%s4316_s20 + $0x1b80] sm:$0xff] %v2107_v1  ;;  %v7276_v55 = vld [vmem:[%s4297_s5 + $0x388] sm:$0xff] }
 0x247   : > { %2236 = vst [vmem:[%s4316_s20 + $0x1b88] sm:$0xff] %v2108_v28  ;;  %9647 = vst [vmem:[#allocation72_spill] sm:$0xff] %v7276_v55  ;;  %v2112_v23 = vadd.f32 %v7276_v55, %v1984_v2  ;;  %v7280_v3 = vld [vmem:[%s4297_s5 + $0x390] sm:$0xff]  ;;  %v7284_v32 = vld [vmem:[%s4297_s5 + $0x398] sm:$0xff] }
 0x248   : > { %9648 = vst [vmem:[#allocation73_spill] sm:$0xff] %v7280_v3  ;;  %v2113_v22 = vadd.f32 %v7280_v3, %v1985_v59  ;;  %9649 = vst [vmem:[#allocation74_spill] sm:$0xff] %v7284_v32  ;;  %v2114_v17 = vadd.f32 %v7284_v32, %v1986_v53  ;;  %v1987_v29 = vld [vmem:[%s4289_s24 + $0x1d80] sm:$0xff]  ;;  %v1988_v28 = vld [vmem:[%s4289_s24 + $0x1d88] sm:$0xff] }
 0x249   : > { %v1989_v1 = vld [vmem:[%s4289_s24 + $0x1d90] sm:$0xff]  ;;  %2237 = vst [vmem:[%s4316_s20 + $0x1b90] sm:$0xff] %v2109_v39  ;;  %2238 = vst [vmem:[%s4316_s20 + $0x1b98] sm:$0xff] %v2110_v18  ;;  %v7294_v2 = vld [vmem:[%s4297_s5 + $0x3a0] sm:$0xff] }
 0x24a   : > { %2239 = vst [vmem:[%s4316_s20 + $0x1c80] sm:$0xff] %v2111_v27  ;;  %9650 = vst [vmem:[#allocation75_spill] sm:$0xff] %v7294_v2  ;;  %v2115_v59 = vadd.f32 %v7294_v2, %v1987_v29  ;;  %v7298_v3 = vld [vmem:[%s4297_s5 + $0x3a8] sm:$0xff]  ;;  %v7302_v32 = vld [vmem:[%s4297_s5 + $0x3b0] sm:$0xff] }
 0x24b   : > { %9651 = vst [vmem:[#allocation76_spill] sm:$0xff] %v7298_v3  ;;  %v2116_v53 = vadd.f32 %v7298_v3, %v1988_v28  ;;  %9652 = vst [vmem:[#allocation77_spill] sm:$0xff] %v7302_v32  ;;  %v2117_v55 = vadd.f32 %v7302_v32, %v1989_v1  ;;  %v1990_v39 = vld [vmem:[%s4289_s24 + $0x1d98] sm:$0xff]  ;;  %v1991_v27 = vld [vmem:[%s4289_s24 + $0x1e80] sm:$0xff] }
 0x24c   : > { %v1992_v18 = vld [vmem:[%s4289_s24 + $0x1e88] sm:$0xff]  ;;  %2240 = vst [vmem:[%s4316_s20 + $0x1c88] sm:$0xff] %v2112_v23  ;;  %2241 = vst [vmem:[%s4316_s20 + $0x1c90] sm:$0xff] %v2113_v22  ;;  %v7312_v29 = vld [vmem:[%s4297_s5 + $0x3b8] sm:$0xff] }
 0x24d   : > { %2242 = vst [vmem:[%s4316_s20 + $0x1c98] sm:$0xff] %v2114_v17  ;;  %9653 = vst [vmem:[#allocation78_spill] sm:$0xff] %v7312_v29  ;;  %v2118_v28 = vadd.f32 %v7312_v29, %v1990_v39  ;;  %v7316_v3 = vld [vmem:[%s4297_s5 + $0x3c0] sm:$0xff]  ;;  %v7320_v32 = vld [vmem:[%s4297_s5 + $0x3c8] sm:$0xff] }
 0x24e   : > { %9654 = vst [vmem:[#allocation79_spill] sm:$0xff] %v7316_v3  ;;  %v2119_v1 = vadd.f32 %v7316_v3, %v1991_v27  ;;  %9655 = vst [vmem:[#allocation80_spill] sm:$0xff] %v7320_v32  ;;  %v2120_v2 = vadd.f32 %v7320_v32, %v1992_v18  ;;  %v1993_v23 = vld [vmem:[%s4289_s24 + $0x1e90] sm:$0xff]  ;;  %v1994_v17 = vld [vmem:[%s4289_s24 + $0x1e98] sm:$0xff] }
 0x24f   : > { %v1995_v22 = vld [vmem:[%s4289_s24 + $0x1f80] sm:$0xff]  ;;  %2243 = vst [vmem:[%s4316_s20 + $0x1d80] sm:$0xff] %v2115_v59  ;;  %2244 = vst [vmem:[%s4316_s20 + $0x1d88] sm:$0xff] %v2116_v53  ;;  %v7330_v39 = vld [vmem:[%s4297_s5 + $0x3d0] sm:$0xff] }
 0x250   : > { %2245 = vst [vmem:[%s4316_s20 + $0x1d90] sm:$0xff] %v2117_v55  ;;  %9656 = vst [vmem:[#allocation81_spill] sm:$0xff] %v7330_v39  ;;  %v2121_v27 = vadd.f32 %v7330_v39, %v1993_v23  ;;  %v7334_v3 = vld [vmem:[%s4297_s5 + $0x3d8] sm:$0xff]  ;;  %v7338_v32 = vld [vmem:[%s4297_s5 + $0x3e0] sm:$0xff] }
 0x251   : > { %9657 = vst [vmem:[#allocation82_spill] sm:$0xff] %v7334_v3  ;;  %v2122_v18 = vadd.f32 %v7334_v3, %v1994_v17  ;;  %9658 = vst [vmem:[#allocation83_spill] sm:$0xff] %v7338_v32  ;;  %v2123_v29 = vadd.f32 %v7338_v32, %v1995_v22  ;;  %v1996_v59 = vld [vmem:[%s4289_s24 + $0x1f88] sm:$0xff]  ;;  %v1997_v55 = vld [vmem:[%s4289_s24 + $0x1f90] sm:$0xff] }
 0x252   : > { %v1998_v53 = vld [vmem:[%s4289_s24 + $0x1f98] sm:$0xff]  ;;  %2246 = vst [vmem:[%s4316_s20 + $0x1d98] sm:$0xff] %v2118_v28  ;;  %2247 = vst [vmem:[%s4316_s20 + $0x1e80] sm:$0xff] %v2119_v1  ;;  %v7348_v23 = vld [vmem:[%s4297_s5 + $0x3e8] sm:$0xff] }
 0x253   : > { %2248 = vst [vmem:[%s4316_s20 + $0x1e88] sm:$0xff] %v2120_v2  ;;  %9659 = vst [vmem:[#allocation84_spill] sm:$0xff] %v7348_v23  ;;  %v2124_v17 = vadd.f32 %v7348_v23, %v1996_v59  ;;  %v7352_v3 = vld [vmem:[%s4297_s5 + $0x3f0] sm:$0xff]  ;;  %v7356_v32 = vld [vmem:[%s4297_s5 + $0x3f8] sm:$0xff] }
 0x254   : > { %9660 = vst [vmem:[#allocation85_spill] sm:$0xff] %v7352_v3  ;;  %v2125_v22 = vadd.f32 %v7352_v3, %v1997_v55  ;;  %9661 = vst [vmem:[#allocation86_spill] sm:$0xff] %v7356_v32  ;;  %v2126_v39 = vadd.f32 %v7356_v32, %v1998_v53  ;;  %v2255_v28 = vld [vmem:[%s4289_s24 + $0xa0] sm:$0xff]  ;;  %v2256_v2 = vld [vmem:[%s4289_s24 + $0xa8] sm:$0xff] }
 0x255   : > { %v2257_v1 = vld [vmem:[%s4289_s24 + $0xb0] sm:$0xff]  ;;  %2249 = vst [vmem:[%s4316_s20 + $0x1e90] sm:$0xff] %v2121_v27  ;;  %2250 = vst [vmem:[%s4316_s20 + $0x1e98] sm:$0xff] %v2122_v18  ;;  %v7366_v59 = vld [vmem:[%s4297_s5] sm:$0xff] }
 0x256   : > { %2251 = vst [vmem:[%s4316_s20 + $0x1f80] sm:$0xff] %v2123_v29  ;;  %9662 = vst [vmem:[#allocation87_spill] sm:$0xff] %v7366_v59  ;;  %v2383_v55 = vadd.f32 %v7366_v59, %v2255_v28  ;;  %v7370_v3 = vld [vmem:[%s4297_s5 + $0x8] sm:$0xff]  ;;  %v7374_v32 = vld [vmem:[%s4297_s5 + $0x10] sm:$0xff] }
 0x257   : > { %9663 = vst [vmem:[#allocation88_spill] sm:$0xff] %v7370_v3  ;;  %v2384_v53 = vadd.f32 %v7370_v3, %v2256_v2  ;;  %9664 = vst [vmem:[#allocation89_spill] sm:$0xff] %v7374_v32  ;;  %v2385_v27 = vadd.f32 %v7374_v32, %v2257_v1  ;;  %v2258_v18 = vld [vmem:[%s4289_s24 + $0xb8] sm:$0xff]  ;;  %v2259_v29 = vld [vmem:[%s4289_s24 + $0x1a0] sm:$0xff] }
 0x258   : > { %v2260_v23 = vld [vmem:[%s4289_s24 + $0x1a8] sm:$0xff]  ;;  %2252 = vst [vmem:[%s4316_s20 + $0x1f88] sm:$0xff] %v2124_v17  ;;  %2253 = vst [vmem:[%s4316_s20 + $0x1f90] sm:$0xff] %v2125_v22  ;;  %v2386_v28 = vadd.f32 %v6617_v49, %v2258_v18  ;;  %v2387_v2 = vadd.f32 %v6621_v12, %v2259_v29  ;;  %v2261_v32 = vld [vmem:[%s4289_s24 + $0x1b0] sm:$0xff] }
 0x259   : > { %2254 = vst [vmem:[%s4316_s20 + $0x1f98] sm:$0xff] %v2126_v39  ;;  %v7386_v3 = vld [vmem:[%s4297_s5 + $0x28] sm:$0xff]  ;;  %v2262_v59 = vld [vmem:[%s4289_s24 + $0x1b8] sm:$0xff]  ;;  %v2263_v45 = vld [vmem:[%s4289_s24 + $0x2a0] sm:$0xff]  ;;  %v2389_v49 = vadd.f32 %v6632_v24, %v2261_v32 }
 0x25a   : > { %v2388_v1 = vadd.f32 %v7386_v3, %v2260_v23  ;;  %2511 = vst [vmem:[%s4316_s20 + $0xa0] sm:$0xff] %v2383_v55  ;;  %2512 = vst [vmem:[%s4316_s20 + $0xa8] sm:$0xff] %v2384_v53  ;;  %v2390_v12 = vadd.f32 %v6636_v62, %v2262_v59  ;;  %v2391_v39 = vadd.f32 %v6646_v33, %v2263_v45  ;;  %v2264_v17 = vld [vmem:[%s4289_s24 + $0x2a8] sm:$0xff]  ;;  %v2265_v23 = vld [vmem:[%s4289_s24 + $0x2b0] sm:$0xff] }
 0x25b   : > { %2513 = vst [vmem:[%s4316_s20 + $0xb0] sm:$0xff] %v2385_v27  ;;  %v2266_v22 = vld [vmem:[%s4289_s24 + $0x2b8] sm:$0xff]  ;;  %2514 = vst [vmem:[%s4316_s20 + $0xb8] sm:$0xff] %v2386_v28  ;;  %v2392_v55 = vadd.f32 %v6650_v48, %v2264_v17  ;;  %v2393_v24 = vadd.f32 %v6654_v42, %v2265_v23  ;;  %v2267_v32 = vld [vmem:[%s4289_s24 + $0x3a0] sm:$0xff] }
 0x25c   : > { %2515 = vst [vmem:[%s4316_s20 + $0x1a0] sm:$0xff] %v2387_v2  ;;  %2516 = vst [vmem:[%s4316_s20 + $0x1a8] sm:$0xff] %v2388_v1  ;;  %v2394_v62 = vadd.f32 %v6664_v4, %v2266_v22  ;;  %v2268_v33 = vld [vmem:[%s4289_s24 + $0x3a8] sm:$0xff]  ;;  %v2269_v45 = vld [vmem:[%s4289_s24 + $0x3b0] sm:$0xff]  ;;  %v2395_v59 = vadd.f32 %v6668_v43, %v2267_v32 }
 0x25d   : > { %2517 = vst [vmem:[%s4316_s20 + $0x1b0] sm:$0xff] %v2389_v49  ;;  %2518 = vst [vmem:[%s4316_s20 + $0x1b8] sm:$0xff] %v2390_v12  ;;  %v2396_v48 = vadd.f32 %v6672_v0, %v2268_v33  ;;  %v2397_v42 = vadd.f32 %v6682_v54, %v2269_v45  ;;  %v2270_v53 = vld [vmem:[%s4289_s24 + $0x3b8] sm:$0xff]  ;;  %v2271_v4 = vld [vmem:[%s4289_s24 + $0x4a0] sm:$0xff] }
 0x25e   : > { %2519 = vst [vmem:[%s4316_s20 + $0x2a0] sm:$0xff] %v2391_v39  ;;  %v2272_v27 = vld [vmem:[%s4289_s24 + $0x4a8] sm:$0xff]  ;;  %2520 = vst [vmem:[%s4316_s20 + $0x2a8] sm:$0xff] %v2392_v55  ;;  %v2398_v18 = vadd.f32 %v6686_v11, %v2270_v53  ;;  %v2399_v43 = vadd.f32 %v6690_v60, %v2271_v4  ;;  %v2273_v29 = vld [vmem:[%s4289_s24 + $0x4b0] sm:$0xff] }
 0x25f   : > { %2521 = vst [vmem:[%s4316_s20 + $0x2b0] sm:$0xff] %v2393_v24  ;;  %2522 = vst [vmem:[%s4316_s20 + $0x2b8] sm:$0xff] %v2394_v62  ;;  %v2400_v0 = vadd.f32 %v6700_v15, %v2272_v27  ;;  %v2274_v54 = vld [vmem:[%s4289_s24 + $0x4b8] sm:$0xff]  ;;  %v2275_v28 = vld [vmem:[%s4289_s24 + $0x5a0] sm:$0xff]  ;;  %v2401_v2 = vadd.f32 %v6704_v16, %v2273_v29 }
 0x260   : > { %2523 = vst [vmem:[%s4316_s20 + $0x3a0] sm:$0xff] %v2395_v59  ;;  %2524 = vst [vmem:[%s4316_s20 + $0x3a8] sm:$0xff] %v2396_v48  ;;  %v2402_v11 = vadd.f32 %v6708_v26, %v2274_v54  ;;  %v2403_v60 = vadd.f32 %v6718_v44, %v2275_v28  ;;  %v2276_v1 = vld [vmem:[%s4289_s24 + $0x5a8] sm:$0xff]  ;;  %v2277_v15 = vld [vmem:[%s4289_s24 + $0x5b0] sm:$0xff] }
 0x261   : > { %2525 = vst [vmem:[%s4316_s20 + $0x3b0] sm:$0xff] %v2397_v42  ;;  %v2278_v49 = vld [vmem:[%s4289_s24 + $0x5b8] sm:$0xff]  ;;  %2526 = vst [vmem:[%s4316_s20 + $0x3b8] sm:$0xff] %v2398_v18  ;;  %v2404_v12 = vadd.f32 %v6722_v34, %v2276_v1  ;;  %v2405_v16 = vadd.f32 %v6726_v51, %v2277_v15  ;;  %v2279_v39 = vld [vmem:[%s4289_s24 + $0x6a0] sm:$0xff] }
 0x262   : > { %2527 = vst [vmem:[%s4316_s20 + $0x4a0] sm:$0xff] %v2399_v43  ;;  %2528 = vst [vmem:[%s4316_s20 + $0x4a8] sm:$0xff] %v2400_v0  ;;  %v2406_v26 = vadd.f32 %v6736_v8, %v2278_v49  ;;  %v2280_v44 = vld [vmem:[%s4289_s24 + $0x6a8] sm:$0xff]  ;;  %v2281_v17 = vld [vmem:[%s4289_s24 + $0x6b0] sm:$0xff]  ;;  %v2407_v23 = vadd.f32 %v6740_v5, %v2279_v39 }
 0x263   : > { %2529 = vst [vmem:[%s4316_s20 + $0x4b0] sm:$0xff] %v2401_v2  ;;  %2530 = vst [vmem:[%s4316_s20 + $0x4b8] sm:$0xff] %v2402_v11  ;;  %v2408_v34 = vadd.f32 %v6744_v52, %v2280_v44  ;;  %v2409_v51 = vadd.f32 %v6754_v30, %v2281_v17  ;;  %v2282_v22 = vld [vmem:[%s4289_s24 + $0x6b8] sm:$0xff]  ;;  %v2283_v8 = vld [vmem:[%s4289_s24 + $0x7a0] sm:$0xff] }
 0x264   : > { %2531 = vst [vmem:[%s4316_s20 + $0x5a0] sm:$0xff] %v2403_v60  ;;  %v2284_v55 = vld [vmem:[%s4289_s24 + $0x7a8] sm:$0xff]  ;;  %2532 = vst [vmem:[%s4316_s20 + $0x5a8] sm:$0xff] %v2404_v12  ;;  %v2410_v24 = vadd.f32 %v6758_v46, %v2282_v22  ;;  %v2411_v5 = vadd.f32 %v6762_v36, %v2283_v8  ;;  %v2285_v62 = vld [vmem:[%s4289_s24 + $0x7b0] sm:$0xff] }
 0x265   : > { %2533 = vst [vmem:[%s4316_s20 + $0x5b0] sm:$0xff] %v2405_v16  ;;  %2534 = vst [vmem:[%s4316_s20 + $0x5b8] sm:$0xff] %v2406_v26  ;;  %v2412_v52 = vadd.f32 %v6772_v50, %v2284_v55  ;;  %v2286_v30 = vld [vmem:[%s4289_s24 + $0x7b8] sm:$0xff]  ;;  %v2287_v32 = vld [vmem:[%s4289_s24 + $0x8a0] sm:$0xff]  ;;  %v2413_v33 = vadd.f32 %v6776_v38, %v2285_v62 }
 0x266   : > { %2535 = vst [vmem:[%s4316_s20 + $0x6a0] sm:$0xff] %v2407_v23  ;;  %2536 = vst [vmem:[%s4316_s20 + $0x6a8] sm:$0xff] %v2408_v34  ;;  %v2414_v46 = vadd.f32 %v6780_v61, %v2286_v30  ;;  %v2415_v36 = vadd.f32 %v6790_v47, %v2287_v32  ;;  %v2288_v45 = vld [vmem:[%s4289_s24 + $0x8a8] sm:$0xff]  ;;  %v2289_v50 = vld [vmem:[%s4289_s24 + $0x8b0] sm:$0xff] }
 0x267   : > { %2537 = vst [vmem:[%s4316_s20 + $0x6b0] sm:$0xff] %v2409_v51  ;;  %v2290_v59 = vld [vmem:[%s4289_s24 + $0x8b8] sm:$0xff]  ;;  %2538 = vst [vmem:[%s4316_s20 + $0x6b8] sm:$0xff] %v2410_v24  ;;  %v2416_v48 = vadd.f32 %v6794_v14, %v2288_v45  ;;  %v2417_v38 = vadd.f32 %v6798_v56, %v2289_v50  ;;  %v2291_v42 = vld [vmem:[%s4289_s24 + $0x9a0] sm:$0xff] }
 0x268   : > { %2539 = vst [vmem:[%s4316_s20 + $0x7a0] sm:$0xff] %v2411_v5  ;;  %2540 = vst [vmem:[%s4316_s20 + $0x7a8] sm:$0xff] %v2412_v52  ;;  %v2418_v61 = vadd.f32 %v6808_v63, %v2290_v59  ;;  %v2292_v47 = vld [vmem:[%s4289_s24 + $0x9a8] sm:$0xff]  ;;  %v2293_v53 = vld [vmem:[%s4289_s24 + $0x9b0] sm:$0xff]  ;;  %v2419_v4 = vadd.f32 %v6812_v6, %v2291_v42 }
 0x269   : > { %2541 = vst [vmem:[%s4316_s20 + $0x7b0] sm:$0xff] %v2413_v33  ;;  %2542 = vst [vmem:[%s4316_s20 + $0x7b8] sm:$0xff] %v2414_v46  ;;  %v2420_v14 = vadd.f32 %v6816_v41, %v2292_v47  ;;  %v2421_v56 = vadd.f32 %v6826_v31, %v2293_v53  ;;  %v2294_v27 = vld [vmem:[%s4289_s24 + $0x9b8] sm:$0xff]  ;;  %v2295_v63 = vld [vmem:[%s4289_s24 + $0xaa0] sm:$0xff] }
 0x26a   : > { %2543 = vst [vmem:[%s4316_s20 + $0x8a0] sm:$0xff] %v2415_v36  ;;  %v2296_v18 = vld [vmem:[%s4289_s24 + $0xaa8] sm:$0xff]  ;;  %2544 = vst [vmem:[%s4316_s20 + $0x8a8] sm:$0xff] %v2416_v48  ;;  %v2422_v43 = vadd.f32 %v6830_v25, %v2294_v27  ;;  %v2423_v6 = vadd.f32 %v6834_v21, %v2295_v63  ;;  %v2297_v0 = vld [vmem:[%s4289_s24 + $0xab0] sm:$0xff] }
 0x26b   : > { %2545 = vst [vmem:[%s4316_s20 + $0x8b0] sm:$0xff] %v2417_v38  ;;  %2546 = vst [vmem:[%s4316_s20 + $0x8b8] sm:$0xff] %v2418_v61  ;;  %v2424_v41 = vadd.f32 %v6844_v13, %v2296_v18  ;;  %v2298_v31 = vld [vmem:[%s4289_s24 + $0xab8] sm:$0xff]  ;;  %v2299_v29 = vld [vmem:[%s4289_s24 + $0xba0] sm:$0xff]  ;;  %v2425_v54 = vadd.f32 %v6848_v35, %v2297_v0 }
 0x26c   : > { %2547 = vst [vmem:[%s4316_s20 + $0x9a0] sm:$0xff] %v2419_v4  ;;  %2548 = vst [vmem:[%s4316_s20 + $0x9a8] sm:$0xff] %v2420_v14  ;;  %v2426_v25 = vadd.f32 %v6852_v37, %v2298_v31  ;;  %v2427_v21 = vadd.f32 %v6862_v57, %v2299_v29  ;;  %v2300_v28 = vld [vmem:[%s4289_s24 + $0xba8] sm:$0xff]  ;;  %v2301_v13 = vld [vmem:[%s4289_s24 + $0xbb0] sm:$0xff] }
 0x26d   : > { %2549 = vst [vmem:[%s4316_s20 + $0x9b0] sm:$0xff] %v2421_v56  ;;  %v2302_v2 = vld [vmem:[%s4289_s24 + $0xbb8] sm:$0xff]  ;;  %2550 = vst [vmem:[%s4316_s20 + $0x9b8] sm:$0xff] %v2422_v43  ;;  %v2428_v11 = vadd.f32 %v6866_v7, %v2300_v28  ;;  %v2429_v35 = vadd.f32 %v6870_v10, %v2301_v13  ;;  %v2303_v60 = vld [vmem:[%s4289_s24 + $0xca0] sm:$0xff] }
 0x26e   : > { %2551 = vst [vmem:[%s4316_s20 + $0xaa0] sm:$0xff] %v2423_v6  ;;  %2552 = vst [vmem:[%s4316_s20 + $0xaa8] sm:$0xff] %v2424_v41  ;;  %v2430_v37 = vadd.f32 %v6880_v20, %v2302_v2  ;;  %v2304_v57 = vld [vmem:[%s4289_s24 + $0xca8] sm:$0xff]  ;;  %v2305_v1 = vld [vmem:[%s4289_s24 + $0xcb0] sm:$0xff]  ;;  %v2431_v15 = vadd.f32 %v6884_v58, %v2303_v60 }
 0x26f   : > { %2553 = vst [vmem:[%s4316_s20 + $0xab0] sm:$0xff] %v2425_v54  ;;  %2554 = vst [vmem:[%s4316_s20 + $0xab8] sm:$0xff] %v2426_v25  ;;  %v2432_v7 = vadd.f32 %v6888_v9, %v2304_v57  ;;  %v2433_v10 = vadd.f32 %v6898_v19, %v2305_v1  ;;  %v2306_v49 = vld [vmem:[%s4289_s24 + $0xcb8] sm:$0xff]  ;;  %v2307_v20 = vld [vmem:[%s4289_s24 + $0xda0] sm:$0xff] }
 0x270   : > { %2555 = vst [vmem:[%s4316_s20 + $0xba0] sm:$0xff] %v2427_v21  ;;  %v2308_v12 = vld [vmem:[%s4289_s24 + $0xda8] sm:$0xff]  ;;  %2556 = vst [vmem:[%s4316_s20 + $0xba8] sm:$0xff] %v2428_v11  ;;  %v2434_v16 = vadd.f32 %v6902_v40, %v2306_v49  ;;  %v9665_v26 = vld [vmem:[#allocation11_spill] sm:$0xff] }
 0x271   : > { %2557 = vst [vmem:[%s4316_s20 + $0xbb0] sm:$0xff] %v2429_v35  ;;  %2558 = vst [vmem:[%s4316_s20 + $0xbb8] sm:$0xff] %v2430_v37  ;;  %v2435_v58 = vadd.f32 %v9665_v26, %v2307_v20  ;;  %v9666_v39 = vld [vmem:[#allocation12_spill] sm:$0xff]  ;;  %v2309_v44 = vld [vmem:[%s4289_s24 + $0xdb0] sm:$0xff] }
 0x272   : > { %v2436_v9 = vadd.f32 %v9666_v39, %v2308_v12  ;;  %v2310_v19 = vld [vmem:[%s4289_s24 + $0xdb8] sm:$0xff]  ;;  %v2311_v17 = vld [vmem:[%s4289_s24 + $0xea0] sm:$0xff]  ;;  %2559 = vst [vmem:[%s4316_s20 + $0xca0] sm:$0xff] %v2431_v15  ;;  %2560 = vst [vmem:[%s4316_s20 + $0xca8] sm:$0xff] %v2432_v7 }
 0x273   : > { %2561 = vst [vmem:[%s4316_s20 + $0xcb0] sm:$0xff] %v2433_v10  ;;  %v9667_v23 = vld [vmem:[#allocation13_spill] sm:$0xff]  ;;  %v9668_v51 = vld [vmem:[#allocation14_spill] sm:$0xff]  ;;  %v9669_v22 = vld [vmem:[#allocation15_spill] sm:$0xff] }
 0x274   : > { %v2437_v34 = vadd.f32 %v9667_v23, %v2309_v44  ;;  %v2438_v40 = vadd.f32 %v9668_v51, %v2310_v19  ;;  %v2439_v8 = vadd.f32 %v9669_v22, %v2311_v17  ;;  %v2312_v55 = vld [vmem:[%s4289_s24 + $0xea8] sm:$0xff]  ;;  %v2313_v24 = vld [vmem:[%s4289_s24 + $0xeb0] sm:$0xff]  ;;  %v2314_v5 = vld [vmem:[%s4289_s24 + $0xeb8] sm:$0xff]  ;;  %2562 = vst [vmem:[%s4316_s20 + $0xcb8] sm:$0xff] %v2434_v16 }
 0x275   : > { %2563 = vst [vmem:[%s4316_s20 + $0xda0] sm:$0xff] %v2435_v58  ;;  %2564 = vst [vmem:[%s4316_s20 + $0xda8] sm:$0xff] %v2436_v9  ;;  %v9670_v52 = vld [vmem:[#allocation16_spill] sm:$0xff]  ;;  %v9671_v30 = vld [vmem:[#allocation17_spill] sm:$0xff] }
 0x276   : > { %v2440_v62 = vadd.f32 %v9670_v52, %v2312_v55  ;;  %v2441_v32 = vadd.f32 %v9671_v30, %v2313_v24  ;;  %v9672_v33 = vld [vmem:[#allocation18_spill] sm:$0xff]  ;;  %v2315_v36 = vld [vmem:[%s4289_s24 + $0xfa0] sm:$0xff]  ;;  %v2316_v45 = vld [vmem:[%s4289_s24 + $0xfa8] sm:$0xff]  ;;  %2565 = vst [vmem:[%s4316_s20 + $0xdb0] sm:$0xff] %v2437_v34 }
 0x277   : > { %v2442_v46 = vadd.f32 %v9672_v33, %v2314_v5  ;;  %v2317_v50 = vld [vmem:[%s4289_s24 + $0xfb0] sm:$0xff]  ;;  %2566 = vst [vmem:[%s4316_s20 + $0xdb8] sm:$0xff] %v2438_v40  ;;  %2567 = vst [vmem:[%s4316_s20 + $0xea0] sm:$0xff] %v2439_v8  ;;  %v9673_v59 = vld [vmem:[#allocation19_spill] sm:$0xff] }
 0x278   : > { %v2443_v48 = vadd.f32 %v9673_v59, %v2315_v36  ;;  %v9674_v38 = vld [vmem:[#allocation20_spill] sm:$0xff]  ;;  %v9675_v42 = vld [vmem:[#allocation21_spill] sm:$0xff]  ;;  %v2318_v53 = vld [vmem:[%s4289_s24 + $0xfb8] sm:$0xff]  ;;  %2568 = vst [vmem:[%s4316_s20 + $0xea8] sm:$0xff] %v2440_v62 }
 0x279   : > { %v2444_v61 = vadd.f32 %v9674_v38, %v2316_v45  ;;  %v2445_v47 = vadd.f32 %v9675_v42, %v2317_v50  ;;  %v2319_v4 = vld [vmem:[%s4289_s24 + $0x10a0] sm:$0xff]  ;;  %v2320_v14 = vld [vmem:[%s4289_s24 + $0x10a8] sm:$0xff]  ;;  %2569 = vst [vmem:[%s4316_s20 + $0xeb0] sm:$0xff] %v2441_v32  ;;  %2570 = vst [vmem:[%s4316_s20 + $0xeb8] sm:$0xff] %v2442_v46 }
 0x27a   : > { %v9676_v56 = vld [vmem:[#allocation22_spill] sm:$0xff]  ;;  %v9677_v63 = vld [vmem:[#allocation23_spill] sm:$0xff]  ;;  %v9678_v43 = vld [vmem:[#allocation24_spill] sm:$0xff]  ;;  %2571 = vst [vmem:[%s4316_s20 + $0xfa0] sm:$0xff] %v2443_v48 }
 0x27b   : > { %v2446_v27 = vadd.f32 %v9676_v56, %v2318_v53  ;;  %v2447_v18 = vadd.f32 %v9677_v63, %v2319_v4  ;;  %v2448_v6 = vadd.f32 %v9678_v43, %v2320_v14  ;;  %v2321_v41 = vld [vmem:[%s4289_s24 + $0x10b0] sm:$0xff]  ;;  %v2322_v0 = vld [vmem:[%s4289_s24 + $0x10b8] sm:$0xff]  ;;  %v2323_v31 = vld [vmem:[%s4289_s24 + $0x11a0] sm:$0xff]  ;;  %2572 = vst [vmem:[%s4316_s20 + $0xfa8] sm:$0xff] %v2444_v61 }
 0x27c   : > { %2573 = vst [vmem:[%s4316_s20 + $0xfb0] sm:$0xff] %v2445_v47  ;;  %v9679_v29 = vld [vmem:[#allocation25_spill] sm:$0xff]  ;;  %v9680_v25 = vld [vmem:[#allocation26_spill] sm:$0xff]  ;;  %v9681_v28 = vld [vmem:[#allocation27_spill] sm:$0xff] }
 0x27d   : > { %v2449_v54 = vadd.f32 %v9679_v29, %v2321_v41  ;;  %v2450_v21 = vadd.f32 %v9680_v25, %v2322_v0  ;;  %v2451_v13 = vadd.f32 %v9681_v28, %v2323_v31  ;;  %v2324_v2 = vld [vmem:[%s4289_s24 + $0x11a8] sm:$0xff]  ;;  %v2325_v11 = vld [vmem:[%s4289_s24 + $0x11b0] sm:$0xff]  ;;  %v2326_v35 = vld [vmem:[%s4289_s24 + $0x11b8] sm:$0xff]  ;;  %2574 = vst [vmem:[%s4316_s20 + $0xfb8] sm:$0xff] %v2446_v27 }
 0x27e   : > { %2575 = vst [vmem:[%s4316_s20 + $0x10a0] sm:$0xff] %v2447_v18  ;;  %2576 = vst [vmem:[%s4316_s20 + $0x10a8] sm:$0xff] %v2448_v6  ;;  %v9682_v37 = vld [vmem:[#allocation28_spill] sm:$0xff]  ;;  %v9683_v57 = vld [vmem:[#allocation29_spill] sm:$0xff] }
 0x27f   : > { %v2452_v60 = vadd.f32 %v9682_v37, %v2324_v2  ;;  %v2453_v1 = vadd.f32 %v9683_v57, %v2325_v11  ;;  %v9684_v15 = vld [vmem:[#allocation30_spill] sm:$0xff]  ;;  %v2327_v10 = vld [vmem:[%s4289_s24 + $0x12a0] sm:$0xff]  ;;  %v2328_v49 = vld [vmem:[%s4289_s24 + $0x12a8] sm:$0xff]  ;;  %2577 = vst [vmem:[%s4316_s20 + $0x10b0] sm:$0xff] %v2449_v54 }
 0x280   : > { %v2454_v7 = vadd.f32 %v9684_v15, %v2326_v35  ;;  %v2329_v20 = vld [vmem:[%s4289_s24 + $0x12b0] sm:$0xff]  ;;  %2578 = vst [vmem:[%s4316_s20 + $0x10b8] sm:$0xff] %v2450_v21  ;;  %2579 = vst [vmem:[%s4316_s20 + $0x11a0] sm:$0xff] %v2451_v13  ;;  %v9685_v12 = vld [vmem:[#allocation31_spill] sm:$0xff] }
 0x281   : > { %v2455_v16 = vadd.f32 %v9685_v12, %v2327_v10  ;;  %v9686_v26 = vld [vmem:[#allocation32_spill] sm:$0xff]  ;;  %v9687_v39 = vld [vmem:[#allocation33_spill] sm:$0xff]  ;;  %v2330_v44 = vld [vmem:[%s4289_s24 + $0x12b8] sm:$0xff]  ;;  %2580 = vst [vmem:[%s4316_s20 + $0x11a8] sm:$0xff] %v2452_v60 }
 0x282   : > { %v2456_v58 = vadd.f32 %v9686_v26, %v2328_v49  ;;  %v2457_v9 = vadd.f32 %v9687_v39, %v2329_v20  ;;  %v2331_v19 = vld [vmem:[%s4289_s24 + $0x13a0] sm:$0xff]  ;;  %v2332_v17 = vld [vmem:[%s4289_s24 + $0x13a8] sm:$0xff]  ;;  %2581 = vst [vmem:[%s4316_s20 + $0x11b0] sm:$0xff] %v2453_v1  ;;  %2582 = vst [vmem:[%s4316_s20 + $0x11b8] sm:$0xff] %v2454_v7 }
 0x283   : > { %v9688_v23 = vld [vmem:[#allocation34_spill] sm:$0xff]  ;;  %v9689_v51 = vld [vmem:[#allocation35_spill] sm:$0xff]  ;;  %v9690_v22 = vld [vmem:[#allocation36_spill] sm:$0xff]  ;;  %2583 = vst [vmem:[%s4316_s20 + $0x12a0] sm:$0xff] %v2455_v16 }
 0x284   : > { %v2458_v34 = vadd.f32 %v9688_v23, %v2330_v44  ;;  %v2459_v40 = vadd.f32 %v9689_v51, %v2331_v19  ;;  %v2460_v8 = vadd.f32 %v9690_v22, %v2332_v17  ;;  %v2333_v55 = vld [vmem:[%s4289_s24 + $0x13b0] sm:$0xff]  ;;  %v2334_v24 = vld [vmem:[%s4289_s24 + $0x13b8] sm:$0xff]  ;;  %v2335_v5 = vld [vmem:[%s4289_s24 + $0x14a0] sm:$0xff]  ;;  %2584 = vst [vmem:[%s4316_s20 + $0x12a8] sm:$0xff] %v2456_v58 }
 0x285   : > { %2585 = vst [vmem:[%s4316_s20 + $0x12b0] sm:$0xff] %v2457_v9  ;;  %v9691_v52 = vld [vmem:[#allocation37_spill] sm:$0xff]  ;;  %v9692_v30 = vld [vmem:[#allocation38_spill] sm:$0xff]  ;;  %v9693_v33 = vld [vmem:[#allocation39_spill] sm:$0xff] }
 0x286   : > { %v2461_v62 = vadd.f32 %v9691_v52, %v2333_v55  ;;  %v2462_v32 = vadd.f32 %v9692_v30, %v2334_v24  ;;  %v2463_v46 = vadd.f32 %v9693_v33, %v2335_v5  ;;  %v2336_v36 = vld [vmem:[%s4289_s24 + $0x14a8] sm:$0xff]  ;;  %v2337_v45 = vld [vmem:[%s4289_s24 + $0x14b0] sm:$0xff]  ;;  %v2338_v50 = vld [vmem:[%s4289_s24 + $0x14b8] sm:$0xff]  ;;  %2586 = vst [vmem:[%s4316_s20 + $0x12b8] sm:$0xff] %v2458_v34 }
 0x287   : > { %2587 = vst [vmem:[%s4316_s20 + $0x13a0] sm:$0xff] %v2459_v40  ;;  %2588 = vst [vmem:[%s4316_s20 + $0x13a8] sm:$0xff] %v2460_v8  ;;  %v9694_v59 = vld [vmem:[#allocation40_spill] sm:$0xff]  ;;  %v9695_v38 = vld [vmem:[#allocation41_spill] sm:$0xff] }
 0x288   : > { %v2464_v48 = vadd.f32 %v9694_v59, %v2336_v36  ;;  %v2465_v61 = vadd.f32 %v9695_v38, %v2337_v45  ;;  %v9696_v42 = vld [vmem:[#allocation42_spill] sm:$0xff]  ;;  %v2339_v53 = vld [vmem:[%s4289_s24 + $0x15a0] sm:$0xff]  ;;  %v2340_v4 = vld [vmem:[%s4289_s24 + $0x15a8] sm:$0xff]  ;;  %2589 = vst [vmem:[%s4316_s20 + $0x13b0] sm:$0xff] %v2461_v62 }
 0x289   : > { %v2466_v47 = vadd.f32 %v9696_v42, %v2338_v50  ;;  %v2341_v14 = vld [vmem:[%s4289_s24 + $0x15b0] sm:$0xff]  ;;  %2590 = vst [vmem:[%s4316_s20 + $0x13b8] sm:$0xff] %v2462_v32  ;;  %2591 = vst [vmem:[%s4316_s20 + $0x14a0] sm:$0xff] %v2463_v46  ;;  %v9697_v56 = vld [vmem:[#allocation43_spill] sm:$0xff] }
 0x28a   : > { %v2467_v27 = vadd.f32 %v9697_v56, %v2339_v53  ;;  %v9698_v63 = vld [vmem:[#allocation44_spill] sm:$0xff]  ;;  %v9699_v43 = vld [vmem:[#allocation45_spill] sm:$0xff]  ;;  %v2342_v41 = vld [vmem:[%s4289_s24 + $0x15b8] sm:$0xff]  ;;  %2592 = vst [vmem:[%s4316_s20 + $0x14a8] sm:$0xff] %v2464_v48 }
 0x28b   : > { %v2468_v18 = vadd.f32 %v9698_v63, %v2340_v4  ;;  %v2469_v6 = vadd.f32 %v9699_v43, %v2341_v14  ;;  %v2343_v0 = vld [vmem:[%s4289_s24 + $0x16a0] sm:$0xff]  ;;  %v2344_v31 = vld [vmem:[%s4289_s24 + $0x16a8] sm:$0xff]  ;;  %2593 = vst [vmem:[%s4316_s20 + $0x14b0] sm:$0xff] %v2465_v61  ;;  %2594 = vst [vmem:[%s4316_s20 + $0x14b8] sm:$0xff] %v2466_v47 }
 0x28c   : > { %v9700_v29 = vld [vmem:[#allocation46_spill] sm:$0xff]  ;;  %v9701_v25 = vld [vmem:[#allocation47_spill] sm:$0xff]  ;;  %v9702_v28 = vld [vmem:[#allocation48_spill] sm:$0xff]  ;;  %2595 = vst [vmem:[%s4316_s20 + $0x15a0] sm:$0xff] %v2467_v27 }
 0x28d   : > { %v2470_v54 = vadd.f32 %v9700_v29, %v2342_v41  ;;  %v2471_v21 = vadd.f32 %v9701_v25, %v2343_v0  ;;  %v2472_v13 = vadd.f32 %v9702_v28, %v2344_v31  ;;  %v2345_v2 = vld [vmem:[%s4289_s24 + $0x16b0] sm:$0xff]  ;;  %v2346_v11 = vld [vmem:[%s4289_s24 + $0x16b8] sm:$0xff]  ;;  %v2347_v35 = vld [vmem:[%s4289_s24 + $0x17a0] sm:$0xff]  ;;  %2596 = vst [vmem:[%s4316_s20 + $0x15a8] sm:$0xff] %v2468_v18 }
 0x28e   : > { %2597 = vst [vmem:[%s4316_s20 + $0x15b0] sm:$0xff] %v2469_v6  ;;  %v9703_v37 = vld [vmem:[#allocation49_spill] sm:$0xff]  ;;  %v9704_v57 = vld [vmem:[#allocation50_spill] sm:$0xff]  ;;  %v9705_v15 = vld [vmem:[#allocation51_spill] sm:$0xff] }
 0x28f   : > { %v2473_v60 = vadd.f32 %v9703_v37, %v2345_v2  ;;  %v2474_v1 = vadd.f32 %v9704_v57, %v2346_v11  ;;  %v2475_v7 = vadd.f32 %v9705_v15, %v2347_v35  ;;  %v2348_v10 = vld [vmem:[%s4289_s24 + $0x17a8] sm:$0xff]  ;;  %v2349_v49 = vld [vmem:[%s4289_s24 + $0x17b0] sm:$0xff]  ;;  %v2350_v20 = vld [vmem:[%s4289_s24 + $0x17b8] sm:$0xff]  ;;  %2598 = vst [vmem:[%s4316_s20 + $0x15b8] sm:$0xff] %v2470_v54 }
 0x290   : > { %2599 = vst [vmem:[%s4316_s20 + $0x16a0] sm:$0xff] %v2471_v21  ;;  %2600 = vst [vmem:[%s4316_s20 + $0x16a8] sm:$0xff] %v2472_v13  ;;  %v9706_v12 = vld [vmem:[#allocation52_spill] sm:$0xff]  ;;  %v9707_v26 = vld [vmem:[#allocation53_spill] sm:$0xff] }
 0x291   : > { %v2476_v16 = vadd.f32 %v9706_v12, %v2348_v10  ;;  %v2477_v58 = vadd.f32 %v9707_v26, %v2349_v49  ;;  %v9708_v39 = vld [vmem:[#allocation54_spill] sm:$0xff]  ;;  %v2351_v44 = vld [vmem:[%s4289_s24 + $0x18a0] sm:$0xff]  ;;  %v2352_v19 = vld [vmem:[%s4289_s24 + $0x18a8] sm:$0xff]  ;;  %2601 = vst [vmem:[%s4316_s20 + $0x16b0] sm:$0xff] %v2473_v60 }
 0x292   : > { %v2478_v9 = vadd.f32 %v9708_v39, %v2350_v20  ;;  %v2353_v17 = vld [vmem:[%s4289_s24 + $0x18b0] sm:$0xff]  ;;  %2602 = vst [vmem:[%s4316_s20 + $0x16b8] sm:$0xff] %v2474_v1  ;;  %2603 = vst [vmem:[%s4316_s20 + $0x17a0] sm:$0xff] %v2475_v7  ;;  %v9709_v23 = vld [vmem:[#allocation55_spill] sm:$0xff] }
 0x293   : > { %v2479_v34 = vadd.f32 %v9709_v23, %v2351_v44  ;;  %v9710_v51 = vld [vmem:[#allocation56_spill] sm:$0xff]  ;;  %v9711_v22 = vld [vmem:[#allocation57_spill] sm:$0xff]  ;;  %v2354_v55 = vld [vmem:[%s4289_s24 + $0x18b8] sm:$0xff]  ;;  %2604 = vst [vmem:[%s4316_s20 + $0x17a8] sm:$0xff] %v2476_v16 }
 0x294   : > { %v2480_v40 = vadd.f32 %v9710_v51, %v2352_v19  ;;  %v2481_v8 = vadd.f32 %v9711_v22, %v2353_v17  ;;  %v2355_v24 = vld [vmem:[%s4289_s24 + $0x19a0] sm:$0xff]  ;;  %v2356_v5 = vld [vmem:[%s4289_s24 + $0x19a8] sm:$0xff]  ;;  %2605 = vst [vmem:[%s4316_s20 + $0x17b0] sm:$0xff] %v2477_v58  ;;  %2606 = vst [vmem:[%s4316_s20 + $0x17b8] sm:$0xff] %v2478_v9 }
 0x295   : > { %v9712_v52 = vld [vmem:[#allocation58_spill] sm:$0xff]  ;;  %v9713_v30 = vld [vmem:[#allocation59_spill] sm:$0xff]  ;;  %v9714_v33 = vld [vmem:[#allocation60_spill] sm:$0xff]  ;;  %2607 = vst [vmem:[%s4316_s20 + $0x18a0] sm:$0xff] %v2479_v34 }
 0x296   : > { %v2482_v62 = vadd.f32 %v9712_v52, %v2354_v55  ;;  %v2483_v32 = vadd.f32 %v9713_v30, %v2355_v24  ;;  %v2484_v46 = vadd.f32 %v9714_v33, %v2356_v5  ;;  %v2357_v36 = vld [vmem:[%s4289_s24 + $0x19b0] sm:$0xff]  ;;  %v2358_v45 = vld [vmem:[%s4289_s24 + $0x19b8] sm:$0xff]  ;;  %v2359_v50 = vld [vmem:[%s4289_s24 + $0x1aa0] sm:$0xff]  ;;  %2608 = vst [vmem:[%s4316_s20 + $0x18a8] sm:$0xff] %v2480_v40 }
 0x297   : > { %2609 = vst [vmem:[%s4316_s20 + $0x18b0] sm:$0xff] %v2481_v8  ;;  %v9715_v59 = vld [vmem:[#allocation61_spill] sm:$0xff]  ;;  %v9716_v38 = vld [vmem:[#allocation62_spill] sm:$0xff]  ;;  %v9717_v42 = vld [vmem:[#allocation63_spill] sm:$0xff] }
 0x298   : > { %v2485_v48 = vadd.f32 %v9715_v59, %v2357_v36  ;;  %v2486_v61 = vadd.f32 %v9716_v38, %v2358_v45  ;;  %v2487_v47 = vadd.f32 %v9717_v42, %v2359_v50  ;;  %v2360_v53 = vld [vmem:[%s4289_s24 + $0x1aa8] sm:$0xff]  ;;  %v2361_v4 = vld [vmem:[%s4289_s24 + $0x1ab0] sm:$0xff]  ;;  %v2362_v14 = vld [vmem:[%s4289_s24 + $0x1ab8] sm:$0xff]  ;;  %2610 = vst [vmem:[%s4316_s20 + $0x18b8] sm:$0xff] %v2482_v62 }
 0x299   : > { %2611 = vst [vmem:[%s4316_s20 + $0x19a0] sm:$0xff] %v2483_v32  ;;  %2612 = vst [vmem:[%s4316_s20 + $0x19a8] sm:$0xff] %v2484_v46  ;;  %v9718_v56 = vld [vmem:[#allocation64_spill] sm:$0xff]  ;;  %v9719_v63 = vld [vmem:[#allocation65_spill] sm:$0xff] }
 0x29a   : > { %v2488_v27 = vadd.f32 %v9718_v56, %v2360_v53  ;;  %v2489_v18 = vadd.f32 %v9719_v63, %v2361_v4  ;;  %v9720_v43 = vld [vmem:[#allocation66_spill] sm:$0xff]  ;;  %v2363_v41 = vld [vmem:[%s4289_s24 + $0x1ba0] sm:$0xff]  ;;  %v2364_v0 = vld [vmem:[%s4289_s24 + $0x1ba8] sm:$0xff]  ;;  %2613 = vst [vmem:[%s4316_s20 + $0x19b0] sm:$0xff] %v2485_v48 }
 0x29b   : > { %v2490_v6 = vadd.f32 %v9720_v43, %v2362_v14  ;;  %v2365_v31 = vld [vmem:[%s4289_s24 + $0x1bb0] sm:$0xff]  ;;  %2614 = vst [vmem:[%s4316_s20 + $0x19b8] sm:$0xff] %v2486_v61  ;;  %2615 = vst [vmem:[%s4316_s20 + $0x1aa0] sm:$0xff] %v2487_v47  ;;  %v9721_v29 = vld [vmem:[#allocation67_spill] sm:$0xff] }
 0x29c   : > { %v2491_v54 = vadd.f32 %v9721_v29, %v2363_v41  ;;  %v9722_v25 = vld [vmem:[#allocation68_spill] sm:$0xff]  ;;  %v9723_v28 = vld [vmem:[#allocation69_spill] sm:$0xff]  ;;  %v2366_v2 = vld [vmem:[%s4289_s24 + $0x1bb8] sm:$0xff]  ;;  %2616 = vst [vmem:[%s4316_s20 + $0x1aa8] sm:$0xff] %v2488_v27 }
 0x29d   : > { %v2492_v21 = vadd.f32 %v9722_v25, %v2364_v0  ;;  %v2493_v13 = vadd.f32 %v9723_v28, %v2365_v31  ;;  %v2367_v11 = vld [vmem:[%s4289_s24 + $0x1ca0] sm:$0xff]  ;;  %v2368_v35 = vld [vmem:[%s4289_s24 + $0x1ca8] sm:$0xff]  ;;  %2617 = vst [vmem:[%s4316_s20 + $0x1ab0] sm:$0xff] %v2489_v18  ;;  %2618 = vst [vmem:[%s4316_s20 + $0x1ab8] sm:$0xff] %v2490_v6 }
 0x29e   : > { %v9724_v37 = vld [vmem:[#allocation70_spill] sm:$0xff]  ;;  %v9725_v57 = vld [vmem:[#allocation71_spill] sm:$0xff]  ;;  %v9726_v15 = vld [vmem:[#allocation72_spill] sm:$0xff]  ;;  %2619 = vst [vmem:[%s4316_s20 + $0x1ba0] sm:$0xff] %v2491_v54 }
 0x29f   : > { %v2494_v60 = vadd.f32 %v9724_v37, %v2366_v2  ;;  %v2495_v1 = vadd.f32 %v9725_v57, %v2367_v11  ;;  %v2496_v7 = vadd.f32 %v9726_v15, %v2368_v35  ;;  %v2369_v10 = vld [vmem:[%s4289_s24 + $0x1cb0] sm:$0xff]  ;;  %v2370_v49 = vld [vmem:[%s4289_s24 + $0x1cb8] sm:$0xff]  ;;  %v2371_v20 = vld [vmem:[%s4289_s24 + $0x1da0] sm:$0xff]  ;;  %2620 = vst [vmem:[%s4316_s20 + $0x1ba8] sm:$0xff] %v2492_v21 }
 0x2a0   : > { %2621 = vst [vmem:[%s4316_s20 + $0x1bb0] sm:$0xff] %v2493_v13  ;;  %v9727_v12 = vld [vmem:[#allocation73_spill] sm:$0xff]  ;;  %v9728_v26 = vld [vmem:[#allocation74_spill] sm:$0xff]  ;;  %v9729_v39 = vld [vmem:[#allocation75_spill] sm:$0xff] }
 0x2a1   : > { %v2497_v16 = vadd.f32 %v9727_v12, %v2369_v10  ;;  %v2498_v58 = vadd.f32 %v9728_v26, %v2370_v49  ;;  %v2499_v9 = vadd.f32 %v9729_v39, %v2371_v20  ;;  %v2372_v44 = vld [vmem:[%s4289_s24 + $0x1da8] sm:$0xff]  ;;  %v2373_v19 = vld [vmem:[%s4289_s24 + $0x1db0] sm:$0xff]  ;;  %v2374_v17 = vld [vmem:[%s4289_s24 + $0x1db8] sm:$0xff]  ;;  %2622 = vst [vmem:[%s4316_s20 + $0x1bb8] sm:$0xff] %v2494_v60 }
 0x2a2   : > { %2623 = vst [vmem:[%s4316_s20 + $0x1ca0] sm:$0xff] %v2495_v1  ;;  %2624 = vst [vmem:[%s4316_s20 + $0x1ca8] sm:$0xff] %v2496_v7  ;;  %v9730_v23 = vld [vmem:[#allocation76_spill] sm:$0xff]  ;;  %v9731_v51 = vld [vmem:[#allocation77_spill] sm:$0xff] }
 0x2a3   : > { %v2500_v34 = vadd.f32 %v9730_v23, %v2372_v44  ;;  %v2501_v40 = vadd.f32 %v9731_v51, %v2373_v19  ;;  %v9732_v22 = vld [vmem:[#allocation78_spill] sm:$0xff]  ;;  %v2375_v55 = vld [vmem:[%s4289_s24 + $0x1ea0] sm:$0xff]  ;;  %v2376_v24 = vld [vmem:[%s4289_s24 + $0x1ea8] sm:$0xff]  ;;  %2625 = vst [vmem:[%s4316_s20 + $0x1cb0] sm:$0xff] %v2497_v16 }
 0x2a4   : > { %v2502_v8 = vadd.f32 %v9732_v22, %v2374_v17  ;;  %v2377_v5 = vld [vmem:[%s4289_s24 + $0x1eb0] sm:$0xff]  ;;  %2626 = vst [vmem:[%s4316_s20 + $0x1cb8] sm:$0xff] %v2498_v58  ;;  %2627 = vst [vmem:[%s4316_s20 + $0x1da0] sm:$0xff] %v2499_v9  ;;  %v9733_v52 = vld [vmem:[#allocation79_spill] sm:$0xff] }
 0x2a5   : > { %v2503_v62 = vadd.f32 %v9733_v52, %v2375_v55  ;;  %v9734_v30 = vld [vmem:[#allocation80_spill] sm:$0xff]  ;;  %v9735_v33 = vld [vmem:[#allocation81_spill] sm:$0xff]  ;;  %v2378_v36 = vld [vmem:[%s4289_s24 + $0x1eb8] sm:$0xff]  ;;  %2628 = vst [vmem:[%s4316_s20 + $0x1da8] sm:$0xff] %v2500_v34 }
 0x2a6   : > { %v2504_v32 = vadd.f32 %v9734_v30, %v2376_v24  ;;  %v2505_v46 = vadd.f32 %v9735_v33, %v2377_v5  ;;  %v2379_v45 = vld [vmem:[%s4289_s24 + $0x1fa0] sm:$0xff]  ;;  %v2380_v50 = vld [vmem:[%s4289_s24 + $0x1fa8] sm:$0xff]  ;;  %2629 = vst [vmem:[%s4316_s20 + $0x1db0] sm:$0xff] %v2501_v40  ;;  %2630 = vst [vmem:[%s4316_s20 + $0x1db8] sm:$0xff] %v2502_v8 }
 0x2a7   : > { %v9736_v59 = vld [vmem:[#allocation82_spill] sm:$0xff]  ;;  %v9737_v38 = vld [vmem:[#allocation83_spill] sm:$0xff]  ;;  %v9738_v42 = vld [vmem:[#allocation84_spill] sm:$0xff]  ;;  %2631 = vst [vmem:[%s4316_s20 + $0x1ea0] sm:$0xff] %v2503_v62 }
 0x2a8   : > { %v2506_v48 = vadd.f32 %v9736_v59, %v2378_v36  ;;  %v2507_v61 = vadd.f32 %v9737_v38, %v2379_v45  ;;  %v2508_v47 = vadd.f32 %v9738_v42, %v2380_v50  ;;  %v2381_v53 = vld [vmem:[%s4289_s24 + $0x1fb0] sm:$0xff]  ;;  %v2382_v4 = vld [vmem:[%s4289_s24 + $0x1fb8] sm:$0xff]  ;;  %v2639_v14 = vld [vmem:[%s4289_s24 + $0xc0] sm:$0xff]  ;;  %2632 = vst [vmem:[%s4316_s20 + $0x1ea8] sm:$0xff] %v2504_v32 }
 0x2a9   : > { %2633 = vst [vmem:[%s4316_s20 + $0x1eb0] sm:$0xff] %v2505_v46  ;;  %v9739_v56 = vld [vmem:[#allocation85_spill] sm:$0xff]  ;;  %v9740_v63 = vld [vmem:[#allocation86_spill] sm:$0xff]  ;;  %v9741_v43 = vld [vmem:[#allocation87_spill] sm:$0xff] }
 0x2aa   : > { %v2509_v27 = vadd.f32 %v9739_v56, %v2381_v53  ;;  %v2510_v18 = vadd.f32 %v9740_v63, %v2382_v4  ;;  %v2767_v6 = vadd.f32 %v9741_v43, %v2639_v14  ;;  %v2640_v41 = vld [vmem:[%s4289_s24 + $0xc8] sm:$0xff]  ;;  %v2641_v0 = vld [vmem:[%s4289_s24 + $0xd0] sm:$0xff]  ;;  %v2642_v31 = vld [vmem:[%s4289_s24 + $0xd8] sm:$0xff]  ;;  %2634 = vst [vmem:[%s4316_s20 + $0x1eb8] sm:$0xff] %v2506_v48 }
 0x2ab   : > { %2635 = vst [vmem:[%s4316_s20 + $0x1fa0] sm:$0xff] %v2507_v61  ;;  %2636 = vst [vmem:[%s4316_s20 + $0x1fa8] sm:$0xff] %v2508_v47  ;;  %v9742_v29 = vld [vmem:[#allocation88_spill] sm:$0xff]  ;;  %v9743_v25 = vld [vmem:[#allocation89_spill] sm:$0xff] }
 0x2ac   : > { %v2768_v54 = vadd.f32 %v9742_v29, %v2640_v41  ;;  %v2769_v21 = vadd.f32 %v9743_v25, %v2641_v0  ;;  %v7767_v28 = vld [vmem:[%s4297_s5 + $0x18] sm:$0xff]  ;;  %v2643_v2 = vld [vmem:[%s4289_s24 + $0x1c0] sm:$0xff]  ;;  %v2644_v11 = vld [vmem:[%s4289_s24 + $0x1c8] sm:$0xff]  ;;  %2637 = vst [vmem:[%s4316_s20 + $0x1fb0] sm:$0xff] %v2509_v27 }
 0x2ad   : > { %v2770_v13 = vadd.f32 %v7767_v28, %v2642_v31  ;;  %v2645_v35 = vld [vmem:[%s4289_s24 + $0x1d0] sm:$0xff]  ;;  %2638 = vst [vmem:[%s4316_s20 + $0x1fb8] sm:$0xff] %v2510_v18  ;;  %2895 = vst [vmem:[%s4316_s20 + $0xc0] sm:$0xff] %v2767_v6  ;;  %v7777_v37 = vld [vmem:[%s4297_s5 + $0x20] sm:$0xff]  ;;  %v2772_v57 = vadd.f32 %v7386_v3, %v2644_v11 }
 0x2ae   : > { %v2771_v60 = vadd.f32 %v7777_v37, %v2643_v2  ;;  %v7782_v1 = vld [vmem:[%s4297_s5 + $0x30] sm:$0xff]  ;;  %v2646_v7 = vld [vmem:[%s4289_s24 + $0x1d8] sm:$0xff]  ;;  %v2647_v10 = vld [vmem:[%s4289_s24 + $0x2c0] sm:$0xff]  ;;  %2896 = vst [vmem:[%s4316_s20 + $0xc8] sm:$0xff] %v2768_v54 }
 0x2af   : > { %v2773_v15 = vadd.f32 %v7782_v1, %v2645_v35  ;;  %v2648_v49 = vld [vmem:[%s4289_s24 + $0x2c8] sm:$0xff]  ;;  %2897 = vst [vmem:[%s4316_s20 + $0xd0] sm:$0xff] %v2769_v21  ;;  %2898 = vst [vmem:[%s4316_s20 + $0xd8] sm:$0xff] %v2770_v13  ;;  %v7792_v20 = vld [vmem:[%s4297_s5 + $0x38] sm:$0xff] }
 0x2b0   : > { %v2774_v3 = vadd.f32 %v7792_v20, %v2646_v7  ;;  %v7796_v12 = vld [vmem:[%s4297_s5 + $0x40] sm:$0xff]  ;;  %v7800_v26 = vld [vmem:[%s4297_s5 + $0x48] sm:$0xff]  ;;  %v2649_v39 = vld [vmem:[%s4289_s24 + $0x2d0] sm:$0xff]  ;;  %2899 = vst [vmem:[%s4316_s20 + $0x1c0] sm:$0xff] %v2771_v60 }
 0x2b1   : > { %v2775_v16 = vadd.f32 %v7796_v12, %v2647_v10  ;;  %v2776_v58 = vadd.f32 %v7800_v26, %v2648_v49  ;;  %v2650_v9 = vld [vmem:[%s4289_s24 + $0x2d8] sm:$0xff]  ;;  %v2651_v44 = vld [vmem:[%s4289_s24 + $0x3c0] sm:$0xff]  ;;  %2900 = vst [vmem:[%s4316_s20 + $0x1c8] sm:$0xff] %v2772_v57  ;;  %2901 = vst [vmem:[%s4316_s20 + $0x1d0] sm:$0xff] %v2773_v15 }
 0x2b2   : > { %v7810_v19 = vld [vmem:[%s4297_s5 + $0x50] sm:$0xff]  ;;  %v7814_v23 = vld [vmem:[%s4297_s5 + $0x58] sm:$0xff]  ;;  %v7818_v51 = vld [vmem:[%s4297_s5 + $0x60] sm:$0xff]  ;;  %2902 = vst [vmem:[%s4316_s20 + $0x1d8] sm:$0xff] %v2774_v3 }
 0x2b3   : > { %v2777_v17 = vadd.f32 %v7810_v19, %v2649_v39  ;;  %v2778_v34 = vadd.f32 %v7814_v23, %v2650_v9  ;;  %v2779_v40 = vadd.f32 %v7818_v51, %v2651_v44  ;;  %v2652_v22 = vld [vmem:[%s4289_s24 + $0x3c8] sm:$0xff]  ;;  %v2653_v8 = vld [vmem:[%s4289_s24 + $0x3d0] sm:$0xff]  ;;  %v2654_v55 = vld [vmem:[%s4289_s24 + $0x3d8] sm:$0xff]  ;;  %2903 = vst [vmem:[%s4316_s20 + $0x2c0] sm:$0xff] %v2775_v16 }
 0x2b4   : > { %2904 = vst [vmem:[%s4316_s20 + $0x2c8] sm:$0xff] %v2776_v58  ;;  %v7828_v24 = vld [vmem:[%s4297_s5 + $0x68] sm:$0xff]  ;;  %v7832_v52 = vld [vmem:[%s4297_s5 + $0x70] sm:$0xff]  ;;  %v7836_v30 = vld [vmem:[%s4297_s5 + $0x78] sm:$0xff] }
 0x2b5   : > { %v2780_v5 = vadd.f32 %v7828_v24, %v2652_v22  ;;  %v2781_v62 = vadd.f32 %v7832_v52, %v2653_v8  ;;  %v2782_v32 = vadd.f32 %v7836_v30, %v2654_v55  ;;  %v2655_v33 = vld [vmem:[%s4289_s24 + $0x4c0] sm:$0xff]  ;;  %v2656_v46 = vld [vmem:[%s4289_s24 + $0x4c8] sm:$0xff]  ;;  %v2657_v36 = vld [vmem:[%s4289_s24 + $0x4d0] sm:$0xff]  ;;  %2905 = vst [vmem:[%s4316_s20 + $0x2d0] sm:$0xff] %v2777_v17 }
 0x2b6   : > { %2906 = vst [vmem:[%s4316_s20 + $0x2d8] sm:$0xff] %v2778_v34  ;;  %2907 = vst [vmem:[%s4316_s20 + $0x3c0] sm:$0xff] %v2779_v40  ;;  %v7846_v45 = vld [vmem:[%s4297_s5 + $0x80] sm:$0xff]  ;;  %v7850_v59 = vld [vmem:[%s4297_s5 + $0x88] sm:$0xff] }
 0x2b7   : > { %v2783_v50 = vadd.f32 %v7846_v45, %v2655_v33  ;;  %v2784_v48 = vadd.f32 %v7850_v59, %v2656_v46  ;;  %v7854_v38 = vld [vmem:[%s4297_s5 + $0x90] sm:$0xff]  ;;  %v2658_v42 = vld [vmem:[%s4289_s24 + $0x4d8] sm:$0xff]  ;;  %v2659_v47 = vld [vmem:[%s4289_s24 + $0x5c0] sm:$0xff]  ;;  %2908 = vst [vmem:[%s4316_s20 + $0x3c8] sm:$0xff] %v2780_v5 }
 0x2b8   : > { %v2785_v61 = vadd.f32 %v7854_v38, %v2657_v36  ;;  %v2660_v53 = vld [vmem:[%s4289_s24 + $0x5c8] sm:$0xff]  ;;  %2909 = vst [vmem:[%s4316_s20 + $0x3d0] sm:$0xff] %v2781_v62  ;;  %2910 = vst [vmem:[%s4316_s20 + $0x3d8] sm:$0xff] %v2782_v32  ;;  %v7864_v4 = vld [vmem:[%s4297_s5 + $0x98] sm:$0xff] }
 0x2b9   : > { %v2786_v14 = vadd.f32 %v7864_v4, %v2658_v42  ;;  %v7868_v56 = vld [vmem:[%s4297_s5 + $0xa0] sm:$0xff]  ;;  %v7872_v63 = vld [vmem:[%s4297_s5 + $0xa8] sm:$0xff]  ;;  %v2661_v43 = vld [vmem:[%s4289_s24 + $0x5d0] sm:$0xff]  ;;  %2911 = vst [vmem:[%s4316_s20 + $0x4c0] sm:$0xff] %v2783_v50 }
 0x2ba   : > { %v2787_v27 = vadd.f32 %v7868_v56, %v2659_v47  ;;  %v2788_v18 = vadd.f32 %v7872_v63, %v2660_v53  ;;  %v2662_v6 = vld [vmem:[%s4289_s24 + $0x5d8] sm:$0xff]  ;;  %v2663_v41 = vld [vmem:[%s4289_s24 + $0x6c0] sm:$0xff]  ;;  %2912 = vst [vmem:[%s4316_s20 + $0x4c8] sm:$0xff] %v2784_v48  ;;  %2913 = vst [vmem:[%s4316_s20 + $0x4d0] sm:$0xff] %v2785_v61 }
 0x2bb   : > { %v7882_v0 = vld [vmem:[%s4297_s5 + $0xb0] sm:$0xff]  ;;  %v7886_v29 = vld [vmem:[%s4297_s5 + $0xb8] sm:$0xff]  ;;  %v7890_v25 = vld [vmem:[%s4297_s5 + $0xc0] sm:$0xff]  ;;  %2914 = vst [vmem:[%s4316_s20 + $0x4d8] sm:$0xff] %v2786_v14 }
 0x2bc   : > { %v2789_v31 = vadd.f32 %v7882_v0, %v2661_v43  ;;  %v2790_v54 = vadd.f32 %v7886_v29, %v2662_v6  ;;  %v2791_v21 = vadd.f32 %v7890_v25, %v2663_v41  ;;  %v2664_v13 = vld [vmem:[%s4289_s24 + $0x6c8] sm:$0xff]  ;;  %v2665_v2 = vld [vmem:[%s4289_s24 + $0x6d0] sm:$0xff]  ;;  %v2666_v11 = vld [vmem:[%s4289_s24 + $0x6d8] sm:$0xff]  ;;  %2915 = vst [vmem:[%s4316_s20 + $0x5c0] sm:$0xff] %v2787_v27 }
 0x2bd   : > { %2916 = vst [vmem:[%s4316_s20 + $0x5c8] sm:$0xff] %v2788_v18  ;;  %v7900_v35 = vld [vmem:[%s4297_s5 + $0xc8] sm:$0xff]  ;;  %v7904_v57 = vld [vmem:[%s4297_s5 + $0xd0] sm:$0xff]  ;;  %v7908_v7 = vld [vmem:[%s4297_s5 + $0xd8] sm:$0xff] }
 0x2be   : > { %v2792_v60 = vadd.f32 %v7900_v35, %v2664_v13  ;;  %v2793_v15 = vadd.f32 %v7904_v57, %v2665_v2  ;;  %v2794_v10 = vadd.f32 %v7908_v7, %v2666_v11  ;;  %v2667_v49 = vld [vmem:[%s4289_s24 + $0x7c0] sm:$0xff]  ;;  %v2668_v3 = vld [vmem:[%s4289_s24 + $0x7c8] sm:$0xff]  ;;  %v2669_v16 = vld [vmem:[%s4289_s24 + $0x7d0] sm:$0xff]  ;;  %2917 = vst [vmem:[%s4316_s20 + $0x5d0] sm:$0xff] %v2789_v31 }
 0x2bf   : > { %2918 = vst [vmem:[%s4316_s20 + $0x5d8] sm:$0xff] %v2790_v54  ;;  %2919 = vst [vmem:[%s4316_s20 + $0x6c0] sm:$0xff] %v2791_v21  ;;  %v7918_v58 = vld [vmem:[%s4297_s5 + $0xe0] sm:$0xff]  ;;  %v7922_v9 = vld [vmem:[%s4297_s5 + $0xe8] sm:$0xff] }
 0x2c0   : > { %v2795_v39 = vadd.f32 %v7918_v58, %v2667_v49  ;;  %v2796_v44 = vadd.f32 %v7922_v9, %v2668_v3  ;;  %v7926_v17 = vld [vmem:[%s4297_s5 + $0xf0] sm:$0xff]  ;;  %v2670_v40 = vld [vmem:[%s4289_s24 + $0x7d8] sm:$0xff]  ;;  %v2671_v22 = vld [vmem:[%s4289_s24 + $0x8c0] sm:$0xff]  ;;  %2920 = vst [vmem:[%s4316_s20 + $0x6c8] sm:$0xff] %v2792_v60 }
 0x2c1   : > { %v2797_v34 = vadd.f32 %v7926_v17, %v2669_v16  ;;  %v2672_v8 = vld [vmem:[%s4289_s24 + $0x8c8] sm:$0xff]  ;;  %2921 = vst [vmem:[%s4316_s20 + $0x6d0] sm:$0xff] %v2793_v15  ;;  %2922 = vst [vmem:[%s4316_s20 + $0x6d8] sm:$0xff] %v2794_v10  ;;  %v7936_v55 = vld [vmem:[%s4297_s5 + $0xf8] sm:$0xff] }
 0x2c2   : > { %v2798_v5 = vadd.f32 %v7936_v55, %v2670_v40  ;;  %v7940_v62 = vld [vmem:[%s4297_s5 + $0x100] sm:$0xff]  ;;  %v7944_v33 = vld [vmem:[%s4297_s5 + $0x108] sm:$0xff]  ;;  %v2673_v36 = vld [vmem:[%s4289_s24 + $0x8d0] sm:$0xff]  ;;  %2923 = vst [vmem:[%s4316_s20 + $0x7c0] sm:$0xff] %v2795_v39 }
 0x2c3   : > { %v2799_v32 = vadd.f32 %v7940_v62, %v2671_v22  ;;  %v2800_v46 = vadd.f32 %v7944_v33, %v2672_v8  ;;  %v2674_v50 = vld [vmem:[%s4289_s24 + $0x8d8] sm:$0xff]  ;;  %v2675_v48 = vld [vmem:[%s4289_s24 + $0x9c0] sm:$0xff]  ;;  %2924 = vst [vmem:[%s4316_s20 + $0x7c8] sm:$0xff] %v2796_v44  ;;  %2925 = vst [vmem:[%s4316_s20 + $0x7d0] sm:$0xff] %v2797_v34 }
 0x2c4   : > { %v7954_v61 = vld [vmem:[%s4297_s5 + $0x110] sm:$0xff]  ;;  %v7958_v47 = vld [vmem:[%s4297_s5 + $0x118] sm:$0xff]  ;;  %v7962_v14 = vld [vmem:[%s4297_s5 + $0x120] sm:$0xff]  ;;  %2926 = vst [vmem:[%s4316_s20 + $0x7d8] sm:$0xff] %v2798_v5 }
 0x2c5   : > { %v2801_v42 = vadd.f32 %v7954_v61, %v2673_v36  ;;  %v2802_v53 = vadd.f32 %v7958_v47, %v2674_v50  ;;  %v2803_v27 = vadd.f32 %v7962_v14, %v2675_v48  ;;  %v2676_v18 = vld [vmem:[%s4289_s24 + $0x9c8] sm:$0xff]  ;;  %v2677_v43 = vld [vmem:[%s4289_s24 + $0x9d0] sm:$0xff]  ;;  %v2678_v6 = vld [vmem:[%s4289_s24 + $0x9d8] sm:$0xff]  ;;  %2927 = vst [vmem:[%s4316_s20 + $0x8c0] sm:$0xff] %v2799_v32 }
 0x2c6   : > { %2928 = vst [vmem:[%s4316_s20 + $0x8c8] sm:$0xff] %v2800_v46  ;;  %v7972_v41 = vld [vmem:[%s4297_s5 + $0x128] sm:$0xff]  ;;  %v7976_v54 = vld [vmem:[%s4297_s5 + $0x130] sm:$0xff]  ;;  %v7980_v13 = vld [vmem:[%s4297_s5 + $0x138] sm:$0xff] }
 0x2c7   : > { %v2804_v31 = vadd.f32 %v7972_v41, %v2676_v18  ;;  %v2805_v21 = vadd.f32 %v7976_v54, %v2677_v43  ;;  %v2806_v2 = vadd.f32 %v7980_v13, %v2678_v6  ;;  %v2679_v11 = vld [vmem:[%s4289_s24 + $0xac0] sm:$0xff]  ;;  %v2680_v60 = vld [vmem:[%s4289_s24 + $0xac8] sm:$0xff]  ;;  %v2681_v15 = vld [vmem:[%s4289_s24 + $0xad0] sm:$0xff]  ;;  %2929 = vst [vmem:[%s4316_s20 + $0x8d0] sm:$0xff] %v2801_v42 }
 0x2c8   : > { %2930 = vst [vmem:[%s4316_s20 + $0x8d8] sm:$0xff] %v2802_v53  ;;  %2931 = vst [vmem:[%s4316_s20 + $0x9c0] sm:$0xff] %v2803_v27  ;;  %v7990_v10 = vld [vmem:[%s4297_s5 + $0x140] sm:$0xff]  ;;  %v7994_v3 = vld [vmem:[%s4297_s5 + $0x148] sm:$0xff] }
 0x2c9   : > { %v2807_v49 = vadd.f32 %v7990_v10, %v2679_v11  ;;  %v2808_v16 = vadd.f32 %v7994_v3, %v2680_v60  ;;  %v7998_v39 = vld [vmem:[%s4297_s5 + $0x150] sm:$0xff]  ;;  %v2682_v34 = vld [vmem:[%s4289_s24 + $0xad8] sm:$0xff]  ;;  %v2683_v40 = vld [vmem:[%s4289_s24 + $0xbc0] sm:$0xff]  ;;  %2932 = vst [vmem:[%s4316_s20 + $0x9c8] sm:$0xff] %v2804_v31 }
 0x2ca   : > { %v2809_v44 = vadd.f32 %v7998_v39, %v2681_v15  ;;  %v2684_v22 = vld [vmem:[%s4289_s24 + $0xbc8] sm:$0xff]  ;;  %2933 = vst [vmem:[%s4316_s20 + $0x9d0] sm:$0xff] %v2805_v21  ;;  %2934 = vst [vmem:[%s4316_s20 + $0x9d8] sm:$0xff] %v2806_v2  ;;  %v8008_v8 = vld [vmem:[%s4297_s5 + $0x158] sm:$0xff] }
 0x2cb   : > { %v2810_v5 = vadd.f32 %v8008_v8, %v2682_v34  ;;  %v8012_v32 = vld [vmem:[%s4297_s5 + $0x160] sm:$0xff]  ;;  %v8016_v36 = vld [vmem:[%s4297_s5 + $0x168] sm:$0xff]  ;;  %v2685_v48 = vld [vmem:[%s4289_s24 + $0xbd0] sm:$0xff]  ;;  %2935 = vst [vmem:[%s4316_s20 + $0xac0] sm:$0xff] %v2807_v49 }
 0x2cc   : > { %v2811_v46 = vadd.f32 %v8012_v32, %v2683_v40  ;;  %v2812_v50 = vadd.f32 %v8016_v36, %v2684_v22  ;;  %v2686_v42 = vld [vmem:[%s4289_s24 + $0xbd8] sm:$0xff]  ;;  %v2687_v53 = vld [vmem:[%s4289_s24 + $0xcc0] sm:$0xff]  ;;  %2936 = vst [vmem:[%s4316_s20 + $0xac8] sm:$0xff] %v2808_v16  ;;  %2937 = vst [vmem:[%s4316_s20 + $0xad0] sm:$0xff] %v2809_v44 }
 0x2cd   : > { %v8026_v27 = vld [vmem:[%s4297_s5 + $0x170] sm:$0xff]  ;;  %v8030_v43 = vld [vmem:[%s4297_s5 + $0x178] sm:$0xff]  ;;  %v8034_v31 = vld [vmem:[%s4297_s5 + $0x180] sm:$0xff]  ;;  %2938 = vst [vmem:[%s4316_s20 + $0xad8] sm:$0xff] %v2810_v5 }
 0x2ce   : > { %v2813_v18 = vadd.f32 %v8026_v27, %v2685_v48  ;;  %v2814_v6 = vadd.f32 %v8030_v43, %v2686_v42  ;;  %v2815_v21 = vadd.f32 %v8034_v31, %v2687_v53  ;;  %v2688_v2 = vld [vmem:[%s4289_s24 + $0xcc8] sm:$0xff]  ;;  %v2689_v11 = vld [vmem:[%s4289_s24 + $0xcd0] sm:$0xff]  ;;  %v2690_v60 = vld [vmem:[%s4289_s24 + $0xcd8] sm:$0xff]  ;;  %2939 = vst [vmem:[%s4316_s20 + $0xbc0] sm:$0xff] %v2811_v46 }
 0x2cf   : > { %2940 = vst [vmem:[%s4316_s20 + $0xbc8] sm:$0xff] %v2812_v50  ;;  %v8044_v15 = vld [vmem:[%s4297_s5 + $0x188] sm:$0xff]  ;;  %v8048_v16 = vld [vmem:[%s4297_s5 + $0x190] sm:$0xff]  ;;  %v8052_v34 = vld [vmem:[%s4297_s5 + $0x198] sm:$0xff] }
 0x2d0   : > { %v2816_v49 = vadd.f32 %v8044_v15, %v2688_v2  ;;  %v2817_v44 = vadd.f32 %v8048_v16, %v2689_v11  ;;  %9744 = vst [vmem:[#allocation11_spill] sm:$0xff] %v8052_v34  ;;  %v2818_v40 = vadd.f32 %v8052_v34, %v2690_v60  ;;  %v2691_v22 = vld [vmem:[%s4289_s24 + $0xdc0] sm:$0xff]  ;;  %v2692_v5 = vld [vmem:[%s4289_s24 + $0xdc8] sm:$0xff]  ;;  %v2693_v46 = vld [vmem:[%s4289_s24 + $0xdd0] sm:$0xff] }
 0x2d1   : > { %2941 = vst [vmem:[%s4316_s20 + $0xbd0] sm:$0xff] %v2813_v18  ;;  %2942 = vst [vmem:[%s4316_s20 + $0xbd8] sm:$0xff] %v2814_v6  ;;  %v8062_v50 = vld [vmem:[%s4297_s5 + $0x1a0] sm:$0xff]  ;;  %v8066_v42 = vld [vmem:[%s4297_s5 + $0x1a8] sm:$0xff] }
 0x2d2   : > { %2943 = vst [vmem:[%s4316_s20 + $0xcc0] sm:$0xff] %v2815_v21  ;;  %9745 = vst [vmem:[#allocation12_spill] sm:$0xff] %v8062_v50  ;;  %v2819_v48 = vadd.f32 %v8062_v50, %v2691_v22  ;;  %v2820_v53 = vadd.f32 %v8066_v42, %v2692_v5  ;;  %v8070_v2 = vld [vmem:[%s4297_s5 + $0x1b0] sm:$0xff]  ;;  %v2694_v18 = vld [vmem:[%s4289_s24 + $0xdd8] sm:$0xff] }
 0x2d3   : > { %9746 = vst [vmem:[#allocation13_spill] sm:$0xff] %v8066_v42  ;;  %9747 = vst [vmem:[#allocation14_spill] sm:$0xff] %v8070_v2  ;;  %v2821_v11 = vadd.f32 %v8070_v2, %v2693_v46  ;;  %v2695_v6 = vld [vmem:[%s4289_s24 + $0xec0] sm:$0xff]  ;;  %v2696_v21 = vld [vmem:[%s4289_s24 + $0xec8] sm:$0xff] }
 0x2d4   : > { %2944 = vst [vmem:[%s4316_s20 + $0xcc8] sm:$0xff] %v2816_v49  ;;  %2945 = vst [vmem:[%s4316_s20 + $0xcd0] sm:$0xff] %v2817_v44  ;;  %v8080_v60 = vld [vmem:[%s4297_s5 + $0x1b8] sm:$0xff]  ;;  %v8084_v5 = vld [vmem:[%s4297_s5 + $0x1c0] sm:$0xff] }
 0x2d5   : > { %2946 = vst [vmem:[%s4316_s20 + $0xcd8] sm:$0xff] %v2818_v40  ;;  %9748 = vst [vmem:[#allocation15_spill] sm:$0xff] %v8080_v60  ;;  %v2822_v22 = vadd.f32 %v8080_v60, %v2694_v18  ;;  %v2823_v46 = vadd.f32 %v8084_v5, %v2695_v6  ;;  %v8088_v2 = vld [vmem:[%s4297_s5 + $0x1c8] sm:$0xff]  ;;  %v2697_v49 = vld [vmem:[%s4289_s24 + $0xed0] sm:$0xff] }
 0x2d6   : > { %9749 = vst [vmem:[#allocation16_spill] sm:$0xff] %v8084_v5  ;;  %9750 = vst [vmem:[#allocation17_spill] sm:$0xff] %v8088_v2  ;;  %v2824_v42 = vadd.f32 %v8088_v2, %v2696_v21  ;;  %v2698_v44 = vld [vmem:[%s4289_s24 + $0xed8] sm:$0xff]  ;;  %v2699_v40 = vld [vmem:[%s4289_s24 + $0xfc0] sm:$0xff] }
 0x2d7   : > { %2947 = vst [vmem:[%s4316_s20 + $0xdc0] sm:$0xff] %v2819_v48  ;;  %2948 = vst [vmem:[%s4316_s20 + $0xdc8] sm:$0xff] %v2820_v53  ;;  %v8098_v18 = vld [vmem:[%s4297_s5 + $0x1d0] sm:$0xff]  ;;  %v8102_v5 = vld [vmem:[%s4297_s5 + $0x1d8] sm:$0xff] }
 0x2d8   : > { %2949 = vst [vmem:[%s4316_s20 + $0xdd0] sm:$0xff] %v2821_v11  ;;  %9751 = vst [vmem:[#allocation18_spill] sm:$0xff] %v8098_v18  ;;  %v2825_v6 = vadd.f32 %v8098_v18, %v2697_v49  ;;  %v2826_v21 = vadd.f32 %v8102_v5, %v2698_v44  ;;  %v8106_v2 = vld [vmem:[%s4297_s5 + $0x1e0] sm:$0xff]  ;;  %v2700_v48 = vld [vmem:[%s4289_s24 + $0xfc8] sm:$0xff] }
 0x2d9   : > { %9752 = vst [vmem:[#allocation19_spill] sm:$0xff] %v8102_v5  ;;  %9753 = vst [vmem:[#allocation20_spill] sm:$0xff] %v8106_v2  ;;  %v2827_v60 = vadd.f32 %v8106_v2, %v2699_v40  ;;  %v2701_v53 = vld [vmem:[%s4289_s24 + $0xfd0] sm:$0xff]  ;;  %v2702_v11 = vld [vmem:[%s4289_s24 + $0xfd8] sm:$0xff] }
 0x2da   : > { %2950 = vst [vmem:[%s4316_s20 + $0xdd8] sm:$0xff] %v2822_v22  ;;  %2951 = vst [vmem:[%s4316_s20 + $0xec0] sm:$0xff] %v2823_v46  ;;  %v8116_v49 = vld [vmem:[%s4297_s5 + $0x1e8] sm:$0xff]  ;;  %v8120_v5 = vld [vmem:[%s4297_s5 + $0x1f0] sm:$0xff] }
 0x2db   : > { %2952 = vst [vmem:[%s4316_s20 + $0xec8] sm:$0xff] %v2824_v42  ;;  %9754 = vst [vmem:[#allocation21_spill] sm:$0xff] %v8116_v49  ;;  %v2828_v44 = vadd.f32 %v8116_v49, %v2700_v48  ;;  %v2829_v40 = vadd.f32 %v8120_v5, %v2701_v53  ;;  %v8124_v2 = vld [vmem:[%s4297_s5 + $0x1f8] sm:$0xff]  ;;  %v2703_v22 = vld [vmem:[%s4289_s24 + $0x10c0] sm:$0xff] }
 0x2dc   : > { %9755 = vst [vmem:[#allocation22_spill] sm:$0xff] %v8120_v5  ;;  %9756 = vst [vmem:[#allocation23_spill] sm:$0xff] %v8124_v2  ;;  %v2830_v18 = vadd.f32 %v8124_v2, %v2702_v11  ;;  %v2704_v42 = vld [vmem:[%s4289_s24 + $0x10c8] sm:$0xff]  ;;  %v2705_v46 = vld [vmem:[%s4289_s24 + $0x10d0] sm:$0xff] }
 0x2dd   : > { %2953 = vst [vmem:[%s4316_s20 + $0xed0] sm:$0xff] %v2825_v6  ;;  %2954 = vst [vmem:[%s4316_s20 + $0xed8] sm:$0xff] %v2826_v21  ;;  %v8134_v48 = vld [vmem:[%s4297_s5 + $0x200] sm:$0xff]  ;;  %v8138_v5 = vld [vmem:[%s4297_s5 + $0x208] sm:$0xff] }
 0x2de   : > { %2955 = vst [vmem:[%s4316_s20 + $0xfc0] sm:$0xff] %v2827_v60  ;;  %9757 = vst [vmem:[#allocation24_spill] sm:$0xff] %v8134_v48  ;;  %v2831_v53 = vadd.f32 %v8134_v48, %v2703_v22  ;;  %v2832_v11 = vadd.f32 %v8138_v5, %v2704_v42  ;;  %v8142_v2 = vld [vmem:[%s4297_s5 + $0x210] sm:$0xff]  ;;  %v2706_v6 = vld [vmem:[%s4289_s24 + $0x10d8] sm:$0xff] }
 0x2df   : > { %9758 = vst [vmem:[#allocation25_spill] sm:$0xff] %v8138_v5  ;;  %9759 = vst [vmem:[#allocation26_spill] sm:$0xff] %v8142_v2  ;;  %v2833_v49 = vadd.f32 %v8142_v2, %v2705_v46  ;;  %v2707_v60 = vld [vmem:[%s4289_s24 + $0x11c0] sm:$0xff]  ;;  %v2708_v21 = vld [vmem:[%s4289_s24 + $0x11c8] sm:$0xff] }
 0x2e0   : > { %2956 = vst [vmem:[%s4316_s20 + $0xfc8] sm:$0xff] %v2828_v44  ;;  %2957 = vst [vmem:[%s4316_s20 + $0xfd0] sm:$0xff] %v2829_v40  ;;  %v8152_v22 = vld [vmem:[%s4297_s5 + $0x218] sm:$0xff]  ;;  %v8156_v5 = vld [vmem:[%s4297_s5 + $0x220] sm:$0xff] }
 0x2e1   : > { %2958 = vst [vmem:[%s4316_s20 + $0xfd8] sm:$0xff] %v2830_v18  ;;  %9760 = vst [vmem:[#allocation27_spill] sm:$0xff] %v8152_v22  ;;  %v2834_v42 = vadd.f32 %v8152_v22, %v2706_v6  ;;  %v2835_v46 = vadd.f32 %v8156_v5, %v2707_v60  ;;  %v8160_v2 = vld [vmem:[%s4297_s5 + $0x228] sm:$0xff]  ;;  %v2709_v44 = vld [vmem:[%s4289_s24 + $0x11d0] sm:$0xff] }
 0x2e2   : > { %9761 = vst [vmem:[#allocation28_spill] sm:$0xff] %v8156_v5  ;;  %9762 = vst [vmem:[#allocation29_spill] sm:$0xff] %v8160_v2  ;;  %v2836_v48 = vadd.f32 %v8160_v2, %v2708_v21  ;;  %v2710_v18 = vld [vmem:[%s4289_s24 + $0x11d8] sm:$0xff]  ;;  %v2711_v40 = vld [vmem:[%s4289_s24 + $0x12c0] sm:$0xff] }
 0x2e3   : > { %2959 = vst [vmem:[%s4316_s20 + $0x10c0] sm:$0xff] %v2831_v53  ;;  %2960 = vst [vmem:[%s4316_s20 + $0x10c8] sm:$0xff] %v2832_v11  ;;  %v8170_v6 = vld [vmem:[%s4297_s5 + $0x230] sm:$0xff]  ;;  %v8174_v5 = vld [vmem:[%s4297_s5 + $0x238] sm:$0xff] }
 0x2e4   : > { %2961 = vst [vmem:[%s4316_s20 + $0x10d0] sm:$0xff] %v2833_v49  ;;  %9763 = vst [vmem:[#allocation30_spill] sm:$0xff] %v8170_v6  ;;  %v2837_v60 = vadd.f32 %v8170_v6, %v2709_v44  ;;  %v2838_v21 = vadd.f32 %v8174_v5, %v2710_v18  ;;  %v8178_v2 = vld [vmem:[%s4297_s5 + $0x240] sm:$0xff]  ;;  %v2712_v53 = vld [vmem:[%s4289_s24 + $0x12c8] sm:$0xff] }
 0x2e5   : > { %9764 = vst [vmem:[#allocation31_spill] sm:$0xff] %v8174_v5  ;;  %9765 = vst [vmem:[#allocation32_spill] sm:$0xff] %v8178_v2  ;;  %v2839_v22 = vadd.f32 %v8178_v2, %v2711_v40  ;;  %v2713_v49 = vld [vmem:[%s4289_s24 + $0x12d0] sm:$0xff]  ;;  %v2714_v11 = vld [vmem:[%s4289_s24 + $0x12d8] sm:$0xff] }
 0x2e6   : > { %2962 = vst [vmem:[%s4316_s20 + $0x10d8] sm:$0xff] %v2834_v42  ;;  %2963 = vst [vmem:[%s4316_s20 + $0x11c0] sm:$0xff] %v2835_v46  ;;  %v8188_v44 = vld [vmem:[%s4297_s5 + $0x248] sm:$0xff]  ;;  %v8192_v5 = vld [vmem:[%s4297_s5 + $0x250] sm:$0xff] }
 0x2e7   : > { %2964 = vst [vmem:[%s4316_s20 + $0x11c8] sm:$0xff] %v2836_v48  ;;  %9766 = vst [vmem:[#allocation33_spill] sm:$0xff] %v8188_v44  ;;  %v2840_v18 = vadd.f32 %v8188_v44, %v2712_v53  ;;  %v2841_v40 = vadd.f32 %v8192_v5, %v2713_v49  ;;  %v8196_v2 = vld [vmem:[%s4297_s5 + $0x258] sm:$0xff]  ;;  %v2715_v42 = vld [vmem:[%s4289_s24 + $0x13c0] sm:$0xff] }
 0x2e8   : > { %9767 = vst [vmem:[#allocation34_spill] sm:$0xff] %v8192_v5  ;;  %9768 = vst [vmem:[#allocation35_spill] sm:$0xff] %v8196_v2  ;;  %v2842_v6 = vadd.f32 %v8196_v2, %v2714_v11  ;;  %v2716_v48 = vld [vmem:[%s4289_s24 + $0x13c8] sm:$0xff]  ;;  %v2717_v46 = vld [vmem:[%s4289_s24 + $0x13d0] sm:$0xff] }
 0x2e9   : > { %2965 = vst [vmem:[%s4316_s20 + $0x11d0] sm:$0xff] %v2837_v60  ;;  %2966 = vst [vmem:[%s4316_s20 + $0x11d8] sm:$0xff] %v2838_v21  ;;  %v8206_v53 = vld [vmem:[%s4297_s5 + $0x260] sm:$0xff]  ;;  %v8210_v5 = vld [vmem:[%s4297_s5 + $0x268] sm:$0xff] }
 0x2ea   : > { %2967 = vst [vmem:[%s4316_s20 + $0x12c0] sm:$0xff] %v2839_v22  ;;  %9769 = vst [vmem:[#allocation36_spill] sm:$0xff] %v8206_v53  ;;  %v2843_v49 = vadd.f32 %v8206_v53, %v2715_v42  ;;  %v2844_v11 = vadd.f32 %v8210_v5, %v2716_v48  ;;  %v8214_v2 = vld [vmem:[%s4297_s5 + $0x270] sm:$0xff]  ;;  %v2718_v60 = vld [vmem:[%s4289_s24 + $0x13d8] sm:$0xff] }
 0x2eb   : > { %9770 = vst [vmem:[#allocation37_spill] sm:$0xff] %v8210_v5  ;;  %9771 = vst [vmem:[#allocation38_spill] sm:$0xff] %v8214_v2  ;;  %v2845_v44 = vadd.f32 %v8214_v2, %v2717_v46  ;;  %v2719_v22 = vld [vmem:[%s4289_s24 + $0x14c0] sm:$0xff]  ;;  %v2720_v21 = vld [vmem:[%s4289_s24 + $0x14c8] sm:$0xff] }
 0x2ec   : > { %2968 = vst [vmem:[%s4316_s20 + $0x12c8] sm:$0xff] %v2840_v18  ;;  %2969 = vst [vmem:[%s4316_s20 + $0x12d0] sm:$0xff] %v2841_v40  ;;  %v8224_v42 = vld [vmem:[%s4297_s5 + $0x278] sm:$0xff]  ;;  %v8228_v5 = vld [vmem:[%s4297_s5 + $0x280] sm:$0xff] }
 0x2ed   : > { %2970 = vst [vmem:[%s4316_s20 + $0x12d8] sm:$0xff] %v2842_v6  ;;  %9772 = vst [vmem:[#allocation39_spill] sm:$0xff] %v8224_v42  ;;  %v2846_v48 = vadd.f32 %v8224_v42, %v2718_v60  ;;  %v2847_v46 = vadd.f32 %v8228_v5, %v2719_v22  ;;  %v8232_v2 = vld [vmem:[%s4297_s5 + $0x288] sm:$0xff]  ;;  %v2721_v18 = vld [vmem:[%s4289_s24 + $0x14d0] sm:$0xff] }
 0x2ee   : > { %9773 = vst [vmem:[#allocation40_spill] sm:$0xff] %v8228_v5  ;;  %9774 = vst [vmem:[#allocation41_spill] sm:$0xff] %v8232_v2  ;;  %v2848_v53 = vadd.f32 %v8232_v2, %v2720_v21  ;;  %v2722_v6 = vld [vmem:[%s4289_s24 + $0x14d8] sm:$0xff]  ;;  %v2723_v40 = vld [vmem:[%s4289_s24 + $0x15c0] sm:$0xff] }
 0x2ef   : > { %2971 = vst [vmem:[%s4316_s20 + $0x13c0] sm:$0xff] %v2843_v49  ;;  %2972 = vst [vmem:[%s4316_s20 + $0x13c8] sm:$0xff] %v2844_v11  ;;  %v8242_v60 = vld [vmem:[%s4297_s5 + $0x290] sm:$0xff]  ;;  %v8246_v5 = vld [vmem:[%s4297_s5 + $0x298] sm:$0xff] }
 0x2f0   : > { %2973 = vst [vmem:[%s4316_s20 + $0x13d0] sm:$0xff] %v2845_v44  ;;  %9775 = vst [vmem:[#allocation42_spill] sm:$0xff] %v8242_v60  ;;  %v2849_v22 = vadd.f32 %v8242_v60, %v2721_v18  ;;  %v2850_v21 = vadd.f32 %v8246_v5, %v2722_v6  ;;  %v8250_v2 = vld [vmem:[%s4297_s5 + $0x2a0] sm:$0xff]  ;;  %v2724_v49 = vld [vmem:[%s4289_s24 + $0x15c8] sm:$0xff] }
 0x2f1   : > { %9776 = vst [vmem:[#allocation43_spill] sm:$0xff] %v8246_v5  ;;  %9777 = vst [vmem:[#allocation44_spill] sm:$0xff] %v8250_v2  ;;  %v2851_v42 = vadd.f32 %v8250_v2, %v2723_v40  ;;  %v2725_v44 = vld [vmem:[%s4289_s24 + $0x15d0] sm:$0xff]  ;;  %v2726_v11 = vld [vmem:[%s4289_s24 + $0x15d8] sm:$0xff] }
 0x2f2   : > { %2974 = vst [vmem:[%s4316_s20 + $0x13d8] sm:$0xff] %v2846_v48  ;;  %2975 = vst [vmem:[%s4316_s20 + $0x14c0] sm:$0xff] %v2847_v46  ;;  %v8260_v18 = vld [vmem:[%s4297_s5 + $0x2a8] sm:$0xff]  ;;  %v8264_v5 = vld [vmem:[%s4297_s5 + $0x2b0] sm:$0xff] }
 0x2f3   : > { %2976 = vst [vmem:[%s4316_s20 + $0x14c8] sm:$0xff] %v2848_v53  ;;  %9778 = vst [vmem:[#allocation45_spill] sm:$0xff] %v8260_v18  ;;  %v2852_v6 = vadd.f32 %v8260_v18, %v2724_v49  ;;  %v2853_v40 = vadd.f32 %v8264_v5, %v2725_v44  ;;  %v8268_v2 = vld [vmem:[%s4297_s5 + $0x2b8] sm:$0xff]  ;;  %v2727_v48 = vld [vmem:[%s4289_s24 + $0x16c0] sm:$0xff] }
 0x2f4   : > { %9779 = vst [vmem:[#allocation46_spill] sm:$0xff] %v8264_v5  ;;  %9780 = vst [vmem:[#allocation47_spill] sm:$0xff] %v8268_v2  ;;  %v2854_v60 = vadd.f32 %v8268_v2, %v2726_v11  ;;  %v2728_v53 = vld [vmem:[%s4289_s24 + $0x16c8] sm:$0xff]  ;;  %v2729_v46 = vld [vmem:[%s4289_s24 + $0x16d0] sm:$0xff] }
 0x2f5   : > { %2977 = vst [vmem:[%s4316_s20 + $0x14d0] sm:$0xff] %v2849_v22  ;;  %2978 = vst [vmem:[%s4316_s20 + $0x14d8] sm:$0xff] %v2850_v21  ;;  %v8278_v49 = vld [vmem:[%s4297_s5 + $0x2c0] sm:$0xff]  ;;  %v8282_v5 = vld [vmem:[%s4297_s5 + $0x2c8] sm:$0xff] }
 0x2f6   : > { %2979 = vst [vmem:[%s4316_s20 + $0x15c0] sm:$0xff] %v2851_v42  ;;  %9781 = vst [vmem:[#allocation48_spill] sm:$0xff] %v8278_v49  ;;  %v2855_v44 = vadd.f32 %v8278_v49, %v2727_v48  ;;  %v2856_v11 = vadd.f32 %v8282_v5, %v2728_v53  ;;  %v8286_v2 = vld [vmem:[%s4297_s5 + $0x2d0] sm:$0xff]  ;;  %v2730_v22 = vld [vmem:[%s4289_s24 + $0x16d8] sm:$0xff] }
 0x2f7   : > { %9782 = vst [vmem:[#allocation49_spill] sm:$0xff] %v8282_v5  ;;  %9783 = vst [vmem:[#allocation50_spill] sm:$0xff] %v8286_v2  ;;  %v2857_v18 = vadd.f32 %v8286_v2, %v2729_v46  ;;  %v2731_v42 = vld [vmem:[%s4289_s24 + $0x17c0] sm:$0xff]  ;;  %v2732_v21 = vld [vmem:[%s4289_s24 + $0x17c8] sm:$0xff] }
 0x2f8   : > { %2980 = vst [vmem:[%s4316_s20 + $0x15c8] sm:$0xff] %v2852_v6  ;;  %2981 = vst [vmem:[%s4316_s20 + $0x15d0] sm:$0xff] %v2853_v40  ;;  %v8296_v48 = vld [vmem:[%s4297_s5 + $0x2d8] sm:$0xff]  ;;  %v8300_v5 = vld [vmem:[%s4297_s5 + $0x2e0] sm:$0xff] }
 0x2f9   : > { %2982 = vst [vmem:[%s4316_s20 + $0x15d8] sm:$0xff] %v2854_v60  ;;  %9784 = vst [vmem:[#allocation51_spill] sm:$0xff] %v8296_v48  ;;  %v2858_v53 = vadd.f32 %v8296_v48, %v2730_v22  ;;  %v2859_v46 = vadd.f32 %v8300_v5, %v2731_v42  ;;  %v8304_v2 = vld [vmem:[%s4297_s5 + $0x2e8] sm:$0xff]  ;;  %v2733_v6 = vld [vmem:[%s4289_s24 + $0x17d0] sm:$0xff] }
 0x2fa   : > { %9785 = vst [vmem:[#allocation52_spill] sm:$0xff] %v8300_v5  ;;  %9786 = vst [vmem:[#allocation53_spill] sm:$0xff] %v8304_v2  ;;  %v2860_v49 = vadd.f32 %v8304_v2, %v2732_v21  ;;  %v2734_v60 = vld [vmem:[%s4289_s24 + $0x17d8] sm:$0xff]  ;;  %v2735_v40 = vld [vmem:[%s4289_s24 + $0x18c0] sm:$0xff] }
 0x2fb   : > { %2983 = vst [vmem:[%s4316_s20 + $0x16c0] sm:$0xff] %v2855_v44  ;;  %2984 = vst [vmem:[%s4316_s20 + $0x16c8] sm:$0xff] %v2856_v11  ;;  %v8314_v22 = vld [vmem:[%s4297_s5 + $0x2f0] sm:$0xff]  ;;  %v8318_v5 = vld [vmem:[%s4297_s5 + $0x2f8] sm:$0xff] }
 0x2fc   : > { %2985 = vst [vmem:[%s4316_s20 + $0x16d0] sm:$0xff] %v2857_v18  ;;  %9787 = vst [vmem:[#allocation54_spill] sm:$0xff] %v8314_v22  ;;  %v2861_v42 = vadd.f32 %v8314_v22, %v2733_v6  ;;  %v2862_v21 = vadd.f32 %v8318_v5, %v2734_v60  ;;  %v8322_v2 = vld [vmem:[%s4297_s5 + $0x300] sm:$0xff]  ;;  %v2736_v44 = vld [vmem:[%s4289_s24 + $0x18c8] sm:$0xff] }
 0x2fd   : > { %9788 = vst [vmem:[#allocation55_spill] sm:$0xff] %v8318_v5  ;;  %9789 = vst [vmem:[#allocation56_spill] sm:$0xff] %v8322_v2  ;;  %v2863_v48 = vadd.f32 %v8322_v2, %v2735_v40  ;;  %v2737_v18 = vld [vmem:[%s4289_s24 + $0x18d0] sm:$0xff]  ;;  %v2738_v11 = vld [vmem:[%s4289_s24 + $0x18d8] sm:$0xff] }
 0x2fe   : > { %2986 = vst [vmem:[%s4316_s20 + $0x16d8] sm:$0xff] %v2858_v53  ;;  %2987 = vst [vmem:[%s4316_s20 + $0x17c0] sm:$0xff] %v2859_v46  ;;  %v8332_v6 = vld [vmem:[%s4297_s5 + $0x308] sm:$0xff]  ;;  %v8336_v5 = vld [vmem:[%s4297_s5 + $0x310] sm:$0xff] }
 0x2ff   : > { %2988 = vst [vmem:[%s4316_s20 + $0x17c8] sm:$0xff] %v2860_v49  ;;  %9790 = vst [vmem:[#allocation57_spill] sm:$0xff] %v8332_v6  ;;  %v2864_v60 = vadd.f32 %v8332_v6, %v2736_v44  ;;  %v2865_v40 = vadd.f32 %v8336_v5, %v2737_v18  ;;  %v8340_v2 = vld [vmem:[%s4297_s5 + $0x318] sm:$0xff]  ;;  %v2739_v53 = vld [vmem:[%s4289_s24 + $0x19c0] sm:$0xff] }
 0x300   : > { %9791 = vst [vmem:[#allocation58_spill] sm:$0xff] %v8336_v5  ;;  %9792 = vst [vmem:[#allocation59_spill] sm:$0xff] %v8340_v2  ;;  %v2866_v22 = vadd.f32 %v8340_v2, %v2738_v11  ;;  %v2740_v49 = vld [vmem:[%s4289_s24 + $0x19c8] sm:$0xff]  ;;  %v2741_v46 = vld [vmem:[%s4289_s24 + $0x19d0] sm:$0xff] }
 0x301   : > { %2989 = vst [vmem:[%s4316_s20 + $0x17d0] sm:$0xff] %v2861_v42  ;;  %2990 = vst [vmem:[%s4316_s20 + $0x17d8] sm:$0xff] %v2862_v21  ;;  %v8350_v44 = vld [vmem:[%s4297_s5 + $0x320] sm:$0xff]  ;;  %v8354_v5 = vld [vmem:[%s4297_s5 + $0x328] sm:$0xff] }
 0x302   : > { %2991 = vst [vmem:[%s4316_s20 + $0x18c0] sm:$0xff] %v2863_v48  ;;  %9793 = vst [vmem:[#allocation60_spill] sm:$0xff] %v8350_v44  ;;  %v2867_v18 = vadd.f32 %v8350_v44, %v2739_v53  ;;  %v2868_v11 = vadd.f32 %v8354_v5, %v2740_v49  ;;  %v8358_v2 = vld [vmem:[%s4297_s5 + $0x330] sm:$0xff]  ;;  %v2742_v42 = vld [vmem:[%s4289_s24 + $0x19d8] sm:$0xff] }
 0x303   : > { %9794 = vst [vmem:[#allocation61_spill] sm:$0xff] %v8354_v5  ;;  %9795 = vst [vmem:[#allocation62_spill] sm:$0xff] %v8358_v2  ;;  %v2869_v6 = vadd.f32 %v8358_v2, %v2741_v46  ;;  %v2743_v48 = vld [vmem:[%s4289_s24 + $0x1ac0] sm:$0xff]  ;;  %v2744_v21 = vld [vmem:[%s4289_s24 + $0x1ac8] sm:$0xff] }
 0x304   : > { %2992 = vst [vmem:[%s4316_s20 + $0x18c8] sm:$0xff] %v2864_v60  ;;  %2993 = vst [vmem:[%s4316_s20 + $0x18d0] sm:$0xff] %v2865_v40  ;;  %v8368_v53 = vld [vmem:[%s4297_s5 + $0x338] sm:$0xff]  ;;  %v8372_v5 = vld [vmem:[%s4297_s5 + $0x340] sm:$0xff] }
 0x305   : > { %2994 = vst [vmem:[%s4316_s20 + $0x18d8] sm:$0xff] %v2866_v22  ;;  %9796 = vst [vmem:[#allocation63_spill] sm:$0xff] %v8368_v53  ;;  %v2870_v49 = vadd.f32 %v8368_v53, %v2742_v42  ;;  %v2871_v46 = vadd.f32 %v8372_v5, %v2743_v48  ;;  %v8376_v2 = vld [vmem:[%s4297_s5 + $0x348] sm:$0xff]  ;;  %v2745_v60 = vld [vmem:[%s4289_s24 + $0x1ad0] sm:$0xff] }
 0x306   : > { %9797 = vst [vmem:[#allocation64_spill] sm:$0xff] %v8372_v5  ;;  %9798 = vst [vmem:[#allocation65_spill] sm:$0xff] %v8376_v2  ;;  %v2872_v44 = vadd.f32 %v8376_v2, %v2744_v21  ;;  %v2746_v22 = vld [vmem:[%s4289_s24 + $0x1ad8] sm:$0xff]  ;;  %v2747_v40 = vld [vmem:[%s4289_s24 + $0x1bc0] sm:$0xff] }
 0x307   : > { %2995 = vst [vmem:[%s4316_s20 + $0x19c0] sm:$0xff] %v2867_v18  ;;  %2996 = vst [vmem:[%s4316_s20 + $0x19c8] sm:$0xff] %v2868_v11  ;;  %v8386_v42 = vld [vmem:[%s4297_s5 + $0x350] sm:$0xff]  ;;  %v8390_v5 = vld [vmem:[%s4297_s5 + $0x358] sm:$0xff] }
 0x308   : > { %2997 = vst [vmem:[%s4316_s20 + $0x19d0] sm:$0xff] %v2869_v6  ;;  %9799 = vst [vmem:[#allocation66_spill] sm:$0xff] %v8386_v42  ;;  %v2873_v48 = vadd.f32 %v8386_v42, %v2745_v60  ;;  %v2874_v21 = vadd.f32 %v8390_v5, %v2746_v22  ;;  %v8394_v2 = vld [vmem:[%s4297_s5 + $0x360] sm:$0xff]  ;;  %v2748_v18 = vld [vmem:[%s4289_s24 + $0x1bc8] sm:$0xff] }
 0x309   : > { %9800 = vst [vmem:[#allocation67_spill] sm:$0xff] %v8390_v5  ;;  %9801 = vst [vmem:[#allocation68_spill] sm:$0xff] %v8394_v2  ;;  %v2875_v53 = vadd.f32 %v8394_v2, %v2747_v40  ;;  %v2749_v6 = vld [vmem:[%s4289_s24 + $0x1bd0] sm:$0xff]  ;;  %v2750_v11 = vld [vmem:[%s4289_s24 + $0x1bd8] sm:$0xff] }
 0x30a   : > { %2998 = vst [vmem:[%s4316_s20 + $0x19d8] sm:$0xff] %v2870_v49  ;;  %2999 = vst [vmem:[%s4316_s20 + $0x1ac0] sm:$0xff] %v2871_v46  ;;  %v8404_v60 = vld [vmem:[%s4297_s5 + $0x368] sm:$0xff]  ;;  %v8408_v5 = vld [vmem:[%s4297_s5 + $0x370] sm:$0xff] }
 0x30b   : > { %3000 = vst [vmem:[%s4316_s20 + $0x1ac8] sm:$0xff] %v2872_v44  ;;  %9802 = vst [vmem:[#allocation69_spill] sm:$0xff] %v8404_v60  ;;  %v2876_v22 = vadd.f32 %v8404_v60, %v2748_v18  ;;  %v2877_v40 = vadd.f32 %v8408_v5, %v2749_v6  ;;  %v8412_v2 = vld [vmem:[%s4297_s5 + $0x378] sm:$0xff]  ;;  %v2751_v49 = vld [vmem:[%s4289_s24 + $0x1cc0] sm:$0xff] }
 0x30c   : > { %9803 = vst [vmem:[#allocation70_spill] sm:$0xff] %v8408_v5  ;;  %9804 = vst [vmem:[#allocation71_spill] sm:$0xff] %v8412_v2  ;;  %v2878_v42 = vadd.f32 %v8412_v2, %v2750_v11  ;;  %v2752_v44 = vld [vmem:[%s4289_s24 + $0x1cc8] sm:$0xff]  ;;  %v2753_v46 = vld [vmem:[%s4289_s24 + $0x1cd0] sm:$0xff] }
 0x30d   : > { %3001 = vst [vmem:[%s4316_s20 + $0x1ad0] sm:$0xff] %v2873_v48  ;;  %3002 = vst [vmem:[%s4316_s20 + $0x1ad8] sm:$0xff] %v2874_v21  ;;  %v8422_v18 = vld [vmem:[%s4297_s5 + $0x380] sm:$0xff]  ;;  %v8426_v5 = vld [vmem:[%s4297_s5 + $0x388] sm:$0xff] }
 0x30e   : > { %3003 = vst [vmem:[%s4316_s20 + $0x1bc0] sm:$0xff] %v2875_v53  ;;  %9805 = vst [vmem:[#allocation72_spill] sm:$0xff] %v8422_v18  ;;  %v2879_v6 = vadd.f32 %v8422_v18, %v2751_v49  ;;  %v2880_v11 = vadd.f32 %v8426_v5, %v2752_v44  ;;  %v8430_v2 = vld [vmem:[%s4297_s5 + $0x390] sm:$0xff]  ;;  %v2754_v48 = vld [vmem:[%s4289_s24 + $0x1cd8] sm:$0xff] }
 0x30f   : > { %9806 = vst [vmem:[#allocation73_spill] sm:$0xff] %v8426_v5  ;;  %9807 = vst [vmem:[#allocation74_spill] sm:$0xff] %v8430_v2  ;;  %v2881_v60 = vadd.f32 %v8430_v2, %v2753_v46  ;;  %v2755_v53 = vld [vmem:[%s4289_s24 + $0x1dc0] sm:$0xff]  ;;  %v2756_v21 = vld [vmem:[%s4289_s24 + $0x1dc8] sm:$0xff] }
 0x310   : > { %3004 = vst [vmem:[%s4316_s20 + $0x1bc8] sm:$0xff] %v2876_v22  ;;  %3005 = vst [vmem:[%s4316_s20 + $0x1bd0] sm:$0xff] %v2877_v40  ;;  %v8440_v49 = vld [vmem:[%s4297_s5 + $0x398] sm:$0xff]  ;;  %v8444_v5 = vld [vmem:[%s4297_s5 + $0x3a0] sm:$0xff] }
 0x311   : > { %3006 = vst [vmem:[%s4316_s20 + $0x1bd8] sm:$0xff] %v2878_v42  ;;  %9808 = vst [vmem:[#allocation75_spill] sm:$0xff] %v8440_v49  ;;  %v2882_v44 = vadd.f32 %v8440_v49, %v2754_v48  ;;  %v2883_v46 = vadd.f32 %v8444_v5, %v2755_v53  ;;  %v8448_v2 = vld [vmem:[%s4297_s5 + $0x3a8] sm:$0xff]  ;;  %v2757_v22 = vld [vmem:[%s4289_s24 + $0x1dd0] sm:$0xff] }
 0x312   : > { %9809 = vst [vmem:[#allocation76_spill] sm:$0xff] %v8444_v5  ;;  %9810 = vst [vmem:[#allocation77_spill] sm:$0xff] %v8448_v2  ;;  %v2884_v18 = vadd.f32 %v8448_v2, %v2756_v21  ;;  %v2758_v42 = vld [vmem:[%s4289_s24 + $0x1dd8] sm:$0xff]  ;;  %v2759_v40 = vld [vmem:[%s4289_s24 + $0x1ec0] sm:$0xff] }
 0x313   : > { %3007 = vst [vmem:[%s4316_s20 + $0x1cc0] sm:$0xff] %v2879_v6  ;;  %3008 = vst [vmem:[%s4316_s20 + $0x1cc8] sm:$0xff] %v2880_v11  ;;  %v8458_v48 = vld [vmem:[%s4297_s5 + $0x3b0] sm:$0xff]  ;;  %v8462_v5 = vld [vmem:[%s4297_s5 + $0x3b8] sm:$0xff] }
 0x314   : > { %3009 = vst [vmem:[%s4316_s20 + $0x1cd0] sm:$0xff] %v2881_v60  ;;  %9811 = vst [vmem:[#allocation78_spill] sm:$0xff] %v8458_v48  ;;  %v2885_v53 = vadd.f32 %v8458_v48, %v2757_v22  ;;  %v2886_v21 = vadd.f32 %v8462_v5, %v2758_v42  ;;  %v8466_v2 = vld [vmem:[%s4297_s5 + $0x3c0] sm:$0xff]  ;;  %v2760_v6 = vld [vmem:[%s4289_s24 + $0x1ec8] sm:$0xff] }
 0x315   : > { %9812 = vst [vmem:[#allocation79_spill] sm:$0xff] %v8462_v5  ;;  %9813 = vst [vmem:[#allocation80_spill] sm:$0xff] %v8466_v2  ;;  %v2887_v49 = vadd.f32 %v8466_v2, %v2759_v40  ;;  %v2761_v60 = vld [vmem:[%s4289_s24 + $0x1ed0] sm:$0xff]  ;;  %v2762_v11 = vld [vmem:[%s4289_s24 + $0x1ed8] sm:$0xff] }
 0x316   : > { %3010 = vst [vmem:[%s4316_s20 + $0x1cd8] sm:$0xff] %v2882_v44  ;;  %3011 = vst [vmem:[%s4316_s20 + $0x1dc0] sm:$0xff] %v2883_v46  ;;  %v8476_v22 = vld [vmem:[%s4297_s5 + $0x3c8] sm:$0xff]  ;;  %v8480_v5 = vld [vmem:[%s4297_s5 + $0x3d0] sm:$0xff] }
 0x317   : > { %3012 = vst [vmem:[%s4316_s20 + $0x1dc8] sm:$0xff] %v2884_v18  ;;  %9814 = vst [vmem:[#allocation81_spill] sm:$0xff] %v8476_v22  ;;  %v2888_v42 = vadd.f32 %v8476_v22, %v2760_v6  ;;  %v2889_v40 = vadd.f32 %v8480_v5, %v2761_v60  ;;  %v8484_v2 = vld [vmem:[%s4297_s5 + $0x3d8] sm:$0xff]  ;;  %v2763_v44 = vld [vmem:[%s4289_s24 + $0x1fc0] sm:$0xff] }
 0x318   : > { %9815 = vst [vmem:[#allocation82_spill] sm:$0xff] %v8480_v5  ;;  %9816 = vst [vmem:[#allocation83_spill] sm:$0xff] %v8484_v2  ;;  %v2890_v48 = vadd.f32 %v8484_v2, %v2762_v11  ;;  %v2764_v18 = vld [vmem:[%s4289_s24 + $0x1fc8] sm:$0xff]  ;;  %v2765_v46 = vld [vmem:[%s4289_s24 + $0x1fd0] sm:$0xff] }
 0x319   : > { %3013 = vst [vmem:[%s4316_s20 + $0x1dd0] sm:$0xff] %v2885_v53  ;;  %3014 = vst [vmem:[%s4316_s20 + $0x1dd8] sm:$0xff] %v2886_v21  ;;  %v8494_v6 = vld [vmem:[%s4297_s5 + $0x3e0] sm:$0xff]  ;;  %v8498_v5 = vld [vmem:[%s4297_s5 + $0x3e8] sm:$0xff] }
 0x31a   : > { %3015 = vst [vmem:[%s4316_s20 + $0x1ec0] sm:$0xff] %v2887_v49  ;;  %9817 = vst [vmem:[#allocation84_spill] sm:$0xff] %v8494_v6  ;;  %v2891_v60 = vadd.f32 %v8494_v6, %v2763_v44  ;;  %v2892_v11 = vadd.f32 %v8498_v5, %v2764_v18  ;;  %v8502_v2 = vld [vmem:[%s4297_s5 + $0x3f0] sm:$0xff]  ;;  %v2766_v53 = vld [vmem:[%s4289_s24 + $0x1fd8] sm:$0xff] }
 0x31b   : > { %9818 = vst [vmem:[#allocation85_spill] sm:$0xff] %v8498_v5  ;;  %9819 = vst [vmem:[#allocation86_spill] sm:$0xff] %v8502_v2  ;;  %v2893_v22 = vadd.f32 %v8502_v2, %v2765_v46  ;;  %v3023_v49 = vld [vmem:[%s4289_s24 + $0xe0] sm:$0xff]  ;;  %v3024_v21 = vld [vmem:[%s4289_s24 + $0xe8] sm:$0xff] }
 0x31c   : > { %3016 = vst [vmem:[%s4316_s20 + $0x1ec8] sm:$0xff] %v2888_v42  ;;  %3017 = vst [vmem:[%s4316_s20 + $0x1ed0] sm:$0xff] %v2889_v40  ;;  %v8512_v44 = vld [vmem:[%s4297_s5 + $0x3f8] sm:$0xff]  ;;  %v3986_v5 = vld [vmem:[%s4297_s5] sm:$0xff] }
 0x31d   : > { %3018 = vst [vmem:[%s4316_s20 + $0x1ed8] sm:$0xff] %v2890_v48  ;;  %v2894_v18 = vadd.f32 %v8512_v44, %v2766_v53  ;;  %v3151_v6 = vadd.f32 %v3986_v5, %v3023_v49  ;;  %v3987_v46 = vld [vmem:[%s4297_s5 + $0x8] sm:$0xff]  ;;  %v3025_v50 = vld [vmem:[%s4289_s24 + $0xf0] sm:$0xff]  ;;  %v3026_v34 = vld [vmem:[%s4289_s24 + $0xf8] sm:$0xff] }
 0x31e   : > { %v3152_v2 = vadd.f32 %v3987_v46, %v3024_v21  ;;  %v3027_v42 = vld [vmem:[%s4289_s24 + $0x1e0] sm:$0xff]  ;;  %3019 = vst [vmem:[%s4316_s20 + $0x1fc0] sm:$0xff] %v2891_v60  ;;  %3020 = vst [vmem:[%s4316_s20 + $0x1fc8] sm:$0xff] %v2892_v11  ;;  %v3988_v48 = vld [vmem:[%s4297_s5 + $0x10] sm:$0xff]  ;;  %v3154_v5 = vadd.f32 %v7767_v28, %v3026_v34 }
 0x31f   : > { %3021 = vst [vmem:[%s4316_s20 + $0x1fd0] sm:$0xff] %v2893_v22  ;;  %v3153_v40 = vadd.f32 %v3988_v48, %v3025_v50  ;;  %v3155_v53 = vadd.f32 %v7777_v37, %v3027_v42  ;;  %v3028_v49 = vld [vmem:[%s4289_s24 + $0x1e8] sm:$0xff]  ;;  %v3029_v21 = vld [vmem:[%s4289_s24 + $0x1f0] sm:$0xff]  ;;  %v3030_v46 = vld [vmem:[%s4289_s24 + $0x1f8] sm:$0xff] }
 0x320   : > { %3022 = vst [vmem:[%s4316_s20 + $0x1fd8] sm:$0xff] %v2894_v18  ;;  %3279 = vst [vmem:[%s4316_s20 + $0xe0] sm:$0xff] %v3151_v6  ;;  %v3989_v22 = vld [vmem:[%s4297_s5 + $0x28] sm:$0xff]  ;;  %v3157_v50 = vadd.f32 %v7782_v1, %v3029_v21  ;;  %v3158_v28 = vadd.f32 %v7792_v20, %v3030_v46  ;;  %v3031_v37 = vld [vmem:[%s4289_s24 + $0x2e0] sm:$0xff] }
 0x321   : > { %3280 = vst [vmem:[%s4316_s20 + $0xe8] sm:$0xff] %v3152_v2  ;;  %v3156_v60 = vadd.f32 %v3989_v22, %v3028_v49  ;;  %v3032_v34 = vld [vmem:[%s4289_s24 + $0x2e8] sm:$0xff]  ;;  %v3033_v11 = vld [vmem:[%s4289_s24 + $0x2f0] sm:$0xff]  ;;  %3281 = vst [vmem:[%s4316_s20 + $0xf0] sm:$0xff] %v3153_v40  ;;  %v3159_v2 = vadd.f32 %v7796_v12, %v3031_v37 }
 0x322   : > { %3282 = vst [vmem:[%s4316_s20 + $0xf8] sm:$0xff] %v3154_v5  ;;  %3283 = vst [vmem:[%s4316_s20 + $0x1e0] sm:$0xff] %v3155_v53  ;;  %v3160_v6 = vadd.f32 %v7800_v26, %v3032_v34  ;;  %v3161_v1 = vadd.f32 %v7810_v19, %v3033_v11  ;;  %v3034_v18 = vld [vmem:[%s4289_s24 + $0x2f8] sm:$0xff]  ;;  %v3035_v20 = vld [vmem:[%s4289_s24 + $0x3e0] sm:$0xff] }
 0x323   : > { %v3036_v42 = vld [vmem:[%s4289_s24 + $0x3e8] sm:$0xff]  ;;  %3284 = vst [vmem:[%s4316_s20 + $0x1e8] sm:$0xff] %v3156_v60  ;;  %3285 = vst [vmem:[%s4316_s20 + $0x1f0] sm:$0xff] %v3157_v50  ;;  %v3162_v48 = vadd.f32 %v7814_v23, %v3034_v18  ;;  %v3163_v12 = vadd.f32 %v7818_v51, %v3035_v20  ;;  %v3037_v40 = vld [vmem:[%s4289_s24 + $0x3f0] sm:$0xff] }
 0x324   : > { %3286 = vst [vmem:[%s4316_s20 + $0x1f8] sm:$0xff] %v3158_v28  ;;  %v3164_v26 = vadd.f32 %v7828_v24, %v3036_v42  ;;  %v3038_v19 = vld [vmem:[%s4289_s24 + $0x3f8] sm:$0xff]  ;;  %v3039_v5 = vld [vmem:[%s4289_s24 + $0x4e0] sm:$0xff]  ;;  %3287 = vst [vmem:[%s4316_s20 + $0x2e0] sm:$0xff] %v3159_v2  ;;  %v3165_v53 = vadd.f32 %v7832_v52, %v3037_v40 }
 0x325   : > { %3288 = vst [vmem:[%s4316_s20 + $0x2e8] sm:$0xff] %v3160_v6  ;;  %3289 = vst [vmem:[%s4316_s20 + $0x2f0] sm:$0xff] %v3161_v1  ;;  %v3166_v23 = vadd.f32 %v7836_v30, %v3038_v19  ;;  %v3167_v51 = vadd.f32 %v7846_v45, %v3039_v5  ;;  %v3040_v49 = vld [vmem:[%s4289_s24 + $0x4e8] sm:$0xff]  ;;  %v3041_v24 = vld [vmem:[%s4289_s24 + $0x4f0] sm:$0xff] }
 0x326   : > { %v3042_v21 = vld [vmem:[%s4289_s24 + $0x4f8] sm:$0xff]  ;;  %3290 = vst [vmem:[%s4316_s20 + $0x2f8] sm:$0xff] %v3162_v48  ;;  %3291 = vst [vmem:[%s4316_s20 + $0x3e0] sm:$0xff] %v3163_v12  ;;  %v3168_v46 = vadd.f32 %v7850_v59, %v3040_v49  ;;  %v3169_v52 = vadd.f32 %v7854_v38, %v3041_v24  ;;  %v3043_v22 = vld [vmem:[%s4289_s24 + $0x5e0] sm:$0xff] }
 0x327   : > { %3292 = vst [vmem:[%s4316_s20 + $0x3e8] sm:$0xff] %v3164_v26  ;;  %v3170_v30 = vadd.f32 %v7864_v4, %v3042_v21  ;;  %v3044_v45 = vld [vmem:[%s4289_s24 + $0x5e8] sm:$0xff]  ;;  %v3045_v60 = vld [vmem:[%s4289_s24 + $0x5f0] sm:$0xff]  ;;  %3293 = vst [vmem:[%s4316_s20 + $0x3f0] sm:$0xff] %v3165_v53  ;;  %v3171_v50 = vadd.f32 %v7868_v56, %v3043_v22 }
 0x328   : > { %3294 = vst [vmem:[%s4316_s20 + $0x3f8] sm:$0xff] %v3166_v23  ;;  %3295 = vst [vmem:[%s4316_s20 + $0x4e0] sm:$0xff] %v3167_v51  ;;  %v3172_v59 = vadd.f32 %v7872_v63, %v3044_v45  ;;  %v3173_v38 = vadd.f32 %v7882_v0, %v3045_v60  ;;  %v3046_v28 = vld [vmem:[%s4289_s24 + $0x5f8] sm:$0xff]  ;;  %v3047_v4 = vld [vmem:[%s4289_s24 + $0x6e0] sm:$0xff] }
 0x329   : > { %v3048_v37 = vld [vmem:[%s4289_s24 + $0x6e8] sm:$0xff]  ;;  %3296 = vst [vmem:[%s4316_s20 + $0x4e8] sm:$0xff] %v3168_v46  ;;  %3297 = vst [vmem:[%s4316_s20 + $0x4f0] sm:$0xff] %v3169_v52  ;;  %v3174_v34 = vadd.f32 %v7886_v29, %v3046_v28  ;;  %v3175_v56 = vadd.f32 %v7890_v25, %v3047_v4  ;;  %v3049_v11 = vld [vmem:[%s4289_s24 + $0x6f0] sm:$0xff] }
 0x32a   : > { %3298 = vst [vmem:[%s4316_s20 + $0x4f8] sm:$0xff] %v3170_v30  ;;  %v3176_v63 = vadd.f32 %v7900_v35, %v3048_v37  ;;  %v3050_v0 = vld [vmem:[%s4289_s24 + $0x6f8] sm:$0xff]  ;;  %v3051_v2 = vld [vmem:[%s4289_s24 + $0x7e0] sm:$0xff]  ;;  %3299 = vst [vmem:[%s4316_s20 + $0x5e0] sm:$0xff] %v3171_v50  ;;  %v3177_v6 = vadd.f32 %v7904_v57, %v3049_v11 }
 0x32b   : > { %3300 = vst [vmem:[%s4316_s20 + $0x5e8] sm:$0xff] %v3172_v59  ;;  %3301 = vst [vmem:[%s4316_s20 + $0x5f0] sm:$0xff] %v3173_v38  ;;  %v3178_v29 = vadd.f32 %v7908_v7, %v3050_v0  ;;  %v3179_v25 = vadd.f32 %v7918_v58, %v3051_v2  ;;  %v3052_v1 = vld [vmem:[%s4289_s24 + $0x7e8] sm:$0xff]  ;;  %v3053_v35 = vld [vmem:[%s4289_s24 + $0x7f0] sm:$0xff] }
 0x32c   : > { %v3054_v18 = vld [vmem:[%s4289_s24 + $0x7f8] sm:$0xff]  ;;  %3302 = vst [vmem:[%s4316_s20 + $0x5f8] sm:$0xff] %v3174_v34  ;;  %3303 = vst [vmem:[%s4316_s20 + $0x6e0] sm:$0xff] %v3175_v56  ;;  %v3180_v20 = vadd.f32 %v7922_v9, %v3052_v1  ;;  %v3181_v57 = vadd.f32 %v7926_v17, %v3053_v35  ;;  %v3055_v42 = vld [vmem:[%s4289_s24 + $0x8e0] sm:$0xff] }
 0x32d   : > { %3304 = vst [vmem:[%s4316_s20 + $0x6e8] sm:$0xff] %v3176_v63  ;;  %v3182_v7 = vadd.f32 %v7936_v55, %v3054_v18  ;;  %v3056_v58 = vld [vmem:[%s4289_s24 + $0x8e8] sm:$0xff]  ;;  %v3057_v48 = vld [vmem:[%s4289_s24 + $0x8f0] sm:$0xff]  ;;  %3305 = vst [vmem:[%s4316_s20 + $0x6f0] sm:$0xff] %v3177_v6  ;;  %v3183_v12 = vadd.f32 %v7940_v62, %v3055_v42 }
 0x32e   : > { %3306 = vst [vmem:[%s4316_s20 + $0x6f8] sm:$0xff] %v3178_v29  ;;  %3307 = vst [vmem:[%s4316_s20 + $0x7e0] sm:$0xff] %v3179_v25  ;;  %v3184_v9 = vadd.f32 %v7944_v33, %v3056_v58  ;;  %v3185_v17 = vadd.f32 %v7954_v61, %v3057_v48  ;;  %v3058_v26 = vld [vmem:[%s4289_s24 + $0x8f8] sm:$0xff]  ;;  %v3059_v55 = vld [vmem:[%s4289_s24 + $0x9e0] sm:$0xff] }
 0x32f   : > { %v3060_v40 = vld [vmem:[%s4289_s24 + $0x9e8] sm:$0xff]  ;;  %3308 = vst [vmem:[%s4316_s20 + $0x7e8] sm:$0xff] %v3180_v20  ;;  %3309 = vst [vmem:[%s4316_s20 + $0x7f0] sm:$0xff] %v3181_v57  ;;  %v3186_v19 = vadd.f32 %v7958_v47, %v3058_v26  ;;  %v3187_v62 = vadd.f32 %v7962_v14, %v3059_v55  ;;  %v3061_v5 = vld [vmem:[%s4289_s24 + $0x9f0] sm:$0xff] }
 0x330   : > { %3310 = vst [vmem:[%s4316_s20 + $0x7f8] sm:$0xff] %v3182_v7  ;;  %v3188_v33 = vadd.f32 %v7972_v41, %v3060_v40  ;;  %v3062_v61 = vld [vmem:[%s4289_s24 + $0x9f8] sm:$0xff]  ;;  %v3063_v53 = vld [vmem:[%s4289_s24 + $0xae0] sm:$0xff]  ;;  %3311 = vst [vmem:[%s4316_s20 + $0x8e0] sm:$0xff] %v3183_v12  ;;  %v3189_v23 = vadd.f32 %v7976_v54, %v3061_v5 }
 0x331   : > { %3312 = vst [vmem:[%s4316_s20 + $0x8e8] sm:$0xff] %v3184_v9  ;;  %3313 = vst [vmem:[%s4316_s20 + $0x8f0] sm:$0xff] %v3185_v17  ;;  %v3190_v47 = vadd.f32 %v7980_v13, %v3062_v61  ;;  %v3191_v14 = vadd.f32 %v7990_v10, %v3063_v53  ;;  %v3064_v51 = vld [vmem:[%s4289_s24 + $0xae8] sm:$0xff]  ;;  %v3065_v41 = vld [vmem:[%s4289_s24 + $0xaf0] sm:$0xff] }
 0x332   : > { %v3066_v49 = vld [vmem:[%s4289_s24 + $0xaf8] sm:$0xff]  ;;  %3314 = vst [vmem:[%s4316_s20 + $0x8f8] sm:$0xff] %v3186_v19  ;;  %3315 = vst [vmem:[%s4316_s20 + $0x9e0] sm:$0xff] %v3187_v62  ;;  %v3192_v24 = vadd.f32 %v7994_v3, %v3064_v51  ;;  %v3193_v54 = vadd.f32 %v7998_v39, %v3065_v41  ;;  %v3067_v21 = vld [vmem:[%s4289_s24 + $0xbe0] sm:$0xff] }
 0x333   : > { %3316 = vst [vmem:[%s4316_s20 + $0x9e8] sm:$0xff] %v3188_v33  ;;  %v3194_v13 = vadd.f32 %v8008_v8, %v3066_v49  ;;  %v3068_v10 = vld [vmem:[%s4289_s24 + $0xbe8] sm:$0xff]  ;;  %v3069_v46 = vld [vmem:[%s4289_s24 + $0xbf0] sm:$0xff]  ;;  %3317 = vst [vmem:[%s4316_s20 + $0x9f0] sm:$0xff] %v3189_v23  ;;  %v3195_v52 = vadd.f32 %v8012_v32, %v3067_v21 }
 0x334   : > { %3318 = vst [vmem:[%s4316_s20 + $0x9f8] sm:$0xff] %v3190_v47  ;;  %3319 = vst [vmem:[%s4316_s20 + $0xae0] sm:$0xff] %v3191_v14  ;;  %v3196_v3 = vadd.f32 %v8016_v36, %v3068_v10  ;;  %v3197_v39 = vadd.f32 %v8026_v27, %v3069_v46  ;;  %v3070_v30 = vld [vmem:[%s4289_s24 + $0xbf8] sm:$0xff]  ;;  %v3071_v8 = vld [vmem:[%s4289_s24 + $0xce0] sm:$0xff] }
 0x335   : > { %v3072_v22 = vld [vmem:[%s4289_s24 + $0xce8] sm:$0xff]  ;;  %3320 = vst [vmem:[%s4316_s20 + $0xae8] sm:$0xff] %v3192_v24  ;;  %3321 = vst [vmem:[%s4316_s20 + $0xaf0] sm:$0xff] %v3193_v54  ;;  %v3198_v45 = vadd.f32 %v8030_v43, %v3070_v30  ;;  %v3199_v32 = vadd.f32 %v8034_v31, %v3071_v8  ;;  %v3073_v60 = vld [vmem:[%s4289_s24 + $0xcf0] sm:$0xff] }
 0x336   : > { %3322 = vst [vmem:[%s4316_s20 + $0xaf8] sm:$0xff] %v3194_v13  ;;  %v3200_v36 = vadd.f32 %v8044_v15, %v3072_v22  ;;  %v3074_v27 = vld [vmem:[%s4289_s24 + $0xcf8] sm:$0xff]  ;;  %v3075_v50 = vld [vmem:[%s4289_s24 + $0xde0] sm:$0xff]  ;;  %3323 = vst [vmem:[%s4316_s20 + $0xbe0] sm:$0xff] %v3195_v52  ;;  %v3201_v59 = vadd.f32 %v8048_v16, %v3073_v60 }
 0x337   : > { %3324 = vst [vmem:[%s4316_s20 + $0xbe8] sm:$0xff] %v3196_v3  ;;  %3325 = vst [vmem:[%s4316_s20 + $0xbf0] sm:$0xff] %v3197_v39  ;;  %v9820_v38 = vld [vmem:[#allocation11_spill] sm:$0xff]  ;;  %v9821_v28 = vld [vmem:[#allocation12_spill] sm:$0xff] }
 0x338   : > { %v3202_v43 = vadd.f32 %v9820_v38, %v3074_v27  ;;  %v3203_v31 = vadd.f32 %v9821_v28, %v3075_v50  ;;  %v3076_v4 = vld [vmem:[%s4289_s24 + $0xde8] sm:$0xff]  ;;  %v3077_v15 = vld [vmem:[%s4289_s24 + $0xdf0] sm:$0xff]  ;;  %v3078_v37 = vld [vmem:[%s4289_s24 + $0xdf8] sm:$0xff]  ;;  %3326 = vst [vmem:[%s4316_s20 + $0xbf8] sm:$0xff] %v3198_v45 }
 0x339   : > { %3327 = vst [vmem:[%s4316_s20 + $0xce0] sm:$0xff] %v3199_v32  ;;  %3328 = vst [vmem:[%s4316_s20 + $0xce8] sm:$0xff] %v3200_v36  ;;  %v9822_v34 = vld [vmem:[#allocation13_spill] sm:$0xff]  ;;  %v9823_v63 = vld [vmem:[#allocation14_spill] sm:$0xff] }
 0x33a   : > { %v3204_v56 = vadd.f32 %v9822_v34, %v3076_v4  ;;  %v3205_v16 = vadd.f32 %v9823_v63, %v3077_v15  ;;  %v9824_v11 = vld [vmem:[#allocation15_spill] sm:$0xff]  ;;  %v3080_v6 = vld [vmem:[%s4289_s24 + $0xee8] sm:$0xff]  ;;  %v3081_v29 = vld [vmem:[%s4289_s24 + $0xef0] sm:$0xff]  ;;  %3329 = vst [vmem:[%s4316_s20 + $0xcf0] sm:$0xff] %v3201_v59 }
 0x33b   : > { %v3206_v0 = vadd.f32 %v9824_v11, %v3078_v37  ;;  %v3079_v2 = vld [vmem:[%s4289_s24 + $0xee0] sm:$0xff]  ;;  %3330 = vst [vmem:[%s4316_s20 + $0xcf8] sm:$0xff] %v3202_v43  ;;  %3331 = vst [vmem:[%s4316_s20 + $0xde0] sm:$0xff] %v3203_v31  ;;  %v9825_v25 = vld [vmem:[#allocation16_spill] sm:$0xff] }
 0x33c   : > { %v3207_v1 = vadd.f32 %v9825_v25, %v3079_v2  ;;  %v9826_v35 = vld [vmem:[#allocation17_spill] sm:$0xff]  ;;  %v9827_v20 = vld [vmem:[#allocation18_spill] sm:$0xff]  ;;  %v3083_v42 = vld [vmem:[%s4289_s24 + $0xfe0] sm:$0xff]  ;;  %3332 = vst [vmem:[%s4316_s20 + $0xde8] sm:$0xff] %v3204_v56 }
 0x33d   : > { %v3208_v18 = vadd.f32 %v9826_v35, %v3080_v6  ;;  %v3209_v57 = vadd.f32 %v9827_v20, %v3081_v29  ;;  %v3082_v7 = vld [vmem:[%s4289_s24 + $0xef8] sm:$0xff]  ;;  %v3084_v58 = vld [vmem:[%s4289_s24 + $0xfe8] sm:$0xff]  ;;  %3333 = vst [vmem:[%s4316_s20 + $0xdf0] sm:$0xff] %v3205_v16  ;;  %3334 = vst [vmem:[%s4316_s20 + $0xdf8] sm:$0xff] %v3206_v0 }
 0x33e   : > { %v9828_v48 = vld [vmem:[#allocation19_spill] sm:$0xff]  ;;  %v9829_v9 = vld [vmem:[#allocation20_spill] sm:$0xff]  ;;  %v9830_v26 = vld [vmem:[#allocation21_spill] sm:$0xff]  ;;  %3335 = vst [vmem:[%s4316_s20 + $0xee0] sm:$0xff] %v3207_v1 }
 0x33f   : > { %v3210_v12 = vadd.f32 %v9828_v48, %v3082_v7  ;;  %v3211_v17 = vadd.f32 %v9829_v9, %v3083_v42  ;;  %v3212_v55 = vadd.f32 %v9830_v26, %v3084_v58  ;;  %v3085_v40 = vld [vmem:[%s4289_s24 + $0xff0] sm:$0xff]  ;;  %v3086_v19 = vld [vmem:[%s4289_s24 + $0xff8] sm:$0xff]  ;;  %v3087_v62 = vld [vmem:[%s4289_s24 + $0x10e0] sm:$0xff]  ;;  %3336 = vst [vmem:[%s4316_s20 + $0xee8] sm:$0xff] %v3208_v18 }
 0x340   : > { %3337 = vst [vmem:[%s4316_s20 + $0xef0] sm:$0xff] %v3209_v57  ;;  %v9831_v33 = vld [vmem:[#allocation22_spill] sm:$0xff]  ;;  %v9832_v61 = vld [vmem:[#allocation23_spill] sm:$0xff]  ;;  %v9833_v23 = vld [vmem:[#allocation24_spill] sm:$0xff] }
 0x341   : > { %v3213_v5 = vadd.f32 %v9831_v33, %v3085_v40  ;;  %v3214_v53 = vadd.f32 %v9832_v61, %v3086_v19  ;;  %v3215_v47 = vadd.f32 %v9833_v23, %v3087_v62  ;;  %v3088_v14 = vld [vmem:[%s4289_s24 + $0x10e8] sm:$0xff]  ;;  %v3089_v51 = vld [vmem:[%s4289_s24 + $0x10f0] sm:$0xff]  ;;  %v3090_v41 = vld [vmem:[%s4289_s24 + $0x10f8] sm:$0xff]  ;;  %3338 = vst [vmem:[%s4316_s20 + $0xef8] sm:$0xff] %v3210_v12 }
 0x342   : > { %3339 = vst [vmem:[%s4316_s20 + $0xfe0] sm:$0xff] %v3211_v17  ;;  %3340 = vst [vmem:[%s4316_s20 + $0xfe8] sm:$0xff] %v3212_v55  ;;  %v9834_v49 = vld [vmem:[#allocation25_spill] sm:$0xff]  ;;  %v9835_v54 = vld [vmem:[#allocation26_spill] sm:$0xff] }
 0x343   : > { %v3216_v24 = vadd.f32 %v9834_v49, %v3088_v14  ;;  %v3217_v13 = vadd.f32 %v9835_v54, %v3089_v51  ;;  %v9836_v21 = vld [vmem:[#allocation27_spill] sm:$0xff]  ;;  %v3092_v52 = vld [vmem:[%s4289_s24 + $0x11e8] sm:$0xff]  ;;  %v3093_v3 = vld [vmem:[%s4289_s24 + $0x11f0] sm:$0xff]  ;;  %3341 = vst [vmem:[%s4316_s20 + $0xff0] sm:$0xff] %v3213_v5 }
 0x344   : > { %v3218_v10 = vadd.f32 %v9836_v21, %v3090_v41  ;;  %v3091_v46 = vld [vmem:[%s4289_s24 + $0x11e0] sm:$0xff]  ;;  %3342 = vst [vmem:[%s4316_s20 + $0xff8] sm:$0xff] %v3214_v53  ;;  %3343 = vst [vmem:[%s4316_s20 + $0x10e0] sm:$0xff] %v3215_v47  ;;  %v9837_v39 = vld [vmem:[#allocation28_spill] sm:$0xff] }
 0x345   : > { %v3219_v30 = vadd.f32 %v9837_v39, %v3091_v46  ;;  %v9838_v8 = vld [vmem:[#allocation29_spill] sm:$0xff]  ;;  %v9839_v45 = vld [vmem:[#allocation30_spill] sm:$0xff]  ;;  %v3095_v60 = vld [vmem:[%s4289_s24 + $0x12e0] sm:$0xff]  ;;  %3344 = vst [vmem:[%s4316_s20 + $0x10e8] sm:$0xff] %v3216_v24 }
 0x346   : > { %v3220_v22 = vadd.f32 %v9838_v8, %v3092_v52  ;;  %v3221_v32 = vadd.f32 %v9839_v45, %v3093_v3  ;;  %v3094_v36 = vld [vmem:[%s4289_s24 + $0x11f8] sm:$0xff]  ;;  %v3096_v27 = vld [vmem:[%s4289_s24 + $0x12e8] sm:$0xff]  ;;  %3345 = vst [vmem:[%s4316_s20 + $0x10f0] sm:$0xff] %v3217_v13  ;;  %3346 = vst [vmem:[%s4316_s20 + $0x10f8] sm:$0xff] %v3218_v10 }
 0x347   : > { %v9840_v50 = vld [vmem:[#allocation31_spill] sm:$0xff]  ;;  %v9841_v38 = vld [vmem:[#allocation32_spill] sm:$0xff]  ;;  %v9842_v28 = vld [vmem:[#allocation33_spill] sm:$0xff]  ;;  %3347 = vst [vmem:[%s4316_s20 + $0x11e0] sm:$0xff] %v3219_v30 }
 0x348   : > { %v3222_v59 = vadd.f32 %v9840_v50, %v3094_v36  ;;  %v3223_v43 = vadd.f32 %v9841_v38, %v3095_v60  ;;  %v3224_v31 = vadd.f32 %v9842_v28, %v3096_v27  ;;  %v3097_v4 = vld [vmem:[%s4289_s24 + $0x12f0] sm:$0xff]  ;;  %v3098_v15 = vld [vmem:[%s4289_s24 + $0x12f8] sm:$0xff]  ;;  %v3099_v37 = vld [vmem:[%s4289_s24 + $0x13e0] sm:$0xff]  ;;  %3348 = vst [vmem:[%s4316_s20 + $0x11e8] sm:$0xff] %v3220_v22 }
 0x349   : > { %3349 = vst [vmem:[%s4316_s20 + $0x11f0] sm:$0xff] %v3221_v32  ;;  %v9843_v34 = vld [vmem:[#allocation34_spill] sm:$0xff]  ;;  %v9844_v63 = vld [vmem:[#allocation35_spill] sm:$0xff]  ;;  %v9845_v11 = vld [vmem:[#allocation36_spill] sm:$0xff] }
 0x34a   : > { %v3225_v56 = vadd.f32 %v9843_v34, %v3097_v4  ;;  %v3226_v16 = vadd.f32 %v9844_v63, %v3098_v15  ;;  %v3227_v0 = vadd.f32 %v9845_v11, %v3099_v37  ;;  %v3100_v2 = vld [vmem:[%s4289_s24 + $0x13e8] sm:$0xff]  ;;  %v3101_v6 = vld [vmem:[%s4289_s24 + $0x13f0] sm:$0xff]  ;;  %v3102_v29 = vld [vmem:[%s4289_s24 + $0x13f8] sm:$0xff]  ;;  %3350 = vst [vmem:[%s4316_s20 + $0x11f8] sm:$0xff] %v3222_v59 }
 0x34b   : > { %3351 = vst [vmem:[%s4316_s20 + $0x12e0] sm:$0xff] %v3223_v43  ;;  %3352 = vst [vmem:[%s4316_s20 + $0x12e8] sm:$0xff] %v3224_v31  ;;  %v9846_v25 = vld [vmem:[#allocation37_spill] sm:$0xff]  ;;  %v9847_v35 = vld [vmem:[#allocation38_spill] sm:$0xff] }
 0x34c   : > { %v3228_v1 = vadd.f32 %v9846_v25, %v3100_v2  ;;  %v3229_v18 = vadd.f32 %v9847_v35, %v3101_v6  ;;  %v9848_v20 = vld [vmem:[#allocation39_spill] sm:$0xff]  ;;  %v3104_v42 = vld [vmem:[%s4289_s24 + $0x14e8] sm:$0xff]  ;;  %v3105_v58 = vld [vmem:[%s4289_s24 + $0x14f0] sm:$0xff]  ;;  %3353 = vst [vmem:[%s4316_s20 + $0x12f0] sm:$0xff] %v3225_v56 }
 0x34d   : > { %v3230_v57 = vadd.f32 %v9848_v20, %v3102_v29  ;;  %v3103_v7 = vld [vmem:[%s4289_s24 + $0x14e0] sm:$0xff]  ;;  %3354 = vst [vmem:[%s4316_s20 + $0x12f8] sm:$0xff] %v3226_v16  ;;  %3355 = vst [vmem:[%s4316_s20 + $0x13e0] sm:$0xff] %v3227_v0  ;;  %v9849_v48 = vld [vmem:[#allocation40_spill] sm:$0xff] }
 0x34e   : > { %v3231_v12 = vadd.f32 %v9849_v48, %v3103_v7  ;;  %v9850_v9 = vld [vmem:[#allocation41_spill] sm:$0xff]  ;;  %v9851_v26 = vld [vmem:[#allocation42_spill] sm:$0xff]  ;;  %v3107_v19 = vld [vmem:[%s4289_s24 + $0x15e0] sm:$0xff]  ;;  %3356 = vst [vmem:[%s4316_s20 + $0x13e8] sm:$0xff] %v3228_v1 }
 0x34f   : > { %v3232_v17 = vadd.f32 %v9850_v9, %v3104_v42  ;;  %v3233_v55 = vadd.f32 %v9851_v26, %v3105_v58  ;;  %v3106_v40 = vld [vmem:[%s4289_s24 + $0x14f8] sm:$0xff]  ;;  %v3108_v62 = vld [vmem:[%s4289_s24 + $0x15e8] sm:$0xff]  ;;  %3357 = vst [vmem:[%s4316_s20 + $0x13f0] sm:$0xff] %v3229_v18  ;;  %3358 = vst [vmem:[%s4316_s20 + $0x13f8] sm:$0xff] %v3230_v57 }
 0x350   : > { %v9852_v33 = vld [vmem:[#allocation43_spill] sm:$0xff]  ;;  %v9853_v61 = vld [vmem:[#allocation44_spill] sm:$0xff]  ;;  %v9854_v23 = vld [vmem:[#allocation45_spill] sm:$0xff]  ;;  %3359 = vst [vmem:[%s4316_s20 + $0x14e0] sm:$0xff] %v3231_v12 }
 0x351   : > { %v3234_v5 = vadd.f32 %v9852_v33, %v3106_v40  ;;  %v3235_v53 = vadd.f32 %v9853_v61, %v3107_v19  ;;  %v3236_v47 = vadd.f32 %v9854_v23, %v3108_v62  ;;  %v3109_v14 = vld [vmem:[%s4289_s24 + $0x15f0] sm:$0xff]  ;;  %v3110_v51 = vld [vmem:[%s4289_s24 + $0x15f8] sm:$0xff]  ;;  %v3111_v41 = vld [vmem:[%s4289_s24 + $0x16e0] sm:$0xff]  ;;  %3360 = vst [vmem:[%s4316_s20 + $0x14e8] sm:$0xff] %v3232_v17 }
 0x352   : > { %3361 = vst [vmem:[%s4316_s20 + $0x14f0] sm:$0xff] %v3233_v55  ;;  %v9855_v49 = vld [vmem:[#allocation46_spill] sm:$0xff]  ;;  %v9856_v54 = vld [vmem:[#allocation47_spill] sm:$0xff]  ;;  %v9857_v21 = vld [vmem:[#allocation48_spill] sm:$0xff] }
 0x353   : > { %v3237_v24 = vadd.f32 %v9855_v49, %v3109_v14  ;;  %v3238_v13 = vadd.f32 %v9856_v54, %v3110_v51  ;;  %v3239_v10 = vadd.f32 %v9857_v21, %v3111_v41  ;;  %v3112_v46 = vld [vmem:[%s4289_s24 + $0x16e8] sm:$0xff]  ;;  %v3113_v52 = vld [vmem:[%s4289_s24 + $0x16f0] sm:$0xff]  ;;  %v3114_v3 = vld [vmem:[%s4289_s24 + $0x16f8] sm:$0xff]  ;;  %3362 = vst [vmem:[%s4316_s20 + $0x14f8] sm:$0xff] %v3234_v5 }
 0x354   : > { %3363 = vst [vmem:[%s4316_s20 + $0x15e0] sm:$0xff] %v3235_v53  ;;  %3364 = vst [vmem:[%s4316_s20 + $0x15e8] sm:$0xff] %v3236_v47  ;;  %v9858_v39 = vld [vmem:[#allocation49_spill] sm:$0xff]  ;;  %v9859_v8 = vld [vmem:[#allocation50_spill] sm:$0xff] }
 0x355   : > { %v3240_v30 = vadd.f32 %v9858_v39, %v3112_v46  ;;  %v3241_v22 = vadd.f32 %v9859_v8, %v3113_v52  ;;  %v9860_v45 = vld [vmem:[#allocation51_spill] sm:$0xff]  ;;  %v3116_v60 = vld [vmem:[%s4289_s24 + $0x17e8] sm:$0xff]  ;;  %v3117_v27 = vld [vmem:[%s4289_s24 + $0x17f0] sm:$0xff]  ;;  %3365 = vst [vmem:[%s4316_s20 + $0x15f0] sm:$0xff] %v3237_v24 }
 0x356   : > { %v3242_v32 = vadd.f32 %v9860_v45, %v3114_v3  ;;  %v3115_v36 = vld [vmem:[%s4289_s24 + $0x17e0] sm:$0xff]  ;;  %3366 = vst [vmem:[%s4316_s20 + $0x15f8] sm:$0xff] %v3238_v13  ;;  %3367 = vst [vmem:[%s4316_s20 + $0x16e0] sm:$0xff] %v3239_v10  ;;  %v9861_v50 = vld [vmem:[#allocation52_spill] sm:$0xff] }
 0x357   : > { %v3243_v59 = vadd.f32 %v9861_v50, %v3115_v36  ;;  %v9862_v38 = vld [vmem:[#allocation53_spill] sm:$0xff]  ;;  %v9863_v28 = vld [vmem:[#allocation54_spill] sm:$0xff]  ;;  %v3119_v15 = vld [vmem:[%s4289_s24 + $0x18e0] sm:$0xff]  ;;  %3368 = vst [vmem:[%s4316_s20 + $0x16e8] sm:$0xff] %v3240_v30 }
 0x358   : > { %v3244_v43 = vadd.f32 %v9862_v38, %v3116_v60  ;;  %v3245_v31 = vadd.f32 %v9863_v28, %v3117_v27  ;;  %v3118_v4 = vld [vmem:[%s4289_s24 + $0x17f8] sm:$0xff]  ;;  %v3120_v37 = vld [vmem:[%s4289_s24 + $0x18e8] sm:$0xff]  ;;  %3369 = vst [vmem:[%s4316_s20 + $0x16f0] sm:$0xff] %v3241_v22  ;;  %3370 = vst [vmem:[%s4316_s20 + $0x16f8] sm:$0xff] %v3242_v32 }
 0x359   : > { %v9864_v34 = vld [vmem:[#allocation55_spill] sm:$0xff]  ;;  %v9865_v63 = vld [vmem:[#allocation56_spill] sm:$0xff]  ;;  %v9866_v11 = vld [vmem:[#allocation57_spill] sm:$0xff]  ;;  %3371 = vst [vmem:[%s4316_s20 + $0x17e0] sm:$0xff] %v3243_v59 }
 0x35a   : > { %v3246_v56 = vadd.f32 %v9864_v34, %v3118_v4  ;;  %v3247_v16 = vadd.f32 %v9865_v63, %v3119_v15  ;;  %v3248_v0 = vadd.f32 %v9866_v11, %v3120_v37  ;;  %v3121_v2 = vld [vmem:[%s4289_s24 + $0x18f0] sm:$0xff]  ;;  %v3122_v6 = vld [vmem:[%s4289_s24 + $0x18f8] sm:$0xff]  ;;  %v3123_v29 = vld [vmem:[%s4289_s24 + $0x19e0] sm:$0xff]  ;;  %3372 = vst [vmem:[%s4316_s20 + $0x17e8] sm:$0xff] %v3244_v43 }
 0x35b   : > { %3373 = vst [vmem:[%s4316_s20 + $0x17f0] sm:$0xff] %v3245_v31  ;;  %v9867_v25 = vld [vmem:[#allocation58_spill] sm:$0xff]  ;;  %v9868_v35 = vld [vmem:[#allocation59_spill] sm:$0xff]  ;;  %v9869_v20 = vld [vmem:[#allocation60_spill] sm:$0xff] }
 0x35c   : > { %v3249_v1 = vadd.f32 %v9867_v25, %v3121_v2  ;;  %v3250_v18 = vadd.f32 %v9868_v35, %v3122_v6  ;;  %v3251_v57 = vadd.f32 %v9869_v20, %v3123_v29  ;;  %v3124_v7 = vld [vmem:[%s4289_s24 + $0x19e8] sm:$0xff]  ;;  %v3125_v42 = vld [vmem:[%s4289_s24 + $0x19f0] sm:$0xff]  ;;  %v3126_v58 = vld [vmem:[%s4289_s24 + $0x19f8] sm:$0xff]  ;;  %3374 = vst [vmem:[%s4316_s20 + $0x17f8] sm:$0xff] %v3246_v56 }
 0x35d   : > { %3375 = vst [vmem:[%s4316_s20 + $0x18e0] sm:$0xff] %v3247_v16  ;;  %3376 = vst [vmem:[%s4316_s20 + $0x18e8] sm:$0xff] %v3248_v0  ;;  %v9870_v48 = vld [vmem:[#allocation61_spill] sm:$0xff]  ;;  %v9871_v9 = vld [vmem:[#allocation62_spill] sm:$0xff] }
 0x35e   : > { %v3252_v12 = vadd.f32 %v9870_v48, %v3124_v7  ;;  %v3253_v17 = vadd.f32 %v9871_v9, %v3125_v42  ;;  %v9872_v26 = vld [vmem:[#allocation63_spill] sm:$0xff]  ;;  %v3128_v19 = vld [vmem:[%s4289_s24 + $0x1ae8] sm:$0xff]  ;;  %v3129_v62 = vld [vmem:[%s4289_s24 + $0x1af0] sm:$0xff]  ;;  %3377 = vst [vmem:[%s4316_s20 + $0x18f0] sm:$0xff] %v3249_v1 }
 0x35f   : > { %v3254_v55 = vadd.f32 %v9872_v26, %v3126_v58  ;;  %v3127_v40 = vld [vmem:[%s4289_s24 + $0x1ae0] sm:$0xff]  ;;  %3378 = vst [vmem:[%s4316_s20 + $0x18f8] sm:$0xff] %v3250_v18  ;;  %3379 = vst [vmem:[%s4316_s20 + $0x19e0] sm:$0xff] %v3251_v57  ;;  %v9873_v33 = vld [vmem:[#allocation64_spill] sm:$0xff] }
 0x360   : > { %v3255_v5 = vadd.f32 %v9873_v33, %v3127_v40  ;;  %v9874_v61 = vld [vmem:[#allocation65_spill] sm:$0xff]  ;;  %v9875_v23 = vld [vmem:[#allocation66_spill] sm:$0xff]  ;;  %v3131_v51 = vld [vmem:[%s4289_s24 + $0x1be0] sm:$0xff]  ;;  %3380 = vst [vmem:[%s4316_s20 + $0x19e8] sm:$0xff] %v3252_v12 }
 0x361   : > { %v3256_v53 = vadd.f32 %v9874_v61, %v3128_v19  ;;  %v3257_v47 = vadd.f32 %v9875_v23, %v3129_v62  ;;  %v3130_v14 = vld [vmem:[%s4289_s24 + $0x1af8] sm:$0xff]  ;;  %v3132_v41 = vld [vmem:[%s4289_s24 + $0x1be8] sm:$0xff]  ;;  %3381 = vst [vmem:[%s4316_s20 + $0x19f0] sm:$0xff] %v3253_v17  ;;  %3382 = vst [vmem:[%s4316_s20 + $0x19f8] sm:$0xff] %v3254_v55 }
 0x362   : > { %v9876_v49 = vld [vmem:[#allocation67_spill] sm:$0xff]  ;;  %v9877_v54 = vld [vmem:[#allocation68_spill] sm:$0xff]  ;;  %v9878_v21 = vld [vmem:[#allocation69_spill] sm:$0xff]  ;;  %3383 = vst [vmem:[%s4316_s20 + $0x1ae0] sm:$0xff] %v3255_v5 }
 0x363   : > { %v3258_v24 = vadd.f32 %v9876_v49, %v3130_v14  ;;  %v3259_v13 = vadd.f32 %v9877_v54, %v3131_v51  ;;  %v3260_v10 = vadd.f32 %v9878_v21, %v3132_v41  ;;  %v3133_v46 = vld [vmem:[%s4289_s24 + $0x1bf0] sm:$0xff]  ;;  %v3134_v52 = vld [vmem:[%s4289_s24 + $0x1bf8] sm:$0xff]  ;;  %v3135_v3 = vld [vmem:[%s4289_s24 + $0x1ce0] sm:$0xff]  ;;  %3384 = vst [vmem:[%s4316_s20 + $0x1ae8] sm:$0xff] %v3256_v53 }
 0x364   : > { %3385 = vst [vmem:[%s4316_s20 + $0x1af0] sm:$0xff] %v3257_v47  ;;  %v9879_v39 = vld [vmem:[#allocation70_spill] sm:$0xff]  ;;  %v9880_v8 = vld [vmem:[#allocation71_spill] sm:$0xff]  ;;  %v9881_v45 = vld [vmem:[#allocation72_spill] sm:$0xff] }
 0x365   : > { %v3261_v30 = vadd.f32 %v9879_v39, %v3133_v46  ;;  %v3262_v22 = vadd.f32 %v9880_v8, %v3134_v52  ;;  %v3263_v32 = vadd.f32 %v9881_v45, %v3135_v3  ;;  %v3136_v36 = vld [vmem:[%s4289_s24 + $0x1ce8] sm:$0xff]  ;;  %v3137_v60 = vld [vmem:[%s4289_s24 + $0x1cf0] sm:$0xff]  ;;  %v3138_v27 = vld [vmem:[%s4289_s24 + $0x1cf8] sm:$0xff]  ;;  %3386 = vst [vmem:[%s4316_s20 + $0x1af8] sm:$0xff] %v3258_v24 }
 0x366   : > { %3387 = vst [vmem:[%s4316_s20 + $0x1be0] sm:$0xff] %v3259_v13  ;;  %3388 = vst [vmem:[%s4316_s20 + $0x1be8] sm:$0xff] %v3260_v10  ;;  %v9882_v50 = vld [vmem:[#allocation73_spill] sm:$0xff]  ;;  %v9883_v38 = vld [vmem:[#allocation74_spill] sm:$0xff] }
 0x367   : > { %v3264_v59 = vadd.f32 %v9882_v50, %v3136_v36  ;;  %v3265_v43 = vadd.f32 %v9883_v38, %v3137_v60  ;;  %v9884_v28 = vld [vmem:[#allocation75_spill] sm:$0xff]  ;;  %v3140_v15 = vld [vmem:[%s4289_s24 + $0x1de8] sm:$0xff]  ;;  %v3141_v37 = vld [vmem:[%s4289_s24 + $0x1df0] sm:$0xff]  ;;  %3389 = vst [vmem:[%s4316_s20 + $0x1bf0] sm:$0xff] %v3261_v30 }
 0x368   : > { %v3266_v31 = vadd.f32 %v9884_v28, %v3138_v27  ;;  %v3139_v4 = vld [vmem:[%s4289_s24 + $0x1de0] sm:$0xff]  ;;  %3390 = vst [vmem:[%s4316_s20 + $0x1bf8] sm:$0xff] %v3262_v22  ;;  %3391 = vst [vmem:[%s4316_s20 + $0x1ce0] sm:$0xff] %v3263_v32  ;;  %v9885_v34 = vld [vmem:[#allocation76_spill] sm:$0xff] }
 0x369   : > { %v3267_v56 = vadd.f32 %v9885_v34, %v3139_v4  ;;  %v9886_v63 = vld [vmem:[#allocation77_spill] sm:$0xff]  ;;  %v9887_v11 = vld [vmem:[#allocation78_spill] sm:$0xff]  ;;  %v3143_v6 = vld [vmem:[%s4289_s24 + $0x1ee0] sm:$0xff]  ;;  %3392 = vst [vmem:[%s4316_s20 + $0x1ce8] sm:$0xff] %v3264_v59 }
 0x36a   : > { %v3268_v16 = vadd.f32 %v9886_v63, %v3140_v15  ;;  %v3269_v0 = vadd.f32 %v9887_v11, %v3141_v37  ;;  %v3142_v2 = vld [vmem:[%s4289_s24 + $0x1df8] sm:$0xff]  ;;  %v3144_v29 = vld [vmem:[%s4289_s24 + $0x1ee8] sm:$0xff]  ;;  %3393 = vst [vmem:[%s4316_s20 + $0x1cf0] sm:$0xff] %v3265_v43  ;;  %3394 = vst [vmem:[%s4316_s20 + $0x1cf8] sm:$0xff] %v3266_v31 }
 0x36b   : > { %v9888_v25 = vld [vmem:[#allocation79_spill] sm:$0xff]  ;;  %v9889_v35 = vld [vmem:[#allocation80_spill] sm:$0xff]  ;;  %v9890_v20 = vld [vmem:[#allocation81_spill] sm:$0xff]  ;;  %3395 = vst [vmem:[%s4316_s20 + $0x1de0] sm:$0xff] %v3267_v56 }
 0x36c   : > { %v3270_v1 = vadd.f32 %v9888_v25, %v3142_v2  ;;  %v3271_v18 = vadd.f32 %v9889_v35, %v3143_v6  ;;  %v3272_v57 = vadd.f32 %v9890_v20, %v3144_v29  ;;  %v3145_v7 = vld [vmem:[%s4289_s24 + $0x1ef0] sm:$0xff]  ;;  %v3146_v42 = vld [vmem:[%s4289_s24 + $0x1ef8] sm:$0xff]  ;;  %v3147_v58 = vld [vmem:[%s4289_s24 + $0x1fe0] sm:$0xff]  ;;  %3396 = vst [vmem:[%s4316_s20 + $0x1de8] sm:$0xff] %v3268_v16 }
 0x36d   : > { %3397 = vst [vmem:[%s4316_s20 + $0x1df0] sm:$0xff] %v3269_v0  ;;  %v9891_v48 = vld [vmem:[#allocation82_spill] sm:$0xff]  ;;  %v9892_v9 = vld [vmem:[#allocation83_spill] sm:$0xff]  ;;  %v9893_v26 = vld [vmem:[#allocation84_spill] sm:$0xff] }
 0x36e   : > { %v3273_v12 = vadd.f32 %v9891_v48, %v3145_v7  ;;  %v3274_v17 = vadd.f32 %v9892_v9, %v3146_v42  ;;  %v3275_v55 = vadd.f32 %v9893_v26, %v3147_v58  ;;  %v3148_v40 = vld [vmem:[%s4289_s24 + $0x1fe8] sm:$0xff]  ;;  %v3149_v19 = vld [vmem:[%s4289_s24 + $0x1ff0] sm:$0xff]  ;;  %v3150_v62 = vld [vmem:[%s4289_s24 + $0x1ff8] sm:$0xff]  ;;  %3398 = vst [vmem:[%s4316_s20 + $0x1df8] sm:$0xff] %v3270_v1 }
 0x36f   : > { %3399 = vst [vmem:[%s4316_s20 + $0x1ee0] sm:$0xff] %v3271_v18  ;;  %3400 = vst [vmem:[%s4316_s20 + $0x1ee8] sm:$0xff] %v3272_v57  ;;  %v9894_v33 = vld [vmem:[#allocation85_spill] sm:$0xff]  ;;  %v9895_v61 = vld [vmem:[#allocation86_spill] sm:$0xff]  ;;  %v3278_v23 = vadd.f32 %v8512_v44, %v3150_v62 }
 0x370   : > { %v3276_v5 = vadd.f32 %v9894_v33, %v3148_v40  ;;  %v3277_v53 = vadd.f32 %v9895_v61, %v3149_v19  ;;  %3401 = vst [vmem:[%s4316_s20 + $0x1ef0] sm:$0xff] %v3273_v12  ;;  %3402 = vst [vmem:[%s4316_s20 + $0x1ef8] sm:$0xff] %v3274_v17 }
 0x371   : > { %3403 = vst [vmem:[%s4316_s20 + $0x1fe0] sm:$0xff] %v3275_v55  ;;  %3406 = vst [vmem:[%s4316_s20 + $0x1ff8] sm:$0xff] %v3278_v23 }
 0x372   : > { %3404 = vst [vmem:[%s4316_s20 + $0x1fe8] sm:$0xff] %v3276_v5  ;;  %3405 = vst [vmem:[%s4316_s20 + $0x1ff0] sm:$0xff] %v3277_v53 }
 0x373   : > { %4059 = shalt.err (!%p4056_p3)
}
 0x374   : > { %s4060_s14 = scalar_lea.hbm %s8896_s26, 131072  ;;  %s4064_s19 = scalar_lea.hbm %s8956_s2, 1048576 }
 0x375   : > { %p4061_p2 = scmp.ne.s32.totalorder %s8896_s26, %s4060_s14  ;;  %p4065_p5 = scmp.lt.s32.totalorder %s8896_s26, %s8956_s2 }
 0x376   : > { %p4066_p8 = scmp.lt.s32.totalorder %s4064_s19, %s4060_s14 }
 0x377   : > { %p4062_p4 = pnand %p4061_p2, %p9896_p0 }
 0x378   : > { %p4067_p6 = por %p4066_p8, %p4065_p5 }
 0x379   : > { %p4063_p11 = pneg %p4062_p4 }
 0x37b   : > { %p4068_p12 = pnand %p4067_p6, %p4063_p11 }
 0x37d   : > { %4071 = shalt.err (!%p4068_p12)
}
 0x37e   : > { %s4123_s3 = smov 4096   ;;  %s4124_s5 = smov 256  }
 0x37f   : > { %3549 = dma.vmem_to_hbm [thread:$0]  (%p9896_p0), %s8900_s17, 131072, %s8896_s26, %s3408_s13, %s4123_s3, %s4123_s3, %s4124_s5  }
 0x380 PF: > { %p3563_p10 = scmp.ge.s32.totalorder %s4114_s12, 2  ;;  %s3437_s20 = sand.u32 1, %s4102_s9  }
 0x381   : > { %p9897_p7 = scmp.ne.s32.totalorder %s9272_s22, 0  ;;  %s3438_s8 = scalar_lea.sflag [#allocation4], %s3437_s20 }
 0x383   : > { %p3559_p9 = pnand %p3563_p10, %p9897_p7 }
 0x385   : > { %p3560_p13 = pneg %p3559_p9 }
 0x387   : > { %4097 = dma.done.wait (%p3560_p13), %s3438_s8, 131072  }
 0x388   : > { %4099 = vsyncadd (%p3560_p13), %s3438_s8, 4294836224  ;;  %p18_p1 = scmp.ge.s32.totalorder %s4165_s15, 10   ;;  %s9898_s9 = smov %s4106_s10 }
 0x389   : > { %s9899_s10 = smov %s4110_s11  ;;  %s9900_s11 = smov %s4177_s18 }
 0x38a   : > { %s9901_s12 = smov %s4165_s15  ;;  %20 = sbr.rel (!%p18_p1) target bundleno = 7 (0x7), region = 86 }
 0x38f   :  { %3443 = vsyncpa [#allocation3], 1 }
 0x390   :  { %3445 = vsyncpa [#allocation3 + $0x1], 1 }
 0x391   :  { %3446 = vsyncpa [#allocation6], 1 }
 0x392   :  { %3448 = vsyncpa [#allocation6 + $0x1], 1 }
 0x393   :  { %3449 = vsyncpa [#allocation4], 1 }
 0x394   :  { %3451 = vsyncpa [#allocation4 + $0x1], 1 }

</bundles_post_ra>
